<compile_context>
chip_gen: v6e
topology: v6e:2x2x1
jax: 0.10.0
libtpu: 0.0.40
codegen_flags: <defaults>
</compile_context>

<pallas_src>
import functools
import math

import jax
import jax.numpy as jnp
from jax.experimental import pallas as pl
from jax.experimental.pallas import tpu as pltpu


OPT = dict(
    nf=16,
    front_rbs=1,
    in_channels=3,
    kernel_dim=361,     # 19 * 19
    use_sharp=True,
    norm="none",        # get_norm_layer('none') -> Identity; hence use_bias=False
    n_blocks=6,
    padding_type="zero",
    use_dropout=False,
)

LRELU_SLOPE = 0.1       # nn.LeakyReLU(negative_slope=0.1) in the original module


def _round_up(v, m):
    return (v + m - 1) // m * m


def _pick_tile_m(m):
    # Largest tile <= 1024 that still gives >= 2 grid steps (keeps both v7x TCs
    # busy via dimension_semantics=("parallel",)); else largest divisor; else m.
    for t in (1024, 512, 256, 128, 64, 32, 16, 8):
        if m % t == 0 and m // t >= 2:
            return t
    for t in (1024, 512, 256, 128, 64, 32, 16, 8):
        if m % t == 0:
            return t
    return m


# ----------------------------------------------------------------------------
# Pallas kernel 1: fused GEMM + bias + activation (generic conv hot path)
# ----------------------------------------------------------------------------
def _gemm_bias_act_kernel(x_ref, w_ref, b_ref, o_ref, *, act):
    y = jnp.dot(x_ref[...], w_ref[...], preferred_element_type=jnp.float32)
    y = y + b_ref[...]
    if act == "relu":
        y = jnp.maximum(y, 0.0)
    elif act == "lrelu":
        y = jnp.where(y >= 0.0, y, LRELU_SLOPE * y)
    o_ref[...] = y


def _gemm_bias_act(x, w_mat, b, act):
    """x: (M, K), w_mat: (K, N) f32, b: (N,) f32 or None -> (M, N) f32."""
    m, k = x.shape
    n = w_mat.shape[1]
    kp = _round_up(k, 128)      # lane-dense contraction dim
    npd = _round_up(n, 128)     # lane-dense output width (unmasked stores)
    xb = jnp.pad(x.astype(jnp.bfloat16), ((0, 0), (0, kp - k)))
    wb = jnp.pad(w_mat.astype(jnp.bfloat16), ((0, kp - k), (0, npd - n)))
    if b is None:
        bvec = jnp.zeros((1, npd), jnp.float32)
    else:
        bvec = jnp.pad(b.reshape(1, n).astype(jnp.float32), ((0, 0), (0, npd - n)))
    tm = _pick_tile_m(m)
    y = pl.pallas_call(
        functools.partial(_gemm_bias_act_kernel, act=act),
        out_shape=jax.ShapeDtypeStruct((m, npd), jnp.float32),
        grid=(m // tm,),
        in_specs=[
            pl.BlockSpec((tm, kp), lambda i: (i, 0)),
            pl.BlockSpec((kp, npd), lambda i: (0, 0)),
            pl.BlockSpec((1, npd), lambda i: (0, 0)),
        ],
        out_specs=pl.BlockSpec((tm, npd), lambda i: (i, 0)),
        compiler_params=pltpu.CompilerParams(dimension_semantics=("parallel",)),
    )(xb, wb, bvec)
    return y[:, :n]


def conv2d_pallas(x, w, b, stride, padding, pad_mode, act):
    """NHWC conv via im2col GEMM.  x: (N,H,W,Cin) f32, w: (Cout,Cin,kh,kw) OIHW."""
    n, _, _, cin = x.shape
    cout, _, kh, kw = w.shape
    xb = x.astype(jnp.bfloat16)
    if padding > 0:
        mode = "reflect" if pad_mode == "reflect" else "constant"
        xb = jnp.pad(xb, ((0, 0), (padding, padding), (padding, padding), (0, 0)),
                     mode=mode)
    hp, wp = xb.shape[1], xb.shape[2]
    ho = (hp - kh) // stride + 1
    wo = (wp - kw) // stride + 1
    taps = []
    for i in range(kh):
        for j in range(kw):
            taps.append(
                jax.lax.slice(
                    xb,
                    (0, i, j, 0),
                    (n, i + (ho - 1) * stride + 1, j + (wo - 1) * stride + 1, cin),
                    (1, stride, stride, 1),
                )
            )
    # (N,Ho,Wo,kh*kw,Cin) -> (N*Ho*Wo, kh*kw*Cin): contiguous reshape, no 5-D transpose.
    patches = jnp.stack(taps, axis=3).reshape(n * ho * wo, kh * kw * cin)
    w_mat = w.transpose(2, 3, 1, 0).reshape(kh * kw * cin, cout)   # (p,q,cin) x cout
    y = _gemm_bias_act(patches, w_mat, b, act)                     # (M, Cout) f32
    return y.reshape(n, ho, wo, cout)


# ----------------------------------------------------------------------------
# Pallas kernel 2: fused 1x1-spatial stack (head_down[3:], ResnetBlocks, tail_last)
# Weights streamed one block per grid step; activation lives in VMEM scratch.
# ----------------------------------------------------------------------------
def _deep_stack_kernel(x0_ref, w_ref, o_ref, x_sc, t_sc, *, n_head, n_total):
    s = pl.program_id(0)

    @pl.when(s == 0)
    def _():
        x_sc[...] = x0_ref[...]

    in_res = jnp.logical_and(s >= n_head, s < n_total - 1)
    plain = jnp.logical_not(in_res)                       # head_down[3:] / tail_last
    res_first = jnp.logical_and(in_res, (s - n_head) % 2 == 0)
    res_second = jnp.logical_and(in_res, (s - n_head) % 2 == 1)

    def mm(v):
        return jnp.dot(v, w_ref[0], preferred_element_type=jnp.float32)

    @pl.when(plain)        # conv (centre tap) + ReLU
    def _():
        x_sc[...] = jnp.maximum(mm(x_sc[...]), 0.0)

    @pl.when(res_first)    # ResnetBlock conv1 + ReLU
    def _():
        t_sc[...] = jnp.maximum(mm(x_sc[...]), 0.0)

    @pl.when(res_second)   # ResnetBlock conv2 + residual add (no final ReLU)
    def _():
        x_sc[...] = x_sc[...] + mm(t_sc[...])

    @pl.when(s == n_total - 1)
    def _():
        o_ref[...] = x_sc[...]


def deep_tail_pallas(x2d, params):
    """All these layers see 1x1 spatial input with zero padding, so only the
    centre tap of each 3x3 kernel touches real data -> plain (Cin x Cout) GEMMs,
    fused into one weight-streaming pallas_call."""
    b, cin0 = x2d.shape
    centre = lambda cp: cp["w"][:, :, 1, 1].T             # OIHW -> (Cin, Cout)
    mats = [centre(params["head_down"][3]), centre(params["head_down"][4])]
    for (c1, c2) in params["tail_blocks"]:
        mats.append(centre(c1))
        mats.append(centre(c2))
    mats.append(centre(params["tail_last"]))
    ch = _round_up(max(max(m_.shape) for m_ in mats), 128)          # 384 for 361
    wstack = jnp.stack(
        [jnp.pad(m_, ((0, ch - m_.shape[0]), (0, ch - m_.shape[1]))) for m_ in mats],
        axis=0).astype(jnp.float32)                                  # (steps, ch, ch)
    n_total = wstack.shape[0]
    x0 = jnp.pad(x2d.astype(jnp.float32), ((0, 0), (0, ch - cin0)))  # (B, ch)
    out = pl.pallas_call(
        functools.partial(_deep_stack_kernel, n_head=2, n_total=n_total),
        out_shape=jax.ShapeDtypeStruct((b, ch), jnp.float32),
        grid=(n_total,),
        in_specs=[
            pl.BlockSpec((b, ch), lambda s: (0, 0)),
            pl.BlockSpec((1, ch, ch), lambda s: (s, 0, 0)),
        ],
        out_specs=pl.BlockSpec((b, ch), lambda s: (0, 0)),
        scratch_shapes=[pltpu.VMEM((b, ch), jnp.float32),
                        pltpu.VMEM((b, ch), jnp.float32)],
        compiler_params=pltpu.CompilerParams(dimension_semantics=("arbitrary",)),
    )(x0, wstack)
    return out                                                        # (B, ch) f32


# ----------------------------------------------------------------------------
# Pallas kernel 3: batched per-sample 19x19 blur convolution (lane-dense output)
# ----------------------------------------------------------------------------
def _blur_matvec_kernel(k_ref, p_ref, o_ref):
    # k_ref: (1, 8, Kp) bf16  (row 0 = predicted kernel, rows 1..7 zero)
    # p_ref: (1, Kp, P) bf16  (taps x pixels im2col of the padded sharp image)
    o_ref[0] = jnp.dot(k_ref[0], p_ref[0], preferred_element_type=jnp.float32)


def blur_conv_pallas(sharp_nchw, kern2d):
    B, C, H, W = sharp_nchw.shape
    K = 19
    pad = K // 2
    kk = K * K
    kp = _round_up(kk, 128)                    # 384
    P = C * H * W                              # pixels on the lane axis
    xpad = jnp.pad(sharp_nchw.astype(jnp.bfloat16),
                   ((0, 0), (0, 0), (pad, pad), (pad, pad)))
    taps = []
    for p in range(K):
        for q in range(K):
            taps.append(jax.lax.slice(xpad, (0, 0, p, q), (B, C, p + H, q + W)))
    patches = jnp.stack(taps, axis=1).reshape(B, kk, P)
    patches = jnp.pad(patches, ((0, 0), (0, kp - kk), (0, 0)))            # (B,Kp,P)
    kmat = jnp.pad(kern2d.astype(jnp.bfloat16), ((0, 0), (0, kp - kk)))   # (B,Kp)
    kmat = jnp.pad(kmat[:, None, :], ((0, 0), (0, 7), (0, 0)))            # (B,8,Kp)
    out = pl.pallas_call(
        _blur_matvec_kernel,
        out_shape=jax.ShapeDtypeStruct((B, 8, P), jnp.float32),
        grid=(B,),
        in_specs=[
            pl.BlockSpec((1, 8, kp), lambda i: (i, 0, 0)),
            pl.BlockSpec((1, kp, P), lambda i: (i, 0, 0)),
        ],
        out_specs=pl.BlockSpec((1, 8, P), lambda i: (i, 0, 0)),
        compiler_params=pltpu.CompilerParams(dimension_semantics=("parallel",)),
    )(kmat, patches)
    return out[:, 0, :].reshape(B, C, H, W)


# ----------------------------------------------------------------------------
# Parameters (deterministic synthetic init; shapes follow the module's __init__)
# ----------------------------------------------------------------------------
def _conv_params(key, cout, cin, k, use_bias):
    kw_, kb_ = jax.random.split(key)
    fan_in = cin * k * k
    w = jax.random.normal(kw_, (cout, cin, k, k), jnp.float32) / math.sqrt(fan_in)
    b = jax.random.normal(kb_, (cout,), jnp.float32) * 0.01 if use_bias else None
    return dict(w=w, b=b)


def init_params(opt, key):
    nf, kd = opt["nf"], opt["kernel_dim"]
    use_bias = False  # norm='none' -> norm_layer != nn.InstanceNorm2d -> use_bias=False
    keys = iter(jax.random.split(key, 64))
    p = {}
    p["fe_conv0"] = _conv_params(next(keys), nf, opt["in_channels"], 3, True)
    p["fe_conv1"] = _conv_params(next(keys), nf, nf, 3, True)
    p["fe_conv2"] = _conv_params(next(keys), nf, nf, 3, True)
    p["fe_rbs"] = [
        (_conv_params(next(keys), nf, nf, 3, True), _conv_params(next(keys), nf, nf, 3, True))
        for _ in range(opt["front_rbs"])
    ]
    input_nc = nf * 2 if opt["use_sharp"] else nf
    p["head_conv7"] = _conv_params(next(keys), nf, input_nc, 7, use_bias)
    p["head_down"] = []
    for i in range(5):
        mult = 2 ** i
        ic, oc = min(nf * mult, kd), min(nf * mult * 2, kd)
        p["head_down"].append(_conv_params(next(keys), oc, ic, 3, use_bias))
    p["tail_blocks"] = [
        (_conv_params(next(keys), kd, kd, 3, use_bias), _conv_params(next(keys), kd, kd, 3, use_bias))
        for _ in range(opt["n_blocks"])
    ]
    i = opt["n_blocks"] - 1
    mult = 2 ** i
    ic, oc = min(nf * mult, kd), min(nf * mult * 2, kd)
    p["tail_last"] = _conv_params(next(keys), oc, ic, 3, use_bias)
    return p


# ----------------------------------------------------------------------------
# Optimized Pallas forward (structure mirrors KernelExtractor.forward)
# ----------------------------------------------------------------------------
def forward_pallas(params, sharp, blur, opt):
    B = sharp.shape[0]
    p = params
    # Batched feature extractor (sharp & blur in one pass), NHWC internally.
    x = jnp.concatenate([sharp, blur], axis=0).transpose(0, 2, 3, 1)   # (2B,H,W,C)
    x = conv2d_pallas(x, p["fe_conv0"]["w"], p["fe_conv0"]["b"], 1, 1, "zero", "lrelu")
    x = conv2d_pallas(x, p["fe_conv1"]["w"], p["fe_conv1"]["b"], 2, 1, "zero", "lrelu")
    x = conv2d_pallas(x, p["fe_conv2"]["w"], p["fe_conv2"]["b"], 2, 1, "zero", "lrelu")
    for (ca, cb) in p["fe_rbs"]:   # ResidualBlock_noBN: x + conv2(relu(conv1(x)))
        y = conv2d_pallas(x, ca["w"], ca["b"], 1, 1, "zero", "relu")
        y = conv2d_pallas(y, cb["w"], cb["b"], 1, 1, "zero", None)
        x = x + y
    feat_s, feat_b = x[:B], x[B:]
    inp = jnp.concatenate([feat_s, feat_b], axis=-1) if opt["use_sharp"] else feat_b

    # Head: reflect-pad(3)+conv7+ReLU, then the first 3 stride-2 downsamplers.
    x = conv2d_pallas(inp, p["head_conv7"]["w"], p["head_conv7"]["b"], 1, 3, "reflect", "relu")
    for cp in p["head_down"][:3]:
        x = conv2d_pallas(x, cp["w"], cp["b"], 2, 1, "zero", "relu")

    # Fused 1x1-spatial stack: head_down[3:], 6 ResnetBlocks, tail_last.
    out2d = deep_tail_pallas(x.reshape(B, -1), p)[:, :opt["kernel_dim"]]   # (B,361)
    output = out2d.reshape(B, opt["kernel_dim"], 1, 1)

    # Per-sample 19x19 convolution of the sharp image with the predicted kernel.
    blur_out = blur_conv_pallas(sharp, out2d).astype(jnp.float32)
    return output, blur_out


# ----------------------------------------------------------------------------
# Pure-XLA reference (NCHW) for the self-check
# ----------------------------------------------------------------------------
def conv2d_ref(x, w, b, stride, padding, pad_mode, act):
    if padding > 0:
        mode = "reflect" if pad_mode == "reflect" else "constant"
        x = jnp.pad(x, ((0, 0), (0, 0), (padding, padding), (padding, padding)), mode=mode)
    y = jax.lax.conv_general_dilated(
        x, w, (stride, stride), "VALID",
        dimension_numbers=("NCHW", "OIHW", "NCHW"),
        preferred_element_type=jnp.float32)
    if b is not None:
        y = y + b[None, :, None, None]
    if act == "relu":
        y = jnp.maximum(y, 0.0)
    elif act == "lrelu":
        y = jnp.where(y >= 0.0, y, LRELU_SLOPE * y)
    return y


def forward_ref(params, sharp, blur, opt):
    conv2d = conv2d_ref

    def feature_extractor(x):
        x = conv2d(x, params["fe_conv0"]["w"], params["fe_conv0"]["b"], 1, 1, "zero", "lrelu")
        x = conv2d(x, params["fe_conv1"]["w"], params["fe_conv1"]["b"], 2, 1, "zero", "lrelu")
        x = conv2d(x, params["fe_conv2"]["w"], params["fe_conv2"]["b"], 2, 1, "zero", "lrelu")
        for (ca, cb) in params["fe_rbs"]:
            y = conv2d(x, ca["w"], ca["b"], 1, 1, "zero", "relu")
            y = conv2d(y, cb["w"], cb["b"], 1, 1, "zero", None)
            x = x + y
        return x

    img_sharp = sharp
    fs = feature_extractor(sharp)
    fb = feature_extractor(blur)
    inp = jnp.concatenate([fs, fb], axis=1) if opt["use_sharp"] else fb
    x = conv2d(inp, params["head_conv7"]["w"], params["head_conv7"]["b"], 1, 3, "reflect", "relu")
    for cp in params["head_down"]:
        x = conv2d(x, cp["w"], cp["b"], 2, 1, "zero", "relu")
    for (c1, c2) in params["tail_blocks"]:
        y = conv2d(x, c1["w"], c1["b"], 1, 1, "zero", "relu")
        y = conv2d(y, c2["w"], c2["b"], 1, 1, "zero", None)
        x = x + y
    output = conv2d(x, params["tail_last"]["w"], params["tail_last"]["b"], 2, 1, "zero", "relu")

    blurs = []
    for bi in range(img_sharp.shape[0]):
        k19 = output[bi].reshape(1, 19, 19)[None]       # (1,1,19,19) OIHW
        xi = img_sharp[bi][:, None]                     # (C,1,H,W)
        yi = conv2d(xi, k19, None, 1, 9, "zero", None)
        blurs.append(yi[:, 0][None])
    blur_out = jnp.concatenate(blurs, axis=0).astype(jnp.float32)
    return output, blur_out


# ----------------------------------------------------------------------------
if __name__ == "__main__":
    key = jax.random.PRNGKey(0)
    kprm, ksh, kbl = jax.random.split(key, 3)
    params = init_params(OPT, kprm)

    B, C, H, W = 2, OPT["in_channels"], 32, 32
    sharp = jax.random.normal(ksh, (B, C, H, W), jnp.float32)
    blur = jax.random.normal(kbl, (B, C, H, W), jnp.float32)

    fwd_pallas = jax.jit(functools.partial(forward_pallas, opt=OPT))
    fwd_ref = jax.jit(functools.partial(forward_ref, opt=OPT))

    out, blur_out = jax.block_until_ready(fwd_pallas(params, sharp, blur))

    assert out.shape == (B, OPT["kernel_dim"], 1, 1), out.shape
    assert blur_out.shape == (B, C, H, W), blur_out.shape
    assert out.dtype == jnp.float32 and blur_out.dtype == jnp.float32
    assert bool(jnp.isfinite(out).all()) and bool(jnp.isfinite(blur_out).all())

    # Self-check vs pure-XLA f32 reference (tolerance covers bf16 MXU inputs).
    out_ref, blur_ref = jax.block_until_ready(fwd_ref(params, sharp, blur))

    def _close(a, b):
        scale = max(1.0, float(jnp.max(jnp.abs(b))))
        return float(jnp.max(jnp.abs(a - b))) <= 5e-2 * scale

    assert _close(out, out_ref), "kernel output mismatch vs reference"
    assert _close(blur_out, blur_ref), "blur output mismatch vs reference"

    print("KERNEL_OK")
</pallas_src>

<mosaic_0001>
module attributes {stable_mosaic.version = 11 : i64} {
  func.func @_gemm_bias_act_kernel(%arg0: i32, %arg1: memref<1024x128xbf16, #tpu.memory_space<vmem>>, %arg2: memref<128x128xbf16, #tpu.memory_space<vmem>>, %arg3: memref<1x128xf32, #tpu.memory_space<vmem>>, %arg4: memref<1024x128xf32, #tpu.memory_space<vmem>>) attributes {dimension_semantics = [#tpu.dimension_semantics<parallel>], iteration_bounds = array<i64: 4>, scalar_prefetch = 0 : i64, scratch_operands = 0 : i64, tpu.core_type = #tpu.core_type<tc>, window_params = [{transform_indices = @transform_0, window_bounds = array<i64: 1024, 128>}, {pipeline_mode = #tpu.pipeline_mode<synchronous>, transform_indices = @transform_1, window_bounds = array<i64: 128, 128>}, {pipeline_mode = #tpu.pipeline_mode<synchronous>, transform_indices = @transform_2, window_bounds = array<i64: 1, 128>}, {transform_indices = @transform_3, window_bounds = array<i64: 1024, 128>}]} {
    %c0 = arith.constant 0 : index
    %c0_0 = arith.constant 0 : index
    %0 = vector.load %arg1[%c0, %c0_0] : memref<1024x128xbf16, #tpu.memory_space<vmem>>, vector<1024x128xbf16>
    %c0_1 = arith.constant 0 : index
    %c0_2 = arith.constant 0 : index
    %1 = vector.load %arg2[%c0_1, %c0_2] : memref<128x128xbf16, #tpu.memory_space<vmem>>, vector<128x128xbf16>
    %cst = arith.constant dense<0.000000e+00> : vector<1024x128xf32>
    %2 = tpu.matmul %0, %1, %cst {dimension_numbers = #tpu.dot_dimension_numbers<[1], [0], [0], [1], [0, 0, 1, 1], [], []>} : vector<1024x128xbf16>, vector<128x128xbf16>, vector<1024x128xf32> -> vector<1024x128xf32>
    %c0_3 = arith.constant 0 : index
    %c0_4 = arith.constant 0 : index
    %3 = vector.load %arg3[%c0_3, %c0_4] : memref<1x128xf32, #tpu.memory_space<vmem>>, vector<1x128xf32>
    %4 = vector.broadcast %3 : vector<1x128xf32> to vector<1024x128xf32>
    %5 = arith.addf %2, %4 : vector<1024x128xf32>
    %cst_5 = arith.constant 0.000000e+00 : f32
    %6 = vector.broadcast %cst_5 : f32 to vector<1024x128xf32>
    %7 = arith.cmpf oge, %5, %6 : vector<1024x128xf32>
    %cst_6 = arith.constant 1.000000e-01 : f32
    %8 = vector.broadcast %cst_6 : f32 to vector<1024x128xf32>
    %9 = arith.mulf %8, %5 : vector<1024x128xf32>
    %10 = arith.select %7, %5, %9 : vector<1024x128xi1>, vector<1024x128xf32>
    %c0_7 = arith.constant 0 : index
    %c0_8 = arith.constant 0 : index
    %11 = vector.load %arg4[%c0_7, %c0_8] : memref<1024x128xf32, #tpu.memory_space<vmem>>, vector<1024x128xf32>
    tpu.vector_store %arg4[%c0_7, %c0_8], %10 {strides = array<i32>} : memref<1024x128xf32, #tpu.memory_space<vmem>>, vector<1024x128xf32>,
    return
  }
  func.func @transform_0(%arg0: i32) -> (i32, i32) {
    %c0_i32 = arith.constant 0 : i32
    %c0_i32_0 = arith.constant 0 : i32
    return %arg0, %c0_i32 : i32, i32
  }
  func.func @transform_1(%arg0: i32) -> (i32, i32) {
    %c0_i32 = arith.constant 0 : i32
    %c0_i32_0 = arith.constant 0 : i32
    %c0_i32_1 = arith.constant 0 : i32
    return %c0_i32, %c0_i32_0 : i32, i32
  }
  func.func @transform_2(%arg0: i32) -> (i32, i32) {
    %c0_i32 = arith.constant 0 : i32
    %c0_i32_0 = arith.constant 0 : i32
    %c0_i32_1 = arith.constant 0 : i32
    return %c0_i32, %c0_i32_0 : i32, i32
  }
  func.func @transform_3(%arg0: i32) -> (i32, i32) {
    %c0_i32 = arith.constant 0 : i32
    %c0_i32_0 = arith.constant 0 : i32
    return %arg0, %c0_i32 : i32, i32
  }
}

module attributes {stable_mosaic.version = 11 : i64} {
  func.func @_gemm_bias_act_kernel(%arg0: i32, %arg1: memref<512x256xbf16, #tpu.memory_space<vmem>>, %arg2: memref<256x128xbf16, #tpu.memory_space<vmem>>, %arg3: memref<1x128xf32, #tpu.memory_space<vmem>>, %arg4: memref<512x128xf32, #tpu.memory_space<vmem>>) attributes {dimension_semantics = [#tpu.dimension_semantics<parallel>], iteration_bounds = array<i64: 2>, scalar_prefetch = 0 : i64, scratch_operands = 0 : i64, tpu.core_type = #tpu.core_type<tc>, window_params = [{transform_indices = @transform_0, window_bounds = array<i64: 512, 256>}, {pipeline_mode = #tpu.pipeline_mode<synchronous>, transform_indices = @transform_1, window_bounds = array<i64: 256, 128>}, {pipeline_mode = #tpu.pipeline_mode<synchronous>, transform_indices = @transform_2, window_bounds = array<i64: 1, 128>}, {transform_indices = @transform_3, window_bounds = array<i64: 512, 128>}]} {
    %c0 = arith.constant 0 : index
    %c0_0 = arith.constant 0 : index
    %0 = vector.load %arg1[%c0, %c0_0] : memref<512x256xbf16, #tpu.memory_space<vmem>>, vector<512x256xbf16>
    %c0_1 = arith.constant 0 : index
    %c0_2 = arith.constant 0 : index
    %1 = vector.load %arg2[%c0_1, %c0_2] : memref<256x128xbf16, #tpu.memory_space<vmem>>, vector<256x128xbf16>
    %cst = arith.constant dense<0.000000e+00> : vector<512x128xf32>
    %2 = tpu.matmul %0, %1, %cst {dimension_numbers = #tpu.dot_dimension_numbers<[1], [0], [0], [1], [0, 0, 1, 1], [], []>} : vector<512x256xbf16>, vector<256x128xbf16>, vector<512x128xf32> -> vector<512x128xf32>
    %c0_3 = arith.constant 0 : index
    %c0_4 = arith.constant 0 : index
    %3 = vector.load %arg3[%c0_3, %c0_4] : memref<1x128xf32, #tpu.memory_space<vmem>>, vector<1x128xf32>
    %4 = vector.broadcast %3 : vector<1x128xf32> to vector<512x128xf32>
    %5 = arith.addf %2, %4 : vector<512x128xf32>
    %cst_5 = arith.constant 0.000000e+00 : f32
    %6 = vector.broadcast %cst_5 : f32 to vector<512x128xf32>
    %7 = arith.cmpf oge, %5, %6 : vector<512x128xf32>
    %cst_6 = arith.constant 1.000000e-01 : f32
    %8 = vector.broadcast %cst_6 : f32 to vector<512x128xf32>
    %9 = arith.mulf %8, %5 : vector<512x128xf32>
    %10 = arith.select %7, %5, %9 : vector<512x128xi1>, vector<512x128xf32>
    %c0_7 = arith.constant 0 : index
    %c0_8 = arith.constant 0 : index
    %11 = vector.load %arg4[%c0_7, %c0_8] : memref<512x128xf32, #tpu.memory_space<vmem>>, vector<512x128xf32>
    tpu.vector_store %arg4[%c0_7, %c0_8], %10 {strides = array<i32>} : memref<512x128xf32, #tpu.memory_space<vmem>>, vector<512x128xf32>,
    return
  }
  func.func @transform_0(%arg0: i32) -> (i32, i32) {
    %c0_i32 = arith.constant 0 : i32
    %c0_i32_0 = arith.constant 0 : i32
    return %arg0, %c0_i32 : i32, i32
  }
  func.func @transform_1(%arg0: i32) -> (i32, i32) {
    %c0_i32 = arith.constant 0 : i32
    %c0_i32_0 = arith.constant 0 : i32
    %c0_i32_1 = arith.constant 0 : i32
    return %c0_i32, %c0_i32_0 : i32, i32
  }
  func.func @transform_2(%arg0: i32) -> (i32, i32) {
    %c0_i32 = arith.constant 0 : i32
    %c0_i32_0 = arith.constant 0 : i32
    %c0_i32_1 = arith.constant 0 : i32
    return %c0_i32, %c0_i32_0 : i32, i32
  }
  func.func @transform_3(%arg0: i32) -> (i32, i32) {
    %c0_i32 = arith.constant 0 : i32
    %c0_i32_0 = arith.constant 0 : i32
    return %arg0, %c0_i32 : i32, i32
  }
}

module attributes {stable_mosaic.version = 11 : i64} {
  func.func @_gemm_bias_act_kernel(%arg0: i32, %arg1: memref<128x256xbf16, #tpu.memory_space<vmem>>, %arg2: memref<256x128xbf16, #tpu.memory_space<vmem>>, %arg3: memref<1x128xf32, #tpu.memory_space<vmem>>, %arg4: memref<128x128xf32, #tpu.memory_space<vmem>>) attributes {dimension_semantics = [#tpu.dimension_semantics<parallel>], iteration_bounds = array<i64: 2>, scalar_prefetch = 0 : i64, scratch_operands = 0 : i64, tpu.core_type = #tpu.core_type<tc>, window_params = [{transform_indices = @transform_0, window_bounds = array<i64: 128, 256>}, {pipeline_mode = #tpu.pipeline_mode<synchronous>, transform_indices = @transform_1, window_bounds = array<i64: 256, 128>}, {pipeline_mode = #tpu.pipeline_mode<synchronous>, transform_indices = @transform_2, window_bounds = array<i64: 1, 128>}, {transform_indices = @transform_3, window_bounds = array<i64: 128, 128>}]} {
    %c0 = arith.constant 0 : index
    %c0_0 = arith.constant 0 : index
    %0 = vector.load %arg1[%c0, %c0_0] : memref<128x256xbf16, #tpu.memory_space<vmem>>, vector<128x256xbf16>
    %c0_1 = arith.constant 0 : index
    %c0_2 = arith.constant 0 : index
    %1 = vector.load %arg2[%c0_1, %c0_2] : memref<256x128xbf16, #tpu.memory_space<vmem>>, vector<256x128xbf16>
    %cst = arith.constant dense<0.000000e+00> : vector<128x128xf32>
    %2 = tpu.matmul %0, %1, %cst {dimension_numbers = #tpu.dot_dimension_numbers<[1], [0], [0], [1], [0, 0, 1, 1], [], []>} : vector<128x256xbf16>, vector<256x128xbf16>, vector<128x128xf32> -> vector<128x128xf32>
    %c0_3 = arith.constant 0 : index
    %c0_4 = arith.constant 0 : index
    %3 = vector.load %arg3[%c0_3, %c0_4] : memref<1x128xf32, #tpu.memory_space<vmem>>, vector<1x128xf32>
    %4 = vector.broadcast %3 : vector<1x128xf32> to vector<128x128xf32>
    %5 = arith.addf %2, %4 : vector<128x128xf32>
    %cst_5 = arith.constant 0.000000e+00 : f32
    %6 = vector.broadcast %cst_5 : f32 to vector<128x128xf32>
    %7 = arith.cmpf oge, %5, %6 : vector<128x128xf32>
    %cst_6 = arith.constant 1.000000e-01 : f32
    %8 = vector.broadcast %cst_6 : f32 to vector<128x128xf32>
    %9 = arith.mulf %8, %5 : vector<128x128xf32>
    %10 = arith.select %7, %5, %9 : vector<128x128xi1>, vector<128x128xf32>
    %c0_7 = arith.constant 0 : index
    %c0_8 = arith.constant 0 : index
    %11 = vector.load %arg4[%c0_7, %c0_8] : memref<128x128xf32, #tpu.memory_space<vmem>>, vector<128x128xf32>
    tpu.vector_store %arg4[%c0_7, %c0_8], %10 {strides = array<i32>} : memref<128x128xf32, #tpu.memory_space<vmem>>, vector<128x128xf32>,
    return
  }
  func.func @transform_0(%arg0: i32) -> (i32, i32) {
    %c0_i32 = arith.constant 0 : i32
    %c0_i32_0 = arith.constant 0 : i32
    return %arg0, %c0_i32 : i32, i32
  }
  func.func @transform_1(%arg0: i32) -> (i32, i32) {
    %c0_i32 = arith.constant 0 : i32
    %c0_i32_0 = arith.constant 0 : i32
    %c0_i32_1 = arith.constant 0 : i32
    return %c0_i32, %c0_i32_0 : i32, i32
  }
  func.func @transform_2(%arg0: i32) -> (i32, i32) {
    %c0_i32 = arith.constant 0 : i32
    %c0_i32_0 = arith.constant 0 : i32
    %c0_i32_1 = arith.constant 0 : i32
    return %c0_i32, %c0_i32_0 : i32, i32
  }
  func.func @transform_3(%arg0: i32) -> (i32, i32) {
    %c0_i32 = arith.constant 0 : i32
    %c0_i32_0 = arith.constant 0 : i32
    return %arg0, %c0_i32 : i32, i32
  }
}

module attributes {stable_mosaic.version = 11 : i64} {
  func.func @_gemm_bias_act_kernel(%arg0: i32, %arg1: memref<128x256xbf16, #tpu.memory_space<vmem>>, %arg2: memref<256x128xbf16, #tpu.memory_space<vmem>>, %arg3: memref<1x128xf32, #tpu.memory_space<vmem>>, %arg4: memref<128x128xf32, #tpu.memory_space<vmem>>) attributes {dimension_semantics = [#tpu.dimension_semantics<parallel>], iteration_bounds = array<i64: 2>, scalar_prefetch = 0 : i64, scratch_operands = 0 : i64, tpu.core_type = #tpu.core_type<tc>, window_params = [{transform_indices = @transform_0, window_bounds = array<i64: 128, 256>}, {pipeline_mode = #tpu.pipeline_mode<synchronous>, transform_indices = @transform_1, window_bounds = array<i64: 256, 128>}, {pipeline_mode = #tpu.pipeline_mode<synchronous>, transform_indices = @transform_2, window_bounds = array<i64: 1, 128>}, {transform_indices = @transform_3, window_bounds = array<i64: 128, 128>}]} {
    %c0 = arith.constant 0 : index
    %c0_0 = arith.constant 0 : index
    %0 = vector.load %arg1[%c0, %c0_0] : memref<128x256xbf16, #tpu.memory_space<vmem>>, vector<128x256xbf16>
    %c0_1 = arith.constant 0 : index
    %c0_2 = arith.constant 0 : index
    %1 = vector.load %arg2[%c0_1, %c0_2] : memref<256x128xbf16, #tpu.memory_space<vmem>>, vector<256x128xbf16>
    %cst = arith.constant dense<0.000000e+00> : vector<128x128xf32>
    %2 = tpu.matmul %0, %1, %cst {dimension_numbers = #tpu.dot_dimension_numbers<[1], [0], [0], [1], [0, 0, 1, 1], [], []>} : vector<128x256xbf16>, vector<256x128xbf16>, vector<128x128xf32> -> vector<128x128xf32>
    %c0_3 = arith.constant 0 : index
    %c0_4 = arith.constant 0 : index
    %3 = vector.load %arg3[%c0_3, %c0_4] : memref<1x128xf32, #tpu.memory_space<vmem>>, vector<1x128xf32>
    %4 = vector.broadcast %3 : vector<1x128xf32> to vector<128x128xf32>
    %5 = arith.addf %2, %4 : vector<128x128xf32>
    %cst_5 = arith.constant 0.000000e+00 : f32
    %6 = vector.broadcast %cst_5 : f32 to vector<128x128xf32>
    %7 = arith.maximumf %5, %6 : vector<128x128xf32>
    %c0_6 = arith.constant 0 : index
    %c0_7 = arith.constant 0 : index
    %8 = vector.load %arg4[%c0_6, %c0_7] : memref<128x128xf32, #tpu.memory_space<vmem>>, vector<128x128xf32>
    tpu.vector_store %arg4[%c0_6, %c0_7], %7 {strides = array<i32>} : memref<128x128xf32, #tpu.memory_space<vmem>>, vector<128x128xf32>,
    return
  }
  func.func @transform_0(%arg0: i32) -> (i32, i32) {
    %c0_i32 = arith.constant 0 : i32
    %c0_i32_0 = arith.constant 0 : i32
    return %arg0, %c0_i32 : i32, i32
  }
  func.func @transform_1(%arg0: i32) -> (i32, i32) {
    %c0_i32 = arith.constant 0 : i32
    %c0_i32_0 = arith.constant 0 : i32
    %c0_i32_1 = arith.constant 0 : i32
    return %c0_i32, %c0_i32_0 : i32, i32
  }
  func.func @transform_2(%arg0: i32) -> (i32, i32) {
    %c0_i32 = arith.constant 0 : i32
    %c0_i32_0 = arith.constant 0 : i32
    %c0_i32_1 = arith.constant 0 : i32
    return %c0_i32, %c0_i32_0 : i32, i32
  }
  func.func @transform_3(%arg0: i32) -> (i32, i32) {
    %c0_i32 = arith.constant 0 : i32
    %c0_i32_0 = arith.constant 0 : i32
    return %arg0, %c0_i32 : i32, i32
  }
}

module attributes {stable_mosaic.version = 11 : i64} {
  func.func @_gemm_bias_act_kernel(%arg0: i32, %arg1: memref<128x256xbf16, #tpu.memory_space<vmem>>, %arg2: memref<256x128xbf16, #tpu.memory_space<vmem>>, %arg3: memref<1x128xf32, #tpu.memory_space<vmem>>, %arg4: memref<128x128xf32, #tpu.memory_space<vmem>>) attributes {dimension_semantics = [#tpu.dimension_semantics<parallel>], iteration_bounds = array<i64: 2>, scalar_prefetch = 0 : i64, scratch_operands = 0 : i64, tpu.core_type = #tpu.core_type<tc>, window_params = [{transform_indices = @transform_0, window_bounds = array<i64: 128, 256>}, {pipeline_mode = #tpu.pipeline_mode<synchronous>, transform_indices = @transform_1, window_bounds = array<i64: 256, 128>}, {pipeline_mode = #tpu.pipeline_mode<synchronous>, transform_indices = @transform_2, window_bounds = array<i64: 1, 128>}, {transform_indices = @transform_3, window_bounds = array<i64: 128, 128>}]} {
    %c0 = arith.constant 0 : index
    %c0_0 = arith.constant 0 : index
    %0 = vector.load %arg1[%c0, %c0_0] : memref<128x256xbf16, #tpu.memory_space<vmem>>, vector<128x256xbf16>
    %c0_1 = arith.constant 0 : index
    %c0_2 = arith.constant 0 : index
    %1 = vector.load %arg2[%c0_1, %c0_2] : memref<256x128xbf16, #tpu.memory_space<vmem>>, vector<256x128xbf16>
    %cst = arith.constant dense<0.000000e+00> : vector<128x128xf32>
    %2 = tpu.matmul %0, %1, %cst {dimension_numbers = #tpu.dot_dimension_numbers<[1], [0], [0], [1], [0, 0, 1, 1], [], []>} : vector<128x256xbf16>, vector<256x128xbf16>, vector<128x128xf32> -> vector<128x128xf32>
    %c0_3 = arith.constant 0 : index
    %c0_4 = arith.constant 0 : index
    %3 = vector.load %arg3[%c0_3, %c0_4] : memref<1x128xf32, #tpu.memory_space<vmem>>, vector<1x128xf32>
    %4 = vector.broadcast %3 : vector<1x128xf32> to vector<128x128xf32>
    %5 = arith.addf %2, %4 : vector<128x128xf32>
    %c0_5 = arith.constant 0 : index
    %c0_6 = arith.constant 0 : index
    %6 = vector.load %arg4[%c0_5, %c0_6] : memref<128x128xf32, #tpu.memory_space<vmem>>, vector<128x128xf32>
    tpu.vector_store %arg4[%c0_5, %c0_6], %5 {strides = array<i32>} : memref<128x128xf32, #tpu.memory_space<vmem>>, vector<128x128xf32>,
    return
  }
  func.func @transform_0(%arg0: i32) -> (i32, i32) {
    %c0_i32 = arith.constant 0 : i32
    %c0_i32_0 = arith.constant 0 : i32
    return %arg0, %c0_i32 : i32, i32
  }
  func.func @transform_1(%arg0: i32) -> (i32, i32) {
    %c0_i32 = arith.constant 0 : i32
    %c0_i32_0 = arith.constant 0 : i32
    %c0_i32_1 = arith.constant 0 : i32
    return %c0_i32, %c0_i32_0 : i32, i32
  }
  func.func @transform_2(%arg0: i32) -> (i32, i32) {
    %c0_i32 = arith.constant 0 : i32
    %c0_i32_0 = arith.constant 0 : i32
    %c0_i32_1 = arith.constant 0 : i32
    return %c0_i32, %c0_i32_0 : i32, i32
  }
  func.func @transform_3(%arg0: i32) -> (i32, i32) {
    %c0_i32 = arith.constant 0 : i32
    %c0_i32_0 = arith.constant 0 : i32
    return %arg0, %c0_i32 : i32, i32
  }
}

module attributes {stable_mosaic.version = 11 : i64} {
  func.func @_gemm_bias_act_kernel(%arg0: i32, %arg1: memref<64x1664xbf16, #tpu.memory_space<vmem>>, %arg2: memref<1664x128xbf16, #tpu.memory_space<vmem>>, %arg3: memref<1x128xf32, #tpu.memory_space<vmem>>, %arg4: memref<64x128xf32, #tpu.memory_space<vmem>>) attributes {dimension_semantics = [#tpu.dimension_semantics<parallel>], iteration_bounds = array<i64: 2>, scalar_prefetch = 0 : i64, scratch_operands = 0 : i64, tpu.core_type = #tpu.core_type<tc>, window_params = [{transform_indices = @transform_0, window_bounds = array<i64: 64, 1664>}, {pipeline_mode = #tpu.pipeline_mode<synchronous>, transform_indices = @transform_1, window_bounds = array<i64: 1664, 128>}, {pipeline_mode = #tpu.pipeline_mode<synchronous>, transform_indices = @transform_2, window_bounds = array<i64: 1, 128>}, {transform_indices = @transform_3, window_bounds = array<i64: 64, 128>}]} {
    %c0 = arith.constant 0 : index
    %c0_0 = arith.constant 0 : index
    %0 = vector.load %arg1[%c0, %c0_0] : memref<64x1664xbf16, #tpu.memory_space<vmem>>, vector<64x1664xbf16>
    %c0_1 = arith.constant 0 : index
    %c0_2 = arith.constant 0 : index
    %1 = vector.load %arg2[%c0_1, %c0_2] : memref<1664x128xbf16, #tpu.memory_space<vmem>>, vector<1664x128xbf16>
    %cst = arith.constant dense<0.000000e+00> : vector<64x128xf32>
    %2 = tpu.matmul %0, %1, %cst {dimension_numbers = #tpu.dot_dimension_numbers<[1], [0], [0], [1], [0, 0, 1, 1], [], []>} : vector<64x1664xbf16>, vector<1664x128xbf16>, vector<64x128xf32> -> vector<64x128xf32>
    %c0_3 = arith.constant 0 : index
    %c0_4 = arith.constant 0 : index
    %3 = vector.load %arg3[%c0_3, %c0_4] : memref<1x128xf32, #tpu.memory_space<vmem>>, vector<1x128xf32>
    %4 = vector.broadcast %3 : vector<1x128xf32> to vector<64x128xf32>
    %5 = arith.addf %2, %4 : vector<64x128xf32>
    %cst_5 = arith.constant 0.000000e+00 : f32
    %6 = vector.broadcast %cst_5 : f32 to vector<64x128xf32>
    %7 = arith.maximumf %5, %6 : vector<64x128xf32>
    %c0_6 = arith.constant 0 : index
    %c0_7 = arith.constant 0 : index
    %8 = vector.load %arg4[%c0_6, %c0_7] : memref<64x128xf32, #tpu.memory_space<vmem>>, vector<64x128xf32>
    tpu.vector_store %arg4[%c0_6, %c0_7], %7 {strides = array<i32>} : memref<64x128xf32, #tpu.memory_space<vmem>>, vector<64x128xf32>,
    return
  }
  func.func @transform_0(%arg0: i32) -> (i32, i32) {
    %c0_i32 = arith.constant 0 : i32
    %c0_i32_0 = arith.constant 0 : i32
    return %arg0, %c0_i32 : i32, i32
  }
  func.func @transform_1(%arg0: i32) -> (i32, i32) {
    %c0_i32 = arith.constant 0 : i32
    %c0_i32_0 = arith.constant 0 : i32
    %c0_i32_1 = arith.constant 0 : i32
    return %c0_i32, %c0_i32_0 : i32, i32
  }
  func.func @transform_2(%arg0: i32) -> (i32, i32) {
    %c0_i32 = arith.constant 0 : i32
    %c0_i32_0 = arith.constant 0 : i32
    %c0_i32_1 = arith.constant 0 : i32
    return %c0_i32, %c0_i32_0 : i32, i32
  }
  func.func @transform_3(%arg0: i32) -> (i32, i32) {
    %c0_i32 = arith.constant 0 : i32
    %c0_i32_0 = arith.constant 0 : i32
    return %arg0, %c0_i32 : i32, i32
  }
}

module attributes {stable_mosaic.version = 11 : i64} {
  func.func @_gemm_bias_act_kernel(%arg0: i32, %arg1: memref<16x256xbf16, #tpu.memory_space<vmem>>, %arg2: memref<256x128xbf16, #tpu.memory_space<vmem>>, %arg3: memref<1x128xf32, #tpu.memory_space<vmem>>, %arg4: memref<16x128xf32, #tpu.memory_space<vmem>>) attributes {dimension_semantics = [#tpu.dimension_semantics<parallel>], iteration_bounds = array<i64: 2>, scalar_prefetch = 0 : i64, scratch_operands = 0 : i64, tpu.core_type = #tpu.core_type<tc>, window_params = [{transform_indices = @transform_0, window_bounds = array<i64: 16, 256>}, {pipeline_mode = #tpu.pipeline_mode<synchronous>, transform_indices = @transform_1, window_bounds = array<i64: 256, 128>}, {pipeline_mode = #tpu.pipeline_mode<synchronous>, transform_indices = @transform_2, window_bounds = array<i64: 1, 128>}, {transform_indices = @transform_3, window_bounds = array<i64: 16, 128>}]} {
    %c0 = arith.constant 0 : index
    %c0_0 = arith.constant 0 : index
    %0 = vector.load %arg1[%c0, %c0_0] : memref<16x256xbf16, #tpu.memory_space<vmem>>, vector<16x256xbf16>
    %c0_1 = arith.constant 0 : index
    %c0_2 = arith.constant 0 : index
    %1 = vector.load %arg2[%c0_1, %c0_2] : memref<256x128xbf16, #tpu.memory_space<vmem>>, vector<256x128xbf16>
    %cst = arith.constant dense<0.000000e+00> : vector<16x128xf32>
    %2 = tpu.matmul %0, %1, %cst {dimension_numbers = #tpu.dot_dimension_numbers<[1], [0], [0], [1], [0, 0, 1, 1], [], []>} : vector<16x256xbf16>, vector<256x128xbf16>, vector<16x128xf32> -> vector<16x128xf32>
    %c0_3 = arith.constant 0 : index
    %c0_4 = arith.constant 0 : index
    %3 = vector.load %arg3[%c0_3, %c0_4] : memref<1x128xf32, #tpu.memory_space<vmem>>, vector<1x128xf32>
    %4 = vector.broadcast %3 : vector<1x128xf32> to vector<16x128xf32>
    %5 = arith.addf %2, %4 : vector<16x128xf32>
    %cst_5 = arith.constant 0.000000e+00 : f32
    %6 = vector.broadcast %cst_5 : f32 to vector<16x128xf32>
    %7 = arith.maximumf %5, %6 : vector<16x128xf32>
    %c0_6 = arith.constant 0 : index
    %c0_7 = arith.constant 0 : index
    %8 = vector.load %arg4[%c0_6, %c0_7] : memref<16x128xf32, #tpu.memory_space<vmem>>, vector<16x128xf32>
    tpu.vector_store %arg4[%c0_6, %c0_7], %7 {strides = array<i32>} : memref<16x128xf32, #tpu.memory_space<vmem>>, vector<16x128xf32>,
    return
  }
  func.func @transform_0(%arg0: i32) -> (i32, i32) {
    %c0_i32 = arith.constant 0 : i32
    %c0_i32_0 = arith.constant 0 : i32
    return %arg0, %c0_i32 : i32, i32
  }
  func.func @transform_1(%arg0: i32) -> (i32, i32) {
    %c0_i32 = arith.constant 0 : i32
    %c0_i32_0 = arith.constant 0 : i32
    %c0_i32_1 = arith.constant 0 : i32
    return %c0_i32, %c0_i32_0 : i32, i32
  }
  func.func @transform_2(%arg0: i32) -> (i32, i32) {
    %c0_i32 = arith.constant 0 : i32
    %c0_i32_0 = arith.constant 0 : i32
    %c0_i32_1 = arith.constant 0 : i32
    return %c0_i32, %c0_i32_0 : i32, i32
  }
  func.func @transform_3(%arg0: i32) -> (i32, i32) {
    %c0_i32 = arith.constant 0 : i32
    %c0_i32_0 = arith.constant 0 : i32
    return %arg0, %c0_i32 : i32, i32
  }
}

module attributes {stable_mosaic.version = 11 : i64} {
  func.func @_gemm_bias_act_kernel(%arg0: i32, %arg1: memref<8x384xbf16, #tpu.memory_space<vmem>>, %arg2: memref<384x128xbf16, #tpu.memory_space<vmem>>, %arg3: memref<1x128xf32, #tpu.memory_space<vmem>>, %arg4: memref<8x128xf32, #tpu.memory_space<vmem>>) attributes {dimension_semantics = [#tpu.dimension_semantics<parallel>], iteration_bounds = array<i64: 1>, scalar_prefetch = 0 : i64, scratch_operands = 0 : i64, tpu.core_type = #tpu.core_type<tc>, window_params = [{transform_indices = @transform_0, window_bounds = array<i64: 8, 384>}, {pipeline_mode = #tpu.pipeline_mode<synchronous>, transform_indices = @transform_1, window_bounds = array<i64: 384, 128>}, {pipeline_mode = #tpu.pipeline_mode<synchronous>, transform_indices = @transform_2, window_bounds = array<i64: 1, 128>}, {transform_indices = @transform_3, window_bounds = array<i64: 8, 128>}]} {
    %c0 = arith.constant 0 : index
    %c0_0 = arith.constant 0 : index
    %0 = vector.load %arg1[%c0, %c0_0] : memref<8x384xbf16, #tpu.memory_space<vmem>>, vector<8x384xbf16>
    %c0_1 = arith.constant 0 : index
    %c0_2 = arith.constant 0 : index
    %1 = vector.load %arg2[%c0_1, %c0_2] : memref<384x128xbf16, #tpu.memory_space<vmem>>, vector<384x128xbf16>
    %cst = arith.constant dense<0.000000e+00> : vector<8x128xf32>
    %2 = tpu.matmul %0, %1, %cst {dimension_numbers = #tpu.dot_dimension_numbers<[1], [0], [0], [1], [0, 0, 1, 1], [], []>} : vector<8x384xbf16>, vector<384x128xbf16>, vector<8x128xf32> -> vector<8x128xf32>
    %c0_3 = arith.constant 0 : index
    %c0_4 = arith.constant 0 : index
    %3 = vector.load %arg3[%c0_3, %c0_4] : memref<1x128xf32, #tpu.memory_space<vmem>>, vector<1x128xf32>
    %4 = vector.broadcast %3 : vector<1x128xf32> to vector<8x128xf32>
    %5 = arith.addf %2, %4 : vector<8x128xf32>
    %cst_5 = arith.constant 0.000000e+00 : f32
    %6 = vector.broadcast %cst_5 : f32 to vector<8x128xf32>
    %7 = arith.maximumf %5, %6 : vector<8x128xf32>
    %c0_6 = arith.constant 0 : index
    %c0_7 = arith.constant 0 : index
    %8 = vector.load %arg4[%c0_6, %c0_7] : memref<8x128xf32, #tpu.memory_space<vmem>>, vector<8x128xf32>
    tpu.vector_store %arg4[%c0_6, %c0_7], %7 {strides = array<i32>} : memref<8x128xf32, #tpu.memory_space<vmem>>, vector<8x128xf32>,
    return
  }
  func.func @transform_0(%arg0: i32) -> (i32, i32) {
    %c0_i32 = arith.constant 0 : i32
    %c0_i32_0 = arith.constant 0 : i32
    return %arg0, %c0_i32 : i32, i32
  }
  func.func @transform_1(%arg0: i32) -> (i32, i32) {
    %c0_i32 = arith.constant 0 : i32
    %c0_i32_0 = arith.constant 0 : i32
    %c0_i32_1 = arith.constant 0 : i32
    return %c0_i32, %c0_i32_0 : i32, i32
  }
  func.func @transform_2(%arg0: i32) -> (i32, i32) {
    %c0_i32 = arith.constant 0 : i32
    %c0_i32_0 = arith.constant 0 : i32
    %c0_i32_1 = arith.constant 0 : i32
    return %c0_i32, %c0_i32_0 : i32, i32
  }
  func.func @transform_3(%arg0: i32) -> (i32, i32) {
    %c0_i32 = arith.constant 0 : i32
    %c0_i32_0 = arith.constant 0 : i32
    return %arg0, %c0_i32 : i32, i32
  }
}

module attributes {stable_mosaic.version = 11 : i64} {
  func.func @_gemm_bias_act_kernel(%arg0: i32, %arg1: memref<2x640xbf16, #tpu.memory_space<vmem>>, %arg2: memref<640x128xbf16, #tpu.memory_space<vmem>>, %arg3: memref<1x128xf32, #tpu.memory_space<vmem>>, %arg4: memref<2x128xf32, #tpu.memory_space<vmem>>) attributes {dimension_semantics = [#tpu.dimension_semantics<parallel>], iteration_bounds = array<i64: 1>, scalar_prefetch = 0 : i64, scratch_operands = 0 : i64, tpu.core_type = #tpu.core_type<tc>, window_params = [{transform_indices = @transform_0, window_bounds = array<i64: 2, 640>}, {pipeline_mode = #tpu.pipeline_mode<synchronous>, transform_indices = @transform_1, window_bounds = array<i64: 640, 128>}, {pipeline_mode = #tpu.pipeline_mode<synchronous>, transform_indices = @transform_2, window_bounds = array<i64: 1, 128>}, {transform_indices = @transform_3, window_bounds = array<i64: 2, 128>}]} {
    %c0 = arith.constant 0 : index
    %c0_0 = arith.constant 0 : index
    %0 = vector.load %arg1[%c0, %c0_0] : memref<2x640xbf16, #tpu.memory_space<vmem>>, vector<2x640xbf16>
    %c0_1 = arith.constant 0 : index
    %c0_2 = arith.constant 0 : index
    %1 = vector.load %arg2[%c0_1, %c0_2] : memref<640x128xbf16, #tpu.memory_space<vmem>>, vector<640x128xbf16>
    %cst = arith.constant dense<0.000000e+00> : vector<2x128xf32>
    %2 = tpu.matmul %0, %1, %cst {dimension_numbers = #tpu.dot_dimension_numbers<[1], [0], [0], [1], [0, 0, 1, 1], [], []>} : vector<2x640xbf16>, vector<640x128xbf16>, vector<2x128xf32> -> vector<2x128xf32>
    %c0_3 = arith.constant 0 : index
    %c0_4 = arith.constant 0 : index
    %3 = vector.load %arg3[%c0_3, %c0_4] : memref<1x128xf32, #tpu.memory_space<vmem>>, vector<1x128xf32>
    %4 = vector.broadcast %3 : vector<1x128xf32> to vector<2x128xf32>
    %5 = arith.addf %2, %4 : vector<2x128xf32>
    %cst_5 = arith.constant 0.000000e+00 : f32
    %6 = vector.broadcast %cst_5 : f32 to vector<2x128xf32>
    %7 = arith.maximumf %5, %6 : vector<2x128xf32>
    %c0_6 = arith.constant 0 : index
    %c0_7 = arith.constant 0 : index
    %8 = vector.load %arg4[%c0_6, %c0_7] : memref<2x128xf32, #tpu.memory_space<vmem>>, vector<2x128xf32>
    tpu.vector_store %arg4[%c0_6, %c0_7], %7 {strides = array<i32>} : memref<2x128xf32, #tpu.memory_space<vmem>>, vector<2x128xf32>,
    return
  }
  func.func @transform_0(%arg0: i32) -> (i32, i32) {
    %c0_i32 = arith.constant 0 : i32
    %c0_i32_0 = arith.constant 0 : i32
    return %arg0, %c0_i32 : i32, i32
  }
  func.func @transform_1(%arg0: i32) -> (i32, i32) {
    %c0_i32 = arith.constant 0 : i32
    %c0_i32_0 = arith.constant 0 : i32
    %c0_i32_1 = arith.constant 0 : i32
    return %c0_i32, %c0_i32_0 : i32, i32
  }
  func.func @transform_2(%arg0: i32) -> (i32, i32) {
    %c0_i32 = arith.constant 0 : i32
    %c0_i32_0 = arith.constant 0 : i32
    %c0_i32_1 = arith.constant 0 : i32
    return %c0_i32, %c0_i32_0 : i32, i32
  }
  func.func @transform_3(%arg0: i32) -> (i32, i32) {
    %c0_i32 = arith.constant 0 : i32
    %c0_i32_0 = arith.constant 0 : i32
    return %arg0, %c0_i32 : i32, i32
  }
}

module attributes {stable_mosaic.version = 11 : i64} {
  func.func @_deep_stack_kernel(%arg0: i32, %arg1: memref<2x384xf32, #tpu.memory_space<vmem>>, %arg2: memref<1x384x384xf32, #tpu.memory_space<vmem>>, %arg3: memref<2x384xf32, #tpu.memory_space<vmem>>, %arg4: memref<2x384xf32, #tpu.memory_space<vmem>>, %arg5: memref<2x384xf32, #tpu.memory_space<vmem>>) attributes {dimension_semantics = [#tpu.dimension_semantics<arbitrary>], iteration_bounds = array<i64: 15>, scalar_prefetch = 0 : i64, scratch_operands = 2 : i64, tpu.core_type = #tpu.core_type<tc>, window_params = [{pipeline_mode = #tpu.pipeline_mode<synchronous>, transform_indices = @transform_0, window_bounds = array<i64: 2, 384>}, {transform_indices = @transform_1, window_bounds = array<i64: 1, 384, 384>}, {pipeline_mode = #tpu.pipeline_mode<synchronous>, transform_indices = @transform_2, window_bounds = array<i64: 2, 384>}]} {
    %c0_i32 = arith.constant 0 : i32
    %0 = arith.cmpi eq, %arg0, %c0_i32 : i32
    %1 = arith.extui %0 : i1 to i32
    %c0_i32_0 = arith.constant 0 : i32
    %2 = arith.cmpi ne, %1, %c0_i32_0 : i32
    scf.if %2 {
      %c0 = arith.constant 0 : index
      %c0_21 = arith.constant 0 : index
      %42 = vector.load %arg1[%c0, %c0_21] : memref<2x384xf32, #tpu.memory_space<vmem>>, vector<2x384xf32>
      %c0_22 = arith.constant 0 : index
      %c0_23 = arith.constant 0 : index
      %43 = vector.load %arg4[%c0_22, %c0_23] : memref<2x384xf32, #tpu.memory_space<vmem>>, vector<2x384xf32>
      tpu.vector_store %arg4[%c0_22, %c0_23], %42 {strides = array<i32>} : memref<2x384xf32, #tpu.memory_space<vmem>>, vector<2x384xf32>,
    } else {
    }
    %c2_i32 = arith.constant 2 : i32
    %3 = arith.cmpi sge, %arg0, %c2_i32 : i32
    %c14_i32 = arith.constant 14 : i32
    %4 = arith.cmpi slt, %arg0, %c14_i32 : i32
    %5 = arith.andi %3, %4 : i1
    %true = arith.constant true
    %6 = arith.xori %5, %true : i1
    %c2_i32_1 = arith.constant 2 : i32
    %7 = arith.subi %arg0, %c2_i32_1 : i32
    %c2_i32_2 = arith.constant 2 : i32
    %c0_i32_3 = arith.constant 0 : i32
    %8 = arith.cmpi eq, %c2_i32_2, %c0_i32_3 : i32
    %c1_i32 = arith.constant 1 : i32
    %9 = arith.select %8, %c1_i32, %c2_i32_2 : i32
    %10 = arith.remsi %7, %9 : i32
    %c0_i32_4 = arith.constant 0 : i32
    %11 = arith.cmpi ne, %10, %c0_i32_4 : i32
    %c0_i32_5 = arith.constant 0 : i32
    %12 = arith.cmpi slt, %10, %c0_i32_5 : i32
    %c0_i32_6 = arith.constant 0 : i32
    %13 = arith.cmpi slt, %9, %c0_i32_6 : i32
    %14 = arith.xori %12, %13 : i1
    %15 = arith.andi %14, %11 : i1
    %16 = arith.addi %10, %9 : i32
    %17 = arith.select %15, %16, %10 : i32
    %c0_i32_7 = arith.constant 0 : i32
    %18 = arith.cmpi eq, %17, %c0_i32_7 : i32
    %19 = arith.andi %5, %18 : i1
    %c2_i32_8 = arith.constant 2 : i32
    %20 = arith.subi %arg0, %c2_i32_8 : i32
    %c2_i32_9 = arith.constant 2 : i32
    %c0_i32_10 = arith.constant 0 : i32
    %21 = arith.cmpi eq, %c2_i32_9, %c0_i32_10 : i32
    %c1_i32_11 = arith.constant 1 : i32
    %22 = arith.select %21, %c1_i32_11, %c2_i32_9 : i32
    %23 = arith.remsi %20, %22 : i32
    %c0_i32_12 = arith.constant 0 : i32
    %24 = arith.cmpi ne, %23, %c0_i32_12 : i32
    %c0_i32_13 = arith.constant 0 : i32
    %25 = arith.cmpi slt, %23, %c0_i32_13 : i32
    %c0_i32_14 = arith.constant 0 : i32
    %26 = arith.cmpi slt, %22, %c0_i32_14 : i32
    %27 = arith.xori %25, %26 : i1
    %28 = arith.andi %27, %24 : i1
    %29 = arith.addi %23, %22 : i32
    %30 = arith.select %28, %29, %23 : i32
    %c1_i32_15 = arith.constant 1 : i32
    %31 = arith.cmpi eq, %30, %c1_i32_15 : i32
    %32 = arith.andi %5, %31 : i1
    %33 = arith.extui %6 : i1 to i32
    %c0_i32_16 = arith.constant 0 : i32
    %34 = arith.cmpi ne, %33, %c0_i32_16 : i32
    scf.if %34 {
      %c0 = arith.constant 0 : index
      %c0_21 = arith.constant 0 : index
      %42 = vector.load %arg4[%c0, %c0_21] : memref<2x384xf32, #tpu.memory_space<vmem>>, vector<2x384xf32>
      %c0_22 = arith.constant 0 : index
      %c0_23 = arith.constant 0 : index
      %c0_24 = arith.constant 0 : index
      %43 = vector.load %arg2[%c0_22, %c0_23, %c0_24] : memref<1x384x384xf32, #tpu.memory_space<vmem>>, vector<1x384x384xf32>
      %44 = vector.shape_cast %43 : vector<1x384x384xf32> to vector<384x384xf32>
      %cst = arith.constant dense<0.000000e+00> : vector<2x384xf32>
      %45 = tpu.matmul %42, %44, %cst {dimension_numbers = #tpu.dot_dimension_numbers<[1], [0], [0], [1], [0, 0, 1, 1], [], []>} : vector<2x384xf32>, vector<384x384xf32>, vector<2x384xf32> -> vector<2x384xf32>
      %cst_25 = arith.constant 0.000000e+00 : f32
      %46 = vector.broadcast %cst_25 : f32 to vector<2x384xf32>
      %47 = arith.maximumf %45, %46 : vector<2x384xf32>
      %c0_26 = arith.constant 0 : index
      %c0_27 = arith.constant 0 : index
      %48 = vector.load %arg4[%c0_26, %c0_27] : memref<2x384xf32, #tpu.memory_space<vmem>>, vector<2x384xf32>
      tpu.vector_store %arg4[%c0_26, %c0_27], %47 {strides = array<i32>} : memref<2x384xf32, #tpu.memory_space<vmem>>, vector<2x384xf32>,
    } else {
    }
    %35 = arith.extui %19 : i1 to i32
    %c0_i32_17 = arith.constant 0 : i32
    %36 = arith.cmpi ne, %35, %c0_i32_17 : i32
    scf.if %36 {
      %c0 = arith.constant 0 : index
      %c0_21 = arith.constant 0 : index
      %42 = vector.load %arg4[%c0, %c0_21] : memref<2x384xf32, #tpu.memory_space<vmem>>, vector<2x384xf32>
      %c0_22 = arith.constant 0 : index
      %c0_23 = arith.constant 0 : index
      %c0_24 = arith.constant 0 : index
      %43 = vector.load %arg2[%c0_22, %c0_23, %c0_24] : memref<1x384x384xf32, #tpu.memory_space<vmem>>, vector<1x384x384xf32>
      %44 = vector.shape_cast %43 : vector<1x384x384xf32> to vector<384x384xf32>
      %cst = arith.constant dense<0.000000e+00> : vector<2x384xf32>
      %45 = tpu.matmul %42, %44, %cst {dimension_numbers = #tpu.dot_dimension_numbers<[1], [0], [0], [1], [0, 0, 1, 1], [], []>} : vector<2x384xf32>, vector<384x384xf32>, vector<2x384xf32> -> vector<2x384xf32>
      %cst_25 = arith.constant 0.000000e+00 : f32
      %46 = vector.broadcast %cst_25 : f32 to vector<2x384xf32>
      %47 = arith.maximumf %45, %46 : vector<2x384xf32>
      %c0_26 = arith.constant 0 : index
      %c0_27 = arith.constant 0 : index
      %48 = vector.load %arg5[%c0_26, %c0_27] : memref<2x384xf32, #tpu.memory_space<vmem>>, vector<2x384xf32>
      tpu.vector_store %arg5[%c0_26, %c0_27], %47 {strides = array<i32>} : memref<2x384xf32, #tpu.memory_space<vmem>>, vector<2x384xf32>,
    } else {
    }
    %37 = arith.extui %32 : i1 to i32
    %c0_i32_18 = arith.constant 0 : i32
    %38 = arith.cmpi ne, %37, %c0_i32_18 : i32
    scf.if %38 {
      %c0 = arith.constant 0 : index
      %c0_21 = arith.constant 0 : index
      %42 = vector.load %arg4[%c0, %c0_21] : memref<2x384xf32, #tpu.memory_space<vmem>>, vector<2x384xf32>
      %c0_22 = arith.constant 0 : index
      %c0_23 = arith.constant 0 : index
      %43 = vector.load %arg5[%c0_22, %c0_23] : memref<2x384xf32, #tpu.memory_space<vmem>>, vector<2x384xf32>
      %c0_24 = arith.constant 0 : index
      %c0_25 = arith.constant 0 : index
      %c0_26 = arith.constant 0 : index
      %44 = vector.load %arg2[%c0_24, %c0_25, %c0_26] : memref<1x384x384xf32, #tpu.memory_space<vmem>>, vector<1x384x384xf32>
      %45 = vector.shape_cast %44 : vector<1x384x384xf32> to vector<384x384xf32>
      %cst = arith.constant dense<0.000000e+00> : vector<2x384xf32>
      %46 = tpu.matmul %43, %45, %cst {dimension_numbers = #tpu.dot_dimension_numbers<[1], [0], [0], [1], [0, 0, 1, 1], [], []>} : vector<2x384xf32>, vector<384x384xf32>, vector<2x384xf32> -> vector<2x384xf32>
      %47 = arith.addf %42, %46 : vector<2x384xf32>
      %c0_27 = arith.constant 0 : index
      %c0_28 = arith.constant 0 : index
      %48 = vector.load %arg4[%c0_27, %c0_28] : memref<2x384xf32, #tpu.memory_space<vmem>>, vector<2x384xf32>
      tpu.vector_store %arg4[%c0_27, %c0_28], %47 {strides = array<i32>} : memref<2x384xf32, #tpu.memory_space<vmem>>, vector<2x384xf32>,
    } else {
    }
    %c14_i32_19 = arith.constant 14 : i32
    %39 = arith.cmpi eq, %arg0, %c14_i32_19 : i32
    %40 = arith.extui %39 : i1 to i32
    %c0_i32_20 = arith.constant 0 : i32
    %41 = arith.cmpi ne, %40, %c0_i32_20 : i32
    scf.if %41 {
      %c0 = arith.constant 0 : index
      %c0_21 = arith.constant 0 : index
      %42 = vector.load %arg4[%c0, %c0_21] : memref<2x384xf32, #tpu.memory_space<vmem>>, vector<2x384xf32>
      %c0_22 = arith.constant 0 : index
      %c0_23 = arith.constant 0 : index
      %43 = vector.load %arg3[%c0_22, %c0_23] : memref<2x384xf32, #tpu.memory_space<vmem>>, vector<2x384xf32>
      tpu.vector_store %arg3[%c0_22, %c0_23], %42 {strides = array<i32>} : memref<2x384xf32, #tpu.memory_space<vmem>>, vector<2x384xf32>,
    } else {
    }
    return
  }
  func.func @transform_0(%arg0: i32) -> (i32, i32) {
    %c0_i32 = arith.constant 0 : i32
    %c0_i32_0 = arith.constant 0 : i32
    %c0_i32_1 = arith.constant 0 : i32
    return %c0_i32, %c0_i32_0 : i32, i32
  }
  func.func @transform_1(%arg0: i32) -> (i32, i32, i32) {
    %c0_i32 = arith.constant 0 : i32
    %c0_i32_0 = arith.constant 0 : i32
    %c0_i32_1 = arith.constant 0 : i32
    return %arg0, %c0_i32, %c0_i32_0 : i32, i32, i32
  }
  func.func @transform_2(%arg0: i32) -> (i32, i32) {
    %c0_i32 = arith.constant 0 : i32
    %c0_i32_0 = arith.constant 0 : i32
    %c0_i32_1 = arith.constant 0 : i32
    return %c0_i32, %c0_i32_0 : i32, i32
  }
}

module attributes {stable_mosaic.version = 11 : i64} {
  func.func @_blur_matvec_kernel(%arg0: i32, %arg1: memref<1x8x384xbf16, #tpu.memory_space<vmem>>, %arg2: memref<1x384x3072xbf16, #tpu.memory_space<vmem>>, %arg3: memref<1x8x3072xf32, #tpu.memory_space<vmem>>) attributes {dimension_semantics = [#tpu.dimension_semantics<parallel>], iteration_bounds = array<i64: 2>, scalar_prefetch = 0 : i64, scratch_operands = 0 : i64, tpu.core_type = #tpu.core_type<tc>, window_params = [{transform_indices = @transform_0, window_bounds = array<i64: 1, 8, 384>}, {transform_indices = @transform_1, window_bounds = array<i64: 1, 384, 3072>}, {transform_indices = @transform_2, window_bounds = array<i64: 1, 8, 3072>}]} {
    %c0 = arith.constant 0 : index
    %c0_0 = arith.constant 0 : index
    %c0_1 = arith.constant 0 : index
    %0 = vector.load %arg1[%c0, %c0_0, %c0_1] : memref<1x8x384xbf16, #tpu.memory_space<vmem>>, vector<1x8x384xbf16>
    %1 = vector.shape_cast %0 : vector<1x8x384xbf16> to vector<8x384xbf16>
    %c0_2 = arith.constant 0 : index
    %c0_3 = arith.constant 0 : index
    %c0_4 = arith.constant 0 : index
    %2 = vector.load %arg2[%c0_2, %c0_3, %c0_4] : memref<1x384x3072xbf16, #tpu.memory_space<vmem>>, vector<1x384x3072xbf16>
    %3 = vector.shape_cast %2 : vector<1x384x3072xbf16> to vector<384x3072xbf16>
    %cst = arith.constant dense<0.000000e+00> : vector<8x3072xf32>
    %4 = tpu.matmul %1, %3, %cst {dimension_numbers = #tpu.dot_dimension_numbers<[1], [0], [0], [1], [0, 0, 1, 1], [], []>} : vector<8x384xbf16>, vector<384x3072xbf16>, vector<8x3072xf32> -> vector<8x3072xf32>
    %c0_5 = arith.constant 0 : index
    %c0_6 = arith.constant 0 : index
    %c0_7 = arith.constant 0 : index
    %5 = vector.load %arg3[%c0_5, %c0_6, %c0_7] : memref<1x8x3072xf32, #tpu.memory_space<vmem>>, vector<1x8x3072xf32>
    %6 = vector.shape_cast %5 : vector<1x8x3072xf32> to vector<8x3072xf32>
    %7 = vector.shape_cast %4 : vector<8x3072xf32> to vector<1x8x3072xf32>
    tpu.vector_store %arg3[%c0_5, %c0_6, %c0_7], %7 {strides = array<i32>} : memref<1x8x3072xf32, #tpu.memory_space<vmem>>, vector<1x8x3072xf32>,
    return
  }
  func.func @transform_0(%arg0: i32) -> (i32, i32, i32) {
    %c0_i32 = arith.constant 0 : i32
    %c0_i32_0 = arith.constant 0 : i32
    %c0_i32_1 = arith.constant 0 : i32
    return %arg0, %c0_i32, %c0_i32_0 : i32, i32, i32
  }
  func.func @transform_1(%arg0: i32) -> (i32, i32, i32) {
    %c0_i32 = arith.constant 0 : i32
    %c0_i32_0 = arith.constant 0 : i32
    %c0_i32_1 = arith.constant 0 : i32
    return %arg0, %c0_i32, %c0_i32_0 : i32, i32, i32
  }
  func.func @transform_2(%arg0: i32) -> (i32, i32, i32) {
    %c0_i32 = arith.constant 0 : i32
    %c0_i32_0 = arith.constant 0 : i32
    %c0_i32_1 = arith.constant 0 : i32
    return %arg0, %c0_i32, %c0_i32_0 : i32, i32, i32
  }
}

</mosaic_0001>

<bundles_post_ra>
// kernel: forward_pallas.11
= control target key start
LH: loop header
LB: loop body
LE: loop exit
PB: predicated region body
PF: predicated region fallthrough
CT: control target
= control target key end

     0   :  { %s2296_s12 = smov 0   ;;  %s2675_s0 = inlined_call_operand.vmem [shape: bf16[4096,128], index: 0, kind: input, shape index: {}]   ;;  %s2676_s1 = inlined_call_operand.vmem [shape: bf16[128,128], index: 1, kind: input, shape index: {}]   ;;  %s2677_s2 = inlined_call_operand.vmem [shape: f32[1,128], index: 2, kind: input, shape index: {}]   ;;  %s2678_s3 = inlined_call_operand.vmem [shape: f32[4096,128], index: 3, kind: output, shape index: {}]  }
   0x1 LB: > { %s1871_s13 = sadd.s32 4294967295, %s2274_s12   ;;  %p1875_p0 = scmp.ge.s32.totalorder %s2274_s12, 1  ;;  %s2274_s12 = sphi %s2296_s12, %s13_s12  }
   0x2   : > { %p138_p1 = scmp.lt.s32.totalorder %s2274_s12, 5 }
   0x4   : > { %p139_p2 = pnand %p1875_p0, %p138_p1 }
   0x5   : > { %s1876_s16 = sshll.u32 (!%p139_p2), %s1871_s13, 7 }
   0x6   : > { %142 = sbr.rel (%p139_p2) target bundleno = 370 (0x172), region = 32  ;;  %p163_p3 = scmp.lt.s32.totalorder (!%p139_p2), %s1876_s16, 511 }
   0xb   : > { %v2195_v0 = vld [vmem:[%s2676_s1 + $0x38] sm:$0xff]   ;;  %v2196_v1 = vld [vmem:[%s2676_s1 + $0x30] sm:$0xff]   ;;  %s2680_s16 = smov (!%p163_p3, %s1876_s16), 511  ;;  %v2197_v2 = vld [vmem:[%s2676_s1 + $0x28] sm:$0xff]  }
   0xc   : > { %2027 = vmatprep.subr.bf16.mxu0 %v2195_v0  ;;  %2171 = vmatprep.subr.bf16.mxu1 %v2195_v0  ;;  %s1877_s21 = sshll.u32 %s2680_s16, 2  ;;  %v2198_v3 = vld [vmem:[%s2676_s1 + $0x20] sm:$0xff]   ;;  %v2199_v6 = vld [vmem:[%s2676_s1 + $0x18] sm:$0xff]   ;;  %v2200_v7 = vld [vmem:[%s2676_s1 + $0x10] sm:$0xff]   ;;  %s1879_s10 = sshll.u32 %s2680_s16, 3 }
   0xd   : > { %2028 = vmatpush3.bf16.msra.mxu0 %v2195_v0  ;;  %2179 = vmatpush3.bf16.msra.mxu1 %v2195_v0  ;;  %s2319_s24 = scalar_lea.vmem %s2675_s0, %s1877_s21  ;;  %v2201_v8 = vld [vmem:[%s2676_s1 + $0x8] sm:$0xff]   ;;  %v2202_v9 = vld [vmem:[%s2676_s1] sm:$0xff]   ;;  %s2411_s14 = scalar_lea.vmem %s2678_s3, %s1879_s10 }
   0xe   : > { %2029 = vmatprep.subr.bf16.mxu0 %v2196_v1  ;;  %2172 = vmatprep.subr.bf16.mxu1 %v2196_v1  ;;  %v2203_v4 = vld [vmem:[%s2319_s24] sm:$0xff]   ;;  %v2205_v10 = vld [vmem:[%s2319_s24 + $0x8] sm:$0xff]   ;;  %v2207_v12 = vld [vmem:[%s2319_s24 + $0x10] sm:$0xff]  }
   0xf   : > { %v2204_v5 = vld [vmem:[%s2319_s24 + $0x100] sm:$0xff]   ;;  %2043 = vmatprep.mubr.bf16.mxu0 %v2203_v4  ;;  %v2206_v11 = vld [vmem:[%s2319_s24 + $0x108] sm:$0xff]   ;;  %v2208_v13 = vld [vmem:[%s2319_s24 + $0x110] sm:$0xff]  }
  0x10   : > { %2107 = vmatprep.mubr.bf16.mxu1 %v2204_v5  ;;  %v2209_v14 = vld [vmem:[%s2319_s24 + $0x18] sm:$0xff]   ;;  %v2211_v16 = vld [vmem:[%s2319_s24 + $0x20] sm:$0xff]   ;;  %v2213_v18 = vld [vmem:[%s2319_s24 + $0x28] sm:$0xff]  }
  0x11   : > { %2030 = vmatpush3.bf16.msra.mxu0 %v2196_v1  ;;  %2180 = vmatpush3.bf16.msra.mxu1 %v2196_v1  ;;  %v2210_v15 = vld [vmem:[%s2319_s24 + $0x118] sm:$0xff]   ;;  %v2212_v17 = vld [vmem:[%s2319_s24 + $0x120] sm:$0xff]   ;;  %v2214_v19 = vld [vmem:[%s2319_s24 + $0x128] sm:$0xff]  }
  0x12   : > { %2031 = vmatprep.subr.bf16.mxu0 %v2197_v2  ;;  %2173 = vmatprep.subr.bf16.mxu1 %v2197_v2  ;;  %v2215_v20 = vld [vmem:[%s2319_s24 + $0x30] sm:$0xff]   ;;  %v2217_v22 = vld [vmem:[%s2319_s24 + $0x38] sm:$0xff]   ;;  %v2219_v24 = vld [vmem:[%s2319_s24 + $0x40] sm:$0xff]  }
  0x13   : > { %v2216_v21 = vld [vmem:[%s2319_s24 + $0x130] sm:$0xff]   ;;  %v2218_v23 = vld [vmem:[%s2319_s24 + $0x138] sm:$0xff]   ;;  %v2220_v25 = vld [vmem:[%s2319_s24 + $0x140] sm:$0xff]  }
  0x14   : > { %v2221_v26 = vld [vmem:[%s2319_s24 + $0x48] sm:$0xff]   ;;  %v2223_v28 = vld [vmem:[%s2319_s24 + $0x50] sm:$0xff]   ;;  %v2225_v30 = vld [vmem:[%s2319_s24 + $0x58] sm:$0xff]  }
  0x15   : > { %2032 = vmatpush3.bf16.msra.mxu0 %v2197_v2  ;;  %2181 = vmatpush3.bf16.msra.mxu1 %v2197_v2  ;;  %v2222_v27 = vld [vmem:[%s2319_s24 + $0x148] sm:$0xff]   ;;  %v2224_v29 = vld [vmem:[%s2319_s24 + $0x150] sm:$0xff]   ;;  %v2226_v31 = vld [vmem:[%s2319_s24 + $0x158] sm:$0xff]  }
  0x16   : > { %2033 = vmatprep.subr.bf16.mxu0 %v2198_v3  ;;  %2174 = vmatprep.subr.bf16.mxu1 %v2198_v3  ;;  %v2227_v32 = vld [vmem:[%s2319_s24 + $0x60] sm:$0xff]   ;;  %v2229_v34 = vld [vmem:[%s2319_s24 + $0x68] sm:$0xff]   ;;  %v2231_v36 = vld [vmem:[%s2319_s24 + $0x70] sm:$0xff]  }
  0x17   : > { %v2228_v33 = vld [vmem:[%s2319_s24 + $0x160] sm:$0xff]   ;;  %v2230_v35 = vld [vmem:[%s2319_s24 + $0x168] sm:$0xff]   ;;  %v2232_v37 = vld [vmem:[%s2319_s24 + $0x170] sm:$0xff]  }
  0x18   : > { %v2233_v38 = vld [vmem:[%s2319_s24 + $0x78] sm:$0xff]   ;;  %v2235_v40 = vld [vmem:[%s2319_s24 + $0x80] sm:$0xff]   ;;  %v2237_v42 = vld [vmem:[%s2319_s24 + $0x88] sm:$0xff]  }
  0x19   : > { %2034 = vmatpush3.bf16.msra.mxu0 %v2198_v3  ;;  %2182 = vmatpush3.bf16.msra.mxu1 %v2198_v3  ;;  %v2234_v39 = vld [vmem:[%s2319_s24 + $0x178] sm:$0xff]   ;;  %v2236_v41 = vld [vmem:[%s2319_s24 + $0x180] sm:$0xff]   ;;  %v2238_v43 = vld [vmem:[%s2319_s24 + $0x188] sm:$0xff]  }
  0x1a   : > { %2035 = vmatprep.subr.bf16.mxu0 %v2199_v6  ;;  %2175 = vmatprep.subr.bf16.mxu1 %v2199_v6  ;;  %v2239_v44 = vld [vmem:[%s2319_s24 + $0x90] sm:$0xff]   ;;  %v2241_v46 = vld [vmem:[%s2319_s24 + $0x98] sm:$0xff]   ;;  %v2243_v48 = vld [vmem:[%s2319_s24 + $0xa0] sm:$0xff]  }
  0x1b   : > { %v2240_v45 = vld [vmem:[%s2319_s24 + $0x190] sm:$0xff]   ;;  %v2242_v47 = vld [vmem:[%s2319_s24 + $0x198] sm:$0xff]   ;;  %v2244_v49 = vld [vmem:[%s2319_s24 + $0x1a0] sm:$0xff]  }
  0x1c   : > { %v2245_v50 = vld [vmem:[%s2319_s24 + $0xa8] sm:$0xff]   ;;  %v2247_v52 = vld [vmem:[%s2319_s24 + $0xb0] sm:$0xff]   ;;  %v2249_v54 = vld [vmem:[%s2319_s24 + $0xb8] sm:$0xff]  }
  0x1d   : > { %2036 = vmatpush3.bf16.msra.mxu0 %v2199_v6  ;;  %2183 = vmatpush3.bf16.msra.mxu1 %v2199_v6  ;;  %v2246_v51 = vld [vmem:[%s2319_s24 + $0x1a8] sm:$0xff]   ;;  %v2248_v53 = vld [vmem:[%s2319_s24 + $0x1b0] sm:$0xff]   ;;  %v2250_v55 = vld [vmem:[%s2319_s24 + $0x1b8] sm:$0xff]  }
  0x1e   : > { %2037 = vmatprep.subr.bf16.mxu0 %v2200_v7  ;;  %2176 = vmatprep.subr.bf16.mxu1 %v2200_v7  ;;  %v2251_v56 = vld [vmem:[%s2319_s24 + $0xc0] sm:$0xff]   ;;  %v2253_v58 = vld [vmem:[%s2319_s24 + $0xc8] sm:$0xff]   ;;  %v2255_v60 = vld [vmem:[%s2319_s24 + $0xd0] sm:$0xff]  }
  0x1f   : > { %v2252_v57 = vld [vmem:[%s2319_s24 + $0x1c0] sm:$0xff]   ;;  %v2254_v59 = vld [vmem:[%s2319_s24 + $0x1c8] sm:$0xff]   ;;  %v2256_v61 = vld [vmem:[%s2319_s24 + $0x1d0] sm:$0xff]  }
  0x20   : > { %v2257_v62 = vld [vmem:[%s2319_s24 + $0xd8] sm:$0xff]   ;;  %v2259_v0 = vld [vmem:[%s2319_s24 + $0xe0] sm:$0xff]   ;;  %v2261_v2 = vld [vmem:[%s2319_s24 + $0xe8] sm:$0xff]  }
  0x21   : > { %2038 = vmatpush3.bf16.msra.mxu0 %v2200_v7  ;;  %2184 = vmatpush3.bf16.msra.mxu1 %v2200_v7  ;;  %v2258_v63 = vld [vmem:[%s2319_s24 + $0x1d8] sm:$0xff]   ;;  %v2260_v1 = vld [vmem:[%s2319_s24 + $0x1e0] sm:$0xff]   ;;  %v2262_v3 = vld [vmem:[%s2319_s24 + $0x1e8] sm:$0xff]  }
  0x22   : > { %2039 = vmatprep.subr.bf16.mxu0 %v2201_v8  ;;  %2177 = vmatprep.subr.bf16.mxu1 %v2201_v8  ;;  %v2263_v4 = vld [vmem:[%s2319_s24 + $0xf0] sm:$0xff]   ;;  %v2265_v6 = vld [vmem:[%s2319_s24 + $0xf8] sm:$0xff]  }
  0x23   : > { %v2264_v5 = vld [vmem:[%s2319_s24 + $0x1f0] sm:$0xff]   ;;  %v2266_v7 = vld [vmem:[%s2319_s24 + $0x1f8] sm:$0xff]  }
  0x25   : > { %2040 = vmatpush3.bf16.msra.mxu0 %v2201_v8  ;;  %2185 = vmatpush3.bf16.msra.mxu1 %v2201_v8  ;;  %v2403_v8 = vld [vmem:[%s2677_s2] ss:$0 sm:$0xff] }
  0x26   : > { %2041 = vmatprep.subr.bf16.mxu0 %v2202_v9  ;;  %2178 = vmatprep.subr.bf16.mxu1 %v2202_v9 }
  0x29   : > { %2042 = vmatpush3.bf16.msra.mxu0 %v2202_v9  ;;  %2186 = vmatpush3.bf16.msra.mxu1 %v2202_v9 }
  0x2c   : > { %2044 = vmatmul.mubr.bf16.vlgmr.msra.gmra.mxu0 %v2205_v10  ;;  %2108 = vmatmul.mubr.bf16.vlgmr.msra.gmra.mxu1 %v2206_v11 }
  0x2d   : > { %2047 = vmatprep.mubr.bf16.mxu0 %v2207_v12  ;;  %2111 = vmatprep.mubr.bf16.mxu1 %v2208_v13 }
  0x34   : > { %2048 = vmatmul.mubr.bf16.gmra.mxu0 %v2209_v14  ;;  %2112 = vmatmul.mubr.bf16.gmra.mxu1 %v2210_v15 }
  0x35   : > { %2051 = vmatprep.mubr.bf16.mxu0 %v2211_v16  ;;  %2115 = vmatprep.mubr.bf16.mxu1 %v2212_v17 }
  0x3c   : > { %2052 = vmatmul.mubr.bf16.gmra.mxu0 %v2213_v18  ;;  %2116 = vmatmul.mubr.bf16.gmra.mxu1 %v2214_v19 }
  0x3d   : > { %2055 = vmatprep.mubr.bf16.mxu0 %v2215_v20  ;;  %2119 = vmatprep.mubr.bf16.mxu1 %v2216_v21 }
  0x44   : > { %2056 = vmatmul.mubr.bf16.gmra.mxu0 %v2217_v22  ;;  %2120 = vmatmul.mubr.bf16.gmra.mxu1 %v2218_v23 }
  0x45   : > { %2059 = vmatprep.mubr.bf16.mxu0 %v2219_v24  ;;  %2123 = vmatprep.mubr.bf16.mxu1 %v2220_v25 }
  0x4c   : > { %2060 = vmatmul.mubr.bf16.gmra.mxu0 %v2221_v26  ;;  %2124 = vmatmul.mubr.bf16.gmra.mxu1 %v2222_v27 }
  0x4d   : > { %2063 = vmatprep.mubr.bf16.mxu0 %v2223_v28  ;;  %2127 = vmatprep.mubr.bf16.mxu1 %v2224_v29 }
  0x54   : > { %2064 = vmatmul.mubr.bf16.gmra.mxu0 %v2225_v30  ;;  %2128 = vmatmul.mubr.bf16.gmra.mxu1 %v2226_v31 }
  0x55   : > { %2067 = vmatprep.mubr.bf16.mxu0 %v2227_v32  ;;  %2131 = vmatprep.mubr.bf16.mxu1 %v2228_v33 }
  0x5c   : > { %2068 = vmatmul.mubr.bf16.gmra.mxu0 %v2229_v34  ;;  %2132 = vmatmul.mubr.bf16.gmra.mxu1 %v2230_v35 }
  0x5d   : > { %2071 = vmatprep.mubr.bf16.mxu0 %v2231_v36  ;;  %2135 = vmatprep.mubr.bf16.mxu1 %v2232_v37 }
  0x64   : > { %2072 = vmatmul.mubr.bf16.gmra.mxu0 %v2233_v38  ;;  %2136 = vmatmul.mubr.bf16.gmra.mxu1 %v2234_v39 }
  0x65   : > { %2075 = vmatprep.mubr.bf16.mxu0 %v2235_v40  ;;  %2139 = vmatprep.mubr.bf16.mxu1 %v2236_v41 }
  0x6c   : > { %2076 = vmatmul.mubr.bf16.gmra.mxu0 %v2237_v42  ;;  %2140 = vmatmul.mubr.bf16.gmra.mxu1 %v2238_v43 }
  0x6d   : > { %2079 = vmatprep.mubr.bf16.mxu0 %v2239_v44  ;;  %2143 = vmatprep.mubr.bf16.mxu1 %v2240_v45 }
  0x74   : > { %2080 = vmatmul.mubr.bf16.gmra.mxu0 %v2241_v46  ;;  %2144 = vmatmul.mubr.bf16.gmra.mxu1 %v2242_v47 }
  0x75   : > { %2083 = vmatprep.mubr.bf16.mxu0 %v2243_v48  ;;  %2147 = vmatprep.mubr.bf16.mxu1 %v2244_v49 }
  0x7c   : > { %2084 = vmatmul.mubr.bf16.gmra.mxu0 %v2245_v50  ;;  %2148 = vmatmul.mubr.bf16.gmra.mxu1 %v2246_v51 }
  0x7d   : > { %2087 = vmatprep.mubr.bf16.mxu0 %v2247_v52  ;;  %2151 = vmatprep.mubr.bf16.mxu1 %v2248_v53 }
  0x84   : > { %2088 = vmatmul.mubr.bf16.gmra.mxu0 %v2249_v54  ;;  %2152 = vmatmul.mubr.bf16.gmra.mxu1 %v2250_v55 }
  0x85   : > { %2091 = vmatprep.mubr.bf16.mxu0 %v2251_v56  ;;  %2155 = vmatprep.mubr.bf16.mxu1 %v2252_v57 }
  0x8c   : > { %2092 = vmatmul.mubr.bf16.gmra.mxu0 %v2253_v58  ;;  %2156 = vmatmul.mubr.bf16.gmra.mxu1 %v2254_v59 }
  0x8d   : > { %2095 = vmatprep.mubr.bf16.mxu0 %v2255_v60  ;;  %2159 = vmatprep.mubr.bf16.mxu1 %v2256_v61 }
  0x94   : > { %2096 = vmatmul.mubr.bf16.gmra.mxu0 %v2257_v62  ;;  %2160 = vmatmul.mubr.bf16.gmra.mxu1 %v2258_v63 }
  0x95   : > { %2099 = vmatprep.mubr.bf16.mxu0 %v2259_v0  ;;  %2163 = vmatprep.mubr.bf16.mxu1 %v2260_v1 }
  0x9c   : > { %2100 = vmatmul.mubr.bf16.gmra.mxu0 %v2261_v2  ;;  %2164 = vmatmul.mubr.bf16.gmra.mxu1 %v2262_v3 }
  0x9d   : > { %2103 = vmatprep.mubr.bf16.mxu0 %v2263_v4  ;;  %2167 = vmatprep.mubr.bf16.mxu1 %v2264_v5 }
  0xa4   : > { %2104 = vmatmul.mubr.bf16.gmra.mxu0 %v2265_v6  ;;  %2168 = vmatmul.mubr.bf16.gmra.mxu1 %v2266_v7 }
  0xec   : > { %v2045_v9 = vpop.f32.mrf.mxu0  ;;  %v2109_v10 = vpop.f32.mrf.mxu1 }
  0xed   : > { %v801_v11 = vadd.f32 %v2045_v9, %v2403_v8  ;;  %v1057_v12 = vadd.f32 %v2109_v10, %v2403_v8 }
  0xee   : > { %v792_v13 = vpop.f32.mrf.mxu0  ;;  %v1048_v14 = vpop.f32.mrf.mxu1 }
  0xef   : > { %vm1305_vm0 = vcmp.ge.f32.partialorder %v801_v11, 0.0  ;;  %v1433_v15 = vmul.f32 0.1, %v801_v11  ;;  %vm1369_vm1 = vcmp.ge.f32.partialorder %v1057_v12, 0.0  ;;  %v1497_v16 = vmul.f32 0.1, %v1057_v12 }
  0xf0   : > { %v793_v17 = vadd.f32 %v2403_v8, %v792_v13  ;;  %v1049_v18 = vadd.f32 %v2403_v8, %v1048_v14  ;;  %v2046_v19 = vpop.f32.mrf.mxu0  ;;  %v2110_v20 = vpop.f32.mrf.mxu1 }
  0xf1   : > { %v1561_v21 = vsel %vm1305_vm0, %v801_v11, %v1433_v15  ;;  %v1625_v22 = vsel %vm1369_vm1, %v1057_v12, %v1497_v16  ;;  %v804_v23 = vadd.f32 %v2046_v19, %v2403_v8  ;;  %v1060_v24 = vadd.f32 %v2110_v20, %v2403_v8 }
  0xf2   : > { %1689 = vst [vmem:[%s2411_s14 + $0x10] sm:$0xff] %v1561_v21  ;;  %1753 = vst [vmem:[%s2411_s14 + $0x210] sm:$0xff] %v1625_v22  ;;  %vm1303_vm2 = vcmp.ge.f32.partialorder %v793_v17, 0.0  ;;  %v1431_v25 = vmul.f32 0.1, %v793_v17  ;;  %vm1367_vm3 = vcmp.ge.f32.partialorder %v1049_v18, 0.0  ;;  %v795_v27 = vpop.f32.mrf.mxu0  ;;  %v1051_v28 = vpop.f32.mrf.mxu1 }
  0xf3   : > { %v1495_v26 = vmul.f32 0.1, %v1049_v18  ;;  %vm1306_vm4 = vcmp.ge.f32.partialorder %v804_v23, 0.0  ;;  %v1434_v29 = vmul.f32 0.1, %v804_v23  ;;  %vm1370_vm5 = vcmp.ge.f32.partialorder %v1060_v24, 0.0 }
  0xf4   : > { %v1498_v30 = vmul.f32 0.1, %v1060_v24  ;;  %v1559_v31 = vsel %vm1303_vm2, %v793_v17, %v1431_v25  ;;  %v796_v33 = vadd.f32 %v2403_v8, %v795_v27  ;;  %v1052_v34 = vadd.f32 %v2403_v8, %v1051_v28  ;;  %v2049_v35 = vpop.f32.mrf.mxu0  ;;  %v2113_v36 = vpop.f32.mrf.mxu1 }
  0xf5   : > { %v1623_v32 = vsel %vm1367_vm3, %v1049_v18, %v1495_v26  ;;  %1687 = vst [vmem:[%s2411_s14] sm:$0xff] %v1559_v31  ;;  %v1562_v37 = vsel %vm1306_vm4, %v804_v23, %v1434_v29  ;;  %v817_v39 = vadd.f32 %v2049_v35, %v2403_v8  ;;  %v1073_v40 = vadd.f32 %v2113_v36, %v2403_v8 }
  0xf6   : > { %1751 = vst [vmem:[%s2411_s14 + $0x200] sm:$0xff] %v1623_v32  ;;  %v1626_v38 = vsel %vm1370_vm5, %v1060_v24, %v1498_v30  ;;  %1690 = vst [vmem:[%s2411_s14 + $0x18] sm:$0xff] %v1562_v37  ;;  %vm1304_vm6 = vcmp.ge.f32.partialorder %v796_v33, 0.0  ;;  %v1432_v41 = vmul.f32 0.1, %v796_v33  ;;  %vm1368_vm7 = vcmp.ge.f32.partialorder %v1052_v34, 0.0  ;;  %v808_v43 = vpop.f32.mrf.mxu0  ;;  %v1064_v44 = vpop.f32.mrf.mxu1 }
  0xf7   : > { %1754 = vst [vmem:[%s2411_s14 + $0x218] sm:$0xff] %v1626_v38  ;;  %v1496_v42 = vmul.f32 0.1, %v1052_v34  ;;  %vm1309_vm8 = vcmp.ge.f32.partialorder %v817_v39, 0.0  ;;  %v1437_v45 = vmul.f32 0.1, %v817_v39  ;;  %v809_v49 = vadd.f32 %v2403_v8, %v808_v43 }
  0xf8   : > { %vm1373_vm9 = vcmp.ge.f32.partialorder %v1073_v40, 0.0  ;;  %v1501_v46 = vmul.f32 0.1, %v1073_v40  ;;  %v1560_v47 = vsel %vm1304_vm6, %v796_v33, %v1432_v41  ;;  %v1065_v50 = vadd.f32 %v2403_v8, %v1064_v44  ;;  %v2050_v51 = vpop.f32.mrf.mxu0  ;;  %v2114_v52 = vpop.f32.mrf.mxu1 }
  0xf9   : > { %v1624_v48 = vsel %vm1368_vm7, %v1052_v34, %v1496_v42  ;;  %1688 = vst [vmem:[%s2411_s14 + $0x8] sm:$0xff] %v1560_v47  ;;  %v1565_v53 = vsel %vm1309_vm8, %v817_v39, %v1437_v45  ;;  %v820_v55 = vadd.f32 %v2050_v51, %v2403_v8  ;;  %v1076_v56 = vadd.f32 %v2114_v52, %v2403_v8 }
  0xfa   : > { %1752 = vst [vmem:[%s2411_s14 + $0x208] sm:$0xff] %v1624_v48  ;;  %v1629_v54 = vsel %vm1373_vm9, %v1073_v40, %v1501_v46  ;;  %1693 = vst [vmem:[%s2411_s14 + $0x30] sm:$0xff] %v1565_v53  ;;  %vm1307_vm10 = vcmp.ge.f32.partialorder %v809_v49, 0.0  ;;  %v1435_v57 = vmul.f32 0.1, %v809_v49  ;;  %vm1371_vm11 = vcmp.ge.f32.partialorder %v1065_v50, 0.0  ;;  %v811_v59 = vpop.f32.mrf.mxu0  ;;  %v1067_v60 = vpop.f32.mrf.mxu1 }
  0xfb   : > { %1757 = vst [vmem:[%s2411_s14 + $0x230] sm:$0xff] %v1629_v54  ;;  %v1499_v58 = vmul.f32 0.1, %v1065_v50  ;;  %vm1310_vm12 = vcmp.ge.f32.partialorder %v820_v55, 0.0  ;;  %v1438_v61 = vmul.f32 0.1, %v820_v55  ;;  %v812_v1 = vadd.f32 %v2403_v8, %v811_v59 }
  0xfc   : > { %vm1374_vm13 = vcmp.ge.f32.partialorder %v1076_v56, 0.0  ;;  %v1502_v62 = vmul.f32 0.1, %v1076_v56  ;;  %v1563_v63 = vsel %vm1307_vm10, %v809_v49, %v1435_v57  ;;  %v1068_v2 = vadd.f32 %v2403_v8, %v1067_v60  ;;  %v2053_v3 = vpop.f32.mrf.mxu0  ;;  %v2117_v4 = vpop.f32.mrf.mxu1 }
  0xfd   : > { %v1627_v0 = vsel %vm1371_vm11, %v1065_v50, %v1499_v58  ;;  %1691 = vst [vmem:[%s2411_s14 + $0x20] sm:$0xff] %v1563_v63  ;;  %v1566_v5 = vsel %vm1310_vm12, %v820_v55, %v1438_v61  ;;  %v833_v7 = vadd.f32 %v2053_v3, %v2403_v8  ;;  %v1089_v9 = vadd.f32 %v2117_v4, %v2403_v8 }
  0xfe   : > { %1755 = vst [vmem:[%s2411_s14 + $0x220] sm:$0xff] %v1627_v0  ;;  %v1630_v6 = vsel %vm1374_vm13, %v1076_v56, %v1502_v62  ;;  %1694 = vst [vmem:[%s2411_s14 + $0x38] sm:$0xff] %v1566_v5  ;;  %vm1308_vm14 = vcmp.ge.f32.partialorder %v812_v1, 0.0  ;;  %v1436_v10 = vmul.f32 0.1, %v812_v1  ;;  %vm1372_vm15 = vcmp.ge.f32.partialorder %v1068_v2, 0.0  ;;  %v824_v12 = vpop.f32.mrf.mxu0  ;;  %v1080_v13 = vpop.f32.mrf.mxu1 }
  0xff   : > { %1758 = vst [vmem:[%s2411_s14 + $0x238] sm:$0xff] %v1630_v6  ;;  %v1500_v11 = vmul.f32 0.1, %v1068_v2  ;;  %vm1313_vm0 = vcmp.ge.f32.partialorder %v833_v7, 0.0  ;;  %v1441_v14 = vmul.f32 0.1, %v833_v7  ;;  %v825_v18 = vadd.f32 %v2403_v8, %v824_v12 }
 0x100   : > { %vm1377_vm1 = vcmp.ge.f32.partialorder %v1089_v9, 0.0  ;;  %v1505_v15 = vmul.f32 0.1, %v1089_v9  ;;  %v1564_v16 = vsel %vm1308_vm14, %v812_v1, %v1436_v10  ;;  %v1081_v19 = vadd.f32 %v2403_v8, %v1080_v13  ;;  %v2054_v20 = vpop.f32.mrf.mxu0  ;;  %v2118_v21 = vpop.f32.mrf.mxu1 }
 0x101   : > { %v1628_v17 = vsel %vm1372_vm15, %v1068_v2, %v1500_v11  ;;  %1692 = vst [vmem:[%s2411_s14 + $0x28] sm:$0xff] %v1564_v16  ;;  %v1569_v22 = vsel %vm1313_vm0, %v833_v7, %v1441_v14  ;;  %v836_v24 = vadd.f32 %v2054_v20, %v2403_v8  ;;  %v1092_v25 = vadd.f32 %v2118_v21, %v2403_v8 }
 0x102   : > { %1756 = vst [vmem:[%s2411_s14 + $0x228] sm:$0xff] %v1628_v17  ;;  %v1633_v23 = vsel %vm1377_vm1, %v1089_v9, %v1505_v15  ;;  %1697 = vst [vmem:[%s2411_s14 + $0x50] sm:$0xff] %v1569_v22  ;;  %vm1311_vm2 = vcmp.ge.f32.partialorder %v825_v18, 0.0  ;;  %v1439_v26 = vmul.f32 0.1, %v825_v18  ;;  %vm1375_vm3 = vcmp.ge.f32.partialorder %v1081_v19, 0.0  ;;  %v827_v28 = vpop.f32.mrf.mxu0  ;;  %v1083_v29 = vpop.f32.mrf.mxu1 }
 0x103   : > { %1761 = vst [vmem:[%s2411_s14 + $0x250] sm:$0xff] %v1633_v23  ;;  %v1503_v27 = vmul.f32 0.1, %v1081_v19  ;;  %vm1314_vm4 = vcmp.ge.f32.partialorder %v836_v24, 0.0  ;;  %v1442_v30 = vmul.f32 0.1, %v836_v24  ;;  %v828_v34 = vadd.f32 %v2403_v8, %v827_v28 }
 0x104   : > { %vm1378_vm5 = vcmp.ge.f32.partialorder %v1092_v25, 0.0  ;;  %v1506_v31 = vmul.f32 0.1, %v1092_v25  ;;  %v1567_v32 = vsel %vm1311_vm2, %v825_v18, %v1439_v26  ;;  %v1084_v35 = vadd.f32 %v2403_v8, %v1083_v29  ;;  %v2057_v36 = vpop.f32.mrf.mxu0  ;;  %v2121_v37 = vpop.f32.mrf.mxu1 }
 0x105   : > { %v1631_v33 = vsel %vm1375_vm3, %v1081_v19, %v1503_v27  ;;  %1695 = vst [vmem:[%s2411_s14 + $0x40] sm:$0xff] %v1567_v32  ;;  %v1570_v38 = vsel %vm1314_vm4, %v836_v24, %v1442_v30  ;;  %v849_v40 = vadd.f32 %v2057_v36, %v2403_v8  ;;  %v1105_v41 = vadd.f32 %v2121_v37, %v2403_v8 }
 0x106   : > { %1759 = vst [vmem:[%s2411_s14 + $0x240] sm:$0xff] %v1631_v33  ;;  %v1634_v39 = vsel %vm1378_vm5, %v1092_v25, %v1506_v31  ;;  %1698 = vst [vmem:[%s2411_s14 + $0x58] sm:$0xff] %v1570_v38  ;;  %vm1312_vm6 = vcmp.ge.f32.partialorder %v828_v34, 0.0  ;;  %v1440_v42 = vmul.f32 0.1, %v828_v34  ;;  %vm1376_vm7 = vcmp.ge.f32.partialorder %v1084_v35, 0.0  ;;  %v840_v44 = vpop.f32.mrf.mxu0  ;;  %v1096_v45 = vpop.f32.mrf.mxu1 }
 0x107   : > { %1762 = vst [vmem:[%s2411_s14 + $0x258] sm:$0xff] %v1634_v39  ;;  %v1504_v43 = vmul.f32 0.1, %v1084_v35  ;;  %vm1317_vm8 = vcmp.ge.f32.partialorder %v849_v40, 0.0  ;;  %v1445_v46 = vmul.f32 0.1, %v849_v40  ;;  %v841_v50 = vadd.f32 %v2403_v8, %v840_v44 }
 0x108   : > { %vm1381_vm9 = vcmp.ge.f32.partialorder %v1105_v41, 0.0  ;;  %v1509_v47 = vmul.f32 0.1, %v1105_v41  ;;  %v1568_v48 = vsel %vm1312_vm6, %v828_v34, %v1440_v42  ;;  %v1097_v51 = vadd.f32 %v2403_v8, %v1096_v45  ;;  %v2058_v52 = vpop.f32.mrf.mxu0  ;;  %v2122_v53 = vpop.f32.mrf.mxu1 }
 0x109   : > { %v1632_v49 = vsel %vm1376_vm7, %v1084_v35, %v1504_v43  ;;  %1696 = vst [vmem:[%s2411_s14 + $0x48] sm:$0xff] %v1568_v48  ;;  %v1573_v54 = vsel %vm1317_vm8, %v849_v40, %v1445_v46  ;;  %v852_v56 = vadd.f32 %v2058_v52, %v2403_v8  ;;  %v1108_v57 = vadd.f32 %v2122_v53, %v2403_v8 }
 0x10a   : > { %1760 = vst [vmem:[%s2411_s14 + $0x248] sm:$0xff] %v1632_v49  ;;  %v1637_v55 = vsel %vm1381_vm9, %v1105_v41, %v1509_v47  ;;  %1701 = vst [vmem:[%s2411_s14 + $0x70] sm:$0xff] %v1573_v54  ;;  %vm1315_vm10 = vcmp.ge.f32.partialorder %v841_v50, 0.0  ;;  %v1443_v58 = vmul.f32 0.1, %v841_v50  ;;  %vm1379_vm11 = vcmp.ge.f32.partialorder %v1097_v51, 0.0  ;;  %v843_v60 = vpop.f32.mrf.mxu0  ;;  %v1099_v61 = vpop.f32.mrf.mxu1 }
 0x10b   : > { %1765 = vst [vmem:[%s2411_s14 + $0x270] sm:$0xff] %v1637_v55  ;;  %v1507_v59 = vmul.f32 0.1, %v1097_v51  ;;  %vm1318_vm12 = vcmp.ge.f32.partialorder %v852_v56, 0.0  ;;  %v1446_v62 = vmul.f32 0.1, %v852_v56  ;;  %v844_v2 = vadd.f32 %v2403_v8, %v843_v60 }
 0x10c   : > { %vm1382_vm13 = vcmp.ge.f32.partialorder %v1108_v57, 0.0  ;;  %v1510_v63 = vmul.f32 0.1, %v1108_v57  ;;  %v1571_v0 = vsel %vm1315_vm10, %v841_v50, %v1443_v58  ;;  %v1100_v3 = vadd.f32 %v2403_v8, %v1099_v61  ;;  %v2061_v4 = vpop.f32.mrf.mxu0  ;;  %v2125_v5 = vpop.f32.mrf.mxu1 }
 0x10d   : > { %v1635_v1 = vsel %vm1379_vm11, %v1097_v51, %v1507_v59  ;;  %1699 = vst [vmem:[%s2411_s14 + $0x60] sm:$0xff] %v1571_v0  ;;  %v1574_v6 = vsel %vm1318_vm12, %v852_v56, %v1446_v62  ;;  %v865_v9 = vadd.f32 %v2061_v4, %v2403_v8  ;;  %v1121_v10 = vadd.f32 %v2125_v5, %v2403_v8 }
 0x10e   : > { %1763 = vst [vmem:[%s2411_s14 + $0x260] sm:$0xff] %v1635_v1  ;;  %v1638_v7 = vsel %vm1382_vm13, %v1108_v57, %v1510_v63  ;;  %1702 = vst [vmem:[%s2411_s14 + $0x78] sm:$0xff] %v1574_v6  ;;  %vm1316_vm14 = vcmp.ge.f32.partialorder %v844_v2, 0.0  ;;  %v1444_v11 = vmul.f32 0.1, %v844_v2  ;;  %vm1380_vm15 = vcmp.ge.f32.partialorder %v1100_v3, 0.0  ;;  %v856_v13 = vpop.f32.mrf.mxu0  ;;  %v1112_v14 = vpop.f32.mrf.mxu1 }
 0x10f   : > { %1766 = vst [vmem:[%s2411_s14 + $0x278] sm:$0xff] %v1638_v7  ;;  %v1508_v12 = vmul.f32 0.1, %v1100_v3  ;;  %vm1321_vm0 = vcmp.ge.f32.partialorder %v865_v9, 0.0  ;;  %v1449_v15 = vmul.f32 0.1, %v865_v9  ;;  %v857_v19 = vadd.f32 %v2403_v8, %v856_v13 }
 0x110   : > { %vm1385_vm1 = vcmp.ge.f32.partialorder %v1121_v10, 0.0  ;;  %v1513_v16 = vmul.f32 0.1, %v1121_v10  ;;  %v1572_v17 = vsel %vm1316_vm14, %v844_v2, %v1444_v11  ;;  %v1113_v20 = vadd.f32 %v2403_v8, %v1112_v14  ;;  %v2062_v21 = vpop.f32.mrf.mxu0  ;;  %v2126_v22 = vpop.f32.mrf.mxu1 }
 0x111   : > { %v1636_v18 = vsel %vm1380_vm15, %v1100_v3, %v1508_v12  ;;  %1700 = vst [vmem:[%s2411_s14 + $0x68] sm:$0xff] %v1572_v17  ;;  %v1577_v23 = vsel %vm1321_vm0, %v865_v9, %v1449_v15  ;;  %v868_v25 = vadd.f32 %v2062_v21, %v2403_v8  ;;  %v1124_v26 = vadd.f32 %v2126_v22, %v2403_v8 }
 0x112   : > { %1764 = vst [vmem:[%s2411_s14 + $0x268] sm:$0xff] %v1636_v18  ;;  %v1641_v24 = vsel %vm1385_vm1, %v1121_v10, %v1513_v16  ;;  %1705 = vst [vmem:[%s2411_s14 + $0x90] sm:$0xff] %v1577_v23  ;;  %vm1319_vm2 = vcmp.ge.f32.partialorder %v857_v19, 0.0  ;;  %v1447_v27 = vmul.f32 0.1, %v857_v19  ;;  %vm1383_vm3 = vcmp.ge.f32.partialorder %v1113_v20, 0.0  ;;  %v859_v29 = vpop.f32.mrf.mxu0  ;;  %v1115_v30 = vpop.f32.mrf.mxu1 }
 0x113   : > { %1769 = vst [vmem:[%s2411_s14 + $0x290] sm:$0xff] %v1641_v24  ;;  %v1511_v28 = vmul.f32 0.1, %v1113_v20  ;;  %vm1322_vm4 = vcmp.ge.f32.partialorder %v868_v25, 0.0  ;;  %v1450_v31 = vmul.f32 0.1, %v868_v25  ;;  %v860_v35 = vadd.f32 %v2403_v8, %v859_v29 }
 0x114   : > { %vm1386_vm5 = vcmp.ge.f32.partialorder %v1124_v26, 0.0  ;;  %v1514_v32 = vmul.f32 0.1, %v1124_v26  ;;  %v1575_v33 = vsel %vm1319_vm2, %v857_v19, %v1447_v27  ;;  %v1116_v36 = vadd.f32 %v2403_v8, %v1115_v30  ;;  %v2065_v37 = vpop.f32.mrf.mxu0  ;;  %v2129_v38 = vpop.f32.mrf.mxu1 }
 0x115   : > { %v1639_v34 = vsel %vm1383_vm3, %v1113_v20, %v1511_v28  ;;  %1703 = vst [vmem:[%s2411_s14 + $0x80] sm:$0xff] %v1575_v33  ;;  %v1578_v39 = vsel %vm1322_vm4, %v868_v25, %v1450_v31  ;;  %v881_v41 = vadd.f32 %v2065_v37, %v2403_v8  ;;  %v1137_v42 = vadd.f32 %v2129_v38, %v2403_v8 }
 0x116   : > { %1767 = vst [vmem:[%s2411_s14 + $0x280] sm:$0xff] %v1639_v34  ;;  %v1642_v40 = vsel %vm1386_vm5, %v1124_v26, %v1514_v32  ;;  %1706 = vst [vmem:[%s2411_s14 + $0x98] sm:$0xff] %v1578_v39  ;;  %vm1320_vm6 = vcmp.ge.f32.partialorder %v860_v35, 0.0  ;;  %v1448_v43 = vmul.f32 0.1, %v860_v35  ;;  %vm1384_vm7 = vcmp.ge.f32.partialorder %v1116_v36, 0.0  ;;  %v872_v45 = vpop.f32.mrf.mxu0  ;;  %v1128_v46 = vpop.f32.mrf.mxu1 }
 0x117   : > { %1770 = vst [vmem:[%s2411_s14 + $0x298] sm:$0xff] %v1642_v40  ;;  %v1512_v44 = vmul.f32 0.1, %v1116_v36  ;;  %vm1325_vm8 = vcmp.ge.f32.partialorder %v881_v41, 0.0  ;;  %v1453_v47 = vmul.f32 0.1, %v881_v41  ;;  %v873_v51 = vadd.f32 %v2403_v8, %v872_v45 }
 0x118   : > { %vm1389_vm9 = vcmp.ge.f32.partialorder %v1137_v42, 0.0  ;;  %v1517_v48 = vmul.f32 0.1, %v1137_v42  ;;  %v1576_v49 = vsel %vm1320_vm6, %v860_v35, %v1448_v43  ;;  %v1129_v52 = vadd.f32 %v2403_v8, %v1128_v46  ;;  %v2066_v53 = vpop.f32.mrf.mxu0  ;;  %v2130_v54 = vpop.f32.mrf.mxu1 }
 0x119   : > { %v1640_v50 = vsel %vm1384_vm7, %v1116_v36, %v1512_v44  ;;  %1704 = vst [vmem:[%s2411_s14 + $0x88] sm:$0xff] %v1576_v49  ;;  %v1581_v55 = vsel %vm1325_vm8, %v881_v41, %v1453_v47  ;;  %v884_v57 = vadd.f32 %v2066_v53, %v2403_v8  ;;  %v1140_v58 = vadd.f32 %v2130_v54, %v2403_v8 }
 0x11a   : > { %1768 = vst [vmem:[%s2411_s14 + $0x288] sm:$0xff] %v1640_v50  ;;  %v1645_v56 = vsel %vm1389_vm9, %v1137_v42, %v1517_v48  ;;  %1709 = vst [vmem:[%s2411_s14 + $0xb0] sm:$0xff] %v1581_v55  ;;  %vm1323_vm10 = vcmp.ge.f32.partialorder %v873_v51, 0.0  ;;  %v1451_v59 = vmul.f32 0.1, %v873_v51  ;;  %vm1387_vm11 = vcmp.ge.f32.partialorder %v1129_v52, 0.0  ;;  %v875_v61 = vpop.f32.mrf.mxu0  ;;  %v1131_v62 = vpop.f32.mrf.mxu1 }
 0x11b   : > { %1773 = vst [vmem:[%s2411_s14 + $0x2b0] sm:$0xff] %v1645_v56  ;;  %v1515_v60 = vmul.f32 0.1, %v1129_v52  ;;  %vm1326_vm12 = vcmp.ge.f32.partialorder %v884_v57, 0.0  ;;  %v1454_v63 = vmul.f32 0.1, %v884_v57  ;;  %v876_v3 = vadd.f32 %v2403_v8, %v875_v61 }
 0x11c   : > { %vm1390_vm13 = vcmp.ge.f32.partialorder %v1140_v58, 0.0  ;;  %v1518_v0 = vmul.f32 0.1, %v1140_v58  ;;  %v1579_v1 = vsel %vm1323_vm10, %v873_v51, %v1451_v59  ;;  %v1132_v4 = vadd.f32 %v2403_v8, %v1131_v62  ;;  %v2069_v5 = vpop.f32.mrf.mxu0  ;;  %v2133_v6 = vpop.f32.mrf.mxu1 }
 0x11d   : > { %v1643_v2 = vsel %vm1387_vm11, %v1129_v52, %v1515_v60  ;;  %1707 = vst [vmem:[%s2411_s14 + $0xa0] sm:$0xff] %v1579_v1  ;;  %v1582_v7 = vsel %vm1326_vm12, %v884_v57, %v1454_v63  ;;  %v897_v10 = vadd.f32 %v2069_v5, %v2403_v8  ;;  %v1153_v11 = vadd.f32 %v2133_v6, %v2403_v8 }
 0x11e   : > { %1771 = vst [vmem:[%s2411_s14 + $0x2a0] sm:$0xff] %v1643_v2  ;;  %v1646_v9 = vsel %vm1390_vm13, %v1140_v58, %v1518_v0  ;;  %1710 = vst [vmem:[%s2411_s14 + $0xb8] sm:$0xff] %v1582_v7  ;;  %vm1324_vm14 = vcmp.ge.f32.partialorder %v876_v3, 0.0  ;;  %v1452_v12 = vmul.f32 0.1, %v876_v3  ;;  %vm1388_vm15 = vcmp.ge.f32.partialorder %v1132_v4, 0.0  ;;  %v888_v14 = vpop.f32.mrf.mxu0  ;;  %v1144_v15 = vpop.f32.mrf.mxu1 }
 0x11f   : > { %1774 = vst [vmem:[%s2411_s14 + $0x2b8] sm:$0xff] %v1646_v9  ;;  %v1516_v13 = vmul.f32 0.1, %v1132_v4  ;;  %vm1329_vm0 = vcmp.ge.f32.partialorder %v897_v10, 0.0  ;;  %v1457_v16 = vmul.f32 0.1, %v897_v10  ;;  %v889_v20 = vadd.f32 %v2403_v8, %v888_v14 }
 0x120   : > { %vm1393_vm1 = vcmp.ge.f32.partialorder %v1153_v11, 0.0  ;;  %v1521_v17 = vmul.f32 0.1, %v1153_v11  ;;  %v1580_v18 = vsel %vm1324_vm14, %v876_v3, %v1452_v12  ;;  %v1145_v21 = vadd.f32 %v2403_v8, %v1144_v15  ;;  %v2070_v22 = vpop.f32.mrf.mxu0  ;;  %v2134_v23 = vpop.f32.mrf.mxu1 }
 0x121   : > { %v1644_v19 = vsel %vm1388_vm15, %v1132_v4, %v1516_v13  ;;  %1708 = vst [vmem:[%s2411_s14 + $0xa8] sm:$0xff] %v1580_v18  ;;  %v1585_v24 = vsel %vm1329_vm0, %v897_v10, %v1457_v16  ;;  %v900_v26 = vadd.f32 %v2070_v22, %v2403_v8  ;;  %v1156_v27 = vadd.f32 %v2134_v23, %v2403_v8 }
 0x122   : > { %1772 = vst [vmem:[%s2411_s14 + $0x2a8] sm:$0xff] %v1644_v19  ;;  %v1649_v25 = vsel %vm1393_vm1, %v1153_v11, %v1521_v17  ;;  %1713 = vst [vmem:[%s2411_s14 + $0xd0] sm:$0xff] %v1585_v24  ;;  %vm1327_vm2 = vcmp.ge.f32.partialorder %v889_v20, 0.0  ;;  %v1455_v28 = vmul.f32 0.1, %v889_v20  ;;  %vm1391_vm3 = vcmp.ge.f32.partialorder %v1145_v21, 0.0  ;;  %v891_v30 = vpop.f32.mrf.mxu0  ;;  %v1147_v31 = vpop.f32.mrf.mxu1 }
 0x123   : > { %1777 = vst [vmem:[%s2411_s14 + $0x2d0] sm:$0xff] %v1649_v25  ;;  %v1519_v29 = vmul.f32 0.1, %v1145_v21  ;;  %vm1330_vm4 = vcmp.ge.f32.partialorder %v900_v26, 0.0  ;;  %v1458_v32 = vmul.f32 0.1, %v900_v26  ;;  %v892_v36 = vadd.f32 %v2403_v8, %v891_v30 }
 0x124   : > { %vm1394_vm5 = vcmp.ge.f32.partialorder %v1156_v27, 0.0  ;;  %v1522_v33 = vmul.f32 0.1, %v1156_v27  ;;  %v1583_v34 = vsel %vm1327_vm2, %v889_v20, %v1455_v28  ;;  %v1148_v37 = vadd.f32 %v2403_v8, %v1147_v31  ;;  %v2073_v38 = vpop.f32.mrf.mxu0  ;;  %v2137_v39 = vpop.f32.mrf.mxu1 }
 0x125   : > { %v1647_v35 = vsel %vm1391_vm3, %v1145_v21, %v1519_v29  ;;  %1711 = vst [vmem:[%s2411_s14 + $0xc0] sm:$0xff] %v1583_v34  ;;  %v1586_v40 = vsel %vm1330_vm4, %v900_v26, %v1458_v32  ;;  %v913_v42 = vadd.f32 %v2073_v38, %v2403_v8  ;;  %v1169_v43 = vadd.f32 %v2137_v39, %v2403_v8 }
 0x126   : > { %1775 = vst [vmem:[%s2411_s14 + $0x2c0] sm:$0xff] %v1647_v35  ;;  %v1650_v41 = vsel %vm1394_vm5, %v1156_v27, %v1522_v33  ;;  %1714 = vst [vmem:[%s2411_s14 + $0xd8] sm:$0xff] %v1586_v40  ;;  %vm1328_vm6 = vcmp.ge.f32.partialorder %v892_v36, 0.0  ;;  %v1456_v44 = vmul.f32 0.1, %v892_v36  ;;  %vm1392_vm7 = vcmp.ge.f32.partialorder %v1148_v37, 0.0  ;;  %v904_v46 = vpop.f32.mrf.mxu0  ;;  %v1160_v47 = vpop.f32.mrf.mxu1 }
 0x127   : > { %1778 = vst [vmem:[%s2411_s14 + $0x2d8] sm:$0xff] %v1650_v41  ;;  %v1520_v45 = vmul.f32 0.1, %v1148_v37  ;;  %vm1333_vm8 = vcmp.ge.f32.partialorder %v913_v42, 0.0  ;;  %v1461_v48 = vmul.f32 0.1, %v913_v42  ;;  %v905_v52 = vadd.f32 %v2403_v8, %v904_v46 }
 0x128   : > { %vm1397_vm9 = vcmp.ge.f32.partialorder %v1169_v43, 0.0  ;;  %v1525_v49 = vmul.f32 0.1, %v1169_v43  ;;  %v1584_v50 = vsel %vm1328_vm6, %v892_v36, %v1456_v44  ;;  %v1161_v53 = vadd.f32 %v2403_v8, %v1160_v47  ;;  %v2074_v54 = vpop.f32.mrf.mxu0  ;;  %v2138_v55 = vpop.f32.mrf.mxu1 }
 0x129   : > { %v1648_v51 = vsel %vm1392_vm7, %v1148_v37, %v1520_v45  ;;  %1712 = vst [vmem:[%s2411_s14 + $0xc8] sm:$0xff] %v1584_v50  ;;  %v1589_v56 = vsel %vm1333_vm8, %v913_v42, %v1461_v48  ;;  %v916_v58 = vadd.f32 %v2074_v54, %v2403_v8  ;;  %v1172_v59 = vadd.f32 %v2138_v55, %v2403_v8 }
 0x12a   : > { %1776 = vst [vmem:[%s2411_s14 + $0x2c8] sm:$0xff] %v1648_v51  ;;  %v1653_v57 = vsel %vm1397_vm9, %v1169_v43, %v1525_v49  ;;  %1717 = vst [vmem:[%s2411_s14 + $0xf0] sm:$0xff] %v1589_v56  ;;  %vm1331_vm10 = vcmp.ge.f32.partialorder %v905_v52, 0.0  ;;  %v1459_v60 = vmul.f32 0.1, %v905_v52  ;;  %vm1395_vm11 = vcmp.ge.f32.partialorder %v1161_v53, 0.0  ;;  %v907_v62 = vpop.f32.mrf.mxu0  ;;  %v1163_v63 = vpop.f32.mrf.mxu1 }
 0x12b   : > { %1781 = vst [vmem:[%s2411_s14 + $0x2f0] sm:$0xff] %v1653_v57  ;;  %v1523_v61 = vmul.f32 0.1, %v1161_v53  ;;  %vm1334_vm12 = vcmp.ge.f32.partialorder %v916_v58, 0.0  ;;  %v1462_v0 = vmul.f32 0.1, %v916_v58  ;;  %v908_v4 = vadd.f32 %v2403_v8, %v907_v62 }
 0x12c   : > { %vm1398_vm13 = vcmp.ge.f32.partialorder %v1172_v59, 0.0  ;;  %v1526_v1 = vmul.f32 0.1, %v1172_v59  ;;  %v1587_v2 = vsel %vm1331_vm10, %v905_v52, %v1459_v60  ;;  %v1164_v5 = vadd.f32 %v2403_v8, %v1163_v63  ;;  %v2077_v6 = vpop.f32.mrf.mxu0  ;;  %v2141_v7 = vpop.f32.mrf.mxu1 }
 0x12d   : > { %v1651_v3 = vsel %vm1395_vm11, %v1161_v53, %v1523_v61  ;;  %1715 = vst [vmem:[%s2411_s14 + $0xe0] sm:$0xff] %v1587_v2  ;;  %v1590_v9 = vsel %vm1334_vm12, %v916_v58, %v1462_v0  ;;  %v929_v11 = vadd.f32 %v2077_v6, %v2403_v8  ;;  %v1185_v12 = vadd.f32 %v2141_v7, %v2403_v8 }
 0x12e   : > { %1779 = vst [vmem:[%s2411_s14 + $0x2e0] sm:$0xff] %v1651_v3  ;;  %v1654_v10 = vsel %vm1398_vm13, %v1172_v59, %v1526_v1  ;;  %1718 = vst [vmem:[%s2411_s14 + $0xf8] sm:$0xff] %v1590_v9  ;;  %vm1332_vm14 = vcmp.ge.f32.partialorder %v908_v4, 0.0  ;;  %v1460_v13 = vmul.f32 0.1, %v908_v4  ;;  %vm1396_vm15 = vcmp.ge.f32.partialorder %v1164_v5, 0.0  ;;  %v920_v15 = vpop.f32.mrf.mxu0  ;;  %v1176_v16 = vpop.f32.mrf.mxu1 }
 0x12f   : > { %1782 = vst [vmem:[%s2411_s14 + $0x2f8] sm:$0xff] %v1654_v10  ;;  %v1524_v14 = vmul.f32 0.1, %v1164_v5  ;;  %vm1337_vm0 = vcmp.ge.f32.partialorder %v929_v11, 0.0  ;;  %v1465_v17 = vmul.f32 0.1, %v929_v11  ;;  %v921_v21 = vadd.f32 %v2403_v8, %v920_v15 }
 0x130   : > { %vm1401_vm1 = vcmp.ge.f32.partialorder %v1185_v12, 0.0  ;;  %v1529_v18 = vmul.f32 0.1, %v1185_v12  ;;  %v1588_v19 = vsel %vm1332_vm14, %v908_v4, %v1460_v13  ;;  %v1177_v22 = vadd.f32 %v2403_v8, %v1176_v16  ;;  %v2078_v23 = vpop.f32.mrf.mxu0  ;;  %v2142_v24 = vpop.f32.mrf.mxu1 }
 0x131   : > { %v1652_v20 = vsel %vm1396_vm15, %v1164_v5, %v1524_v14  ;;  %1716 = vst [vmem:[%s2411_s14 + $0xe8] sm:$0xff] %v1588_v19  ;;  %v1593_v25 = vsel %vm1337_vm0, %v929_v11, %v1465_v17  ;;  %v932_v27 = vadd.f32 %v2078_v23, %v2403_v8  ;;  %v1188_v28 = vadd.f32 %v2142_v24, %v2403_v8 }
 0x132   : > { %1780 = vst [vmem:[%s2411_s14 + $0x2e8] sm:$0xff] %v1652_v20  ;;  %v1657_v26 = vsel %vm1401_vm1, %v1185_v12, %v1529_v18  ;;  %1721 = vst [vmem:[%s2411_s14 + $0x110] sm:$0xff] %v1593_v25  ;;  %vm1335_vm2 = vcmp.ge.f32.partialorder %v921_v21, 0.0  ;;  %v1463_v29 = vmul.f32 0.1, %v921_v21  ;;  %vm1399_vm3 = vcmp.ge.f32.partialorder %v1177_v22, 0.0  ;;  %v923_v31 = vpop.f32.mrf.mxu0  ;;  %v1179_v32 = vpop.f32.mrf.mxu1 }
 0x133   : > { %1785 = vst [vmem:[%s2411_s14 + $0x310] sm:$0xff] %v1657_v26  ;;  %v1527_v30 = vmul.f32 0.1, %v1177_v22  ;;  %vm1338_vm4 = vcmp.ge.f32.partialorder %v932_v27, 0.0  ;;  %v1466_v33 = vmul.f32 0.1, %v932_v27  ;;  %v924_v37 = vadd.f32 %v2403_v8, %v923_v31 }
 0x134   : > { %vm1402_vm5 = vcmp.ge.f32.partialorder %v1188_v28, 0.0  ;;  %v1530_v34 = vmul.f32 0.1, %v1188_v28  ;;  %v1591_v35 = vsel %vm1335_vm2, %v921_v21, %v1463_v29  ;;  %v1180_v38 = vadd.f32 %v2403_v8, %v1179_v32  ;;  %v2081_v39 = vpop.f32.mrf.mxu0  ;;  %v2145_v40 = vpop.f32.mrf.mxu1 }
 0x135   : > { %v1655_v36 = vsel %vm1399_vm3, %v1177_v22, %v1527_v30  ;;  %1719 = vst [vmem:[%s2411_s14 + $0x100] sm:$0xff] %v1591_v35  ;;  %v1594_v41 = vsel %vm1338_vm4, %v932_v27, %v1466_v33  ;;  %v945_v43 = vadd.f32 %v2081_v39, %v2403_v8  ;;  %v1201_v44 = vadd.f32 %v2145_v40, %v2403_v8 }
 0x136   : > { %1783 = vst [vmem:[%s2411_s14 + $0x300] sm:$0xff] %v1655_v36  ;;  %v1658_v42 = vsel %vm1402_vm5, %v1188_v28, %v1530_v34  ;;  %1722 = vst [vmem:[%s2411_s14 + $0x118] sm:$0xff] %v1594_v41  ;;  %vm1336_vm6 = vcmp.ge.f32.partialorder %v924_v37, 0.0  ;;  %v1464_v45 = vmul.f32 0.1, %v924_v37  ;;  %vm1400_vm7 = vcmp.ge.f32.partialorder %v1180_v38, 0.0  ;;  %v936_v47 = vpop.f32.mrf.mxu0  ;;  %v1192_v48 = vpop.f32.mrf.mxu1 }
 0x137   : > { %1786 = vst [vmem:[%s2411_s14 + $0x318] sm:$0xff] %v1658_v42  ;;  %v1528_v46 = vmul.f32 0.1, %v1180_v38  ;;  %vm1341_vm8 = vcmp.ge.f32.partialorder %v945_v43, 0.0  ;;  %v1469_v49 = vmul.f32 0.1, %v945_v43  ;;  %v937_v53 = vadd.f32 %v2403_v8, %v936_v47 }
 0x138   : > { %vm1405_vm9 = vcmp.ge.f32.partialorder %v1201_v44, 0.0  ;;  %v1533_v50 = vmul.f32 0.1, %v1201_v44  ;;  %v1592_v51 = vsel %vm1336_vm6, %v924_v37, %v1464_v45  ;;  %v1193_v54 = vadd.f32 %v2403_v8, %v1192_v48  ;;  %v2082_v55 = vpop.f32.mrf.mxu0  ;;  %v2146_v56 = vpop.f32.mrf.mxu1 }
 0x139   : > { %v1656_v52 = vsel %vm1400_vm7, %v1180_v38, %v1528_v46  ;;  %1720 = vst [vmem:[%s2411_s14 + $0x108] sm:$0xff] %v1592_v51  ;;  %v1597_v57 = vsel %vm1341_vm8, %v945_v43, %v1469_v49  ;;  %v948_v59 = vadd.f32 %v2082_v55, %v2403_v8  ;;  %v1204_v60 = vadd.f32 %v2146_v56, %v2403_v8 }
 0x13a   : > { %1784 = vst [vmem:[%s2411_s14 + $0x308] sm:$0xff] %v1656_v52  ;;  %v1661_v58 = vsel %vm1405_vm9, %v1201_v44, %v1533_v50  ;;  %1725 = vst [vmem:[%s2411_s14 + $0x130] sm:$0xff] %v1597_v57  ;;  %vm1339_vm10 = vcmp.ge.f32.partialorder %v937_v53, 0.0  ;;  %v1467_v61 = vmul.f32 0.1, %v937_v53  ;;  %vm1403_vm11 = vcmp.ge.f32.partialorder %v1193_v54, 0.0  ;;  %v939_v63 = vpop.f32.mrf.mxu0  ;;  %v1195_v0 = vpop.f32.mrf.mxu1 }
 0x13b   : > { %1789 = vst [vmem:[%s2411_s14 + $0x330] sm:$0xff] %v1661_v58  ;;  %v1531_v62 = vmul.f32 0.1, %v1193_v54  ;;  %vm1342_vm12 = vcmp.ge.f32.partialorder %v948_v59, 0.0  ;;  %v1470_v1 = vmul.f32 0.1, %v948_v59  ;;  %v940_v5 = vadd.f32 %v2403_v8, %v939_v63 }
 0x13c   : > { %vm1406_vm13 = vcmp.ge.f32.partialorder %v1204_v60, 0.0  ;;  %v1534_v2 = vmul.f32 0.1, %v1204_v60  ;;  %v1595_v3 = vsel %vm1339_vm10, %v937_v53, %v1467_v61  ;;  %v1196_v6 = vadd.f32 %v2403_v8, %v1195_v0  ;;  %v2085_v7 = vpop.f32.mrf.mxu0  ;;  %v2149_v9 = vpop.f32.mrf.mxu1 }
 0x13d   : > { %v1659_v4 = vsel %vm1403_vm11, %v1193_v54, %v1531_v62  ;;  %1723 = vst [vmem:[%s2411_s14 + $0x120] sm:$0xff] %v1595_v3  ;;  %v1598_v10 = vsel %vm1342_vm12, %v948_v59, %v1470_v1  ;;  %v961_v12 = vadd.f32 %v2085_v7, %v2403_v8  ;;  %v1217_v13 = vadd.f32 %v2149_v9, %v2403_v8 }
 0x13e   : > { %1787 = vst [vmem:[%s2411_s14 + $0x320] sm:$0xff] %v1659_v4  ;;  %v1662_v11 = vsel %vm1406_vm13, %v1204_v60, %v1534_v2  ;;  %1726 = vst [vmem:[%s2411_s14 + $0x138] sm:$0xff] %v1598_v10  ;;  %vm1340_vm14 = vcmp.ge.f32.partialorder %v940_v5, 0.0  ;;  %v1468_v14 = vmul.f32 0.1, %v940_v5  ;;  %vm1404_vm15 = vcmp.ge.f32.partialorder %v1196_v6, 0.0  ;;  %v952_v16 = vpop.f32.mrf.mxu0  ;;  %v1208_v17 = vpop.f32.mrf.mxu1 }
 0x13f   : > { %1790 = vst [vmem:[%s2411_s14 + $0x338] sm:$0xff] %v1662_v11  ;;  %v1532_v15 = vmul.f32 0.1, %v1196_v6  ;;  %vm1345_vm0 = vcmp.ge.f32.partialorder %v961_v12, 0.0  ;;  %v1473_v18 = vmul.f32 0.1, %v961_v12  ;;  %v953_v22 = vadd.f32 %v2403_v8, %v952_v16 }
 0x140   : > { %vm1409_vm1 = vcmp.ge.f32.partialorder %v1217_v13, 0.0  ;;  %v1537_v19 = vmul.f32 0.1, %v1217_v13  ;;  %v1596_v20 = vsel %vm1340_vm14, %v940_v5, %v1468_v14  ;;  %v1209_v23 = vadd.f32 %v2403_v8, %v1208_v17  ;;  %v2086_v24 = vpop.f32.mrf.mxu0  ;;  %v2150_v25 = vpop.f32.mrf.mxu1 }
 0x141   : > { %v1660_v21 = vsel %vm1404_vm15, %v1196_v6, %v1532_v15  ;;  %1724 = vst [vmem:[%s2411_s14 + $0x128] sm:$0xff] %v1596_v20  ;;  %v1601_v26 = vsel %vm1345_vm0, %v961_v12, %v1473_v18  ;;  %v964_v28 = vadd.f32 %v2086_v24, %v2403_v8  ;;  %v1220_v29 = vadd.f32 %v2150_v25, %v2403_v8  ;;  %v2582_v8 = vld [vmem:[%s2677_s2] ss:$0 sm:$0xff] }
 0x142   : > { %1788 = vst [vmem:[%s2411_s14 + $0x328] sm:$0xff] %v1660_v21  ;;  %v1665_v27 = vsel %vm1409_vm1, %v1217_v13, %v1537_v19  ;;  %1729 = vst [vmem:[%s2411_s14 + $0x150] sm:$0xff] %v1601_v26  ;;  %vm1343_vm2 = vcmp.ge.f32.partialorder %v953_v22, 0.0  ;;  %v1471_v30 = vmul.f32 0.1, %v953_v22  ;;  %vm1407_vm3 = vcmp.ge.f32.partialorder %v1209_v23, 0.0  ;;  %v955_v32 = vpop.f32.mrf.mxu0  ;;  %v1211_v33 = vpop.f32.mrf.mxu1 }
 0x143   : > { %1793 = vst [vmem:[%s2411_s14 + $0x350] sm:$0xff] %v1665_v27  ;;  %v1535_v31 = vmul.f32 0.1, %v1209_v23  ;;  %vm1346_vm4 = vcmp.ge.f32.partialorder %v964_v28, 0.0  ;;  %v1474_v34 = vmul.f32 0.1, %v964_v28  ;;  %v956_v38 = vadd.f32 %v2582_v8, %v955_v32 }
 0x144   : > { %vm1410_vm5 = vcmp.ge.f32.partialorder %v1220_v29, 0.0  ;;  %v1538_v35 = vmul.f32 0.1, %v1220_v29  ;;  %v1599_v36 = vsel %vm1343_vm2, %v953_v22, %v1471_v30  ;;  %v1212_v39 = vadd.f32 %v2582_v8, %v1211_v33  ;;  %v2089_v40 = vpop.f32.mrf.mxu0  ;;  %v2153_v41 = vpop.f32.mrf.mxu1 }
 0x145   : > { %v1663_v37 = vsel %vm1407_vm3, %v1209_v23, %v1535_v31  ;;  %1727 = vst [vmem:[%s2411_s14 + $0x140] sm:$0xff] %v1599_v36  ;;  %v1602_v42 = vsel %vm1346_vm4, %v964_v28, %v1474_v34  ;;  %v977_v44 = vadd.f32 %v2582_v8, %v2089_v40  ;;  %v1233_v45 = vadd.f32 %v2582_v8, %v2153_v41 }
 0x146   : > { %1791 = vst [vmem:[%s2411_s14 + $0x340] sm:$0xff] %v1663_v37  ;;  %v1666_v43 = vsel %vm1410_vm5, %v1220_v29, %v1538_v35  ;;  %1730 = vst [vmem:[%s2411_s14 + $0x158] sm:$0xff] %v1602_v42  ;;  %vm1344_vm6 = vcmp.ge.f32.partialorder %v956_v38, 0.0  ;;  %v1472_v46 = vmul.f32 0.1, %v956_v38  ;;  %vm1408_vm7 = vcmp.ge.f32.partialorder %v1212_v39, 0.0  ;;  %v968_v48 = vpop.f32.mrf.mxu0  ;;  %v1224_v49 = vpop.f32.mrf.mxu1 }
 0x147   : > { %1794 = vst [vmem:[%s2411_s14 + $0x358] sm:$0xff] %v1666_v43  ;;  %v1536_v47 = vmul.f32 0.1, %v1212_v39  ;;  %vm1349_vm8 = vcmp.ge.f32.partialorder %v977_v44, 0.0  ;;  %v1477_v50 = vmul.f32 0.1, %v977_v44  ;;  %v969_v54 = vadd.f32 %v2582_v8, %v968_v48 }
 0x148   : > { %vm1413_vm9 = vcmp.ge.f32.partialorder %v1233_v45, 0.0  ;;  %v1541_v51 = vmul.f32 0.1, %v1233_v45  ;;  %v1600_v52 = vsel %vm1344_vm6, %v956_v38, %v1472_v46  ;;  %v1225_v55 = vadd.f32 %v2582_v8, %v1224_v49  ;;  %v2090_v56 = vpop.f32.mrf.mxu0  ;;  %v2154_v57 = vpop.f32.mrf.mxu1 }
 0x149   : > { %v1664_v53 = vsel %vm1408_vm7, %v1212_v39, %v1536_v47  ;;  %1728 = vst [vmem:[%s2411_s14 + $0x148] sm:$0xff] %v1600_v52  ;;  %v1605_v58 = vsel %vm1349_vm8, %v977_v44, %v1477_v50  ;;  %v980_v60 = vadd.f32 %v2582_v8, %v2090_v56  ;;  %v1236_v61 = vadd.f32 %v2582_v8, %v2154_v57 }
 0x14a   : > { %1792 = vst [vmem:[%s2411_s14 + $0x348] sm:$0xff] %v1664_v53  ;;  %v1669_v59 = vsel %vm1413_vm9, %v1233_v45, %v1541_v51  ;;  %1733 = vst [vmem:[%s2411_s14 + $0x170] sm:$0xff] %v1605_v58  ;;  %vm1347_vm10 = vcmp.ge.f32.partialorder %v969_v54, 0.0  ;;  %v1475_v62 = vmul.f32 0.1, %v969_v54  ;;  %vm1411_vm11 = vcmp.ge.f32.partialorder %v1225_v55, 0.0  ;;  %v971_v0 = vpop.f32.mrf.mxu0  ;;  %v1227_v1 = vpop.f32.mrf.mxu1 }
 0x14b   : > { %1797 = vst [vmem:[%s2411_s14 + $0x370] sm:$0xff] %v1669_v59  ;;  %v1539_v63 = vmul.f32 0.1, %v1225_v55  ;;  %vm1350_vm12 = vcmp.ge.f32.partialorder %v980_v60, 0.0  ;;  %v1478_v2 = vmul.f32 0.1, %v980_v60  ;;  %v972_v6 = vadd.f32 %v2582_v8, %v971_v0 }
 0x14c   : > { %vm1414_vm13 = vcmp.ge.f32.partialorder %v1236_v61, 0.0  ;;  %v1542_v3 = vmul.f32 0.1, %v1236_v61  ;;  %v1603_v4 = vsel %vm1347_vm10, %v969_v54, %v1475_v62  ;;  %v1228_v7 = vadd.f32 %v2582_v8, %v1227_v1  ;;  %v2093_v9 = vpop.f32.mrf.mxu0  ;;  %v2157_v10 = vpop.f32.mrf.mxu1 }
 0x14d   : > { %v1667_v5 = vsel %vm1411_vm11, %v1225_v55, %v1539_v63  ;;  %1731 = vst [vmem:[%s2411_s14 + $0x160] sm:$0xff] %v1603_v4  ;;  %v1606_v11 = vsel %vm1350_vm12, %v980_v60, %v1478_v2  ;;  %v993_v13 = vadd.f32 %v2582_v8, %v2093_v9  ;;  %v1249_v14 = vadd.f32 %v2582_v8, %v2157_v10 }
 0x14e   : > { %1795 = vst [vmem:[%s2411_s14 + $0x360] sm:$0xff] %v1667_v5  ;;  %v1670_v12 = vsel %vm1414_vm13, %v1236_v61, %v1542_v3  ;;  %1734 = vst [vmem:[%s2411_s14 + $0x178] sm:$0xff] %v1606_v11  ;;  %vm1348_vm14 = vcmp.ge.f32.partialorder %v972_v6, 0.0  ;;  %v1476_v15 = vmul.f32 0.1, %v972_v6  ;;  %vm1412_vm15 = vcmp.ge.f32.partialorder %v1228_v7, 0.0  ;;  %v984_v17 = vpop.f32.mrf.mxu0  ;;  %v1240_v18 = vpop.f32.mrf.mxu1 }
 0x14f   : > { %1798 = vst [vmem:[%s2411_s14 + $0x378] sm:$0xff] %v1670_v12  ;;  %v1540_v16 = vmul.f32 0.1, %v1228_v7  ;;  %vm1353_vm0 = vcmp.ge.f32.partialorder %v993_v13, 0.0  ;;  %v1481_v19 = vmul.f32 0.1, %v993_v13  ;;  %v985_v23 = vadd.f32 %v2582_v8, %v984_v17 }
 0x150   : > { %vm1417_vm1 = vcmp.ge.f32.partialorder %v1249_v14, 0.0  ;;  %v1545_v20 = vmul.f32 0.1, %v1249_v14  ;;  %v1604_v21 = vsel %vm1348_vm14, %v972_v6, %v1476_v15  ;;  %v1241_v24 = vadd.f32 %v2582_v8, %v1240_v18  ;;  %v2094_v25 = vpop.f32.mrf.mxu0  ;;  %v2158_v26 = vpop.f32.mrf.mxu1 }
 0x151   : > { %v1668_v22 = vsel %vm1412_vm15, %v1228_v7, %v1540_v16  ;;  %1732 = vst [vmem:[%s2411_s14 + $0x168] sm:$0xff] %v1604_v21  ;;  %v1609_v27 = vsel %vm1353_vm0, %v993_v13, %v1481_v19  ;;  %v996_v29 = vadd.f32 %v2582_v8, %v2094_v25  ;;  %v1252_v30 = vadd.f32 %v2582_v8, %v2158_v26 }
 0x152   : > { %1796 = vst [vmem:[%s2411_s14 + $0x368] sm:$0xff] %v1668_v22  ;;  %v1673_v28 = vsel %vm1417_vm1, %v1249_v14, %v1545_v20  ;;  %1737 = vst [vmem:[%s2411_s14 + $0x190] sm:$0xff] %v1609_v27  ;;  %vm1351_vm2 = vcmp.ge.f32.partialorder %v985_v23, 0.0  ;;  %v1479_v31 = vmul.f32 0.1, %v985_v23  ;;  %vm1415_vm3 = vcmp.ge.f32.partialorder %v1241_v24, 0.0  ;;  %v987_v33 = vpop.f32.mrf.mxu0  ;;  %v1243_v34 = vpop.f32.mrf.mxu1 }
 0x153   : > { %1801 = vst [vmem:[%s2411_s14 + $0x390] sm:$0xff] %v1673_v28  ;;  %v1543_v32 = vmul.f32 0.1, %v1241_v24  ;;  %vm1354_vm4 = vcmp.ge.f32.partialorder %v996_v29, 0.0  ;;  %v1482_v35 = vmul.f32 0.1, %v996_v29  ;;  %v988_v39 = vadd.f32 %v2582_v8, %v987_v33 }
 0x154   : > { %vm1418_vm5 = vcmp.ge.f32.partialorder %v1252_v30, 0.0  ;;  %v1546_v36 = vmul.f32 0.1, %v1252_v30  ;;  %v1607_v37 = vsel %vm1351_vm2, %v985_v23, %v1479_v31  ;;  %v1244_v40 = vadd.f32 %v2582_v8, %v1243_v34  ;;  %v2097_v41 = vpop.f32.mrf.mxu0  ;;  %v2161_v42 = vpop.f32.mrf.mxu1 }
 0x155   : > { %v1671_v38 = vsel %vm1415_vm3, %v1241_v24, %v1543_v32  ;;  %1735 = vst [vmem:[%s2411_s14 + $0x180] sm:$0xff] %v1607_v37  ;;  %v1610_v43 = vsel %vm1354_vm4, %v996_v29, %v1482_v35  ;;  %v1009_v45 = vadd.f32 %v2582_v8, %v2097_v41  ;;  %v1265_v46 = vadd.f32 %v2582_v8, %v2161_v42 }
 0x156   : > { %1799 = vst [vmem:[%s2411_s14 + $0x380] sm:$0xff] %v1671_v38  ;;  %v1674_v44 = vsel %vm1418_vm5, %v1252_v30, %v1546_v36  ;;  %1738 = vst [vmem:[%s2411_s14 + $0x198] sm:$0xff] %v1610_v43  ;;  %vm1352_vm6 = vcmp.ge.f32.partialorder %v988_v39, 0.0  ;;  %v1480_v47 = vmul.f32 0.1, %v988_v39  ;;  %vm1416_vm7 = vcmp.ge.f32.partialorder %v1244_v40, 0.0  ;;  %v1000_v49 = vpop.f32.mrf.mxu0  ;;  %v1256_v50 = vpop.f32.mrf.mxu1 }
 0x157   : > { %1802 = vst [vmem:[%s2411_s14 + $0x398] sm:$0xff] %v1674_v44  ;;  %v1544_v48 = vmul.f32 0.1, %v1244_v40  ;;  %vm1357_vm8 = vcmp.ge.f32.partialorder %v1009_v45, 0.0  ;;  %v1485_v51 = vmul.f32 0.1, %v1009_v45  ;;  %v1001_v55 = vadd.f32 %v2582_v8, %v1000_v49 }
 0x158   : > { %vm1421_vm9 = vcmp.ge.f32.partialorder %v1265_v46, 0.0  ;;  %v1549_v52 = vmul.f32 0.1, %v1265_v46  ;;  %v1608_v53 = vsel %vm1352_vm6, %v988_v39, %v1480_v47  ;;  %v1257_v56 = vadd.f32 %v2582_v8, %v1256_v50  ;;  %v2098_v57 = vpop.f32.mrf.mxu0  ;;  %v2162_v58 = vpop.f32.mrf.mxu1 }
 0x159   : > { %v1672_v54 = vsel %vm1416_vm7, %v1244_v40, %v1544_v48  ;;  %1736 = vst [vmem:[%s2411_s14 + $0x188] sm:$0xff] %v1608_v53  ;;  %v1613_v59 = vsel %vm1357_vm8, %v1009_v45, %v1485_v51  ;;  %v1012_v61 = vadd.f32 %v2582_v8, %v2098_v57  ;;  %v1268_v62 = vadd.f32 %v2582_v8, %v2162_v58 }
 0x15a   : > { %1800 = vst [vmem:[%s2411_s14 + $0x388] sm:$0xff] %v1672_v54  ;;  %v1677_v60 = vsel %vm1421_vm9, %v1265_v46, %v1549_v52  ;;  %1741 = vst [vmem:[%s2411_s14 + $0x1b0] sm:$0xff] %v1613_v59  ;;  %vm1355_vm10 = vcmp.ge.f32.partialorder %v1001_v55, 0.0  ;;  %v1483_v63 = vmul.f32 0.1, %v1001_v55  ;;  %vm1419_vm11 = vcmp.ge.f32.partialorder %v1257_v56, 0.0  ;;  %v1003_v1 = vpop.f32.mrf.mxu0  ;;  %v1259_v2 = vpop.f32.mrf.mxu1 }
 0x15b   : > { %1805 = vst [vmem:[%s2411_s14 + $0x3b0] sm:$0xff] %v1677_v60  ;;  %v1547_v0 = vmul.f32 0.1, %v1257_v56  ;;  %vm1358_vm12 = vcmp.ge.f32.partialorder %v1012_v61, 0.0  ;;  %v1486_v3 = vmul.f32 0.1, %v1012_v61  ;;  %v1004_v7 = vadd.f32 %v2582_v8, %v1003_v1 }
 0x15c   : > { %vm1422_vm13 = vcmp.ge.f32.partialorder %v1268_v62, 0.0  ;;  %v1550_v4 = vmul.f32 0.1, %v1268_v62  ;;  %v1611_v5 = vsel %vm1355_vm10, %v1001_v55, %v1483_v63  ;;  %v1260_v9 = vadd.f32 %v2582_v8, %v1259_v2  ;;  %v2101_v10 = vpop.f32.mrf.mxu0  ;;  %v2165_v11 = vpop.f32.mrf.mxu1 }
 0x15d   : > { %v1675_v6 = vsel %vm1419_vm11, %v1257_v56, %v1547_v0  ;;  %1739 = vst [vmem:[%s2411_s14 + $0x1a0] sm:$0xff] %v1611_v5  ;;  %v1614_v12 = vsel %vm1358_vm12, %v1012_v61, %v1486_v3  ;;  %v1025_v14 = vadd.f32 %v2582_v8, %v2101_v10  ;;  %v1281_v15 = vadd.f32 %v2582_v8, %v2165_v11 }
 0x15e   : > { %1803 = vst [vmem:[%s2411_s14 + $0x3a0] sm:$0xff] %v1675_v6  ;;  %v1678_v13 = vsel %vm1422_vm13, %v1268_v62, %v1550_v4  ;;  %1742 = vst [vmem:[%s2411_s14 + $0x1b8] sm:$0xff] %v1614_v12  ;;  %vm1356_vm14 = vcmp.ge.f32.partialorder %v1004_v7, 0.0  ;;  %v1484_v16 = vmul.f32 0.1, %v1004_v7  ;;  %vm1420_vm15 = vcmp.ge.f32.partialorder %v1260_v9, 0.0  ;;  %v1016_v18 = vpop.f32.mrf.mxu0  ;;  %v1272_v19 = vpop.f32.mrf.mxu1 }
 0x15f   : > { %1806 = vst [vmem:[%s2411_s14 + $0x3b8] sm:$0xff] %v1678_v13  ;;  %v1548_v17 = vmul.f32 0.1, %v1260_v9  ;;  %vm1361_vm0 = vcmp.ge.f32.partialorder %v1025_v14, 0.0  ;;  %v1489_v20 = vmul.f32 0.1, %v1025_v14  ;;  %v1017_v24 = vadd.f32 %v2582_v8, %v1016_v18 }
 0x160   : > { %vm1425_vm1 = vcmp.ge.f32.partialorder %v1281_v15, 0.0  ;;  %v1553_v21 = vmul.f32 0.1, %v1281_v15  ;;  %v1612_v22 = vsel %vm1356_vm14, %v1004_v7, %v1484_v16  ;;  %v1273_v25 = vadd.f32 %v2582_v8, %v1272_v19  ;;  %v2102_v26 = vpop.f32.mrf.mxu0  ;;  %v2166_v27 = vpop.f32.mrf.mxu1 }
 0x161   : > { %v1676_v23 = vsel %vm1420_vm15, %v1260_v9, %v1548_v17  ;;  %1740 = vst [vmem:[%s2411_s14 + $0x1a8] sm:$0xff] %v1612_v22  ;;  %v1617_v28 = vsel %vm1361_vm0, %v1025_v14, %v1489_v20  ;;  %v1028_v30 = vadd.f32 %v2582_v8, %v2102_v26  ;;  %v1284_v31 = vadd.f32 %v2582_v8, %v2166_v27 }
 0x162   : > { %1804 = vst [vmem:[%s2411_s14 + $0x3a8] sm:$0xff] %v1676_v23  ;;  %v1681_v29 = vsel %vm1425_vm1, %v1281_v15, %v1553_v21  ;;  %1745 = vst [vmem:[%s2411_s14 + $0x1d0] sm:$0xff] %v1617_v28  ;;  %vm1359_vm2 = vcmp.ge.f32.partialorder %v1017_v24, 0.0  ;;  %v1487_v32 = vmul.f32 0.1, %v1017_v24  ;;  %vm1423_vm3 = vcmp.ge.f32.partialorder %v1273_v25, 0.0  ;;  %v1019_v34 = vpop.f32.mrf.mxu0  ;;  %v1275_v35 = vpop.f32.mrf.mxu1 }
 0x163   : > { %1809 = vst [vmem:[%s2411_s14 + $0x3d0] sm:$0xff] %v1681_v29  ;;  %v1551_v33 = vmul.f32 0.1, %v1273_v25  ;;  %vm1362_vm4 = vcmp.ge.f32.partialorder %v1028_v30, 0.0  ;;  %v1490_v36 = vmul.f32 0.1, %v1028_v30  ;;  %v1020_v40 = vadd.f32 %v2582_v8, %v1019_v34 }
 0x164   : > { %vm1426_vm5 = vcmp.ge.f32.partialorder %v1284_v31, 0.0  ;;  %v1554_v37 = vmul.f32 0.1, %v1284_v31  ;;  %v1615_v38 = vsel %vm1359_vm2, %v1017_v24, %v1487_v32  ;;  %v1276_v41 = vadd.f32 %v2582_v8, %v1275_v35  ;;  %v2105_v42 = vpop.f32.mrf.mxu0  ;;  %v2169_v43 = vpop.f32.mrf.mxu1 }
 0x165   : > { %v1679_v39 = vsel %vm1423_vm3, %v1273_v25, %v1551_v33  ;;  %1743 = vst [vmem:[%s2411_s14 + $0x1c0] sm:$0xff] %v1615_v38  ;;  %v1618_v44 = vsel %vm1362_vm4, %v1028_v30, %v1490_v36  ;;  %v1041_v46 = vadd.f32 %v2582_v8, %v2105_v42  ;;  %v1297_v47 = vadd.f32 %v2582_v8, %v2169_v43 }
 0x166   : > { %1807 = vst [vmem:[%s2411_s14 + $0x3c0] sm:$0xff] %v1679_v39  ;;  %v1682_v45 = vsel %vm1426_vm5, %v1284_v31, %v1554_v37  ;;  %1746 = vst [vmem:[%s2411_s14 + $0x1d8] sm:$0xff] %v1618_v44  ;;  %vm1360_vm6 = vcmp.ge.f32.partialorder %v1020_v40, 0.0  ;;  %v1488_v48 = vmul.f32 0.1, %v1020_v40  ;;  %vm1424_vm7 = vcmp.ge.f32.partialorder %v1276_v41, 0.0  ;;  %v1032_v50 = vpop.f32.mrf.mxu0  ;;  %v1288_v51 = vpop.f32.mrf.mxu1 }
 0x167   : > { %1810 = vst [vmem:[%s2411_s14 + $0x3d8] sm:$0xff] %v1682_v45  ;;  %v1552_v49 = vmul.f32 0.1, %v1276_v41  ;;  %vm1365_vm8 = vcmp.ge.f32.partialorder %v1041_v46, 0.0  ;;  %v1493_v52 = vmul.f32 0.1, %v1041_v46  ;;  %v1033_v56 = vadd.f32 %v2582_v8, %v1032_v50 }
 0x168   : > { %vm1429_vm9 = vcmp.ge.f32.partialorder %v1297_v47, 0.0  ;;  %v1557_v53 = vmul.f32 0.1, %v1297_v47  ;;  %v1616_v54 = vsel %vm1360_vm6, %v1020_v40, %v1488_v48  ;;  %v1289_v57 = vadd.f32 %v2582_v8, %v1288_v51  ;;  %v2106_v58 = vpop.f32.mrf.mxu0  ;;  %v2170_v59 = vpop.f32.mrf.mxu1 }
 0x169   : > { %v1680_v55 = vsel %vm1424_vm7, %v1276_v41, %v1552_v49  ;;  %1744 = vst [vmem:[%s2411_s14 + $0x1c8] sm:$0xff] %v1616_v54  ;;  %v1621_v60 = vsel %vm1365_vm8, %v1041_v46, %v1493_v52  ;;  %v1044_v62 = vadd.f32 %v2582_v8, %v2106_v58  ;;  %v1300_v63 = vadd.f32 %v2582_v8, %v2170_v59 }
 0x16a   : > { %1808 = vst [vmem:[%s2411_s14 + $0x3c8] sm:$0xff] %v1680_v55  ;;  %v1685_v61 = vsel %vm1429_vm9, %v1297_v47, %v1557_v53  ;;  %1749 = vst [vmem:[%s2411_s14 + $0x1f0] sm:$0xff] %v1621_v60  ;;  %vm1363_vm10 = vcmp.ge.f32.partialorder %v1033_v56, 0.0  ;;  %v1491_v0 = vmul.f32 0.1, %v1033_v56  ;;  %vm1427_vm11 = vcmp.ge.f32.partialorder %v1289_v57, 0.0  ;;  %v1035_v2 = vpop.f32.mrf.mxu0  ;;  %v1291_v3 = vpop.f32.mrf.mxu1 }
 0x16b   : > { %1813 = vst [vmem:[%s2411_s14 + $0x3f0] sm:$0xff] %v1685_v61  ;;  %v1555_v1 = vmul.f32 0.1, %v1289_v57  ;;  %vm1366_vm12 = vcmp.ge.f32.partialorder %v1044_v62, 0.0  ;;  %v1494_v4 = vmul.f32 0.1, %v1044_v62  ;;  %v1036_v9 = vadd.f32 %v2582_v8, %v1035_v2 }
 0x16c   : > { %vm1430_vm13 = vcmp.ge.f32.partialorder %v1300_v63, 0.0  ;;  %v1558_v5 = vmul.f32 0.1, %v1300_v63  ;;  %v1619_v6 = vsel %vm1363_vm10, %v1033_v56, %v1491_v0  ;;  %v1292_v10 = vadd.f32 %v2582_v8, %v1291_v3 }
 0x16d   : > { %v1683_v7 = vsel %vm1427_vm11, %v1289_v57, %v1555_v1  ;;  %1747 = vst [vmem:[%s2411_s14 + $0x1e0] sm:$0xff] %v1619_v6  ;;  %v1622_v11 = vsel %vm1366_vm12, %v1044_v62, %v1494_v4  ;;  %vm1364_vm14 = vcmp.ge.f32.partialorder %v1036_v9, 0.0  ;;  %v1492_v13 = vmul.f32 0.1, %v1036_v9 }
 0x16e   : > { %1811 = vst [vmem:[%s2411_s14 + $0x3e0] sm:$0xff] %v1683_v7  ;;  %v1686_v12 = vsel %vm1430_vm13, %v1300_v63, %v1558_v5  ;;  %1750 = vst [vmem:[%s2411_s14 + $0x1f8] sm:$0xff] %v1622_v11  ;;  %vm1428_vm15 = vcmp.ge.f32.partialorder %v1292_v10, 0.0  ;;  %v1556_v14 = vmul.f32 0.1, %v1292_v10 }
 0x16f   : > { %1814 = vst [vmem:[%s2411_s14 + $0x3f8] sm:$0xff] %v1686_v12  ;;  %v1620_v15 = vsel %vm1364_vm14, %v1036_v9, %v1492_v13 }
 0x170   : > { %v1684_v16 = vsel %vm1428_vm15, %v1292_v10, %v1556_v14  ;;  %1748 = vst [vmem:[%s2411_s14 + $0x1e8] sm:$0xff] %v1620_v15 }
 0x171   : > { %1812 = vst [vmem:[%s2411_s14 + $0x3e8] sm:$0xff] %v1684_v16 }
 0x172 PF: > { %s13_s12 = sadd.s32 1, %s2274_s12  }
 0x173   : > { %p10_p4 = scmp.ge.s32.totalorder %s13_s12, 6  }
 0x175   :  { %12 = sbr.rel (!%p10_p4) target bundleno = 1 (0x1), region = 62 }

// kernel: forward_pallas.12
= control target key start
LH: loop header
LB: loop body
LE: loop exit
PB: predicated region body
PF: predicated region fallthrough
CT: control target
= control target key end

     0   :  { %s1574_s12 = smov 0   ;;  %s1879_s0 = inlined_call_operand.vmem [shape: bf16[1024,256], index: 0, kind: input, shape index: {}]   ;;  %s1880_s1 = inlined_call_operand.vmem [shape: bf16[256,128], index: 1, kind: input, shape index: {}]   ;;  %s1881_s2 = inlined_call_operand.vmem [shape: f32[1,128], index: 2, kind: input, shape index: {}]   ;;  %s1882_s3 = inlined_call_operand.vmem [shape: f32[1024,128], index: 3, kind: output, shape index: {}]  }
   0x1 LB: > { %s1298_s13 = sadd.s32 4294967295, %s1551_s12   ;;  %p1302_p0 = scmp.ge.s32.totalorder %s1551_s12, 1  ;;  %s1551_s12 = sphi %s1574_s12, %s13_s12  }
   0x2   : > { %p139_p1 = scmp.lt.s32.totalorder %s1551_s12, 3 }
   0x4   : > { %p140_p2 = pnand %p1302_p0, %p139_p1 }
   0x5   : > { %s1303_s16 = sshll.u32 (!%p140_p2), %s1298_s13, 6 }
   0x6   : > { %143 = sbr.rel (%p140_p2) target bundleno = 399 (0x18f), region = 32  ;;  %p165_p3 = scmp.lt.s32.totalorder (!%p140_p2), %s1303_s16, 127 }
   0xb   : > { %v1433_v0 = vld [vmem:[%s1880_s1 + $0x38] sm:$0xff]   ;;  %v1553_v1 = vmov 0   ;;  %v1434_v2 = vld [vmem:[%s1880_s1 + $0x30] sm:$0xff]   ;;  %v1435_v3 = vld [vmem:[%s1880_s1 + $0x28] sm:$0xff]   ;;  %s1884_s16 = smov (!%p165_p3, %s1303_s16), 127 }
   0xc   : > { %697 = vmatprep.subr.bf16.mxu0 %v1553_v1  ;;  %1392 = vmatprep.subr.bf16.mxu1 %v1553_v1  ;;  %v1436_v4 = vld [vmem:[%s1880_s1 + $0x20] sm:$0xff]   ;;  %s1391_s23 = sshll.u32 %s1884_s16, 3  ;;  %v1437_v5 = vld [vmem:[%s1880_s1 + $0x18] sm:$0xff]   ;;  %v1438_v7 = vld [vmem:[%s1880_s1 + $0x10] sm:$0xff]  }
   0xd   : > { %698 = vmatpush1.bf16.msra.mxu0 %v1433_v0  ;;  %1408 = vmatpush1.bf16.msra.mxu1 %v1433_v0  ;;  %s1613_s28 = scalar_lea.vmem %s1879_s0, %s1391_s23  ;;  %v1439_v9 = vld [vmem:[%s1880_s1 + $0x8] sm:$0xff]   ;;  %v1440_v10 = vld [vmem:[%s1880_s1] sm:$0xff]   ;;  %v1441_v11 = vld [vmem:[%s1880_s1 + $0x78] sm:$0xff]  }
   0xe   : > { %699 = vmatprep.subr.bf16.mxu0 %v1553_v1  ;;  %1393 = vmatprep.subr.bf16.mxu1 %v1553_v1  ;;  %v1451_v6 = vld [vmem:[%s1613_s28 + $0x4] ss:$8 sps:$4 sm:$0xff]   ;;  %v1442_v12 = vld [vmem:[%s1880_s1 + $0x70] sm:$0xff]   ;;  %v1445_v15 = vld [vmem:[%s1880_s1 + $0x58] sm:$0xff]  }
   0xf   : > { %v1454_v8 = vld [vmem:[%s1613_s28 + $0x104] ss:$8 sps:$4 sm:$0xff]   ;;  %729 = vmatprep.mubr.bf16.mxu0 %v1451_v6  ;;  %v1446_v16 = vld [vmem:[%s1880_s1 + $0x50] sm:$0xff]   ;;  %v1449_v19 = vld [vmem:[%s1613_s28] ss:$8 sps:$4 sm:$0xff]  }
  0x10   : > { %857 = vmatprep.mubr.bf16.mxu1 %v1454_v8  ;;  %v1443_v13 = vld [vmem:[%s1880_s1 + $0x68] sm:$0xff]   ;;  %v1444_v14 = vld [vmem:[%s1880_s1 + $0x60] sm:$0xff]   ;;  %v1455_v21 = vld [vmem:[%s1613_s28 + $0x14] ss:$8 sps:$4 sm:$0xff]  }
  0x11   : > { %700 = vmatpush1.bf16.msra.mxu0 %v1434_v2  ;;  %1409 = vmatpush1.bf16.msra.mxu1 %v1434_v2  ;;  %v1447_v17 = vld [vmem:[%s1880_s1 + $0x48] sm:$0xff]   ;;  %v1448_v18 = vld [vmem:[%s1880_s1 + $0x40] sm:$0xff]   ;;  %v1457_v22 = vld [vmem:[%s1613_s28 + $0x114] ss:$8 sps:$4 sm:$0xff]  }
  0x12   : > { %701 = vmatprep.subr.bf16.mxu0 %v1553_v1  ;;  %1394 = vmatprep.subr.bf16.mxu1 %v1553_v1  ;;  %v1452_v20 = vld [vmem:[%s1613_s28 + $0x100] ss:$8 sps:$4 sm:$0xff]   ;;  %v1459_v23 = vld [vmem:[%s1613_s28 + $0x10] ss:$8 sps:$4 sm:$0xff]   ;;  %v1461_v25 = vld [vmem:[%s1613_s28 + $0x24] ss:$8 sps:$4 sm:$0xff]  }
  0x13   : > { %v1460_v24 = vld [vmem:[%s1613_s28 + $0x110] ss:$8 sps:$4 sm:$0xff]   ;;  %v1463_v26 = vld [vmem:[%s1613_s28 + $0x124] ss:$8 sps:$4 sm:$0xff]   ;;  %v1465_v27 = vld [vmem:[%s1613_s28 + $0x20] ss:$8 sps:$4 sm:$0xff]  }
  0x14   : > { %v1466_v28 = vld [vmem:[%s1613_s28 + $0x120] ss:$8 sps:$4 sm:$0xff]   ;;  %v1467_v29 = vld [vmem:[%s1613_s28 + $0x34] ss:$8 sps:$4 sm:$0xff]   ;;  %v1471_v31 = vld [vmem:[%s1613_s28 + $0x30] ss:$8 sps:$4 sm:$0xff]  }
  0x15   : > { %702 = vmatpush1.bf16.msra.mxu0 %v1435_v3  ;;  %1410 = vmatpush1.bf16.msra.mxu1 %v1435_v3  ;;  %v1469_v30 = vld [vmem:[%s1613_s28 + $0x134] ss:$8 sps:$4 sm:$0xff]   ;;  %v1472_v32 = vld [vmem:[%s1613_s28 + $0x130] ss:$8 sps:$4 sm:$0xff]   ;;  %v1473_v33 = vld [vmem:[%s1613_s28 + $0x44] ss:$8 sps:$4 sm:$0xff]  }
  0x16   : > { %703 = vmatprep.subr.bf16.mxu0 %v1553_v1  ;;  %1395 = vmatprep.subr.bf16.mxu1 %v1553_v1  ;;  %v1475_v34 = vld [vmem:[%s1613_s28 + $0x144] ss:$8 sps:$4 sm:$0xff]   ;;  %v1477_v35 = vld [vmem:[%s1613_s28 + $0x40] ss:$8 sps:$4 sm:$0xff]   ;;  %v1479_v37 = vld [vmem:[%s1613_s28 + $0x54] ss:$8 sps:$4 sm:$0xff]  }
  0x17   : > { %v1478_v36 = vld [vmem:[%s1613_s28 + $0x140] ss:$8 sps:$4 sm:$0xff]   ;;  %v1481_v38 = vld [vmem:[%s1613_s28 + $0x154] ss:$8 sps:$4 sm:$0xff]   ;;  %v1483_v39 = vld [vmem:[%s1613_s28 + $0x50] ss:$8 sps:$4 sm:$0xff]  }
  0x18   : > { %v1484_v40 = vld [vmem:[%s1613_s28 + $0x150] ss:$8 sps:$4 sm:$0xff]   ;;  %v1485_v41 = vld [vmem:[%s1613_s28 + $0x64] ss:$8 sps:$4 sm:$0xff]   ;;  %v1489_v43 = vld [vmem:[%s1613_s28 + $0x60] ss:$8 sps:$4 sm:$0xff]  }
  0x19   : > { %704 = vmatpush1.bf16.msra.mxu0 %v1436_v4  ;;  %1411 = vmatpush1.bf16.msra.mxu1 %v1436_v4  ;;  %v1487_v42 = vld [vmem:[%s1613_s28 + $0x164] ss:$8 sps:$4 sm:$0xff]   ;;  %v1490_v44 = vld [vmem:[%s1613_s28 + $0x160] ss:$8 sps:$4 sm:$0xff]   ;;  %v1491_v45 = vld [vmem:[%s1613_s28 + $0x74] ss:$8 sps:$4 sm:$0xff]  }
  0x1a   : > { %705 = vmatprep.subr.bf16.mxu0 %v1553_v1  ;;  %1396 = vmatprep.subr.bf16.mxu1 %v1553_v1  ;;  %v1493_v46 = vld [vmem:[%s1613_s28 + $0x174] ss:$8 sps:$4 sm:$0xff]   ;;  %v1495_v47 = vld [vmem:[%s1613_s28 + $0x70] ss:$8 sps:$4 sm:$0xff]   ;;  %v1497_v49 = vld [vmem:[%s1613_s28 + $0x84] ss:$8 sps:$4 sm:$0xff]  }
  0x1b   : > { %v1496_v48 = vld [vmem:[%s1613_s28 + $0x170] ss:$8 sps:$4 sm:$0xff]   ;;  %v1499_v50 = vld [vmem:[%s1613_s28 + $0x184] ss:$8 sps:$4 sm:$0xff]   ;;  %v1501_v51 = vld [vmem:[%s1613_s28 + $0x80] ss:$8 sps:$4 sm:$0xff]  }
  0x1c   : > { %v1502_v52 = vld [vmem:[%s1613_s28 + $0x180] ss:$8 sps:$4 sm:$0xff]   ;;  %v1503_v53 = vld [vmem:[%s1613_s28 + $0x94] ss:$8 sps:$4 sm:$0xff]   ;;  %v1507_v55 = vld [vmem:[%s1613_s28 + $0x90] ss:$8 sps:$4 sm:$0xff]  }
  0x1d   : > { %706 = vmatpush1.bf16.msra.mxu0 %v1437_v5  ;;  %1412 = vmatpush1.bf16.msra.mxu1 %v1437_v5  ;;  %v1505_v54 = vld [vmem:[%s1613_s28 + $0x194] ss:$8 sps:$4 sm:$0xff]   ;;  %v1508_v56 = vld [vmem:[%s1613_s28 + $0x190] ss:$8 sps:$4 sm:$0xff]   ;;  %v1509_v57 = vld [vmem:[%s1613_s28 + $0xa4] ss:$8 sps:$4 sm:$0xff]  }
  0x1e   : > { %707 = vmatprep.subr.bf16.mxu0 %v1553_v1  ;;  %1397 = vmatprep.subr.bf16.mxu1 %v1553_v1  ;;  %v1511_v58 = vld [vmem:[%s1613_s28 + $0x1a4] ss:$8 sps:$4 sm:$0xff]   ;;  %v1513_v59 = vld [vmem:[%s1613_s28 + $0xa0] ss:$8 sps:$4 sm:$0xff]   ;;  %v1515_v61 = vld [vmem:[%s1613_s28 + $0xb4] ss:$8 sps:$4 sm:$0xff]  }
  0x1f   : > { %v1514_v60 = vld [vmem:[%s1613_s28 + $0x1a0] ss:$8 sps:$4 sm:$0xff]   ;;  %v1517_v62 = vld [vmem:[%s1613_s28 + $0x1b4] ss:$8 sps:$4 sm:$0xff]   ;;  %v1519_v63 = vld [vmem:[%s1613_s28 + $0xb0] ss:$8 sps:$4 sm:$0xff]  }
  0x20   : > { %v1520_v0 = vld [vmem:[%s1613_s28 + $0x1b0] ss:$8 sps:$4 sm:$0xff]   ;;  %v1523_v2 = vld [vmem:[%s1613_s28 + $0x1c4] ss:$8 sps:$4 sm:$0xff]   ;;  %v1525_v3 = vld [vmem:[%s1613_s28 + $0xc0] ss:$8 sps:$4 sm:$0xff]  }
  0x21   : > { %708 = vmatpush1.bf16.msra.mxu0 %v1438_v7  ;;  %1413 = vmatpush1.bf16.msra.mxu1 %v1438_v7  ;;  %v1526_v4 = vld [vmem:[%s1613_s28 + $0x1c0] ss:$8 sps:$4 sm:$0xff]   ;;  %v1527_v5 = vld [vmem:[%s1613_s28 + $0xd4] ss:$8 sps:$4 sm:$0xff]   ;;  %v1531_v7 = vld [vmem:[%s1613_s28 + $0xd0] ss:$8 sps:$4 sm:$0xff]  }
  0x22   : > { %709 = vmatprep.subr.bf16.mxu0 %v1553_v1  ;;  %1398 = vmatprep.subr.bf16.mxu1 %v1553_v1  ;;  %v1529_v6 = vld [vmem:[%s1613_s28 + $0x1d4] ss:$8 sps:$4 sm:$0xff]   ;;  %v1532_v8 = vld [vmem:[%s1613_s28 + $0x1d0] ss:$8 sps:$4 sm:$0xff]  }
  0x25   : > { %710 = vmatpush1.bf16.msra.mxu0 %v1439_v9  ;;  %1414 = vmatpush1.bf16.msra.mxu1 %v1439_v9  ;;  %v1533_v9 = vld [vmem:[%s1613_s28 + $0xe4] ss:$8 sps:$4 sm:$0xff]  }
  0x26   : > { %711 = vmatprep.subr.bf16.mxu0 %v1553_v1  ;;  %1399 = vmatprep.subr.bf16.mxu1 %v1553_v1 }
  0x29   : > { %712 = vmatpush1.bf16.msra.mxu0 %v1440_v10  ;;  %1415 = vmatpush1.bf16.msra.mxu1 %v1440_v10  ;;  %v1535_v10 = vld [vmem:[%s1613_s28 + $0x1e4] ss:$8 sps:$4 sm:$0xff]  }
  0x2a   : > { %713 = vmatprep.subr.bf16.mxu0 %v1553_v1  ;;  %1400 = vmatprep.subr.bf16.mxu1 %v1553_v1 }
  0x2d   : > { %714 = vmatpush2.bf16.msra.mxu0 %v1441_v11  ;;  %1416 = vmatpush2.bf16.msra.mxu1 %v1441_v11  ;;  %v1537_v11 = vld [vmem:[%s1613_s28 + $0xe0] ss:$8 sps:$4 sm:$0xff]  }
  0x2e   : > { %715 = vmatprep.subr.bf16.mxu0 %v1553_v1  ;;  %1401 = vmatprep.subr.bf16.mxu1 %v1553_v1 }
  0x31   : > { %716 = vmatpush2.bf16.msra.mxu0 %v1442_v12  ;;  %1417 = vmatpush2.bf16.msra.mxu1 %v1442_v12  ;;  %v1538_v12 = vld [vmem:[%s1613_s28 + $0x1e0] ss:$8 sps:$4 sm:$0xff]  }
  0x32   : > { %717 = vmatprep.subr.bf16.mxu0 %v1553_v1  ;;  %1402 = vmatprep.subr.bf16.mxu1 %v1553_v1 }
  0x35   : > { %718 = vmatpush2.bf16.msra.mxu0 %v1443_v13  ;;  %1418 = vmatpush2.bf16.msra.mxu1 %v1443_v13  ;;  %v1539_v13 = vld [vmem:[%s1613_s28 + $0xf4] ss:$8 sps:$4 sm:$0xff]  }
  0x36   : > { %719 = vmatprep.subr.bf16.mxu0 %v1553_v1  ;;  %1403 = vmatprep.subr.bf16.mxu1 %v1553_v1 }
  0x39   : > { %720 = vmatpush2.bf16.msra.mxu0 %v1444_v14  ;;  %1419 = vmatpush2.bf16.msra.mxu1 %v1444_v14  ;;  %v1541_v14 = vld [vmem:[%s1613_s28 + $0x1f4] ss:$8 sps:$4 sm:$0xff]  }
  0x3a   : > { %721 = vmatprep.subr.bf16.mxu0 %v1553_v1  ;;  %1404 = vmatprep.subr.bf16.mxu1 %v1553_v1 }
  0x3d   : > { %722 = vmatpush2.bf16.msra.mxu0 %v1445_v15  ;;  %1420 = vmatpush2.bf16.msra.mxu1 %v1445_v15  ;;  %v1543_v15 = vld [vmem:[%s1613_s28 + $0xf0] ss:$8 sps:$4 sm:$0xff]  }
  0x3e   : > { %723 = vmatprep.subr.bf16.mxu0 %v1553_v1  ;;  %1405 = vmatprep.subr.bf16.mxu1 %v1553_v1 }
  0x41   : > { %724 = vmatpush2.bf16.msra.mxu0 %v1446_v16  ;;  %1421 = vmatpush2.bf16.msra.mxu1 %v1446_v16  ;;  %v1544_v16 = vld [vmem:[%s1613_s28 + $0x1f0] ss:$8 sps:$4 sm:$0xff]  }
  0x42   : > { %725 = vmatprep.subr.bf16.mxu0 %v1553_v1  ;;  %1406 = vmatprep.subr.bf16.mxu1 %v1553_v1 }
  0x45   : > { %726 = vmatpush2.bf16.msra.mxu0 %v1447_v17  ;;  %1422 = vmatpush2.bf16.msra.mxu1 %v1447_v17  ;;  %v1739_v17 = vld [vmem:[%s1881_s2] ss:$0 sm:$0xff] }
  0x46   : > { %727 = vmatprep.subr.bf16.mxu0 %v1553_v1  ;;  %1407 = vmatprep.subr.bf16.mxu1 %v1553_v1  ;;  %v1521_v1 = vld [vmem:[%s1613_s28 + $0xc4] ss:$8 sps:$4 sm:$0xff]   ;;  %s1748_s28 = scalar_lea.vmem %s1882_s3, %s1391_s23 }
  0x49   : > { %728 = vmatpush2.bf16.msra.mxu0 %v1448_v18  ;;  %1423 = vmatpush2.bf16.msra.mxu1 %v1448_v18 }
  0x4c   : > { %730 = vmatmul.mubr.bf16.vlgmr.msra.gmra.mxu0 %v1449_v19  ;;  %858 = vmatmul.mubr.bf16.vlgmr.msra.gmra.mxu1 %v1452_v20 }
  0x4d   : > { %737 = vmatprep.mubr.bf16.mxu0 %v1455_v21  ;;  %865 = vmatprep.mubr.bf16.mxu1 %v1457_v22 }
  0x54   : > { %738 = vmatmul.mubr.bf16.gmra.mxu0 %v1459_v23  ;;  %866 = vmatmul.mubr.bf16.gmra.mxu1 %v1460_v24 }
  0x55   : > { %745 = vmatprep.mubr.bf16.mxu0 %v1461_v25  ;;  %873 = vmatprep.mubr.bf16.mxu1 %v1463_v26 }
  0x5c   : > { %746 = vmatmul.mubr.bf16.gmra.mxu0 %v1465_v27  ;;  %874 = vmatmul.mubr.bf16.gmra.mxu1 %v1466_v28 }
  0x5d   : > { %753 = vmatprep.mubr.bf16.mxu0 %v1467_v29  ;;  %881 = vmatprep.mubr.bf16.mxu1 %v1469_v30 }
  0x64   : > { %754 = vmatmul.mubr.bf16.gmra.mxu0 %v1471_v31  ;;  %882 = vmatmul.mubr.bf16.gmra.mxu1 %v1472_v32 }
  0x65   : > { %761 = vmatprep.mubr.bf16.mxu0 %v1473_v33  ;;  %889 = vmatprep.mubr.bf16.mxu1 %v1475_v34 }
  0x6c   : > { %762 = vmatmul.mubr.bf16.gmra.mxu0 %v1477_v35  ;;  %890 = vmatmul.mubr.bf16.gmra.mxu1 %v1478_v36 }
  0x6d   : > { %769 = vmatprep.mubr.bf16.mxu0 %v1479_v37  ;;  %897 = vmatprep.mubr.bf16.mxu1 %v1481_v38 }
  0x74   : > { %770 = vmatmul.mubr.bf16.gmra.mxu0 %v1483_v39  ;;  %898 = vmatmul.mubr.bf16.gmra.mxu1 %v1484_v40 }
  0x75   : > { %777 = vmatprep.mubr.bf16.mxu0 %v1485_v41  ;;  %905 = vmatprep.mubr.bf16.mxu1 %v1487_v42 }
  0x7c   : > { %778 = vmatmul.mubr.bf16.gmra.mxu0 %v1489_v43  ;;  %906 = vmatmul.mubr.bf16.gmra.mxu1 %v1490_v44 }
  0x7d   : > { %785 = vmatprep.mubr.bf16.mxu0 %v1491_v45  ;;  %913 = vmatprep.mubr.bf16.mxu1 %v1493_v46 }
  0x84   : > { %786 = vmatmul.mubr.bf16.gmra.mxu0 %v1495_v47  ;;  %914 = vmatmul.mubr.bf16.gmra.mxu1 %v1496_v48 }
  0x85   : > { %793 = vmatprep.mubr.bf16.mxu0 %v1497_v49  ;;  %921 = vmatprep.mubr.bf16.mxu1 %v1499_v50 }
  0x8c   : > { %794 = vmatmul.mubr.bf16.gmra.mxu0 %v1501_v51  ;;  %922 = vmatmul.mubr.bf16.gmra.mxu1 %v1502_v52 }
  0x8d   : > { %801 = vmatprep.mubr.bf16.mxu0 %v1503_v53  ;;  %929 = vmatprep.mubr.bf16.mxu1 %v1505_v54 }
  0x94   : > { %802 = vmatmul.mubr.bf16.gmra.mxu0 %v1507_v55  ;;  %930 = vmatmul.mubr.bf16.gmra.mxu1 %v1508_v56 }
  0x95   : > { %809 = vmatprep.mubr.bf16.mxu0 %v1509_v57  ;;  %937 = vmatprep.mubr.bf16.mxu1 %v1511_v58 }
  0x9c   : > { %810 = vmatmul.mubr.bf16.gmra.mxu0 %v1513_v59  ;;  %938 = vmatmul.mubr.bf16.gmra.mxu1 %v1514_v60 }
  0x9d   : > { %817 = vmatprep.mubr.bf16.mxu0 %v1515_v61  ;;  %945 = vmatprep.mubr.bf16.mxu1 %v1517_v62 }
  0xa4   : > { %818 = vmatmul.mubr.bf16.gmra.mxu0 %v1519_v63  ;;  %946 = vmatmul.mubr.bf16.gmra.mxu1 %v1520_v0 }
  0xa5   : > { %825 = vmatprep.mubr.bf16.mxu0 %v1521_v1  ;;  %953 = vmatprep.mubr.bf16.mxu1 %v1523_v2 }
  0xac   : > { %826 = vmatmul.mubr.bf16.gmra.mxu0 %v1525_v3  ;;  %954 = vmatmul.mubr.bf16.gmra.mxu1 %v1526_v4 }
  0xad   : > { %833 = vmatprep.mubr.bf16.mxu0 %v1527_v5  ;;  %961 = vmatprep.mubr.bf16.mxu1 %v1529_v6 }
  0xb4   : > { %834 = vmatmul.mubr.bf16.gmra.mxu0 %v1531_v7  ;;  %962 = vmatmul.mubr.bf16.gmra.mxu1 %v1532_v8 }
  0xb5   : > { %841 = vmatprep.mubr.bf16.mxu0 %v1533_v9  ;;  %969 = vmatprep.mubr.bf16.mxu1 %v1535_v10 }
  0xbc   : > { %842 = vmatmul.mubr.bf16.gmra.mxu0 %v1537_v11  ;;  %970 = vmatmul.mubr.bf16.gmra.mxu1 %v1538_v12 }
  0xbd   : > { %849 = vmatprep.mubr.bf16.mxu0 %v1539_v13  ;;  %977 = vmatprep.mubr.bf16.mxu1 %v1541_v14 }
  0xc4   : > { %850 = vmatmul.mubr.bf16.gmra.mxu0 %v1543_v15  ;;  %978 = vmatmul.mubr.bf16.gmra.mxu1 %v1544_v16 }
 0x10c   : > { %v731_v18 = vpop.f32.mrf.mxu0  ;;  %v859_v19 = vpop.f32.mrf.mxu1 }
 0x10d   : > { %v732_v20 = vadd.f32 %v1739_v17, %v731_v18  ;;  %v860_v21 = vadd.f32 %v1739_v17, %v859_v19 }
 0x10e   : > { %v733_v22 = vpop.f32.mrf.mxu0  ;;  %v861_v23 = vpop.f32.mrf.mxu1 }
 0x10f   : > { %vm986_vm0 = vcmp.ge.f32.partialorder %v732_v20, 0.0  ;;  %v1050_v24 = vmul.f32 0.1, %v732_v20  ;;  %vm1018_vm1 = vcmp.ge.f32.partialorder %v860_v21, 0.0  ;;  %v1082_v25 = vmul.f32 0.1, %v860_v21 }
 0x110   : > { %v734_v26 = vpop.f32.mrf.mxu0  ;;  %v862_v27 = vpop.f32.mrf.mxu1 }
 0x111   : > { %v1114_v28 = vsel %vm986_vm0, %v732_v20, %v1050_v24  ;;  %v1146_v29 = vsel %vm1018_vm1, %v860_v21, %v1082_v25  ;;  %v735_v30 = vadd.f32 %v1739_v17, %v734_v26  ;;  %v863_v31 = vadd.f32 %v1739_v17, %v862_v27 }
 0x112   : > { %1178 = vst [vmem:[%s1748_s28] sm:$0xff] %v1114_v28  ;;  %1210 = vst [vmem:[%s1748_s28 + $0x100] sm:$0xff] %v1146_v29  ;;  %v736_v32 = vpop.f32.mrf.mxu0  ;;  %v864_v33 = vpop.f32.mrf.mxu1 }
 0x113   : > { %vm987_vm2 = vcmp.ge.f32.partialorder %v735_v30, 0.0  ;;  %v1051_v34 = vmul.f32 0.1, %v735_v30  ;;  %vm1019_vm3 = vcmp.ge.f32.partialorder %v863_v31, 0.0  ;;  %v1083_v35 = vmul.f32 0.1, %v863_v31 }
 0x114   : > { %v739_v36 = vpop.f32.mrf.mxu0  ;;  %v867_v37 = vpop.f32.mrf.mxu1 }
 0x115   : > { %v1115_v38 = vsel %vm987_vm2, %v735_v30, %v1051_v34  ;;  %v1147_v39 = vsel %vm1019_vm3, %v863_v31, %v1083_v35  ;;  %v740_v40 = vadd.f32 %v1739_v17, %v739_v36  ;;  %v868_v41 = vadd.f32 %v1739_v17, %v867_v37 }
 0x116   : > { %1179 = vst [vmem:[%s1748_s28 + $0x8] sm:$0xff] %v1115_v38  ;;  %1211 = vst [vmem:[%s1748_s28 + $0x108] sm:$0xff] %v1147_v39  ;;  %v741_v42 = vpop.f32.mrf.mxu0  ;;  %v869_v43 = vpop.f32.mrf.mxu1 }
 0x117   : > { %vm988_vm4 = vcmp.ge.f32.partialorder %v740_v40, 0.0  ;;  %v1052_v44 = vmul.f32 0.1, %v740_v40  ;;  %vm1020_vm5 = vcmp.ge.f32.partialorder %v868_v41, 0.0  ;;  %v1084_v45 = vmul.f32 0.1, %v868_v41 }
 0x118   : > { %v742_v46 = vpop.f32.mrf.mxu0  ;;  %v870_v47 = vpop.f32.mrf.mxu1 }
 0x119   : > { %v1116_v48 = vsel %vm988_vm4, %v740_v40, %v1052_v44  ;;  %v1148_v49 = vsel %vm1020_vm5, %v868_v41, %v1084_v45  ;;  %v743_v50 = vadd.f32 %v1739_v17, %v742_v46  ;;  %v871_v51 = vadd.f32 %v1739_v17, %v870_v47 }
 0x11a   : > { %1180 = vst [vmem:[%s1748_s28 + $0x10] sm:$0xff] %v1116_v48  ;;  %1212 = vst [vmem:[%s1748_s28 + $0x110] sm:$0xff] %v1148_v49  ;;  %v744_v52 = vpop.f32.mrf.mxu0  ;;  %v872_v53 = vpop.f32.mrf.mxu1 }
 0x11b   : > { %vm989_vm6 = vcmp.ge.f32.partialorder %v743_v50, 0.0  ;;  %v1053_v54 = vmul.f32 0.1, %v743_v50  ;;  %vm1021_vm7 = vcmp.ge.f32.partialorder %v871_v51, 0.0  ;;  %v1085_v55 = vmul.f32 0.1, %v871_v51 }
 0x11c   : > { %v747_v56 = vpop.f32.mrf.mxu0  ;;  %v875_v57 = vpop.f32.mrf.mxu1 }
 0x11d   : > { %v1117_v58 = vsel %vm989_vm6, %v743_v50, %v1053_v54  ;;  %v1149_v59 = vsel %vm1021_vm7, %v871_v51, %v1085_v55  ;;  %v748_v60 = vadd.f32 %v1739_v17, %v747_v56  ;;  %v876_v61 = vadd.f32 %v1739_v17, %v875_v57 }
 0x11e   : > { %1181 = vst [vmem:[%s1748_s28 + $0x18] sm:$0xff] %v1117_v58  ;;  %1213 = vst [vmem:[%s1748_s28 + $0x118] sm:$0xff] %v1149_v59  ;;  %v749_v62 = vpop.f32.mrf.mxu0  ;;  %v877_v63 = vpop.f32.mrf.mxu1 }
 0x11f   : > { %vm990_vm8 = vcmp.ge.f32.partialorder %v748_v60, 0.0  ;;  %v1054_v0 = vmul.f32 0.1, %v748_v60  ;;  %vm1022_vm9 = vcmp.ge.f32.partialorder %v876_v61, 0.0  ;;  %v1086_v1 = vmul.f32 0.1, %v876_v61 }
 0x120   : > { %v750_v2 = vpop.f32.mrf.mxu0  ;;  %v878_v3 = vpop.f32.mrf.mxu1 }
 0x121   : > { %v1118_v4 = vsel %vm990_vm8, %v748_v60, %v1054_v0  ;;  %v1150_v5 = vsel %vm1022_vm9, %v876_v61, %v1086_v1  ;;  %v751_v6 = vadd.f32 %v1739_v17, %v750_v2  ;;  %v879_v7 = vadd.f32 %v1739_v17, %v878_v3 }
 0x122   : > { %1182 = vst [vmem:[%s1748_s28 + $0x20] sm:$0xff] %v1118_v4  ;;  %1214 = vst [vmem:[%s1748_s28 + $0x120] sm:$0xff] %v1150_v5  ;;  %v752_v8 = vpop.f32.mrf.mxu0  ;;  %v880_v9 = vpop.f32.mrf.mxu1 }
 0x123   : > { %vm991_vm10 = vcmp.ge.f32.partialorder %v751_v6, 0.0  ;;  %v1055_v10 = vmul.f32 0.1, %v751_v6  ;;  %vm1023_vm11 = vcmp.ge.f32.partialorder %v879_v7, 0.0  ;;  %v1087_v11 = vmul.f32 0.1, %v879_v7 }
 0x124   : > { %v755_v12 = vpop.f32.mrf.mxu0  ;;  %v883_v13 = vpop.f32.mrf.mxu1 }
 0x125   : > { %v1119_v14 = vsel %vm991_vm10, %v751_v6, %v1055_v10  ;;  %v1151_v15 = vsel %vm1023_vm11, %v879_v7, %v1087_v11  ;;  %v756_v16 = vadd.f32 %v1739_v17, %v755_v12  ;;  %v884_v18 = vadd.f32 %v1739_v17, %v883_v13 }
 0x126   : > { %1183 = vst [vmem:[%s1748_s28 + $0x28] sm:$0xff] %v1119_v14  ;;  %1215 = vst [vmem:[%s1748_s28 + $0x128] sm:$0xff] %v1151_v15  ;;  %v757_v19 = vpop.f32.mrf.mxu0  ;;  %v885_v20 = vpop.f32.mrf.mxu1 }
 0x127   : > { %vm992_vm12 = vcmp.ge.f32.partialorder %v756_v16, 0.0  ;;  %v1056_v21 = vmul.f32 0.1, %v756_v16  ;;  %vm1024_vm13 = vcmp.ge.f32.partialorder %v884_v18, 0.0  ;;  %v1088_v22 = vmul.f32 0.1, %v884_v18 }
 0x128   : > { %v758_v23 = vpop.f32.mrf.mxu0  ;;  %v886_v24 = vpop.f32.mrf.mxu1 }
 0x129   : > { %v1120_v25 = vsel %vm992_vm12, %v756_v16, %v1056_v21  ;;  %v1152_v26 = vsel %vm1024_vm13, %v884_v18, %v1088_v22  ;;  %v759_v27 = vadd.f32 %v1739_v17, %v758_v23  ;;  %v887_v28 = vadd.f32 %v1739_v17, %v886_v24 }
 0x12a   : > { %1184 = vst [vmem:[%s1748_s28 + $0x30] sm:$0xff] %v1120_v25  ;;  %1216 = vst [vmem:[%s1748_s28 + $0x130] sm:$0xff] %v1152_v26  ;;  %v760_v29 = vpop.f32.mrf.mxu0  ;;  %v888_v30 = vpop.f32.mrf.mxu1 }
 0x12b   : > { %vm993_vm14 = vcmp.ge.f32.partialorder %v759_v27, 0.0  ;;  %v1057_v31 = vmul.f32 0.1, %v759_v27  ;;  %vm1025_vm15 = vcmp.ge.f32.partialorder %v887_v28, 0.0  ;;  %v1089_v32 = vmul.f32 0.1, %v887_v28 }
 0x12c   : > { %v763_v33 = vpop.f32.mrf.mxu0  ;;  %v891_v34 = vpop.f32.mrf.mxu1 }
 0x12d   : > { %v1121_v35 = vsel %vm993_vm14, %v759_v27, %v1057_v31  ;;  %v1153_v36 = vsel %vm1025_vm15, %v887_v28, %v1089_v32  ;;  %v764_v37 = vadd.f32 %v1739_v17, %v763_v33  ;;  %v892_v38 = vadd.f32 %v1739_v17, %v891_v34 }
 0x12e   : > { %1185 = vst [vmem:[%s1748_s28 + $0x38] sm:$0xff] %v1121_v35  ;;  %1217 = vst [vmem:[%s1748_s28 + $0x138] sm:$0xff] %v1153_v36  ;;  %v765_v39 = vpop.f32.mrf.mxu0  ;;  %v893_v40 = vpop.f32.mrf.mxu1 }
 0x12f   : > { %vm994_vm0 = vcmp.ge.f32.partialorder %v764_v37, 0.0  ;;  %v1058_v41 = vmul.f32 0.1, %v764_v37  ;;  %vm1026_vm1 = vcmp.ge.f32.partialorder %v892_v38, 0.0  ;;  %v1090_v42 = vmul.f32 0.1, %v892_v38 }
 0x130   : > { %v766_v43 = vpop.f32.mrf.mxu0  ;;  %v894_v44 = vpop.f32.mrf.mxu1 }
 0x131   : > { %v1122_v45 = vsel %vm994_vm0, %v764_v37, %v1058_v41  ;;  %v1154_v46 = vsel %vm1026_vm1, %v892_v38, %v1090_v42  ;;  %v767_v47 = vadd.f32 %v1739_v17, %v766_v43  ;;  %v895_v48 = vadd.f32 %v1739_v17, %v894_v44 }
 0x132   : > { %1186 = vst [vmem:[%s1748_s28 + $0x40] sm:$0xff] %v1122_v45  ;;  %1218 = vst [vmem:[%s1748_s28 + $0x140] sm:$0xff] %v1154_v46  ;;  %v768_v49 = vpop.f32.mrf.mxu0  ;;  %v896_v50 = vpop.f32.mrf.mxu1 }
 0x133   : > { %vm995_vm2 = vcmp.ge.f32.partialorder %v767_v47, 0.0  ;;  %v1059_v51 = vmul.f32 0.1, %v767_v47  ;;  %vm1027_vm3 = vcmp.ge.f32.partialorder %v895_v48, 0.0  ;;  %v1091_v52 = vmul.f32 0.1, %v895_v48 }
 0x134   : > { %v771_v53 = vpop.f32.mrf.mxu0  ;;  %v899_v54 = vpop.f32.mrf.mxu1 }
 0x135   : > { %v1123_v55 = vsel %vm995_vm2, %v767_v47, %v1059_v51  ;;  %v1155_v56 = vsel %vm1027_vm3, %v895_v48, %v1091_v52  ;;  %v772_v57 = vadd.f32 %v1739_v17, %v771_v53  ;;  %v900_v58 = vadd.f32 %v1739_v17, %v899_v54 }
 0x136   : > { %1187 = vst [vmem:[%s1748_s28 + $0x48] sm:$0xff] %v1123_v55  ;;  %1219 = vst [vmem:[%s1748_s28 + $0x148] sm:$0xff] %v1155_v56  ;;  %v773_v59 = vpop.f32.mrf.mxu0  ;;  %v901_v60 = vpop.f32.mrf.mxu1 }
 0x137   : > { %vm996_vm4 = vcmp.ge.f32.partialorder %v772_v57, 0.0  ;;  %v1060_v61 = vmul.f32 0.1, %v772_v57  ;;  %vm1028_vm5 = vcmp.ge.f32.partialorder %v900_v58, 0.0  ;;  %v1092_v62 = vmul.f32 0.1, %v900_v58 }
 0x138   : > { %v774_v63 = vpop.f32.mrf.mxu0  ;;  %v902_v0 = vpop.f32.mrf.mxu1 }
 0x139   : > { %v1124_v1 = vsel %vm996_vm4, %v772_v57, %v1060_v61  ;;  %v1156_v2 = vsel %vm1028_vm5, %v900_v58, %v1092_v62  ;;  %v775_v3 = vadd.f32 %v1739_v17, %v774_v63  ;;  %v903_v4 = vadd.f32 %v1739_v17, %v902_v0 }
 0x13a   : > { %1188 = vst [vmem:[%s1748_s28 + $0x50] sm:$0xff] %v1124_v1  ;;  %1220 = vst [vmem:[%s1748_s28 + $0x150] sm:$0xff] %v1156_v2  ;;  %v776_v5 = vpop.f32.mrf.mxu0  ;;  %v904_v6 = vpop.f32.mrf.mxu1 }
 0x13b   : > { %vm997_vm6 = vcmp.ge.f32.partialorder %v775_v3, 0.0  ;;  %v1061_v7 = vmul.f32 0.1, %v775_v3  ;;  %vm1029_vm7 = vcmp.ge.f32.partialorder %v903_v4, 0.0  ;;  %v1093_v8 = vmul.f32 0.1, %v903_v4 }
 0x13c   : > { %v779_v9 = vpop.f32.mrf.mxu0  ;;  %v907_v10 = vpop.f32.mrf.mxu1 }
 0x13d   : > { %v1125_v11 = vsel %vm997_vm6, %v775_v3, %v1061_v7  ;;  %v1157_v12 = vsel %vm1029_vm7, %v903_v4, %v1093_v8  ;;  %v780_v13 = vadd.f32 %v1739_v17, %v779_v9  ;;  %v908_v14 = vadd.f32 %v1739_v17, %v907_v10 }
 0x13e   : > { %1189 = vst [vmem:[%s1748_s28 + $0x58] sm:$0xff] %v1125_v11  ;;  %1221 = vst [vmem:[%s1748_s28 + $0x158] sm:$0xff] %v1157_v12  ;;  %v781_v15 = vpop.f32.mrf.mxu0  ;;  %v909_v16 = vpop.f32.mrf.mxu1 }
 0x13f   : > { %vm998_vm8 = vcmp.ge.f32.partialorder %v780_v13, 0.0  ;;  %v1062_v18 = vmul.f32 0.1, %v780_v13  ;;  %vm1030_vm9 = vcmp.ge.f32.partialorder %v908_v14, 0.0  ;;  %v1094_v19 = vmul.f32 0.1, %v908_v14 }
 0x140   : > { %v782_v20 = vpop.f32.mrf.mxu0  ;;  %v910_v21 = vpop.f32.mrf.mxu1 }
 0x141   : > { %v1126_v22 = vsel %vm998_vm8, %v780_v13, %v1062_v18  ;;  %v1158_v23 = vsel %vm1030_vm9, %v908_v14, %v1094_v19  ;;  %v783_v24 = vadd.f32 %v1739_v17, %v782_v20  ;;  %v911_v25 = vadd.f32 %v1739_v17, %v910_v21 }
 0x142   : > { %1190 = vst [vmem:[%s1748_s28 + $0x60] sm:$0xff] %v1126_v22  ;;  %1222 = vst [vmem:[%s1748_s28 + $0x160] sm:$0xff] %v1158_v23  ;;  %v784_v26 = vpop.f32.mrf.mxu0  ;;  %v912_v27 = vpop.f32.mrf.mxu1 }
 0x143   : > { %vm999_vm10 = vcmp.ge.f32.partialorder %v783_v24, 0.0  ;;  %v1063_v28 = vmul.f32 0.1, %v783_v24  ;;  %vm1031_vm11 = vcmp.ge.f32.partialorder %v911_v25, 0.0  ;;  %v1095_v29 = vmul.f32 0.1, %v911_v25 }
 0x144   : > { %v787_v30 = vpop.f32.mrf.mxu0  ;;  %v915_v31 = vpop.f32.mrf.mxu1 }
 0x145   : > { %v1127_v32 = vsel %vm999_vm10, %v783_v24, %v1063_v28  ;;  %v1159_v33 = vsel %vm1031_vm11, %v911_v25, %v1095_v29  ;;  %v788_v34 = vadd.f32 %v1739_v17, %v787_v30  ;;  %v916_v35 = vadd.f32 %v1739_v17, %v915_v31 }
 0x146   : > { %1191 = vst [vmem:[%s1748_s28 + $0x68] sm:$0xff] %v1127_v32  ;;  %1223 = vst [vmem:[%s1748_s28 + $0x168] sm:$0xff] %v1159_v33  ;;  %v789_v36 = vpop.f32.mrf.mxu0  ;;  %v917_v37 = vpop.f32.mrf.mxu1 }
 0x147   : > { %vm1000_vm12 = vcmp.ge.f32.partialorder %v788_v34, 0.0  ;;  %v1064_v38 = vmul.f32 0.1, %v788_v34  ;;  %vm1032_vm13 = vcmp.ge.f32.partialorder %v916_v35, 0.0  ;;  %v1096_v39 = vmul.f32 0.1, %v916_v35 }
 0x148   : > { %v790_v40 = vpop.f32.mrf.mxu0  ;;  %v918_v41 = vpop.f32.mrf.mxu1 }
 0x149   : > { %v1128_v42 = vsel %vm1000_vm12, %v788_v34, %v1064_v38  ;;  %v1160_v43 = vsel %vm1032_vm13, %v916_v35, %v1096_v39  ;;  %v791_v44 = vadd.f32 %v1739_v17, %v790_v40  ;;  %v919_v45 = vadd.f32 %v1739_v17, %v918_v41 }
 0x14a   : > { %1192 = vst [vmem:[%s1748_s28 + $0x70] sm:$0xff] %v1128_v42  ;;  %1224 = vst [vmem:[%s1748_s28 + $0x170] sm:$0xff] %v1160_v43  ;;  %v792_v46 = vpop.f32.mrf.mxu0  ;;  %v920_v47 = vpop.f32.mrf.mxu1 }
 0x14b   : > { %vm1001_vm14 = vcmp.ge.f32.partialorder %v791_v44, 0.0  ;;  %v1065_v48 = vmul.f32 0.1, %v791_v44  ;;  %vm1033_vm15 = vcmp.ge.f32.partialorder %v919_v45, 0.0  ;;  %v1097_v49 = vmul.f32 0.1, %v919_v45 }
 0x14c   : > { %v795_v50 = vpop.f32.mrf.mxu0  ;;  %v923_v51 = vpop.f32.mrf.mxu1 }
 0x14d   : > { %v1129_v52 = vsel %vm1001_vm14, %v791_v44, %v1065_v48  ;;  %v1161_v53 = vsel %vm1033_vm15, %v919_v45, %v1097_v49  ;;  %v796_v54 = vadd.f32 %v1739_v17, %v795_v50  ;;  %v924_v55 = vadd.f32 %v1739_v17, %v923_v51 }
 0x14e   : > { %1193 = vst [vmem:[%s1748_s28 + $0x78] sm:$0xff] %v1129_v52  ;;  %1225 = vst [vmem:[%s1748_s28 + $0x178] sm:$0xff] %v1161_v53  ;;  %v797_v56 = vpop.f32.mrf.mxu0  ;;  %v925_v57 = vpop.f32.mrf.mxu1 }
 0x14f   : > { %vm1002_vm0 = vcmp.ge.f32.partialorder %v796_v54, 0.0  ;;  %v1066_v58 = vmul.f32 0.1, %v796_v54  ;;  %vm1034_vm1 = vcmp.ge.f32.partialorder %v924_v55, 0.0  ;;  %v1098_v59 = vmul.f32 0.1, %v924_v55 }
 0x150   : > { %v798_v60 = vpop.f32.mrf.mxu0  ;;  %v926_v61 = vpop.f32.mrf.mxu1 }
 0x151   : > { %v1130_v62 = vsel %vm1002_vm0, %v796_v54, %v1066_v58  ;;  %v1162_v63 = vsel %vm1034_vm1, %v924_v55, %v1098_v59  ;;  %v799_v0 = vadd.f32 %v1739_v17, %v798_v60  ;;  %v927_v1 = vadd.f32 %v1739_v17, %v926_v61 }
 0x152   : > { %1194 = vst [vmem:[%s1748_s28 + $0x80] sm:$0xff] %v1130_v62  ;;  %1226 = vst [vmem:[%s1748_s28 + $0x180] sm:$0xff] %v1162_v63  ;;  %v800_v2 = vpop.f32.mrf.mxu0  ;;  %v928_v3 = vpop.f32.mrf.mxu1 }
 0x153   : > { %vm1003_vm2 = vcmp.ge.f32.partialorder %v799_v0, 0.0  ;;  %v1067_v4 = vmul.f32 0.1, %v799_v0  ;;  %vm1035_vm3 = vcmp.ge.f32.partialorder %v927_v1, 0.0  ;;  %v1099_v5 = vmul.f32 0.1, %v927_v1 }
 0x154   : > { %v803_v6 = vpop.f32.mrf.mxu0  ;;  %v931_v7 = vpop.f32.mrf.mxu1 }
 0x155   : > { %v1131_v8 = vsel %vm1003_vm2, %v799_v0, %v1067_v4  ;;  %v1163_v9 = vsel %vm1035_vm3, %v927_v1, %v1099_v5  ;;  %v804_v10 = vadd.f32 %v1739_v17, %v803_v6  ;;  %v932_v11 = vadd.f32 %v1739_v17, %v931_v7 }
 0x156   : > { %1195 = vst [vmem:[%s1748_s28 + $0x88] sm:$0xff] %v1131_v8  ;;  %1227 = vst [vmem:[%s1748_s28 + $0x188] sm:$0xff] %v1163_v9  ;;  %v805_v12 = vpop.f32.mrf.mxu0  ;;  %v933_v13 = vpop.f32.mrf.mxu1 }
 0x157   : > { %vm1004_vm4 = vcmp.ge.f32.partialorder %v804_v10, 0.0  ;;  %v1068_v14 = vmul.f32 0.1, %v804_v10  ;;  %vm1036_vm5 = vcmp.ge.f32.partialorder %v932_v11, 0.0  ;;  %v1100_v15 = vmul.f32 0.1, %v932_v11 }
 0x158   : > { %v806_v16 = vpop.f32.mrf.mxu0  ;;  %v934_v18 = vpop.f32.mrf.mxu1 }
 0x159   : > { %v1132_v19 = vsel %vm1004_vm4, %v804_v10, %v1068_v14  ;;  %v1164_v20 = vsel %vm1036_vm5, %v932_v11, %v1100_v15  ;;  %v807_v21 = vadd.f32 %v1739_v17, %v806_v16  ;;  %v935_v22 = vadd.f32 %v1739_v17, %v934_v18 }
 0x15a   : > { %1196 = vst [vmem:[%s1748_s28 + $0x90] sm:$0xff] %v1132_v19  ;;  %1228 = vst [vmem:[%s1748_s28 + $0x190] sm:$0xff] %v1164_v20  ;;  %v808_v23 = vpop.f32.mrf.mxu0  ;;  %v936_v24 = vpop.f32.mrf.mxu1 }
 0x15b   : > { %vm1005_vm6 = vcmp.ge.f32.partialorder %v807_v21, 0.0  ;;  %v1069_v25 = vmul.f32 0.1, %v807_v21  ;;  %vm1037_vm7 = vcmp.ge.f32.partialorder %v935_v22, 0.0  ;;  %v1101_v26 = vmul.f32 0.1, %v935_v22 }
 0x15c   : > { %v811_v27 = vpop.f32.mrf.mxu0  ;;  %v939_v28 = vpop.f32.mrf.mxu1 }
 0x15d   : > { %v1133_v29 = vsel %vm1005_vm6, %v807_v21, %v1069_v25  ;;  %v1165_v30 = vsel %vm1037_vm7, %v935_v22, %v1101_v26  ;;  %v812_v31 = vadd.f32 %v1739_v17, %v811_v27  ;;  %v940_v32 = vadd.f32 %v1739_v17, %v939_v28 }
 0x15e   : > { %1197 = vst [vmem:[%s1748_s28 + $0x98] sm:$0xff] %v1133_v29  ;;  %1229 = vst [vmem:[%s1748_s28 + $0x198] sm:$0xff] %v1165_v30  ;;  %v813_v33 = vpop.f32.mrf.mxu0  ;;  %v941_v34 = vpop.f32.mrf.mxu1 }
 0x15f   : > { %vm1006_vm8 = vcmp.ge.f32.partialorder %v812_v31, 0.0  ;;  %v1070_v35 = vmul.f32 0.1, %v812_v31  ;;  %vm1038_vm9 = vcmp.ge.f32.partialorder %v940_v32, 0.0  ;;  %v1102_v36 = vmul.f32 0.1, %v940_v32 }
 0x160   : > { %v814_v37 = vpop.f32.mrf.mxu0  ;;  %v942_v38 = vpop.f32.mrf.mxu1 }
 0x161   : > { %v1134_v39 = vsel %vm1006_vm8, %v812_v31, %v1070_v35  ;;  %v1166_v40 = vsel %vm1038_vm9, %v940_v32, %v1102_v36  ;;  %v815_v41 = vadd.f32 %v1739_v17, %v814_v37  ;;  %v943_v42 = vadd.f32 %v1739_v17, %v942_v38 }
 0x162   : > { %1198 = vst [vmem:[%s1748_s28 + $0xa0] sm:$0xff] %v1134_v39  ;;  %1230 = vst [vmem:[%s1748_s28 + $0x1a0] sm:$0xff] %v1166_v40  ;;  %v816_v43 = vpop.f32.mrf.mxu0  ;;  %v944_v44 = vpop.f32.mrf.mxu1 }
 0x163   : > { %vm1007_vm10 = vcmp.ge.f32.partialorder %v815_v41, 0.0  ;;  %v1071_v45 = vmul.f32 0.1, %v815_v41  ;;  %vm1039_vm11 = vcmp.ge.f32.partialorder %v943_v42, 0.0  ;;  %v1103_v46 = vmul.f32 0.1, %v943_v42 }
 0x164   : > { %v819_v47 = vpop.f32.mrf.mxu0  ;;  %v947_v48 = vpop.f32.mrf.mxu1 }
 0x165   : > { %v1135_v49 = vsel %vm1007_vm10, %v815_v41, %v1071_v45  ;;  %v1167_v50 = vsel %vm1039_vm11, %v943_v42, %v1103_v46  ;;  %v820_v51 = vadd.f32 %v1739_v17, %v819_v47  ;;  %v948_v52 = vadd.f32 %v1739_v17, %v947_v48 }
 0x166   : > { %1199 = vst [vmem:[%s1748_s28 + $0xa8] sm:$0xff] %v1135_v49  ;;  %1231 = vst [vmem:[%s1748_s28 + $0x1a8] sm:$0xff] %v1167_v50  ;;  %v821_v53 = vpop.f32.mrf.mxu0  ;;  %v949_v54 = vpop.f32.mrf.mxu1 }
 0x167   : > { %vm1008_vm12 = vcmp.ge.f32.partialorder %v820_v51, 0.0  ;;  %v1072_v55 = vmul.f32 0.1, %v820_v51  ;;  %vm1040_vm13 = vcmp.ge.f32.partialorder %v948_v52, 0.0  ;;  %v1104_v56 = vmul.f32 0.1, %v948_v52 }
 0x168   : > { %v822_v57 = vpop.f32.mrf.mxu0  ;;  %v950_v58 = vpop.f32.mrf.mxu1 }
 0x169   : > { %v1136_v59 = vsel %vm1008_vm12, %v820_v51, %v1072_v55  ;;  %v1168_v60 = vsel %vm1040_vm13, %v948_v52, %v1104_v56  ;;  %v823_v61 = vadd.f32 %v1739_v17, %v822_v57  ;;  %v951_v62 = vadd.f32 %v1739_v17, %v950_v58 }
 0x16a   : > { %1200 = vst [vmem:[%s1748_s28 + $0xb0] sm:$0xff] %v1136_v59  ;;  %1232 = vst [vmem:[%s1748_s28 + $0x1b0] sm:$0xff] %v1168_v60  ;;  %v824_v63 = vpop.f32.mrf.mxu0  ;;  %v952_v0 = vpop.f32.mrf.mxu1 }
 0x16b   : > { %vm1009_vm14 = vcmp.ge.f32.partialorder %v823_v61, 0.0  ;;  %v1073_v1 = vmul.f32 0.1, %v823_v61  ;;  %vm1041_vm15 = vcmp.ge.f32.partialorder %v951_v62, 0.0  ;;  %v1105_v2 = vmul.f32 0.1, %v951_v62 }
 0x16c   : > { %v827_v3 = vpop.f32.mrf.mxu0  ;;  %v955_v4 = vpop.f32.mrf.mxu1 }
 0x16d   : > { %v1137_v5 = vsel %vm1009_vm14, %v823_v61, %v1073_v1  ;;  %v1169_v6 = vsel %vm1041_vm15, %v951_v62, %v1105_v2  ;;  %v828_v7 = vadd.f32 %v1739_v17, %v827_v3  ;;  %v956_v8 = vadd.f32 %v1739_v17, %v955_v4 }
 0x16e   : > { %1201 = vst [vmem:[%s1748_s28 + $0xb8] sm:$0xff] %v1137_v5  ;;  %1233 = vst [vmem:[%s1748_s28 + $0x1b8] sm:$0xff] %v1169_v6  ;;  %v829_v9 = vpop.f32.mrf.mxu0  ;;  %v957_v10 = vpop.f32.mrf.mxu1 }
 0x16f   : > { %vm1010_vm0 = vcmp.ge.f32.partialorder %v828_v7, 0.0  ;;  %v1074_v11 = vmul.f32 0.1, %v828_v7  ;;  %vm1042_vm1 = vcmp.ge.f32.partialorder %v956_v8, 0.0  ;;  %v1106_v12 = vmul.f32 0.1, %v956_v8 }
 0x170   : > { %v830_v13 = vpop.f32.mrf.mxu0  ;;  %v958_v14 = vpop.f32.mrf.mxu1 }
 0x171   : > { %v1138_v15 = vsel %vm1010_vm0, %v828_v7, %v1074_v11  ;;  %v1170_v16 = vsel %vm1042_vm1, %v956_v8, %v1106_v12  ;;  %v831_v18 = vadd.f32 %v1739_v17, %v830_v13  ;;  %v959_v19 = vadd.f32 %v1739_v17, %v958_v14 }
 0x172   : > { %1202 = vst [vmem:[%s1748_s28 + $0xc0] sm:$0xff] %v1138_v15  ;;  %1234 = vst [vmem:[%s1748_s28 + $0x1c0] sm:$0xff] %v1170_v16  ;;  %v832_v20 = vpop.f32.mrf.mxu0  ;;  %v960_v21 = vpop.f32.mrf.mxu1 }
 0x173   : > { %vm1011_vm2 = vcmp.ge.f32.partialorder %v831_v18, 0.0  ;;  %v1075_v22 = vmul.f32 0.1, %v831_v18  ;;  %vm1043_vm3 = vcmp.ge.f32.partialorder %v959_v19, 0.0  ;;  %v1107_v23 = vmul.f32 0.1, %v959_v19 }
 0x174   : > { %v835_v24 = vpop.f32.mrf.mxu0  ;;  %v963_v25 = vpop.f32.mrf.mxu1 }
 0x175   : > { %v1139_v26 = vsel %vm1011_vm2, %v831_v18, %v1075_v22  ;;  %v1171_v27 = vsel %vm1043_vm3, %v959_v19, %v1107_v23  ;;  %v836_v28 = vadd.f32 %v1739_v17, %v835_v24  ;;  %v964_v29 = vadd.f32 %v1739_v17, %v963_v25 }
 0x176   : > { %1203 = vst [vmem:[%s1748_s28 + $0xc8] sm:$0xff] %v1139_v26  ;;  %1235 = vst [vmem:[%s1748_s28 + $0x1c8] sm:$0xff] %v1171_v27  ;;  %v837_v30 = vpop.f32.mrf.mxu0  ;;  %v965_v31 = vpop.f32.mrf.mxu1 }
 0x177   : > { %vm1012_vm4 = vcmp.ge.f32.partialorder %v836_v28, 0.0  ;;  %v1076_v32 = vmul.f32 0.1, %v836_v28  ;;  %vm1044_vm5 = vcmp.ge.f32.partialorder %v964_v29, 0.0  ;;  %v1108_v33 = vmul.f32 0.1, %v964_v29 }
 0x178   : > { %v838_v34 = vpop.f32.mrf.mxu0  ;;  %v966_v35 = vpop.f32.mrf.mxu1 }
 0x179   : > { %v1140_v36 = vsel %vm1012_vm4, %v836_v28, %v1076_v32  ;;  %v1172_v37 = vsel %vm1044_vm5, %v964_v29, %v1108_v33  ;;  %v839_v38 = vadd.f32 %v1739_v17, %v838_v34  ;;  %v967_v39 = vadd.f32 %v1739_v17, %v966_v35 }
 0x17a   : > { %1204 = vst [vmem:[%s1748_s28 + $0xd0] sm:$0xff] %v1140_v36  ;;  %1236 = vst [vmem:[%s1748_s28 + $0x1d0] sm:$0xff] %v1172_v37  ;;  %v840_v40 = vpop.f32.mrf.mxu0  ;;  %v968_v41 = vpop.f32.mrf.mxu1 }
 0x17b   : > { %vm1013_vm6 = vcmp.ge.f32.partialorder %v839_v38, 0.0  ;;  %v1077_v42 = vmul.f32 0.1, %v839_v38  ;;  %vm1045_vm7 = vcmp.ge.f32.partialorder %v967_v39, 0.0  ;;  %v1109_v43 = vmul.f32 0.1, %v967_v39 }
 0x17c   : > { %v843_v44 = vpop.f32.mrf.mxu0  ;;  %v971_v45 = vpop.f32.mrf.mxu1 }
 0x17d   : > { %v1141_v46 = vsel %vm1013_vm6, %v839_v38, %v1077_v42  ;;  %v1173_v47 = vsel %vm1045_vm7, %v967_v39, %v1109_v43  ;;  %v844_v48 = vadd.f32 %v1739_v17, %v843_v44  ;;  %v972_v49 = vadd.f32 %v1739_v17, %v971_v45 }
 0x17e   : > { %1205 = vst [vmem:[%s1748_s28 + $0xd8] sm:$0xff] %v1141_v46  ;;  %1237 = vst [vmem:[%s1748_s28 + $0x1d8] sm:$0xff] %v1173_v47  ;;  %v845_v50 = vpop.f32.mrf.mxu0  ;;  %v973_v51 = vpop.f32.mrf.mxu1 }
 0x17f   : > { %vm1014_vm8 = vcmp.ge.f32.partialorder %v844_v48, 0.0  ;;  %v1078_v52 = vmul.f32 0.1, %v844_v48  ;;  %vm1046_vm9 = vcmp.ge.f32.partialorder %v972_v49, 0.0  ;;  %v1110_v53 = vmul.f32 0.1, %v972_v49 }
 0x180   : > { %v846_v54 = vpop.f32.mrf.mxu0  ;;  %v974_v55 = vpop.f32.mrf.mxu1 }
 0x181   : > { %v1142_v56 = vsel %vm1014_vm8, %v844_v48, %v1078_v52  ;;  %v1174_v57 = vsel %vm1046_vm9, %v972_v49, %v1110_v53  ;;  %v847_v58 = vadd.f32 %v1739_v17, %v846_v54  ;;  %v975_v59 = vadd.f32 %v1739_v17, %v974_v55 }
 0x182   : > { %1206 = vst [vmem:[%s1748_s28 + $0xe0] sm:$0xff] %v1142_v56  ;;  %1238 = vst [vmem:[%s1748_s28 + $0x1e0] sm:$0xff] %v1174_v57  ;;  %v848_v60 = vpop.f32.mrf.mxu0  ;;  %v976_v61 = vpop.f32.mrf.mxu1 }
 0x183   : > { %vm1015_vm10 = vcmp.ge.f32.partialorder %v847_v58, 0.0  ;;  %v1079_v62 = vmul.f32 0.1, %v847_v58  ;;  %vm1047_vm11 = vcmp.ge.f32.partialorder %v975_v59, 0.0  ;;  %v1111_v63 = vmul.f32 0.1, %v975_v59 }
 0x184   : > { %v851_v0 = vpop.f32.mrf.mxu0  ;;  %v979_v1 = vpop.f32.mrf.mxu1 }
 0x185   : > { %v1143_v2 = vsel %vm1015_vm10, %v847_v58, %v1079_v62  ;;  %v1175_v3 = vsel %vm1047_vm11, %v975_v59, %v1111_v63  ;;  %v852_v4 = vadd.f32 %v1739_v17, %v851_v0  ;;  %v980_v5 = vadd.f32 %v1739_v17, %v979_v1 }
 0x186   : > { %1207 = vst [vmem:[%s1748_s28 + $0xe8] sm:$0xff] %v1143_v2  ;;  %1239 = vst [vmem:[%s1748_s28 + $0x1e8] sm:$0xff] %v1175_v3  ;;  %v853_v6 = vpop.f32.mrf.mxu0  ;;  %v981_v7 = vpop.f32.mrf.mxu1 }
 0x187   : > { %vm1016_vm12 = vcmp.ge.f32.partialorder %v852_v4, 0.0  ;;  %v1080_v8 = vmul.f32 0.1, %v852_v4  ;;  %vm1048_vm13 = vcmp.ge.f32.partialorder %v980_v5, 0.0  ;;  %v1112_v9 = vmul.f32 0.1, %v980_v5 }
 0x188   : > { %v854_v10 = vpop.f32.mrf.mxu0  ;;  %v982_v11 = vpop.f32.mrf.mxu1 }
 0x189   : > { %v1144_v12 = vsel %vm1016_vm12, %v852_v4, %v1080_v8  ;;  %v1176_v13 = vsel %vm1048_vm13, %v980_v5, %v1112_v9  ;;  %v855_v14 = vadd.f32 %v1739_v17, %v854_v10  ;;  %v983_v15 = vadd.f32 %v1739_v17, %v982_v11 }
 0x18a   : > { %1208 = vst [vmem:[%s1748_s28 + $0xf0] sm:$0xff] %v1144_v12  ;;  %1240 = vst [vmem:[%s1748_s28 + $0x1f0] sm:$0xff] %v1176_v13  ;;  %v856_v16 = vpop.f32.mrf.mxu0  ;;  %v984_v18 = vpop.f32.mrf.mxu1 }
 0x18b   : > { %vm1017_vm14 = vcmp.ge.f32.partialorder %v855_v14, 0.0  ;;  %v1081_v19 = vmul.f32 0.1, %v855_v14  ;;  %vm1049_vm15 = vcmp.ge.f32.partialorder %v983_v15, 0.0  ;;  %v1113_v20 = vmul.f32 0.1, %v983_v15 }
 0x18d   : > { %v1145_v21 = vsel %vm1017_vm14, %v855_v14, %v1081_v19  ;;  %v1177_v22 = vsel %vm1049_vm15, %v983_v15, %v1113_v20 }
 0x18e   : > { %1209 = vst [vmem:[%s1748_s28 + $0xf8] sm:$0xff] %v1145_v21  ;;  %1241 = vst [vmem:[%s1748_s28 + $0x1f8] sm:$0xff] %v1177_v22 }
 0x18f PF: > { %s13_s12 = sadd.s32 1, %s1551_s12  }
 0x190   : > { %p10_p4 = scmp.ge.s32.totalorder %s13_s12, 4  }
 0x192   :  { %12 = sbr.rel (!%p10_p4) target bundleno = 1 (0x1), region = 62 }

// kernel: forward_pallas.13
= control target key start
LH: loop header
LB: loop body
LE: loop exit
PB: predicated region body
PF: predicated region fallthrough
CT: control target
= control target key end

     0   :  { %s828_s12 = smov 0   ;;  %s957_s0 = inlined_call_operand.vmem [shape: bf16[256,256], index: 0, kind: input, shape index: {}]   ;;  %s958_s1 = inlined_call_operand.vmem [shape: bf16[256,128], index: 1, kind: input, shape index: {}]   ;;  %s959_s2 = inlined_call_operand.vmem [shape: f32[1,128], index: 2, kind: input, shape index: {}]   ;;  %s960_s3 = inlined_call_operand.vmem [shape: f32[256,128], index: 3, kind: output, shape index: {}]  }
   0x1 LB: > { %s626_s13 = sadd.s32 4294967295, %s806_s12   ;;  %p630_p0 = scmp.ge.s32.totalorder %s806_s12, 1  ;;  %s806_s12 = sphi %s828_s12, %s13_s12  }
   0x2   : > { %p139_p1 = scmp.lt.s32.totalorder %s806_s12, 3 }
   0x4   : > { %p140_p2 = pnand %p630_p0, %p139_p1 }
   0x5   : > { %s631_s16 = sshll.u32 (!%p140_p2), %s626_s13, 4 }
   0x6   : > { %143 = sbr.rel (%p140_p2) target bundleno = 276 (0x114), region = 32  ;;  %p165_p3 = scmp.lt.s32.totalorder (!%p140_p2), %s631_s16, 31 }
   0xb   : > { %v760_v0 = vld [vmem:[%s958_s1 + $0x78] sm:$0xff]   ;;  %v762_v2 = vld [vmem:[%s958_s1 + $0x70] sm:$0xff]   ;;  %v764_v4 = vld [vmem:[%s958_s1 + $0x68] sm:$0xff]   ;;  %s962_s16 = smov (!%p165_p3, %s631_s16), 31 }
   0xc   : > { %v761_v1 = vld [vmem:[%s958_s1 + $0x38] sm:$0xff]   ;;  %672 = vmatprep.subr.bf16.mxu0 %v760_v0  ;;  %736 = vmatprep.subr.bf16.mxu1 %v760_v0  ;;  %v763_v3 = vld [vmem:[%s958_s1 + $0x30] sm:$0xff]   ;;  %v765_v5 = vld [vmem:[%s958_s1 + $0x28] sm:$0xff]   ;;  %s671_s4 = sshll.u32 %s962_s16, 3 }
   0xd   : > { %673 = vmatpush3.bf16.msra.mxu0 %v761_v1  ;;  %744 = vmatpush3.bf16.msra.mxu1 %v761_v1  ;;  %v766_v6 = vld [vmem:[%s958_s1 + $0x60] sm:$0xff]   ;;  %v768_v8 = vld [vmem:[%s958_s1 + $0x58] sm:$0xff]   ;;  %s871_s9 = scalar_lea.vmem %s957_s0, %s671_s4  ;;  %v770_v10 = vld [vmem:[%s958_s1 + $0x50] sm:$0xff]   ;;  %s922_s30 = scalar_lea.vmem %s960_s3, %s671_s4 }
   0xe   : > { %674 = vmatprep.subr.bf16.mxu0 %v762_v2  ;;  %737 = vmatprep.subr.bf16.mxu1 %v762_v2  ;;  %v767_v7 = vld [vmem:[%s958_s1 + $0x20] sm:$0xff]   ;;  %v769_v9 = vld [vmem:[%s958_s1 + $0x18] sm:$0xff]   ;;  %v771_v13 = vld [vmem:[%s958_s1 + $0x10] sm:$0xff]  }
   0xf   : > { %v778_v11 = vld [vmem:[%s871_s9 + $0x4] ss:$8 sps:$4 sm:$0xff]   ;;  %v776_v18 = vld [vmem:[%s871_s9] ss:$8 sps:$4 sm:$0xff]   ;;  %v782_v20 = vld [vmem:[%s871_s9 + $0x14] ss:$8 sps:$4 sm:$0xff]  }
  0x10   : > { %v781_v12 = vld [vmem:[%s871_s9 + $0x44] ss:$8 sps:$4 sm:$0xff]   ;;  %441 = vmatprep.mubr.bf16.mxu0 %v778_v11  ;;  %v779_v19 = vld [vmem:[%s871_s9 + $0x40] ss:$8 sps:$4 sm:$0xff]   ;;  %v784_v21 = vld [vmem:[%s871_s9 + $0x54] ss:$8 sps:$4 sm:$0xff]  }
  0x11   : > { %675 = vmatpush3.bf16.msra.mxu0 %v763_v3  ;;  %745 = vmatpush3.bf16.msra.mxu1 %v763_v3  ;;  %v772_v14 = vld [vmem:[%s958_s1 + $0x48] sm:$0xff]   ;;  %v774_v16 = vld [vmem:[%s958_s1 + $0x40] sm:$0xff]   ;;  %v786_v22 = vld [vmem:[%s871_s9 + $0x10] ss:$8 sps:$4 sm:$0xff]  }
  0x12   : > { %676 = vmatprep.subr.bf16.mxu0 %v764_v4  ;;  %738 = vmatprep.subr.bf16.mxu1 %v764_v4  ;;  %v773_v15 = vld [vmem:[%s958_s1 + $0x8] sm:$0xff]   ;;  %v775_v17 = vld [vmem:[%s958_s1] sm:$0xff]   ;;  %v787_v23 = vld [vmem:[%s871_s9 + $0x50] ss:$8 sps:$4 sm:$0xff]  }
  0x13   : > { %473 = vmatprep.mubr.bf16.mxu1 %v781_v12  ;;  %v788_v24 = vld [vmem:[%s871_s9 + $0x24] ss:$8 sps:$4 sm:$0xff]   ;;  %v792_v26 = vld [vmem:[%s871_s9 + $0x20] ss:$8 sps:$4 sm:$0xff]   ;;  %v794_v28 = vld [vmem:[%s871_s9 + $0x34] ss:$8 sps:$4 sm:$0xff]  }
  0x14   : > { %v790_v25 = vld [vmem:[%s871_s9 + $0x64] ss:$8 sps:$4 sm:$0xff]   ;;  %v793_v27 = vld [vmem:[%s871_s9 + $0x60] ss:$8 sps:$4 sm:$0xff]   ;;  %v796_v29 = vld [vmem:[%s871_s9 + $0x74] ss:$8 sps:$4 sm:$0xff]  }
  0x15   : > { %677 = vmatpush3.bf16.msra.mxu0 %v765_v5  ;;  %746 = vmatpush3.bf16.msra.mxu1 %v765_v5  ;;  %v798_v30 = vld [vmem:[%s871_s9 + $0x30] ss:$8 sps:$4 sm:$0xff]   ;;  %v913_v34 = vld [vmem:[%s959_s2] ss:$0 sm:$0xff] }
  0x16   : > { %678 = vmatprep.subr.bf16.mxu0 %v766_v6  ;;  %739 = vmatprep.subr.bf16.mxu1 %v766_v6  ;;  %v799_v31 = vld [vmem:[%s871_s9 + $0x70] ss:$8 sps:$4 sm:$0xff]  }
  0x19   : > { %679 = vmatpush3.bf16.msra.mxu0 %v767_v7  ;;  %747 = vmatpush3.bf16.msra.mxu1 %v767_v7 }
  0x1a   : > { %680 = vmatprep.subr.bf16.mxu0 %v768_v8  ;;  %740 = vmatprep.subr.bf16.mxu1 %v768_v8 }
  0x1d   : > { %681 = vmatpush3.bf16.msra.mxu0 %v769_v9  ;;  %748 = vmatpush3.bf16.msra.mxu1 %v769_v9 }
  0x1e   : > { %682 = vmatprep.subr.bf16.mxu0 %v770_v10  ;;  %741 = vmatprep.subr.bf16.mxu1 %v770_v10 }
  0x21   : > { %683 = vmatpush3.bf16.msra.mxu0 %v771_v13  ;;  %749 = vmatpush3.bf16.msra.mxu1 %v771_v13 }
  0x22   : > { %684 = vmatprep.subr.bf16.mxu0 %v772_v14  ;;  %742 = vmatprep.subr.bf16.mxu1 %v772_v14 }
  0x25   : > { %685 = vmatpush3.bf16.msra.mxu0 %v773_v15  ;;  %750 = vmatpush3.bf16.msra.mxu1 %v773_v15 }
  0x26   : > { %686 = vmatprep.subr.bf16.mxu0 %v774_v16  ;;  %743 = vmatprep.subr.bf16.mxu1 %v774_v16 }
  0x29   : > { %687 = vmatpush3.bf16.msra.mxu0 %v775_v17  ;;  %751 = vmatpush3.bf16.msra.mxu1 %v775_v17 }
  0x2c   : > { %442 = vmatmul.mubr.bf16.vlgmr.msra.gmra.mxu0 %v776_v18  ;;  %474 = vmatmul.mubr.bf16.vlgmr.msra.gmra.mxu1 %v779_v19 }
  0x2d   : > { %449 = vmatprep.mubr.bf16.mxu0 %v782_v20  ;;  %481 = vmatprep.mubr.bf16.mxu1 %v784_v21 }
  0x34   : > { %450 = vmatmul.mubr.bf16.gmra.mxu0 %v786_v22  ;;  %482 = vmatmul.mubr.bf16.gmra.mxu1 %v787_v23 }
  0x35   : > { %457 = vmatprep.mubr.bf16.mxu0 %v788_v24  ;;  %489 = vmatprep.mubr.bf16.mxu1 %v790_v25 }
  0x3c   : > { %458 = vmatmul.mubr.bf16.gmra.mxu0 %v792_v26  ;;  %490 = vmatmul.mubr.bf16.gmra.mxu1 %v793_v27 }
  0x3d   : > { %465 = vmatprep.mubr.bf16.mxu0 %v794_v28  ;;  %497 = vmatprep.mubr.bf16.mxu1 %v796_v29 }
  0x44   : > { %466 = vmatmul.mubr.bf16.gmra.mxu0 %v798_v30  ;;  %498 = vmatmul.mubr.bf16.gmra.mxu1 %v799_v31 }
  0xec   : > { %v688_v32 = vpop.f32.mrf.mxu0  ;;  %v712_v33 = vpop.f32.mrf.mxu1 }
  0xee   : > { %v689_v35 = vpop.f32.mrf.mxu0  ;;  %v713_v36 = vpop.f32.mrf.mxu1 }
  0xef   : > { %v690_v37 = vadd.f32 %v689_v35, %v688_v32  ;;  %v714_v38 = vadd.f32 %v713_v36, %v712_v33 }
  0xf0   : > { %v691_v39 = vpop.f32.mrf.mxu0  ;;  %v715_v40 = vpop.f32.mrf.mxu1 }
  0xf1   : > { %v444_v41 = vadd.f32 %v690_v37, %v913_v34  ;;  %v476_v42 = vadd.f32 %v714_v38, %v913_v34 }
  0xf2   : > { %v692_v43 = vpop.f32.mrf.mxu0  ;;  %v716_v44 = vpop.f32.mrf.mxu1 }
  0xf3   : > { %vm506_vm0 = vcmp.ge.f32.partialorder %v444_v41, 0.0  ;;  %v522_v45 = vmul.f32 0.1, %v444_v41  ;;  %vm514_vm1 = vcmp.ge.f32.partialorder %v476_v42, 0.0  ;;  %v530_v46 = vmul.f32 0.1, %v476_v42 }
  0xf4   : > { %v693_v47 = vadd.f32 %v692_v43, %v691_v39  ;;  %v717_v48 = vadd.f32 %v716_v44, %v715_v40  ;;  %v694_v49 = vpop.f32.mrf.mxu0  ;;  %v718_v50 = vpop.f32.mrf.mxu1 }
  0xf5   : > { %v538_v51 = vsel %vm506_vm0, %v444_v41, %v522_v45  ;;  %v546_v52 = vsel %vm514_vm1, %v476_v42, %v530_v46 }
  0xf6   : > { %554 = vst [vmem:[%s922_s30] sm:$0xff] %v538_v51  ;;  %562 = vst [vmem:[%s922_s30 + $0x40] sm:$0xff] %v546_v52  ;;  %v447_v53 = vadd.f32 %v693_v47, %v913_v34  ;;  %v479_v54 = vadd.f32 %v717_v48, %v913_v34  ;;  %v695_v55 = vpop.f32.mrf.mxu0  ;;  %v719_v56 = vpop.f32.mrf.mxu1 }
  0xf7   : > { %v696_v57 = vadd.f32 %v695_v55, %v694_v49  ;;  %v720_v58 = vadd.f32 %v719_v56, %v718_v50 }
  0xf8   : > { %vm507_vm2 = vcmp.ge.f32.partialorder %v447_v53, 0.0  ;;  %v523_v59 = vmul.f32 0.1, %v447_v53  ;;  %vm515_vm3 = vcmp.ge.f32.partialorder %v479_v54, 0.0  ;;  %v531_v60 = vmul.f32 0.1, %v479_v54  ;;  %v697_v61 = vpop.f32.mrf.mxu0  ;;  %v721_v62 = vpop.f32.mrf.mxu1 }
  0xf9   : > { %v452_v63 = vadd.f32 %v696_v57, %v913_v34  ;;  %v484_v0 = vadd.f32 %v720_v58, %v913_v34 }
  0xfa   : > { %v539_v1 = vsel %vm507_vm2, %v447_v53, %v523_v59  ;;  %v547_v2 = vsel %vm515_vm3, %v479_v54, %v531_v60  ;;  %v698_v3 = vpop.f32.mrf.mxu0  ;;  %v722_v4 = vpop.f32.mrf.mxu1 }
  0xfb   : > { %555 = vst [vmem:[%s922_s30 + $0x8] sm:$0xff] %v539_v1  ;;  %563 = vst [vmem:[%s922_s30 + $0x48] sm:$0xff] %v547_v2  ;;  %vm508_vm4 = vcmp.ge.f32.partialorder %v452_v63, 0.0  ;;  %v524_v5 = vmul.f32 0.1, %v452_v63  ;;  %vm516_vm5 = vcmp.ge.f32.partialorder %v484_v0, 0.0  ;;  %v699_v7 = vadd.f32 %v698_v3, %v697_v61 }
  0xfc   : > { %v532_v6 = vmul.f32 0.1, %v484_v0  ;;  %v723_v8 = vadd.f32 %v722_v4, %v721_v62  ;;  %v700_v9 = vpop.f32.mrf.mxu0  ;;  %v724_v10 = vpop.f32.mrf.mxu1 }
  0xfd   : > { %v540_v11 = vsel %vm508_vm4, %v452_v63, %v524_v5  ;;  %v455_v13 = vadd.f32 %v699_v7, %v913_v34 }
  0xfe   : > { %v548_v12 = vsel %vm516_vm5, %v484_v0, %v532_v6  ;;  %556 = vst [vmem:[%s922_s30 + $0x10] sm:$0xff] %v540_v11  ;;  %v487_v14 = vadd.f32 %v723_v8, %v913_v34  ;;  %v701_v15 = vpop.f32.mrf.mxu0  ;;  %v725_v16 = vpop.f32.mrf.mxu1 }
  0xff   : > { %564 = vst [vmem:[%s922_s30 + $0x50] sm:$0xff] %v548_v12  ;;  %v702_v17 = vadd.f32 %v701_v15, %v700_v9  ;;  %v726_v18 = vadd.f32 %v725_v16, %v724_v10  ;;  %vm509_vm6 = vcmp.ge.f32.partialorder %v455_v13, 0.0  ;;  %v525_v19 = vmul.f32 0.1, %v455_v13 }
 0x100   : > { %vm517_vm7 = vcmp.ge.f32.partialorder %v487_v14, 0.0  ;;  %v533_v20 = vmul.f32 0.1, %v487_v14  ;;  %v703_v21 = vpop.f32.mrf.mxu0  ;;  %v727_v22 = vpop.f32.mrf.mxu1 }
 0x101   : > { %v460_v23 = vadd.f32 %v702_v17, %v913_v34  ;;  %v492_v24 = vadd.f32 %v726_v18, %v913_v34  ;;  %v541_v25 = vsel %vm509_vm6, %v455_v13, %v525_v19 }
 0x102   : > { %v549_v26 = vsel %vm517_vm7, %v487_v14, %v533_v20  ;;  %v704_v27 = vpop.f32.mrf.mxu0  ;;  %v728_v28 = vpop.f32.mrf.mxu1  ;;  %557 = vst [vmem:[%s922_s30 + $0x18] sm:$0xff] %v541_v25 }
 0x103   : > { %565 = vst [vmem:[%s922_s30 + $0x58] sm:$0xff] %v549_v26  ;;  %vm510_vm8 = vcmp.ge.f32.partialorder %v460_v23, 0.0  ;;  %v526_v29 = vmul.f32 0.1, %v460_v23  ;;  %vm518_vm9 = vcmp.ge.f32.partialorder %v492_v24, 0.0  ;;  %v705_v31 = vadd.f32 %v704_v27, %v703_v21 }
 0x104   : > { %v534_v30 = vmul.f32 0.1, %v492_v24  ;;  %v729_v32 = vadd.f32 %v728_v28, %v727_v22  ;;  %v706_v33 = vpop.f32.mrf.mxu0  ;;  %v730_v35 = vpop.f32.mrf.mxu1 }
 0x105   : > { %v542_v36 = vsel %vm510_vm8, %v460_v23, %v526_v29  ;;  %v463_v38 = vadd.f32 %v705_v31, %v913_v34 }
 0x106   : > { %v550_v37 = vsel %vm518_vm9, %v492_v24, %v534_v30  ;;  %558 = vst [vmem:[%s922_s30 + $0x20] sm:$0xff] %v542_v36  ;;  %v495_v39 = vadd.f32 %v729_v32, %v913_v34  ;;  %v707_v40 = vpop.f32.mrf.mxu0  ;;  %v731_v41 = vpop.f32.mrf.mxu1 }
 0x107   : > { %566 = vst [vmem:[%s922_s30 + $0x60] sm:$0xff] %v550_v37  ;;  %v708_v42 = vadd.f32 %v707_v40, %v706_v33  ;;  %v732_v43 = vadd.f32 %v731_v41, %v730_v35  ;;  %vm511_vm10 = vcmp.ge.f32.partialorder %v463_v38, 0.0  ;;  %v527_v44 = vmul.f32 0.1, %v463_v38 }
 0x108   : > { %vm519_vm11 = vcmp.ge.f32.partialorder %v495_v39, 0.0  ;;  %v535_v45 = vmul.f32 0.1, %v495_v39  ;;  %v709_v46 = vpop.f32.mrf.mxu0  ;;  %v733_v47 = vpop.f32.mrf.mxu1 }
 0x109   : > { %v468_v48 = vadd.f32 %v708_v42, %v913_v34  ;;  %v500_v49 = vadd.f32 %v732_v43, %v913_v34  ;;  %v543_v50 = vsel %vm511_vm10, %v463_v38, %v527_v44 }
 0x10a   : > { %v551_v51 = vsel %vm519_vm11, %v495_v39, %v535_v45  ;;  %v710_v52 = vpop.f32.mrf.mxu0  ;;  %v734_v53 = vpop.f32.mrf.mxu1  ;;  %559 = vst [vmem:[%s922_s30 + $0x28] sm:$0xff] %v543_v50 }
 0x10b   : > { %567 = vst [vmem:[%s922_s30 + $0x68] sm:$0xff] %v551_v51  ;;  %vm512_vm12 = vcmp.ge.f32.partialorder %v468_v48, 0.0  ;;  %v528_v54 = vmul.f32 0.1, %v468_v48  ;;  %vm520_vm13 = vcmp.ge.f32.partialorder %v500_v49, 0.0  ;;  %v711_v56 = vadd.f32 %v710_v52, %v709_v46 }
 0x10c   : > { %v536_v55 = vmul.f32 0.1, %v500_v49  ;;  %v735_v57 = vadd.f32 %v734_v53, %v733_v47 }
 0x10d   : > { %v544_v58 = vsel %vm512_vm12, %v468_v48, %v528_v54  ;;  %v471_v60 = vadd.f32 %v711_v56, %v913_v34 }
 0x10e   : > { %v552_v59 = vsel %vm520_vm13, %v500_v49, %v536_v55  ;;  %560 = vst [vmem:[%s922_s30 + $0x30] sm:$0xff] %v544_v58  ;;  %v503_v61 = vadd.f32 %v735_v57, %v913_v34 }
 0x10f   : > { %568 = vst [vmem:[%s922_s30 + $0x70] sm:$0xff] %v552_v59  ;;  %vm513_vm14 = vcmp.ge.f32.partialorder %v471_v60, 0.0  ;;  %v529_v62 = vmul.f32 0.1, %v471_v60 }
 0x110   : > { %vm521_vm15 = vcmp.ge.f32.partialorder %v503_v61, 0.0  ;;  %v537_v63 = vmul.f32 0.1, %v503_v61 }
 0x111   : > { %v545_v0 = vsel %vm513_vm14, %v471_v60, %v529_v62 }
 0x112   : > { %v553_v1 = vsel %vm521_vm15, %v503_v61, %v537_v63  ;;  %561 = vst [vmem:[%s922_s30 + $0x38] sm:$0xff] %v545_v0 }
 0x113   : > { %569 = vst [vmem:[%s922_s30 + $0x78] sm:$0xff] %v553_v1 }
 0x114 PF: > { %s13_s12 = sadd.s32 1, %s806_s12  }
 0x115   : > { %p10_p4 = scmp.ge.s32.totalorder %s13_s12, 4  }
 0x117   :  { %12 = sbr.rel (!%p10_p4) target bundleno = 1 (0x1), region = 62 }

// kernel: forward_pallas.14
= control target key start
LH: loop header
LB: loop body
LE: loop exit
PB: predicated region body
PF: predicated region fallthrough
CT: control target
= control target key end

     0   :  { %s796_s12 = smov 0   ;;  %s925_s0 = inlined_call_operand.vmem [shape: bf16[256,256], index: 0, kind: input, shape index: {}]   ;;  %s926_s1 = inlined_call_operand.vmem [shape: bf16[256,128], index: 1, kind: input, shape index: {}]   ;;  %s927_s2 = inlined_call_operand.vmem [shape: f32[1,128], index: 2, kind: input, shape index: {}]   ;;  %s928_s3 = inlined_call_operand.vmem [shape: f32[256,128], index: 3, kind: output, shape index: {}]  }
   0x1 LB: > { %s594_s13 = sadd.s32 4294967295, %s774_s12   ;;  %p598_p0 = scmp.ge.s32.totalorder %s774_s12, 1  ;;  %s774_s12 = sphi %s796_s12, %s13_s12  }
   0x2   : > { %p139_p1 = scmp.lt.s32.totalorder %s774_s12, 3 }
   0x4   : > { %p140_p2 = pnand %p598_p0, %p139_p1 }
   0x5   : > { %s599_s16 = sshll.u32 (!%p140_p2), %s594_s13, 4 }
   0x6   : > { %143 = sbr.rel (%p140_p2) target bundleno = 274 (0x112), region = 32  ;;  %p165_p3 = scmp.lt.s32.totalorder (!%p140_p2), %s599_s16, 31 }
   0xb   : > { %v728_v0 = vld [vmem:[%s926_s1 + $0x78] sm:$0xff]   ;;  %v730_v2 = vld [vmem:[%s926_s1 + $0x70] sm:$0xff]   ;;  %v732_v4 = vld [vmem:[%s926_s1 + $0x68] sm:$0xff]   ;;  %s930_s16 = smov (!%p165_p3, %s599_s16), 31 }
   0xc   : > { %v729_v1 = vld [vmem:[%s926_s1 + $0x38] sm:$0xff]   ;;  %640 = vmatprep.subr.bf16.mxu0 %v728_v0  ;;  %704 = vmatprep.subr.bf16.mxu1 %v728_v0  ;;  %v731_v3 = vld [vmem:[%s926_s1 + $0x30] sm:$0xff]   ;;  %v733_v5 = vld [vmem:[%s926_s1 + $0x28] sm:$0xff]   ;;  %s639_s4 = sshll.u32 %s930_s16, 3 }
   0xd   : > { %641 = vmatpush3.bf16.msra.mxu0 %v729_v1  ;;  %712 = vmatpush3.bf16.msra.mxu1 %v729_v1  ;;  %v734_v6 = vld [vmem:[%s926_s1 + $0x60] sm:$0xff]   ;;  %v736_v8 = vld [vmem:[%s926_s1 + $0x58] sm:$0xff]   ;;  %s839_s9 = scalar_lea.vmem %s925_s0, %s639_s4  ;;  %v738_v10 = vld [vmem:[%s926_s1 + $0x50] sm:$0xff]   ;;  %s890_s30 = scalar_lea.vmem %s928_s3, %s639_s4 }
   0xe   : > { %642 = vmatprep.subr.bf16.mxu0 %v730_v2  ;;  %705 = vmatprep.subr.bf16.mxu1 %v730_v2  ;;  %v735_v7 = vld [vmem:[%s926_s1 + $0x20] sm:$0xff]   ;;  %v737_v9 = vld [vmem:[%s926_s1 + $0x18] sm:$0xff]   ;;  %v739_v13 = vld [vmem:[%s926_s1 + $0x10] sm:$0xff]  }
   0xf   : > { %v746_v11 = vld [vmem:[%s839_s9 + $0x4] ss:$8 sps:$4 sm:$0xff]   ;;  %v744_v18 = vld [vmem:[%s839_s9] ss:$8 sps:$4 sm:$0xff]   ;;  %v750_v20 = vld [vmem:[%s839_s9 + $0x14] ss:$8 sps:$4 sm:$0xff]  }
  0x10   : > { %v749_v12 = vld [vmem:[%s839_s9 + $0x44] ss:$8 sps:$4 sm:$0xff]   ;;  %441 = vmatprep.mubr.bf16.mxu0 %v746_v11  ;;  %v747_v19 = vld [vmem:[%s839_s9 + $0x40] ss:$8 sps:$4 sm:$0xff]   ;;  %v752_v21 = vld [vmem:[%s839_s9 + $0x54] ss:$8 sps:$4 sm:$0xff]  }
  0x11   : > { %643 = vmatpush3.bf16.msra.mxu0 %v731_v3  ;;  %713 = vmatpush3.bf16.msra.mxu1 %v731_v3  ;;  %v740_v14 = vld [vmem:[%s926_s1 + $0x48] sm:$0xff]   ;;  %v742_v16 = vld [vmem:[%s926_s1 + $0x40] sm:$0xff]   ;;  %v754_v22 = vld [vmem:[%s839_s9 + $0x10] ss:$8 sps:$4 sm:$0xff]  }
  0x12   : > { %644 = vmatprep.subr.bf16.mxu0 %v732_v4  ;;  %706 = vmatprep.subr.bf16.mxu1 %v732_v4  ;;  %v741_v15 = vld [vmem:[%s926_s1 + $0x8] sm:$0xff]   ;;  %v743_v17 = vld [vmem:[%s926_s1] sm:$0xff]   ;;  %v755_v23 = vld [vmem:[%s839_s9 + $0x50] ss:$8 sps:$4 sm:$0xff]  }
  0x13   : > { %473 = vmatprep.mubr.bf16.mxu1 %v749_v12  ;;  %v756_v24 = vld [vmem:[%s839_s9 + $0x24] ss:$8 sps:$4 sm:$0xff]   ;;  %v760_v26 = vld [vmem:[%s839_s9 + $0x20] ss:$8 sps:$4 sm:$0xff]   ;;  %v762_v28 = vld [vmem:[%s839_s9 + $0x34] ss:$8 sps:$4 sm:$0xff]  }
  0x14   : > { %v758_v25 = vld [vmem:[%s839_s9 + $0x64] ss:$8 sps:$4 sm:$0xff]   ;;  %v761_v27 = vld [vmem:[%s839_s9 + $0x60] ss:$8 sps:$4 sm:$0xff]   ;;  %v764_v29 = vld [vmem:[%s839_s9 + $0x74] ss:$8 sps:$4 sm:$0xff]  }
  0x15   : > { %645 = vmatpush3.bf16.msra.mxu0 %v733_v5  ;;  %714 = vmatpush3.bf16.msra.mxu1 %v733_v5  ;;  %v766_v30 = vld [vmem:[%s839_s9 + $0x30] ss:$8 sps:$4 sm:$0xff]   ;;  %v881_v34 = vld [vmem:[%s927_s2] ss:$0 sm:$0xff] }
  0x16   : > { %646 = vmatprep.subr.bf16.mxu0 %v734_v6  ;;  %707 = vmatprep.subr.bf16.mxu1 %v734_v6  ;;  %v767_v31 = vld [vmem:[%s839_s9 + $0x70] ss:$8 sps:$4 sm:$0xff]  }
  0x19   : > { %647 = vmatpush3.bf16.msra.mxu0 %v735_v7  ;;  %715 = vmatpush3.bf16.msra.mxu1 %v735_v7 }
  0x1a   : > { %648 = vmatprep.subr.bf16.mxu0 %v736_v8  ;;  %708 = vmatprep.subr.bf16.mxu1 %v736_v8 }
  0x1d   : > { %649 = vmatpush3.bf16.msra.mxu0 %v737_v9  ;;  %716 = vmatpush3.bf16.msra.mxu1 %v737_v9 }
  0x1e   : > { %650 = vmatprep.subr.bf16.mxu0 %v738_v10  ;;  %709 = vmatprep.subr.bf16.mxu1 %v738_v10 }
  0x21   : > { %651 = vmatpush3.bf16.msra.mxu0 %v739_v13  ;;  %717 = vmatpush3.bf16.msra.mxu1 %v739_v13 }
  0x22   : > { %652 = vmatprep.subr.bf16.mxu0 %v740_v14  ;;  %710 = vmatprep.subr.bf16.mxu1 %v740_v14 }
  0x25   : > { %653 = vmatpush3.bf16.msra.mxu0 %v741_v15  ;;  %718 = vmatpush3.bf16.msra.mxu1 %v741_v15 }
  0x26   : > { %654 = vmatprep.subr.bf16.mxu0 %v742_v16  ;;  %711 = vmatprep.subr.bf16.mxu1 %v742_v16 }
  0x29   : > { %655 = vmatpush3.bf16.msra.mxu0 %v743_v17  ;;  %719 = vmatpush3.bf16.msra.mxu1 %v743_v17 }
  0x2c   : > { %442 = vmatmul.mubr.bf16.vlgmr.msra.gmra.mxu0 %v744_v18  ;;  %474 = vmatmul.mubr.bf16.vlgmr.msra.gmra.mxu1 %v747_v19 }
  0x2d   : > { %449 = vmatprep.mubr.bf16.mxu0 %v750_v20  ;;  %481 = vmatprep.mubr.bf16.mxu1 %v752_v21 }
  0x34   : > { %450 = vmatmul.mubr.bf16.gmra.mxu0 %v754_v22  ;;  %482 = vmatmul.mubr.bf16.gmra.mxu1 %v755_v23 }
  0x35   : > { %457 = vmatprep.mubr.bf16.mxu0 %v756_v24  ;;  %489 = vmatprep.mubr.bf16.mxu1 %v758_v25 }
  0x3c   : > { %458 = vmatmul.mubr.bf16.gmra.mxu0 %v760_v26  ;;  %490 = vmatmul.mubr.bf16.gmra.mxu1 %v761_v27 }
  0x3d   : > { %465 = vmatprep.mubr.bf16.mxu0 %v762_v28  ;;  %497 = vmatprep.mubr.bf16.mxu1 %v764_v29 }
  0x44   : > { %466 = vmatmul.mubr.bf16.gmra.mxu0 %v766_v30  ;;  %498 = vmatmul.mubr.bf16.gmra.mxu1 %v767_v31 }
  0xec   : > { %v656_v32 = vpop.f32.mrf.mxu0  ;;  %v680_v33 = vpop.f32.mrf.mxu1 }
  0xee   : > { %v657_v35 = vpop.f32.mrf.mxu0  ;;  %v681_v36 = vpop.f32.mrf.mxu1 }
  0xef   : > { %v658_v37 = vadd.f32 %v657_v35, %v656_v32  ;;  %v682_v38 = vadd.f32 %v681_v36, %v680_v33 }
  0xf0   : > { %v659_v39 = vpop.f32.mrf.mxu0  ;;  %v683_v40 = vpop.f32.mrf.mxu1 }
  0xf1   : > { %v444_v41 = vadd.f32 %v658_v37, %v881_v34  ;;  %v476_v42 = vadd.f32 %v682_v38, %v881_v34 }
  0xf2   : > { %v660_v43 = vpop.f32.mrf.mxu0  ;;  %v684_v44 = vpop.f32.mrf.mxu1 }
  0xf3   : > { %v506_v45 = vmax.f32 %v444_v41, 0.0  ;;  %v514_v46 = vmax.f32 %v476_v42, 0.0  ;;  %v661_v47 = vadd.f32 %v660_v43, %v659_v39  ;;  %v685_v48 = vadd.f32 %v684_v44, %v683_v40 }
  0xf4   : > { %v662_v49 = vpop.f32.mrf.mxu0  ;;  %v686_v50 = vpop.f32.mrf.mxu1 }
  0xf5   : > { %522 = vst [vmem:[%s890_s30] sm:$0xff] %v506_v45  ;;  %530 = vst [vmem:[%s890_s30 + $0x40] sm:$0xff] %v514_v46  ;;  %v447_v51 = vadd.f32 %v661_v47, %v881_v34  ;;  %v479_v52 = vadd.f32 %v685_v48, %v881_v34 }
  0xf6   : > { %v663_v53 = vpop.f32.mrf.mxu0  ;;  %v687_v54 = vpop.f32.mrf.mxu1 }
  0xf7   : > { %v507_v55 = vmax.f32 %v447_v51, 0.0  ;;  %v515_v56 = vmax.f32 %v479_v52, 0.0  ;;  %v664_v57 = vadd.f32 %v663_v53, %v662_v49  ;;  %v688_v58 = vadd.f32 %v687_v54, %v686_v50 }
  0xf8   : > { %v665_v59 = vpop.f32.mrf.mxu0  ;;  %v689_v60 = vpop.f32.mrf.mxu1 }
  0xf9   : > { %523 = vst [vmem:[%s890_s30 + $0x8] sm:$0xff] %v507_v55  ;;  %531 = vst [vmem:[%s890_s30 + $0x48] sm:$0xff] %v515_v56  ;;  %v452_v61 = vadd.f32 %v664_v57, %v881_v34  ;;  %v484_v62 = vadd.f32 %v688_v58, %v881_v34 }
  0xfa   : > { %v666_v63 = vpop.f32.mrf.mxu0  ;;  %v690_v0 = vpop.f32.mrf.mxu1 }
  0xfb   : > { %v508_v1 = vmax.f32 %v452_v61, 0.0  ;;  %v516_v2 = vmax.f32 %v484_v62, 0.0  ;;  %v667_v3 = vadd.f32 %v666_v63, %v665_v59  ;;  %v691_v4 = vadd.f32 %v690_v0, %v689_v60 }
  0xfc   : > { %v668_v5 = vpop.f32.mrf.mxu0  ;;  %v692_v6 = vpop.f32.mrf.mxu1 }
  0xfd   : > { %524 = vst [vmem:[%s890_s30 + $0x10] sm:$0xff] %v508_v1  ;;  %532 = vst [vmem:[%s890_s30 + $0x50] sm:$0xff] %v516_v2  ;;  %v455_v7 = vadd.f32 %v667_v3, %v881_v34  ;;  %v487_v8 = vadd.f32 %v691_v4, %v881_v34 }
  0xfe   : > { %v669_v9 = vpop.f32.mrf.mxu0  ;;  %v693_v10 = vpop.f32.mrf.mxu1 }
  0xff   : > { %v509_v11 = vmax.f32 %v455_v7, 0.0  ;;  %v517_v12 = vmax.f32 %v487_v8, 0.0  ;;  %v670_v13 = vadd.f32 %v669_v9, %v668_v5  ;;  %v694_v14 = vadd.f32 %v693_v10, %v692_v6 }
 0x100   : > { %v671_v15 = vpop.f32.mrf.mxu0  ;;  %v695_v16 = vpop.f32.mrf.mxu1 }
 0x101   : > { %525 = vst [vmem:[%s890_s30 + $0x18] sm:$0xff] %v509_v11  ;;  %533 = vst [vmem:[%s890_s30 + $0x58] sm:$0xff] %v517_v12  ;;  %v460_v17 = vadd.f32 %v670_v13, %v881_v34  ;;  %v492_v18 = vadd.f32 %v694_v14, %v881_v34 }
 0x102   : > { %v672_v19 = vpop.f32.mrf.mxu0  ;;  %v696_v20 = vpop.f32.mrf.mxu1 }
 0x103   : > { %v510_v21 = vmax.f32 %v460_v17, 0.0  ;;  %v518_v22 = vmax.f32 %v492_v18, 0.0  ;;  %v673_v23 = vadd.f32 %v672_v19, %v671_v15  ;;  %v697_v24 = vadd.f32 %v696_v20, %v695_v16 }
 0x104   : > { %v674_v25 = vpop.f32.mrf.mxu0  ;;  %v698_v26 = vpop.f32.mrf.mxu1 }
 0x105   : > { %526 = vst [vmem:[%s890_s30 + $0x20] sm:$0xff] %v510_v21  ;;  %534 = vst [vmem:[%s890_s30 + $0x60] sm:$0xff] %v518_v22  ;;  %v463_v27 = vadd.f32 %v673_v23, %v881_v34  ;;  %v495_v28 = vadd.f32 %v697_v24, %v881_v34 }
 0x106   : > { %v675_v29 = vpop.f32.mrf.mxu0  ;;  %v699_v30 = vpop.f32.mrf.mxu1 }
 0x107   : > { %v511_v31 = vmax.f32 %v463_v27, 0.0  ;;  %v519_v32 = vmax.f32 %v495_v28, 0.0  ;;  %v676_v33 = vadd.f32 %v675_v29, %v674_v25  ;;  %v700_v35 = vadd.f32 %v699_v30, %v698_v26 }
 0x108   : > { %v677_v36 = vpop.f32.mrf.mxu0  ;;  %v701_v37 = vpop.f32.mrf.mxu1 }
 0x109   : > { %527 = vst [vmem:[%s890_s30 + $0x28] sm:$0xff] %v511_v31  ;;  %535 = vst [vmem:[%s890_s30 + $0x68] sm:$0xff] %v519_v32  ;;  %v468_v38 = vadd.f32 %v676_v33, %v881_v34  ;;  %v500_v39 = vadd.f32 %v700_v35, %v881_v34 }
 0x10a   : > { %v678_v40 = vpop.f32.mrf.mxu0  ;;  %v702_v41 = vpop.f32.mrf.mxu1 }
 0x10b   : > { %v512_v42 = vmax.f32 %v468_v38, 0.0  ;;  %v520_v43 = vmax.f32 %v500_v39, 0.0  ;;  %v679_v44 = vadd.f32 %v678_v40, %v677_v36  ;;  %v703_v45 = vadd.f32 %v702_v41, %v701_v37 }
 0x10d   : > { %528 = vst [vmem:[%s890_s30 + $0x30] sm:$0xff] %v512_v42  ;;  %536 = vst [vmem:[%s890_s30 + $0x70] sm:$0xff] %v520_v43  ;;  %v471_v46 = vadd.f32 %v679_v44, %v881_v34  ;;  %v503_v47 = vadd.f32 %v703_v45, %v881_v34 }
 0x10f   : > { %v513_v48 = vmax.f32 %v471_v46, 0.0  ;;  %v521_v49 = vmax.f32 %v503_v47, 0.0 }
 0x111   : > { %529 = vst [vmem:[%s890_s30 + $0x38] sm:$0xff] %v513_v48  ;;  %537 = vst [vmem:[%s890_s30 + $0x78] sm:$0xff] %v521_v49 }
 0x112 PF: > { %s13_s12 = sadd.s32 1, %s774_s12  }
 0x113   : > { %p10_p4 = scmp.ge.s32.totalorder %s13_s12, 4  }
 0x115   :  { %12 = sbr.rel (!%p10_p4) target bundleno = 1 (0x1), region = 62 }

// kernel: forward_pallas.15
= control target key start
LH: loop header
LB: loop body
LE: loop exit
PB: predicated region body
PF: predicated region fallthrough
CT: control target
= control target key end

     0   :  { %s780_s12 = smov 0   ;;  %s909_s0 = inlined_call_operand.vmem [shape: bf16[256,256], index: 0, kind: input, shape index: {}]   ;;  %s910_s1 = inlined_call_operand.vmem [shape: bf16[256,128], index: 1, kind: input, shape index: {}]   ;;  %s911_s2 = inlined_call_operand.vmem [shape: f32[1,128], index: 2, kind: input, shape index: {}]   ;;  %s912_s3 = inlined_call_operand.vmem [shape: f32[256,128], index: 3, kind: output, shape index: {}]  }
   0x1 LB: > { %s578_s13 = sadd.s32 4294967295, %s758_s12   ;;  %p582_p0 = scmp.ge.s32.totalorder %s758_s12, 1  ;;  %s758_s12 = sphi %s780_s12, %s13_s12  }
   0x2   : > { %p139_p1 = scmp.lt.s32.totalorder %s758_s12, 3 }
   0x4   : > { %p140_p2 = pnand %p582_p0, %p139_p1 }
   0x5   : > { %s583_s16 = sshll.u32 (!%p140_p2), %s578_s13, 4 }
   0x6   : > { %143 = sbr.rel (%p140_p2) target bundleno = 272 (0x110), region = 32  ;;  %p165_p3 = scmp.lt.s32.totalorder (!%p140_p2), %s583_s16, 31 }
   0xb   : > { %v712_v0 = vld [vmem:[%s910_s1 + $0x78] sm:$0xff]   ;;  %v714_v2 = vld [vmem:[%s910_s1 + $0x70] sm:$0xff]   ;;  %v716_v4 = vld [vmem:[%s910_s1 + $0x68] sm:$0xff]   ;;  %s914_s16 = smov (!%p165_p3, %s583_s16), 31 }
   0xc   : > { %v713_v1 = vld [vmem:[%s910_s1 + $0x38] sm:$0xff]   ;;  %624 = vmatprep.subr.bf16.mxu0 %v712_v0  ;;  %688 = vmatprep.subr.bf16.mxu1 %v712_v0  ;;  %v715_v3 = vld [vmem:[%s910_s1 + $0x30] sm:$0xff]   ;;  %v717_v5 = vld [vmem:[%s910_s1 + $0x28] sm:$0xff]   ;;  %s623_s4 = sshll.u32 %s914_s16, 3 }
   0xd   : > { %625 = vmatpush3.bf16.msra.mxu0 %v713_v1  ;;  %696 = vmatpush3.bf16.msra.mxu1 %v713_v1  ;;  %v718_v6 = vld [vmem:[%s910_s1 + $0x60] sm:$0xff]   ;;  %v720_v8 = vld [vmem:[%s910_s1 + $0x58] sm:$0xff]   ;;  %s823_s9 = scalar_lea.vmem %s909_s0, %s623_s4  ;;  %v722_v10 = vld [vmem:[%s910_s1 + $0x50] sm:$0xff]   ;;  %s872_s30 = scalar_lea.vmem %s912_s3, %s623_s4 }
   0xe   : > { %626 = vmatprep.subr.bf16.mxu0 %v714_v2  ;;  %689 = vmatprep.subr.bf16.mxu1 %v714_v2  ;;  %v719_v7 = vld [vmem:[%s910_s1 + $0x20] sm:$0xff]   ;;  %v721_v9 = vld [vmem:[%s910_s1 + $0x18] sm:$0xff]   ;;  %v723_v13 = vld [vmem:[%s910_s1 + $0x10] sm:$0xff]  }
   0xf   : > { %v730_v11 = vld [vmem:[%s823_s9 + $0x4] ss:$8 sps:$4 sm:$0xff]   ;;  %v728_v18 = vld [vmem:[%s823_s9] ss:$8 sps:$4 sm:$0xff]   ;;  %v734_v20 = vld [vmem:[%s823_s9 + $0x14] ss:$8 sps:$4 sm:$0xff]  }
  0x10   : > { %v733_v12 = vld [vmem:[%s823_s9 + $0x44] ss:$8 sps:$4 sm:$0xff]   ;;  %441 = vmatprep.mubr.bf16.mxu0 %v730_v11  ;;  %v731_v19 = vld [vmem:[%s823_s9 + $0x40] ss:$8 sps:$4 sm:$0xff]   ;;  %v736_v21 = vld [vmem:[%s823_s9 + $0x54] ss:$8 sps:$4 sm:$0xff]  }
  0x11   : > { %627 = vmatpush3.bf16.msra.mxu0 %v715_v3  ;;  %697 = vmatpush3.bf16.msra.mxu1 %v715_v3  ;;  %v724_v14 = vld [vmem:[%s910_s1 + $0x48] sm:$0xff]   ;;  %v726_v16 = vld [vmem:[%s910_s1 + $0x40] sm:$0xff]   ;;  %v738_v22 = vld [vmem:[%s823_s9 + $0x10] ss:$8 sps:$4 sm:$0xff]  }
  0x12   : > { %628 = vmatprep.subr.bf16.mxu0 %v716_v4  ;;  %690 = vmatprep.subr.bf16.mxu1 %v716_v4  ;;  %v725_v15 = vld [vmem:[%s910_s1 + $0x8] sm:$0xff]   ;;  %v727_v17 = vld [vmem:[%s910_s1] sm:$0xff]   ;;  %v739_v23 = vld [vmem:[%s823_s9 + $0x50] ss:$8 sps:$4 sm:$0xff]  }
  0x13   : > { %473 = vmatprep.mubr.bf16.mxu1 %v733_v12  ;;  %v740_v24 = vld [vmem:[%s823_s9 + $0x24] ss:$8 sps:$4 sm:$0xff]   ;;  %v744_v26 = vld [vmem:[%s823_s9 + $0x20] ss:$8 sps:$4 sm:$0xff]   ;;  %v746_v28 = vld [vmem:[%s823_s9 + $0x34] ss:$8 sps:$4 sm:$0xff]  }
  0x14   : > { %v742_v25 = vld [vmem:[%s823_s9 + $0x64] ss:$8 sps:$4 sm:$0xff]   ;;  %v745_v27 = vld [vmem:[%s823_s9 + $0x60] ss:$8 sps:$4 sm:$0xff]   ;;  %v748_v29 = vld [vmem:[%s823_s9 + $0x74] ss:$8 sps:$4 sm:$0xff]  }
  0x15   : > { %629 = vmatpush3.bf16.msra.mxu0 %v717_v5  ;;  %698 = vmatpush3.bf16.msra.mxu1 %v717_v5  ;;  %v750_v30 = vld [vmem:[%s823_s9 + $0x30] ss:$8 sps:$4 sm:$0xff]   ;;  %v865_v34 = vld [vmem:[%s911_s2] ss:$0 sm:$0xff] }
  0x16   : > { %630 = vmatprep.subr.bf16.mxu0 %v718_v6  ;;  %691 = vmatprep.subr.bf16.mxu1 %v718_v6  ;;  %v751_v31 = vld [vmem:[%s823_s9 + $0x70] ss:$8 sps:$4 sm:$0xff]  }
  0x19   : > { %631 = vmatpush3.bf16.msra.mxu0 %v719_v7  ;;  %699 = vmatpush3.bf16.msra.mxu1 %v719_v7 }
  0x1a   : > { %632 = vmatprep.subr.bf16.mxu0 %v720_v8  ;;  %692 = vmatprep.subr.bf16.mxu1 %v720_v8 }
  0x1d   : > { %633 = vmatpush3.bf16.msra.mxu0 %v721_v9  ;;  %700 = vmatpush3.bf16.msra.mxu1 %v721_v9 }
  0x1e   : > { %634 = vmatprep.subr.bf16.mxu0 %v722_v10  ;;  %693 = vmatprep.subr.bf16.mxu1 %v722_v10 }
  0x21   : > { %635 = vmatpush3.bf16.msra.mxu0 %v723_v13  ;;  %701 = vmatpush3.bf16.msra.mxu1 %v723_v13 }
  0x22   : > { %636 = vmatprep.subr.bf16.mxu0 %v724_v14  ;;  %694 = vmatprep.subr.bf16.mxu1 %v724_v14 }
  0x25   : > { %637 = vmatpush3.bf16.msra.mxu0 %v725_v15  ;;  %702 = vmatpush3.bf16.msra.mxu1 %v725_v15 }
  0x26   : > { %638 = vmatprep.subr.bf16.mxu0 %v726_v16  ;;  %695 = vmatprep.subr.bf16.mxu1 %v726_v16 }
  0x29   : > { %639 = vmatpush3.bf16.msra.mxu0 %v727_v17  ;;  %703 = vmatpush3.bf16.msra.mxu1 %v727_v17 }
  0x2c   : > { %442 = vmatmul.mubr.bf16.vlgmr.msra.gmra.mxu0 %v728_v18  ;;  %474 = vmatmul.mubr.bf16.vlgmr.msra.gmra.mxu1 %v731_v19 }
  0x2d   : > { %449 = vmatprep.mubr.bf16.mxu0 %v734_v20  ;;  %481 = vmatprep.mubr.bf16.mxu1 %v736_v21 }
  0x34   : > { %450 = vmatmul.mubr.bf16.gmra.mxu0 %v738_v22  ;;  %482 = vmatmul.mubr.bf16.gmra.mxu1 %v739_v23 }
  0x35   : > { %457 = vmatprep.mubr.bf16.mxu0 %v740_v24  ;;  %489 = vmatprep.mubr.bf16.mxu1 %v742_v25 }
  0x3c   : > { %458 = vmatmul.mubr.bf16.gmra.mxu0 %v744_v26  ;;  %490 = vmatmul.mubr.bf16.gmra.mxu1 %v745_v27 }
  0x3d   : > { %465 = vmatprep.mubr.bf16.mxu0 %v746_v28  ;;  %497 = vmatprep.mubr.bf16.mxu1 %v748_v29 }
  0x44   : > { %466 = vmatmul.mubr.bf16.gmra.mxu0 %v750_v30  ;;  %498 = vmatmul.mubr.bf16.gmra.mxu1 %v751_v31 }
  0xec   : > { %v640_v32 = vpop.f32.mrf.mxu0  ;;  %v664_v33 = vpop.f32.mrf.mxu1 }
  0xee   : > { %v641_v35 = vpop.f32.mrf.mxu0  ;;  %v665_v36 = vpop.f32.mrf.mxu1 }
  0xef   : > { %v642_v37 = vadd.f32 %v641_v35, %v640_v32  ;;  %v666_v38 = vadd.f32 %v665_v36, %v664_v33 }
  0xf0   : > { %v643_v39 = vpop.f32.mrf.mxu0  ;;  %v667_v40 = vpop.f32.mrf.mxu1 }
  0xf1   : > { %v444_v41 = vadd.f32 %v642_v37, %v865_v34  ;;  %v476_v42 = vadd.f32 %v666_v38, %v865_v34 }
  0xf2   : > { %v644_v43 = vpop.f32.mrf.mxu0  ;;  %v668_v44 = vpop.f32.mrf.mxu1 }
  0xf3   : > { %506 = vst [vmem:[%s872_s30] sm:$0xff] %v444_v41  ;;  %514 = vst [vmem:[%s872_s30 + $0x40] sm:$0xff] %v476_v42  ;;  %v645_v45 = vadd.f32 %v644_v43, %v643_v39  ;;  %v669_v46 = vadd.f32 %v668_v44, %v667_v40 }
  0xf4   : > { %v646_v47 = vpop.f32.mrf.mxu0  ;;  %v670_v48 = vpop.f32.mrf.mxu1 }
  0xf5   : > { %v447_v49 = vadd.f32 %v645_v45, %v865_v34  ;;  %v479_v50 = vadd.f32 %v669_v46, %v865_v34 }
  0xf6   : > { %v647_v51 = vpop.f32.mrf.mxu0  ;;  %v671_v52 = vpop.f32.mrf.mxu1 }
  0xf7   : > { %507 = vst [vmem:[%s872_s30 + $0x8] sm:$0xff] %v447_v49  ;;  %515 = vst [vmem:[%s872_s30 + $0x48] sm:$0xff] %v479_v50  ;;  %v648_v53 = vadd.f32 %v647_v51, %v646_v47  ;;  %v672_v54 = vadd.f32 %v671_v52, %v670_v48 }
  0xf8   : > { %v649_v55 = vpop.f32.mrf.mxu0  ;;  %v673_v56 = vpop.f32.mrf.mxu1 }
  0xf9   : > { %v452_v57 = vadd.f32 %v648_v53, %v865_v34  ;;  %v484_v58 = vadd.f32 %v672_v54, %v865_v34 }
  0xfa   : > { %v650_v59 = vpop.f32.mrf.mxu0  ;;  %v674_v60 = vpop.f32.mrf.mxu1 }
  0xfb   : > { %508 = vst [vmem:[%s872_s30 + $0x10] sm:$0xff] %v452_v57  ;;  %516 = vst [vmem:[%s872_s30 + $0x50] sm:$0xff] %v484_v58  ;;  %v651_v61 = vadd.f32 %v650_v59, %v649_v55  ;;  %v675_v62 = vadd.f32 %v674_v60, %v673_v56 }
  0xfc   : > { %v652_v63 = vpop.f32.mrf.mxu0  ;;  %v676_v0 = vpop.f32.mrf.mxu1 }
  0xfd   : > { %v455_v1 = vadd.f32 %v651_v61, %v865_v34  ;;  %v487_v2 = vadd.f32 %v675_v62, %v865_v34 }
  0xfe   : > { %v653_v3 = vpop.f32.mrf.mxu0  ;;  %v677_v4 = vpop.f32.mrf.mxu1 }
  0xff   : > { %509 = vst [vmem:[%s872_s30 + $0x18] sm:$0xff] %v455_v1  ;;  %517 = vst [vmem:[%s872_s30 + $0x58] sm:$0xff] %v487_v2  ;;  %v654_v5 = vadd.f32 %v653_v3, %v652_v63  ;;  %v678_v6 = vadd.f32 %v677_v4, %v676_v0 }
 0x100   : > { %v655_v7 = vpop.f32.mrf.mxu0  ;;  %v679_v8 = vpop.f32.mrf.mxu1 }
 0x101   : > { %v460_v9 = vadd.f32 %v654_v5, %v865_v34  ;;  %v492_v10 = vadd.f32 %v678_v6, %v865_v34 }
 0x102   : > { %v656_v11 = vpop.f32.mrf.mxu0  ;;  %v680_v12 = vpop.f32.mrf.mxu1 }
 0x103   : > { %510 = vst [vmem:[%s872_s30 + $0x20] sm:$0xff] %v460_v9  ;;  %518 = vst [vmem:[%s872_s30 + $0x60] sm:$0xff] %v492_v10  ;;  %v657_v13 = vadd.f32 %v656_v11, %v655_v7  ;;  %v681_v14 = vadd.f32 %v680_v12, %v679_v8 }
 0x104   : > { %v658_v15 = vpop.f32.mrf.mxu0  ;;  %v682_v16 = vpop.f32.mrf.mxu1 }
 0x105   : > { %v463_v17 = vadd.f32 %v657_v13, %v865_v34  ;;  %v495_v18 = vadd.f32 %v681_v14, %v865_v34 }
 0x106   : > { %v659_v19 = vpop.f32.mrf.mxu0  ;;  %v683_v20 = vpop.f32.mrf.mxu1 }
 0x107   : > { %511 = vst [vmem:[%s872_s30 + $0x28] sm:$0xff] %v463_v17  ;;  %519 = vst [vmem:[%s872_s30 + $0x68] sm:$0xff] %v495_v18  ;;  %v660_v21 = vadd.f32 %v659_v19, %v658_v15  ;;  %v684_v22 = vadd.f32 %v683_v20, %v682_v16 }
 0x108   : > { %v661_v23 = vpop.f32.mrf.mxu0  ;;  %v685_v24 = vpop.f32.mrf.mxu1 }
 0x109   : > { %v468_v25 = vadd.f32 %v660_v21, %v865_v34  ;;  %v500_v26 = vadd.f32 %v684_v22, %v865_v34 }
 0x10a   : > { %v662_v27 = vpop.f32.mrf.mxu0  ;;  %v686_v28 = vpop.f32.mrf.mxu1 }
 0x10b   : > { %512 = vst [vmem:[%s872_s30 + $0x30] sm:$0xff] %v468_v25  ;;  %520 = vst [vmem:[%s872_s30 + $0x70] sm:$0xff] %v500_v26  ;;  %v663_v29 = vadd.f32 %v662_v27, %v661_v23  ;;  %v687_v30 = vadd.f32 %v686_v28, %v685_v24 }
 0x10d   : > { %v471_v31 = vadd.f32 %v663_v29, %v865_v34  ;;  %v503_v32 = vadd.f32 %v687_v30, %v865_v34 }
 0x10f   : > { %513 = vst [vmem:[%s872_s30 + $0x38] sm:$0xff] %v471_v31  ;;  %521 = vst [vmem:[%s872_s30 + $0x78] sm:$0xff] %v503_v32 }
 0x110 PF: > { %s13_s12 = sadd.s32 1, %s758_s12  }
 0x111   : > { %p10_p4 = scmp.ge.s32.totalorder %s13_s12, 4  }
 0x113   :  { %12 = sbr.rel (!%p10_p4) target bundleno = 1 (0x1), region = 62 }

// kernel: forward_pallas.16
= control target key start
LH: loop header
LB: loop body
LE: loop exit
PB: predicated region body
PF: predicated region fallthrough
CT: control target
= control target key end

     0   :  { %s2541_s12 = smov 0   ;;  %s3061_s0 = inlined_call_operand.vmem [shape: bf16[128,1664], index: 0, kind: input, shape index: {}]   ;;  %s3062_s1 = inlined_call_operand.vmem [shape: bf16[1664,128], index: 1, kind: input, shape index: {}]   ;;  %s3063_s2 = inlined_call_operand.vmem [shape: f32[1,128], index: 2, kind: input, shape index: {}]   ;;  %s3064_s3 = inlined_call_operand.vmem [shape: f32[128,128], index: 3, kind: output, shape index: {}]  }
   0x1 LB: > { %s1864_s13 = sadd.s32 4294967295, %s2519_s12   ;;  %p1868_p0 = scmp.ge.s32.totalorder %s2519_s12, 1  ;;  %s2519_s12 = sphi %s2541_s12, %s13_s12  }
   0x2   : > { %p139_p1 = scmp.lt.s32.totalorder %s2519_s12, 3 }
   0x4   : > { %p140_p2 = pnand %p1868_p0, %p139_p1 }
   0x6   : > { %143 = sbr.rel (%p140_p2) target bundleno = 347 (0x15b), region = 32 }
   0xb   : > { %v2333_v0 = vld [vmem:[%s3062_s1 + $0x78] sm:$0xff]   ;;  %v2337_v4 = vld [vmem:[%s3062_s1 + $0x70] sm:$0xff]   ;;  %v2341_v8 = vld [vmem:[%s3062_s1 + $0x68] sm:$0xff]   ;;  %s1869_s19 = sshll.u32 %s1864_s13, 3 }
   0xc   : > { %v2334_v1 = vld [vmem:[%s3062_s1 + $0xf8] sm:$0xff]   ;;  %2032 = vmatprep.subr.bf16.mxu0 %v2333_v0  ;;  %v2338_v5 = vld [vmem:[%s3062_s1 + $0xf0] sm:$0xff]   ;;  %v2342_v9 = vld [vmem:[%s3062_s1 + $0xe8] sm:$0xff]   ;;  %p165_p3 = scmp.lt.s32.totalorder %s1869_s19, 15 }
   0xd   : > { %v2335_v2 = vld [vmem:[%s3062_s1 + $0x38] sm:$0xff]   ;;  %2072 = vmatprep.subr.bf16.mxu1 %v2334_v1  ;;  %v2339_v6 = vld [vmem:[%s3062_s1 + $0x30] sm:$0xff]   ;;  %v2343_v10 = vld [vmem:[%s3062_s1 + $0x28] sm:$0xff]  }
   0xe   : > { %v2336_v3 = vld [vmem:[%s3062_s1 + $0xb8] sm:$0xff]   ;;  %2033 = vmatpush3.bf16.msra.mxu0 %v2335_v2  ;;  %v2340_v7 = vld [vmem:[%s3062_s1 + $0xb0] sm:$0xff]   ;;  %v2344_v11 = vld [vmem:[%s3062_s1 + $0xa8] sm:$0xff]   ;;  %s3090_s19 = smov (!%p165_p3, %s1869_s19), 15 }
   0xf   : > { %2073 = vmatpush3.bf16.msra.mxu1 %v2336_v3  ;;  %2034 = vmatprep.subr.bf16.mxu0 %v2337_v4  ;;  %v2345_v12 = vld [vmem:[%s3062_s1 + $0x60] sm:$0xff]   ;;  %v2349_v16 = vld [vmem:[%s3062_s1 + $0x58] sm:$0xff]   ;;  %v2353_v20 = vld [vmem:[%s3062_s1 + $0x50] sm:$0xff]   ;;  %s2324_s16 = smul.u32 52, %s3090_s19 }
  0x10   : > { %2074 = vmatprep.subr.bf16.mxu1 %v2338_v5  ;;  %v2346_v13 = vld [vmem:[%s3062_s1 + $0xe0] sm:$0xff]   ;;  %v2350_v17 = vld [vmem:[%s3062_s1 + $0xd8] sm:$0xff]   ;;  %v2354_v21 = vld [vmem:[%s3062_s1 + $0xd0] sm:$0xff]  }
  0x11   : > { %v2347_v14 = vld [vmem:[%s3062_s1 + $0x20] sm:$0xff]   ;;  %v2351_v18 = vld [vmem:[%s3062_s1 + $0x18] sm:$0xff]   ;;  %v2355_v22 = vld [vmem:[%s3062_s1 + $0x10] sm:$0xff]   ;;  %s2647_s13 = scalar_lea.vmem %s3061_s0, %s2324_s16 }
  0x12   : > { %2035 = vmatpush3.bf16.msra.mxu0 %v2339_v6  ;;  %v2348_v15 = vld [vmem:[%s3062_s1 + $0xa0] sm:$0xff]   ;;  %v2352_v19 = vld [vmem:[%s3062_s1 + $0x98] sm:$0xff]   ;;  %v2356_v23 = vld [vmem:[%s3062_s1 + $0x90] sm:$0xff]  }
  0x13   : > { %2075 = vmatpush3.bf16.msra.mxu1 %v2340_v7  ;;  %2036 = vmatprep.subr.bf16.mxu0 %v2341_v8  ;;  %v2357_v24 = vld [vmem:[%s3062_s1 + $0x48] sm:$0xff]   ;;  %v2361_v28 = vld [vmem:[%s3062_s1 + $0x40] sm:$0xff]   ;;  %v2371_v36 = vld [vmem:[%s3062_s1 + $0x178] sm:$0xff]  }
  0x14   : > { %2076 = vmatprep.subr.bf16.mxu1 %v2342_v9  ;;  %v2358_v25 = vld [vmem:[%s3062_s1 + $0xc8] sm:$0xff]   ;;  %v2362_v29 = vld [vmem:[%s3062_s1 + $0xc0] sm:$0xff]   ;;  %v2372_v37 = vld [vmem:[%s3062_s1 + $0x1f8] sm:$0xff]  }
  0x15   : > { %v2359_v26 = vld [vmem:[%s3062_s1 + $0x8] sm:$0xff]   ;;  %v2363_v30 = vld [vmem:[%s3062_s1] sm:$0xff]   ;;  %v2373_v38 = vld [vmem:[%s3062_s1 + $0x138] sm:$0xff]  }
  0x16   : > { %2037 = vmatpush3.bf16.msra.mxu0 %v2343_v10  ;;  %v2360_v27 = vld [vmem:[%s3062_s1 + $0x88] sm:$0xff]   ;;  %v2364_v31 = vld [vmem:[%s3062_s1 + $0x80] sm:$0xff]   ;;  %v2374_v39 = vld [vmem:[%s3062_s1 + $0x1b8] sm:$0xff]  }
  0x17   : > { %2077 = vmatpush3.bf16.msra.mxu1 %v2344_v11  ;;  %2038 = vmatprep.subr.bf16.mxu0 %v2345_v12  ;;  %v2365_v32 = vld [vmem:[%s2647_s13] ss:$52 sps:$4 sm:$0xff]   ;;  %v2367_v33 = vld [vmem:[%s2647_s13 + $0x4] ss:$52 sps:$4 sm:$0xff]   ;;  %v2368_v34 = vld [vmem:[%s2647_s13 + $0x8] ss:$52 sps:$4 sm:$0xff]  }
  0x18   : > { %2078 = vmatprep.subr.bf16.mxu1 %v2346_v13  ;;  %v2370_v35 = vld [vmem:[%s2647_s13 + $0xc] ss:$52 sps:$4 sm:$0xff]   ;;  %1369 = vmatprep.mubr.bf16.mxu0 %v2367_v33  ;;  %v2375_v40 = vld [vmem:[%s3062_s1 + $0x170] sm:$0xff]   ;;  %v2383_v46 = vld [vmem:[%s2647_s13 + $0x68] ss:$52 sps:$4 sm:$0xff]  }
  0x19   : > { %1434 = vmatprep.mubr.bf16.mxu1 %v2370_v35  ;;  %v2376_v41 = vld [vmem:[%s3062_s1 + $0x1f0] sm:$0xff]   ;;  %v2379_v44 = vld [vmem:[%s2647_s13 + $0x6c] ss:$52 sps:$4 sm:$0xff]   ;;  %v2399_v60 = vld [vmem:[%s3062_s1 + $0x158] sm:$0xff]  }
  0x1a   : > { %2039 = vmatpush3.bf16.msra.mxu0 %v2347_v14  ;;  %v2377_v42 = vld [vmem:[%s3062_s1 + $0x130] sm:$0xff]   ;;  %v2385_v48 = vld [vmem:[%s3062_s1 + $0x168] sm:$0xff]   ;;  %v2389_v52 = vld [vmem:[%s3062_s1 + $0x160] sm:$0xff]  }
  0x1b   : > { %2079 = vmatpush3.bf16.msra.mxu1 %v2348_v15  ;;  %2040 = vmatprep.subr.bf16.mxu0 %v2349_v16  ;;  %v2378_v43 = vld [vmem:[%s3062_s1 + $0x1b0] sm:$0xff]   ;;  %v2386_v49 = vld [vmem:[%s3062_s1 + $0x1e8] sm:$0xff]   ;;  %v2390_v53 = vld [vmem:[%s3062_s1 + $0x1e0] sm:$0xff]  }
  0x1c   : > { %2080 = vmatprep.subr.bf16.mxu1 %v2350_v17  ;;  %v2381_v45 = vld [vmem:[%s2647_s13 + $0x74] ss:$52 sps:$4 sm:$0xff]   ;;  %v2384_v47 = vld [vmem:[%s2647_s13 + $0x70] ss:$52 sps:$4 sm:$0xff]   ;;  %v2398_v59 = vld [vmem:[%s2647_s13 + $0xd8] ss:$52 sps:$4 sm:$0xff]  }
  0x1d   : > { %v2387_v50 = vld [vmem:[%s3062_s1 + $0x128] sm:$0xff]   ;;  %v2391_v54 = vld [vmem:[%s3062_s1 + $0x120] sm:$0xff]   ;;  %v2395_v57 = vld [vmem:[%s2647_s13 + $0xdc] ss:$52 sps:$4 sm:$0xff]  }
  0x1e   : > { %2041 = vmatpush3.bf16.msra.mxu0 %v2351_v18  ;;  %v2388_v51 = vld [vmem:[%s3062_s1 + $0x1a8] sm:$0xff]   ;;  %v2392_v55 = vld [vmem:[%s3062_s1 + $0x1a0] sm:$0xff]   ;;  %v2400_v61 = vld [vmem:[%s3062_s1 + $0x1d8] sm:$0xff]  }
  0x1f   : > { %2081 = vmatpush3.bf16.msra.mxu1 %v2352_v19  ;;  %2042 = vmatprep.subr.bf16.mxu0 %v2353_v20  ;;  %v2393_v56 = vld [vmem:[%s2647_s13 + $0xd4] ss:$52 sps:$4 sm:$0xff]   ;;  %v2397_v58 = vld [vmem:[%s2647_s13 + $0xd0] ss:$52 sps:$4 sm:$0xff]   ;;  %v2401_v62 = vld [vmem:[%s3062_s1 + $0x118] sm:$0xff]  }
  0x20   : > { %2082 = vmatprep.subr.bf16.mxu1 %v2354_v21  ;;  %v2402_v63 = vld [vmem:[%s3062_s1 + $0x198] sm:$0xff]   ;;  %v2403_v0 = vld [vmem:[%s3062_s1 + $0x150] sm:$0xff]   ;;  %v2413_v8 = vld [vmem:[%s3062_s1 + $0x148] sm:$0xff]  }
  0x21   : > { %v2404_v1 = vld [vmem:[%s3062_s1 + $0x1d0] sm:$0xff]   ;;  %v2409_v5 = vld [vmem:[%s2647_s13 + $0x144] ss:$52 sps:$4 sm:$0xff]   ;;  %v2414_v9 = vld [vmem:[%s3062_s1 + $0x1c8] sm:$0xff]  }
  0x22   : > { %2043 = vmatpush3.bf16.msra.mxu0 %v2355_v22  ;;  %v2405_v2 = vld [vmem:[%s3062_s1 + $0x110] sm:$0xff]   ;;  %v2411_v6 = vld [vmem:[%s2647_s13 + $0x138] ss:$52 sps:$4 sm:$0xff]   ;;  %v2417_v12 = vld [vmem:[%s3062_s1 + $0x140] sm:$0xff]  }
  0x23   : > { %2083 = vmatpush3.bf16.msra.mxu1 %v2356_v23  ;;  %2044 = vmatprep.subr.bf16.mxu0 %v2357_v24  ;;  %v2406_v3 = vld [vmem:[%s3062_s1 + $0x190] sm:$0xff]   ;;  %v2415_v10 = vld [vmem:[%s3062_s1 + $0x108] sm:$0xff]   ;;  %v2418_v13 = vld [vmem:[%s3062_s1 + $0x1c0] sm:$0xff]  }
  0x24   : > { %2084 = vmatprep.subr.bf16.mxu1 %v2358_v25  ;;  %v2407_v4 = vld [vmem:[%s2647_s13 + $0x13c] ss:$52 sps:$4 sm:$0xff]   ;;  %v2412_v7 = vld [vmem:[%s2647_s13 + $0x140] ss:$52 sps:$4 sm:$0xff]   ;;  %v2416_v11 = vld [vmem:[%s3062_s1 + $0x188] sm:$0xff]  }
  0x25   : > { %v2419_v14 = vld [vmem:[%s3062_s1 + $0x100] sm:$0xff]   ;;  %v2423_v17 = vld [vmem:[%s2647_s13 + $0x14] ss:$52 sps:$4 sm:$0xff]   ;;  %v2424_v18 = vld [vmem:[%s2647_s13 + $0x18] ss:$52 sps:$4 sm:$0xff]  }
  0x26   : > { %2045 = vmatpush3.bf16.msra.mxu0 %v2359_v26  ;;  %v2420_v15 = vld [vmem:[%s3062_s1 + $0x180] sm:$0xff]   ;;  %v2426_v19 = vld [vmem:[%s2647_s13 + $0x1c] ss:$52 sps:$4 sm:$0xff]   ;;  %v2442_v33 = vld [vmem:[%s3062_s1 + $0x2e8] sm:$0xff]  }
  0x27   : > { %2085 = vmatpush3.bf16.msra.mxu1 %v2360_v27  ;;  %2046 = vmatprep.subr.bf16.mxu0 %v2361_v28  ;;  %v2421_v16 = vld [vmem:[%s2647_s13 + $0x10] ss:$52 sps:$4 sm:$0xff]   ;;  %v2427_v20 = vld [vmem:[%s3062_s1 + $0x278] sm:$0xff]   ;;  %v2444_v35 = vld [vmem:[%s3062_s1 + $0x2a8] sm:$0xff]  }
  0x28   : > { %2086 = vmatprep.subr.bf16.mxu1 %v2362_v29  ;;  %v2428_v21 = vld [vmem:[%s3062_s1 + $0x2f8] sm:$0xff]   ;;  %v2431_v24 = vld [vmem:[%s3062_s1 + $0x270] sm:$0xff]  }
  0x29   : > { %v2429_v22 = vld [vmem:[%s3062_s1 + $0x238] sm:$0xff]   ;;  %v2432_v25 = vld [vmem:[%s3062_s1 + $0x2f0] sm:$0xff]  }
  0x2a   : > { %2047 = vmatpush3.bf16.msra.mxu0 %v2363_v30  ;;  %v2430_v23 = vld [vmem:[%s3062_s1 + $0x2b8] sm:$0xff]   ;;  %v2433_v26 = vld [vmem:[%s3062_s1 + $0x230] sm:$0xff]  }
  0x2b   : > { %2087 = vmatpush3.bf16.msra.mxu1 %v2364_v31  ;;  %2112 = vmatprep.subr.bf16.mxu0 %v2371_v36  ;;  %v2434_v27 = vld [vmem:[%s3062_s1 + $0x2b0] sm:$0xff]   ;;  %v2437_v29 = vld [vmem:[%s2647_s13 + $0x84] ss:$52 sps:$4 sm:$0xff]  }
  0x2c   : > { %2152 = vmatprep.subr.bf16.mxu1 %v2372_v37  ;;  %v2435_v28 = vld [vmem:[%s2647_s13 + $0x7c] ss:$52 sps:$4 sm:$0xff]   ;;  %v2439_v30 = vld [vmem:[%s2647_s13 + $0x78] ss:$52 sps:$4 sm:$0xff]   ;;  %v2440_v31 = vld [vmem:[%s2647_s13 + $0x80] ss:$52 sps:$4 sm:$0xff]  }
  0x2d   : > { %1370 = vmatmul.mubr.bf16.vlgmr.msra.gmra.mxu0 %v2365_v32  ;;  %v2441_v32 = vld [vmem:[%s3062_s1 + $0x268] sm:$0xff]   ;;  %v2445_v36 = vld [vmem:[%s3062_s1 + $0x260] sm:$0xff]  }
  0x2e   : > { %1435 = vmatmul.mubr.bf16.vlgmr.msra.gmra.mxu1 %v2368_v34  ;;  %2113 = vmatpush3.bf16.msra.mxu0 %v2373_v38  ;;  %v2443_v34 = vld [vmem:[%s3062_s1 + $0x228] sm:$0xff]   ;;  %v2446_v37 = vld [vmem:[%s3062_s1 + $0x2e0] sm:$0xff]  }
  0x2f   : > { %2153 = vmatpush3.bf16.msra.mxu1 %v2374_v39  ;;  %2114 = vmatprep.subr.bf16.mxu0 %v2375_v40  ;;  %v2447_v38 = vld [vmem:[%s3062_s1 + $0x220] sm:$0xff]  }
  0x30   : > { %2154 = vmatprep.subr.bf16.mxu1 %v2376_v41  ;;  %1377 = vmatprep.mubr.bf16.mxu0 %v2379_v44  ;;  %v2448_v39 = vld [vmem:[%s3062_s1 + $0x2a0] sm:$0xff]   ;;  %v2455_v44 = vld [vmem:[%s3062_s1 + $0x258] sm:$0xff]  }
  0x31   : > { %1442 = vmatprep.mubr.bf16.mxu1 %v2381_v45  ;;  %v2449_v40 = vld [vmem:[%s2647_s13 + $0xe4] ss:$52 sps:$4 sm:$0xff]   ;;  %v2451_v41 = vld [vmem:[%s2647_s13 + $0xec] ss:$52 sps:$4 sm:$0xff]  }
  0x32   : > { %2115 = vmatpush3.bf16.msra.mxu0 %v2377_v42  ;;  %v2453_v42 = vld [vmem:[%s2647_s13 + $0xe0] ss:$52 sps:$4 sm:$0xff]   ;;  %v2456_v45 = vld [vmem:[%s3062_s1 + $0x2d8] sm:$0xff]  }
  0x33   : > { %2155 = vmatpush3.bf16.msra.mxu1 %v2378_v43  ;;  %2116 = vmatprep.subr.bf16.mxu0 %v2385_v48  ;;  %v2454_v43 = vld [vmem:[%s2647_s13 + $0xe8] ss:$52 sps:$4 sm:$0xff]   ;;  %v2459_v48 = vld [vmem:[%s3062_s1 + $0x250] sm:$0xff]  }
  0x34   : > { %2156 = vmatprep.subr.bf16.mxu1 %v2386_v49  ;;  %v2460_v49 = vld [vmem:[%s3062_s1 + $0x2d0] sm:$0xff]  }
  0x35   : > { %1378 = vmatmul.mubr.bf16.gmra.mxu0 %v2383_v46  ;;  %v2457_v46 = vld [vmem:[%s3062_s1 + $0x218] sm:$0xff]  }
  0x36   : > { %1443 = vmatmul.mubr.bf16.gmra.mxu1 %v2384_v47  ;;  %2117 = vmatpush3.bf16.msra.mxu0 %v2387_v50  ;;  %v2458_v47 = vld [vmem:[%s3062_s1 + $0x298] sm:$0xff]   ;;  %v2461_v50 = vld [vmem:[%s3062_s1 + $0x210] sm:$0xff]  }
  0x37   : > { %2157 = vmatpush3.bf16.msra.mxu1 %v2388_v51  ;;  %2118 = vmatprep.subr.bf16.mxu0 %v2389_v52  ;;  %v2462_v51 = vld [vmem:[%s3062_s1 + $0x290] sm:$0xff]   ;;  %v2463_v52 = vld [vmem:[%s2647_s13 + $0x14c] ss:$52 sps:$4 sm:$0xff]  }
  0x38   : > { %2158 = vmatprep.subr.bf16.mxu1 %v2390_v53  ;;  %1385 = vmatprep.mubr.bf16.mxu0 %v2393_v56  ;;  %v2465_v53 = vld [vmem:[%s2647_s13 + $0x154] ss:$52 sps:$4 sm:$0xff]  }
  0x39   : > { %1450 = vmatprep.mubr.bf16.mxu1 %v2395_v57  ;;  %v2469_v56 = vld [vmem:[%s3062_s1 + $0x248] sm:$0xff]  }
  0x3a   : > { %2119 = vmatpush3.bf16.msra.mxu0 %v2391_v54  ;;  %v2467_v54 = vld [vmem:[%s2647_s13 + $0x148] ss:$52 sps:$4 sm:$0xff]  }
  0x3b   : > { %2159 = vmatpush3.bf16.msra.mxu1 %v2392_v55  ;;  %2120 = vmatprep.subr.bf16.mxu0 %v2399_v60  ;;  %v2468_v55 = vld [vmem:[%s2647_s13 + $0x150] ss:$52 sps:$4 sm:$0xff]   ;;  %v2470_v57 = vld [vmem:[%s3062_s1 + $0x2c8] sm:$0xff]  }
  0x3c   : > { %2160 = vmatprep.subr.bf16.mxu1 %v2400_v61  ;;  %v2473_v60 = vld [vmem:[%s3062_s1 + $0x240] sm:$0xff]  }
  0x3d   : > { %1386 = vmatmul.mubr.bf16.gmra.mxu0 %v2397_v58  ;;  %v2471_v58 = vld [vmem:[%s3062_s1 + $0x208] sm:$0xff]   ;;  %v2474_v61 = vld [vmem:[%s3062_s1 + $0x2c0] sm:$0xff]  }
  0x3e   : > { %1451 = vmatmul.mubr.bf16.gmra.mxu1 %v2398_v59  ;;  %2121 = vmatpush3.bf16.msra.mxu0 %v2401_v62  ;;  %v2472_v59 = vld [vmem:[%s3062_s1 + $0x288] sm:$0xff]   ;;  %v2475_v62 = vld [vmem:[%s3062_s1 + $0x200] sm:$0xff]  }
  0x3f   : > { %2161 = vmatpush3.bf16.msra.mxu1 %v2402_v63  ;;  %2122 = vmatprep.subr.bf16.mxu0 %v2403_v0  ;;  %v2476_v63 = vld [vmem:[%s3062_s1 + $0x280] sm:$0xff]  }
  0x40   : > { %2162 = vmatprep.subr.bf16.mxu1 %v2404_v1  ;;  %1393 = vmatprep.mubr.bf16.mxu0 %v2407_v4  ;;  %v2477_v0 = vld [vmem:[%s2647_s13 + $0x20] ss:$52 sps:$4 sm:$0xff]   ;;  %v2479_v1 = vld [vmem:[%s2647_s13 + $0x24] ss:$52 sps:$4 sm:$0xff]  }
  0x41   : > { %1458 = vmatprep.mubr.bf16.mxu1 %v2409_v5  ;;  %v2483_v4 = vld [vmem:[%s3062_s1 + $0x338] sm:$0xff]   ;;  %v2484_v5 = vld [vmem:[%s3062_s1 + $0x330] sm:$0xff]  }
  0x42   : > { %2123 = vmatpush3.bf16.msra.mxu0 %v2405_v2  ;;  %v2480_v2 = vld [vmem:[%s2647_s13 + $0x28] ss:$52 sps:$4 sm:$0xff]  }
  0x43   : > { %2163 = vmatpush3.bf16.msra.mxu1 %v2406_v3  ;;  %2124 = vmatprep.subr.bf16.mxu0 %v2413_v8  ;;  %v2482_v3 = vld [vmem:[%s2647_s13 + $0x2c] ss:$52 sps:$4 sm:$0xff]   ;;  %v2489_v8 = vld [vmem:[%s2647_s13 + $0x88] ss:$52 sps:$4 sm:$0xff]  }
  0x44   : > { %2164 = vmatprep.subr.bf16.mxu1 %v2414_v9  ;;  %v2491_v9 = vld [vmem:[%s3062_s1 + $0x328] sm:$0xff]  }
  0x45   : > { %1394 = vmatmul.mubr.bf16.gmra.mxu0 %v2411_v6  ;;  %v2485_v6 = vld [vmem:[%s2647_s13 + $0x8c] ss:$52 sps:$4 sm:$0xff]  }
  0x46   : > { %1459 = vmatmul.mubr.bf16.gmra.mxu1 %v2412_v7  ;;  %2125 = vmatpush3.bf16.msra.mxu0 %v2415_v10  ;;  %v2487_v7 = vld [vmem:[%s2647_s13 + $0x94] ss:$52 sps:$4 sm:$0xff]   ;;  %v2490_v10 = vld [vmem:[%s2647_s13 + $0x90] ss:$52 sps:$4 sm:$0xff]  }
  0x47   : > { %2165 = vmatpush3.bf16.msra.mxu1 %v2416_v11  ;;  %2126 = vmatprep.subr.bf16.mxu0 %v2417_v12  ;;  %v2493_v11 = vld [vmem:[%s2647_s13 + $0xf4] ss:$52 sps:$4 sm:$0xff]   ;;  %v2492_v12 = vld [vmem:[%s3062_s1 + $0x320] sm:$0xff]  }
  0x48   : > { %2166 = vmatprep.subr.bf16.mxu1 %v2418_v13  ;;  %1499 = vmatprep.mubr.bf16.mxu0 %v2423_v17  ;;  %v2495_v13 = vld [vmem:[%s2647_s13 + $0xfc] ss:$52 sps:$4 sm:$0xff]  }
  0x49   : > { %1564 = vmatprep.mubr.bf16.mxu1 %v2426_v19  ;;  %v2501_v17 = vld [vmem:[%s2647_s13 + $0x15c] ss:$52 sps:$4 sm:$0xff]  }
  0x4a   : > { %2127 = vmatpush3.bf16.msra.mxu0 %v2419_v14  ;;  %v2499_v14 = vld [vmem:[%s3062_s1 + $0x318] sm:$0xff]   ;;  %v2500_v19 = vld [vmem:[%s3062_s1 + $0x310] sm:$0xff]  }
  0x4b   : > { %2167 = vmatpush3.bf16.msra.mxu1 %v2420_v15  ;;  %2192 = vmatprep.subr.bf16.mxu0 %v2427_v20  ;;  %v2497_v15 = vld [vmem:[%s2647_s13 + $0xf0] ss:$52 sps:$4 sm:$0xff]   ;;  %v2507_v20 = vld [vmem:[%s3062_s1 + $0x308] sm:$0xff]  }
  0x4c   : > { %2232 = vmatprep.subr.bf16.mxu1 %v2428_v21  ;;  %v2505_v21 = vld [vmem:[%s2647_s13 + $0x158] ss:$52 sps:$4 sm:$0xff]  }
  0x4d   : > { %1500 = vmatmul.mubr.bf16.vlgmr.msra.gmra.mxu0 %v2421_v16  ;;  %v2498_v16 = vld [vmem:[%s2647_s13 + $0xf8] ss:$52 sps:$4 sm:$0xff]  }
  0x4e   : > { %1565 = vmatmul.mubr.bf16.vlgmr.msra.gmra.mxu1 %v2424_v18  ;;  %2193 = vmatpush3.bf16.msra.mxu0 %v2429_v22  ;;  %v2503_v18 = vld [vmem:[%s2647_s13 + $0x164] ss:$52 sps:$4 sm:$0xff]   ;;  %v2506_v22 = vld [vmem:[%s2647_s13 + $0x160] ss:$52 sps:$4 sm:$0xff]  }
  0x4f   : > { %2233 = vmatpush3.bf16.msra.mxu1 %v2430_v23  ;;  %2194 = vmatprep.subr.bf16.mxu0 %v2431_v24  ;;  %v2509_v23 = vld [vmem:[%s2647_s13 + $0x30] ss:$52 sps:$4 sm:$0xff]   ;;  %v2510_v24 = vld [vmem:[%s2647_s13 + $0x100] ss:$52 sps:$4 sm:$0xff]  }
  0x50   : > { %2234 = vmatprep.subr.bf16.mxu1 %v2432_v25  ;;  %1507 = vmatprep.mubr.bf16.mxu0 %v2435_v28  ;;  %v2508_v25 = vld [vmem:[%s3062_s1 + $0x300] sm:$0xff]  }
  0x51   : > { %1572 = vmatprep.mubr.bf16.mxu1 %v2437_v29 }
  0x52   : > { %2195 = vmatpush3.bf16.msra.mxu0 %v2433_v26  ;;  %v2511_v26 = vld [vmem:[%s2647_s13 + $0x98] ss:$52 sps:$4 sm:$0xff]  }
  0x53   : > { %2235 = vmatpush3.bf16.msra.mxu1 %v2434_v27  ;;  %2196 = vmatprep.subr.bf16.mxu0 %v2441_v32  ;;  %v2512_v27 = vld [vmem:[%s2647_s13 + $0x168] ss:$52 sps:$4 sm:$0xff]   ;;  %s1872_s13 = sshll.u32 %s3090_s19, 3 }
  0x54   : > { %2236 = vmatprep.subr.bf16.mxu1 %v2442_v33  ;;  %s3044_s9 = scalar_lea.vmem %s3064_s3, %s1872_s13 }
  0x55   : > { %1508 = vmatmul.mubr.bf16.gmra.mxu0 %v2439_v30  ;;  %v2926_v30 = vld [vmem:[%s3063_s2] ss:$0 sm:$0xff] }
  0x56   : > { %1573 = vmatmul.mubr.bf16.gmra.mxu1 %v2440_v31  ;;  %2197 = vmatpush3.bf16.msra.mxu0 %v2443_v34 }
  0x57   : > { %2237 = vmatpush3.bf16.msra.mxu1 %v2444_v35  ;;  %2198 = vmatprep.subr.bf16.mxu0 %v2445_v36 }
  0x58   : > { %2238 = vmatprep.subr.bf16.mxu1 %v2446_v37  ;;  %1515 = vmatprep.mubr.bf16.mxu0 %v2449_v40 }
  0x59   : > { %1580 = vmatprep.mubr.bf16.mxu1 %v2451_v41 }
  0x5a   : > { %2199 = vmatpush3.bf16.msra.mxu0 %v2447_v38 }
  0x5b   : > { %2239 = vmatpush3.bf16.msra.mxu1 %v2448_v39  ;;  %2200 = vmatprep.subr.bf16.mxu0 %v2455_v44 }
  0x5c   : > { %2240 = vmatprep.subr.bf16.mxu1 %v2456_v45 }
  0x5d   : > { %1516 = vmatmul.mubr.bf16.gmra.mxu0 %v2453_v42 }
  0x5e   : > { %1581 = vmatmul.mubr.bf16.gmra.mxu1 %v2454_v43  ;;  %2201 = vmatpush3.bf16.msra.mxu0 %v2457_v46 }
  0x5f   : > { %2241 = vmatpush3.bf16.msra.mxu1 %v2458_v47  ;;  %2202 = vmatprep.subr.bf16.mxu0 %v2459_v48 }
  0x60   : > { %2242 = vmatprep.subr.bf16.mxu1 %v2460_v49  ;;  %1523 = vmatprep.mubr.bf16.mxu0 %v2463_v52 }
  0x61   : > { %1588 = vmatprep.mubr.bf16.mxu1 %v2465_v53 }
  0x62   : > { %2203 = vmatpush3.bf16.msra.mxu0 %v2461_v50 }
  0x63   : > { %2243 = vmatpush3.bf16.msra.mxu1 %v2462_v51  ;;  %2204 = vmatprep.subr.bf16.mxu0 %v2469_v56 }
  0x64   : > { %2244 = vmatprep.subr.bf16.mxu1 %v2470_v57 }
  0x65   : > { %1524 = vmatmul.mubr.bf16.gmra.mxu0 %v2467_v54 }
  0x66   : > { %1589 = vmatmul.mubr.bf16.gmra.mxu1 %v2468_v55  ;;  %2205 = vmatpush3.bf16.msra.mxu0 %v2471_v58 }
  0x67   : > { %2245 = vmatpush3.bf16.msra.mxu1 %v2472_v59  ;;  %2206 = vmatprep.subr.bf16.mxu0 %v2473_v60 }
  0x68   : > { %2246 = vmatprep.subr.bf16.mxu1 %v2474_v61  ;;  %1629 = vmatprep.mubr.bf16.mxu0 %v2479_v1 }
  0x69   : > { %1694 = vmatprep.mubr.bf16.mxu1 %v2482_v3 }
  0x6a   : > { %2207 = vmatpush3.bf16.msra.mxu0 %v2475_v62 }
  0x6b   : > { %2247 = vmatpush3.bf16.msra.mxu1 %v2476_v63  ;;  %2284 = vmatprep.subr.bf16.mxu0 %v2483_v4 }
  0x6c   : > { %2308 = vmatprep.subr.bf16.mxu1 %v2483_v4 }
  0x6d   : > { %1630 = vmatmul.mubr.bf16.vlgmr.msra.gmra.mxu0 %v2477_v0 }
  0x6e   : > { %1695 = vmatmul.mubr.bf16.vlgmr.msra.gmra.mxu1 %v2480_v2  ;;  %2285 = vmatpush3.bf16.msra.mxu0 %v2483_v4 }
  0x6f   : > { %2316 = vmatpush3.bf16.msra.mxu1 %v2483_v4  ;;  %2286 = vmatprep.subr.bf16.mxu0 %v2484_v5 }
  0x70   : > { %2309 = vmatprep.subr.bf16.mxu1 %v2484_v5  ;;  %1637 = vmatprep.mubr.bf16.mxu0 %v2485_v6 }
  0x71   : > { %1702 = vmatprep.mubr.bf16.mxu1 %v2487_v7 }
  0x72   : > { %2287 = vmatpush3.bf16.msra.mxu0 %v2484_v5 }
  0x73   : > { %2317 = vmatpush3.bf16.msra.mxu1 %v2484_v5  ;;  %2288 = vmatprep.subr.bf16.mxu0 %v2491_v9 }
  0x74   : > { %2310 = vmatprep.subr.bf16.mxu1 %v2491_v9 }
  0x75   : > { %1638 = vmatmul.mubr.bf16.gmra.mxu0 %v2489_v8 }
  0x76   : > { %1703 = vmatmul.mubr.bf16.gmra.mxu1 %v2490_v10  ;;  %1645 = vmatprep.mubr.bf16.mxu0 %v2493_v11 }
  0x77   : > { %2289 = vmatpush3.bf16.msra.mxu0 %v2491_v9  ;;  %1710 = vmatprep.mubr.bf16.mxu1 %v2495_v13 }
  0x78   : > { %2318 = vmatpush3.bf16.msra.mxu1 %v2491_v9  ;;  %2290 = vmatprep.subr.bf16.mxu0 %v2492_v12 }
  0x79   : > { %2311 = vmatprep.subr.bf16.mxu1 %v2492_v12 }
  0x7b   : > { %2291 = vmatpush3.bf16.msra.mxu0 %v2492_v12 }
  0x7c   : > { %2319 = vmatpush3.bf16.msra.mxu1 %v2492_v12  ;;  %2292 = vmatprep.subr.bf16.mxu0 %v2499_v14 }
  0x7d   : > { %1646 = vmatmul.mubr.bf16.gmra.mxu0 %v2497_v15  ;;  %2312 = vmatprep.subr.bf16.mxu1 %v2499_v14 }
  0x7e   : > { %1711 = vmatmul.mubr.bf16.gmra.mxu1 %v2498_v16  ;;  %1653 = vmatprep.mubr.bf16.mxu0 %v2501_v17 }
  0x7f   : > { %2293 = vmatpush3.bf16.msra.mxu0 %v2499_v14  ;;  %1718 = vmatprep.mubr.bf16.mxu1 %v2503_v18 }
  0x80   : > { %2320 = vmatpush3.bf16.msra.mxu1 %v2499_v14  ;;  %2294 = vmatprep.subr.bf16.mxu0 %v2500_v19 }
  0x81   : > { %2313 = vmatprep.subr.bf16.mxu1 %v2500_v19 }
  0x83   : > { %2295 = vmatpush3.bf16.msra.mxu0 %v2500_v19 }
  0x84   : > { %2321 = vmatpush3.bf16.msra.mxu1 %v2500_v19  ;;  %2296 = vmatprep.subr.bf16.mxu0 %v2507_v20 }
  0x85   : > { %1654 = vmatmul.mubr.bf16.gmra.mxu0 %v2505_v21  ;;  %2314 = vmatprep.subr.bf16.mxu1 %v2507_v20 }
  0x86   : > { %1719 = vmatmul.mubr.bf16.gmra.mxu1 %v2506_v22  ;;  %2300 = vmatprep.mubr.bf16.mxu0 %v2509_v23 }
  0x87   : > { %2297 = vmatpush3.bf16.msra.mxu0 %v2507_v20  ;;  %2304 = vmatprep.mubr.bf16.mxu1 %v2510_v24 }
  0x88   : > { %2322 = vmatpush3.bf16.msra.mxu1 %v2507_v20  ;;  %2298 = vmatprep.subr.bf16.mxu0 %v2508_v25 }
  0x89   : > { %2315 = vmatprep.subr.bf16.mxu1 %v2508_v25 }
  0x8b   : > { %2299 = vmatpush3.bf16.msra.mxu0 %v2508_v25 }
  0x8c   : > { %2323 = vmatpush3.bf16.msra.mxu1 %v2508_v25 }
  0x8e   : > { %2301 = vmatmul.mubr.bf16.vlgmr.msra.gmra.mxu0 %v2511_v26 }
  0x8f   : > { %2305 = vmatmul.mubr.bf16.vlgmr.msra.gmra.mxu1 %v2512_v27 }
  0xed   : > { %v2048_v28 = vpop.f32.mrf.mxu0 }
  0xee   : > { %v2088_v29 = vpop.f32.mrf.mxu1 }
  0xef   : > { %v2049_v31 = vpop.f32.mrf.mxu0 }
  0xf0   : > { %v2050_v32 = vadd.f32 %v2049_v31, %v2048_v28  ;;  %v2089_v33 = vpop.f32.mrf.mxu1 }
  0xf1   : > { %v2090_v34 = vadd.f32 %v2089_v33, %v2088_v29  ;;  %v2051_v35 = vpop.f32.mrf.mxu0 }
  0xf2   : > { %v1372_v36 = vadd.f32 %v2050_v32, %v2926_v30  ;;  %v2091_v37 = vpop.f32.mrf.mxu1 }
  0xf3   : > { %v2052_v38 = vpop.f32.mrf.mxu0 }
  0xf4   : > { %v2929_v39 = vadd.f32 %v2090_v34, %v1372_v36  ;;  %v2053_v40 = vadd.f32 %v2052_v38, %v2051_v35  ;;  %v2092_v41 = vpop.f32.mrf.mxu1 }
  0xf5   : > { %v2093_v42 = vadd.f32 %v2092_v41, %v2091_v37  ;;  %v2054_v44 = vpop.f32.mrf.mxu0 }
  0xf6   : > { %v1375_v43 = vadd.f32 %v2053_v40, %v2926_v30  ;;  %v2094_v46 = vpop.f32.mrf.mxu1 }
  0xf7   : > { %v2055_v47 = vpop.f32.mrf.mxu0 }
  0xf8   : > { %v2932_v45 = vadd.f32 %v2093_v42, %v1375_v43  ;;  %v2056_v48 = vadd.f32 %v2055_v47, %v2054_v44  ;;  %v2095_v49 = vpop.f32.mrf.mxu1 }
  0xf9   : > { %v2096_v50 = vadd.f32 %v2095_v49, %v2094_v46  ;;  %v2057_v51 = vpop.f32.mrf.mxu0 }
  0xfa   : > { %v1380_v52 = vadd.f32 %v2056_v48, %v2926_v30  ;;  %v2097_v53 = vpop.f32.mrf.mxu1 }
  0xfb   : > { %v2058_v54 = vpop.f32.mrf.mxu0 }
  0xfc   : > { %v2935_v55 = vadd.f32 %v2096_v50, %v1380_v52  ;;  %v2059_v56 = vadd.f32 %v2058_v54, %v2057_v51  ;;  %v2098_v57 = vpop.f32.mrf.mxu1 }
  0xfd   : > { %v2099_v58 = vadd.f32 %v2098_v57, %v2097_v53  ;;  %v2060_v61 = vpop.f32.mrf.mxu0 }
  0xfe   : > { %v1383_v59 = vadd.f32 %v2059_v56, %v2926_v30  ;;  %v2100_v62 = vpop.f32.mrf.mxu1 }
  0xff   : > { %v2061_v63 = vpop.f32.mrf.mxu0 }
 0x100   : > { %v2938_v60 = vadd.f32 %v2099_v58, %v1383_v59  ;;  %v2062_v0 = vadd.f32 %v2061_v63, %v2060_v61  ;;  %v2101_v1 = vpop.f32.mrf.mxu1 }
 0x101   : > { %v2102_v2 = vadd.f32 %v2101_v1, %v2100_v62  ;;  %v2063_v3 = vpop.f32.mrf.mxu0 }
 0x102   : > { %v1388_v4 = vadd.f32 %v2062_v0, %v2926_v30  ;;  %v2103_v5 = vpop.f32.mrf.mxu1 }
 0x103   : > { %v2064_v6 = vpop.f32.mrf.mxu0 }
 0x104   : > { %v2941_v7 = vadd.f32 %v2102_v2, %v1388_v4  ;;  %v2065_v8 = vadd.f32 %v2064_v6, %v2063_v3  ;;  %v2104_v9 = vpop.f32.mrf.mxu1 }
 0x105   : > { %v2105_v10 = vadd.f32 %v2104_v9, %v2103_v5  ;;  %v2066_v13 = vpop.f32.mrf.mxu0 }
 0x106   : > { %v1391_v11 = vadd.f32 %v2065_v8, %v2926_v30  ;;  %v2106_v14 = vpop.f32.mrf.mxu1 }
 0x107   : > { %v2067_v15 = vpop.f32.mrf.mxu0 }
 0x108   : > { %v2944_v12 = vadd.f32 %v2105_v10, %v1391_v11  ;;  %v2107_v16 = vpop.f32.mrf.mxu1  ;;  %v2068_v8 = vadd.f32 %v2067_v15, %v2066_v13 }
 0x109   : > { %v2069_v17 = vpop.f32.mrf.mxu0 }
 0x10a   : > { %3065 = vst [vmem:[#allocation2_spill] sm:$0xff] %v2944_v12  ;;  %v2946_v18 = vpop.f32.mrf.mxu1 }
 0x10b   : > { %v2070_v19 = vpop.f32.mrf.mxu0 }
 0x10c   : > { %v2948_v20 = vpop.f32.mrf.mxu1  ;;  %v2071_v11 = vadd.f32 %v2070_v19, %v2069_v17 }
 0x10d   : > { %v2128_v21 = vpop.f32.mrf.mxu0 }
 0x10e   : > { %v2950_v22 = vpop.f32.mrf.mxu1 }
 0x10f   : > { %v2129_v23 = vpop.f32.mrf.mxu0 }
 0x110   : > { %v2952_v24 = vpop.f32.mrf.mxu1 }
 0x111   : > { %v2131_v25 = vpop.f32.mrf.mxu0 }
 0x112   : > { %v2954_v26 = vpop.f32.mrf.mxu1 }
 0x113   : > { %v2132_v27 = vpop.f32.mrf.mxu0 }
 0x114   : > { %v2956_v28 = vpop.f32.mrf.mxu1  ;;  %v2133_v12 = vadd.f32 %v2132_v27, %v2131_v25 }
 0x115   : > { %v2134_v29 = vpop.f32.mrf.mxu0 }
 0x116   : > { %v2958_v31 = vpop.f32.mrf.mxu1 }
 0x117   : > { %v2135_v32 = vpop.f32.mrf.mxu0 }
 0x118   : > { %v2960_v33 = vpop.f32.mrf.mxu1 }
 0x119   : > { %v2137_v34 = vpop.f32.mrf.mxu0 }
 0x11a   : > { %v2962_v35 = vpop.f32.mrf.mxu1 }
 0x11b   : > { %v2138_v36 = vpop.f32.mrf.mxu0 }
 0x11c   : > { %v2964_v37 = vpop.f32.mrf.mxu1  ;;  %v2139_v13 = vadd.f32 %v2138_v36, %v2137_v34  ;;  %v1505_v36 = vadd.f32 %v2133_v12, %v2932_v45 }
 0x11d   : > { %v2140_v38 = vpop.f32.mrf.mxu0 }
 0x11e   : > { %v2966_v40 = vpop.f32.mrf.mxu1  ;;  %v1513_v34 = vadd.f32 %v2139_v13, %v2938_v60 }
 0x11f   : > { %v2141_v41 = vpop.f32.mrf.mxu0 }
 0x120   : > { %v2968_v42 = vpop.f32.mrf.mxu1  ;;  %v2142_v17 = vadd.f32 %v2141_v41, %v2140_v38  ;;  %v2179_v38 = vadd.f32 %v2964_v37, %v2962_v35 }
 0x121   : > { %v2970_v43 = vpop.f32.mrf.mxu0  ;;  %v2182_v45 = vadd.f32 %v2968_v42, %v2966_v40 }
 0x122   : > { %v2972_v44 = vpop.f32.mrf.mxu1 }
 0x123   : > { %3066 = vst [vmem:[#allocation3_spill] sm:$0xff] %v2972_v44  ;;  %v2144_v46 = vpop.f32.mrf.mxu0  ;;  %v1399_v44 = vadd.f32 %v2071_v11, %v2926_v30 }
 0x124   : > { %v2974_v47 = vpop.f32.mrf.mxu1  ;;  %v2145_v60 = vadd.f32 %v2144_v46, %v2970_v43  ;;  %v3077_v46 = vld [vmem:[#allocation2_spill] sm:$0xff] }
 0x125   : > { %3067 = vst [vmem:[#allocation4_spill] sm:$0xff] %v2974_v47  ;;  %v2146_v48 = vpop.f32.mrf.mxu0  ;;  %v2136_v47 = vadd.f32 %v2135_v32, %v2134_v29 }
 0x126   : > { %v2186_v49 = vpop.f32.mrf.mxu1 }
 0x127   : > { %v2147_v50 = vpop.f32.mrf.mxu0 }
 0x128   : > { %v2187_v51 = vpop.f32.mrf.mxu1  ;;  %v2148_v15 = vadd.f32 %v2147_v50, %v2146_v48 }
 0x129   : > { %v2149_v52 = vpop.f32.mrf.mxu0  ;;  %v2188_v41 = vadd.f32 %v2187_v51, %v2186_v49  ;;  %v1521_v49 = vadd.f32 %v2145_v60, %v3077_v46 }
 0x12a   : > { %v2976_v53 = vpop.f32.mrf.mxu1  ;;  %v3078_v51 = vld [vmem:[#allocation3_spill] sm:$0xff] }
 0x12b   : > { %v2150_v54 = vpop.f32.mrf.mxu0 }
 0x12c   : > { %v2978_v56 = vpop.f32.mrf.mxu1 }
 0x12d   : > { %v2208_v57 = vpop.f32.mrf.mxu0 }
 0x12e   : > { %v2980_v58 = vpop.f32.mrf.mxu1 }
 0x12f   : > { %3068 = vst [vmem:[#allocation5_spill] sm:$0xff] %v2980_v58  ;;  %v2209_v59 = vpop.f32.mrf.mxu0 }
 0x130   : > { %v2982_v61 = vpop.f32.mrf.mxu1 }
 0x131   : > { %3069 = vst [vmem:[#allocation6_spill] sm:$0xff] %v2982_v61  ;;  %v2984_v62 = vpop.f32.mrf.mxu0  ;;  %v2130_v61 = vadd.f32 %v2129_v23, %v2128_v21  ;;  %v2111_v23 = vadd.f32 %v2948_v20, %v2946_v18  ;;  %v2176_v18 = vadd.f32 %v2960_v33, %v2958_v31  ;;  %v1518_v20 = vadd.f32 %v2142_v17, %v2941_v7 }
 0x132   : > { %3070 = vst [vmem:[#allocation7_spill] sm:$0xff] %v2984_v62  ;;  %v2986_v63 = vpop.f32.mrf.mxu1  ;;  %v2210_v31 = vadd.f32 %v2209_v59, %v2208_v57  ;;  %v1578_v7 = vadd.f32 %v2179_v38, %v1513_v34 }
 0x133   : > { %3071 = vst [vmem:[#allocation8_spill] sm:$0xff] %v2986_v63  ;;  %v2988_v0 = vpop.f32.mrf.mxu0 }
 0x134   : > { %3072 = vst [vmem:[#allocation9_spill] sm:$0xff] %v2988_v0  ;;  %v2990_v1 = vpop.f32.mrf.mxu1  ;;  %v1396_v0 = vadd.f32 %v2068_v8, %v2926_v30  ;;  %v2170_v8 = vadd.f32 %v2952_v24, %v2950_v22  ;;  %v2151_v30 = vadd.f32 %v2150_v54, %v2149_v52 }
 0x135   : > { %3073 = vst [vmem:[#allocation10_spill] sm:$0xff] %v2990_v1  ;;  %v2214_v2 = vpop.f32.mrf.mxu0  ;;  %v2108_v1 = vadd.f32 %v2107_v16, %v2106_v14  ;;  %v1510_v16 = vadd.f32 %v2136_v47, %v2935_v55  ;;  %v2173_v55 = vadd.f32 %v2956_v28, %v2954_v26  ;;  %v1583_v26 = vadd.f32 %v2182_v45, %v1518_v20 }
 0x136   : > { %v2992_v3 = vpop.f32.mrf.mxu1  ;;  %v2191_v28 = vadd.f32 %v2978_v56, %v2976_v53 }
 0x137   : > { %3074 = vst [vmem:[#allocation11_spill] sm:$0xff] %v2992_v3  ;;  %v2215_v4 = vpop.f32.mrf.mxu0  ;;  %v1461_v21 = vadd.f32 %v2108_v1, %v1396_v0  ;;  %v1575_v47 = vadd.f32 %v2176_v18, %v1510_v16  ;;  %v1570_v17 = vadd.f32 %v2173_v55, %v1505_v36 }
 0x138   : > { %v2994_v5 = vpop.f32.mrf.mxu1  ;;  %v2216_v22 = vadd.f32 %v2215_v4, %v2214_v2 }
 0x139   : > { %3075 = vst [vmem:[#allocation12_spill] sm:$0xff] %v2994_v5  ;;  %v2217_v6 = vpop.f32.mrf.mxu0  ;;  %v1502_v5 = vadd.f32 %v2130_v61, %v2929_v39  ;;  %v1464_v39 = vadd.f32 %v2111_v23, %v1399_v44  ;;  %v1526_v25 = vadd.f32 %v2148_v15, %v1461_v21  ;;  %v3079_v61 = vld [vmem:[#allocation4_spill] sm:$0xff]  ;;  %v3080_v1 = vld [vmem:[#allocation7_spill] sm:$0xff]  ;;  %v3084_v21 = vld [vmem:[#allocation5_spill] sm:$0xff] }
 0x13a   : > { %v2996_v9 = vpop.f32.mrf.mxu1  ;;  %v1640_v35 = vadd.f32 %v2216_v22, %v1575_v47  ;;  %v2185_v40 = vadd.f32 %v3079_v61, %v3078_v51  ;;  %v3085_v23 = vld [vmem:[#allocation6_spill] sm:$0xff] }
 0x13b   : > { %3076 = vst [vmem:[#allocation13_spill] sm:$0xff] %v2996_v9  ;;  %v2218_v10 = vpop.f32.mrf.mxu0  ;;  %v1567_v32 = vadd.f32 %v2170_v8, %v1502_v5  ;;  %v1529_v12 = vadd.f32 %v2151_v30, %v1464_v39  ;;  %v1591_v48 = vadd.f32 %v2188_v41, %v1526_v25  ;;  %v3081_v2 = vld [vmem:[#allocation9_spill] sm:$0xff]  ;;  %v2250_v8 = vadd.f32 %v3085_v23, %v3084_v21  ;;  %v3087_v41 = vld [vmem:[#allocation8_spill] sm:$0xff] }
 0x13c   : > { %v2998_v58 = vpop.f32.mrf.mxu1  ;;  %v2219_v37 = vadd.f32 %v2218_v10, %v2217_v6  ;;  %v1586_v39 = vadd.f32 %v2185_v40, %v1521_v49 }
 0x13d   : > { %v2220_v63 = vpop.f32.mrf.mxu0  ;;  %v1594_v0 = vadd.f32 %v2191_v28, %v1529_v12 }
 0x13e   : > { %v3001_v62 = vpop.f32.mrf.mxu1  ;;  %v3082_v4 = vld [vmem:[#allocation11_spill] sm:$0xff]  ;;  %v1643_v16 = vadd.f32 %v2219_v37, %v1578_v7 }
 0x13f   : > { %v2221_v3 = vpop.f32.mrf.mxu0 }
 0x140   : > { %v2261_v9 = vpop.f32.mrf.mxu1  ;;  %v2222_v50 = vadd.f32 %v2221_v3, %v2220_v63  ;;  %v1632_v63 = vadd.f32 %v2210_v31, %v1567_v32  ;;  %v2213_v3 = vadd.f32 %v3081_v2, %v3080_v1  ;;  %v3083_v5 = vld [vmem:[#allocation12_spill] sm:$0xff] }
 0x141   : > { %v2223_v19 = vpop.f32.mrf.mxu0  ;;  %v2256_v53 = vadd.f32 %v3083_v5, %v3082_v4  ;;  %v2262_v32 = vadd.f32 %v2261_v9, %v3001_v62 }
 0x142   : > { %v3009_v14 = vpop.f32.mrf.mxu1  ;;  %v1648_v6 = vadd.f32 %v2222_v50, %v1583_v26  ;;  %v1635_v20 = vadd.f32 %v2213_v3, %v1570_v17  ;;  %v3086_v22 = vld [vmem:[#allocation13_spill] sm:$0xff]  ;;  %v1697_v38 = vadd.f32 %v2250_v8, %v1632_v63 }
 0x143   : > { %v2224_v29 = vpop.f32.mrf.mxu0  ;;  %v1705_v30 = vadd.f32 %v2256_v53, %v1640_v35 }
 0x144   : > { %v3013_v27 = vpop.f32.mrf.mxu1  ;;  %v2225_v10 = vadd.f32 %v2224_v29, %v2223_v19  ;;  %v2259_v19 = vadd.f32 %v2998_v58, %v3086_v22  ;;  %v1713_v62 = vadd.f32 %v2262_v32, %v1648_v6 }
 0x145   : > { %v2226_v24 = vpop.f32.mrf.mxu0 }
 0x146   : > { %v2266_v44 = vpop.f32.mrf.mxu1  ;;  %v1651_v36 = vadd.f32 %v2225_v10, %v1586_v39  ;;  %v1708_v31 = vadd.f32 %v2259_v19, %v1643_v16 }
 0x147   : > { %v2227_v33 = vpop.f32.mrf.mxu0 }
 0x148   : > { %v2228_v52 = vadd.f32 %v2227_v33, %v2226_v24  ;;  %v2267_v54 = vpop.f32.mrf.mxu1  ;;  %v2265_v33 = vadd.f32 %v3013_v27, %v3009_v14 }
 0x149   : > { %v2229_v43 = vpop.f32.mrf.mxu0  ;;  %v2268_v57 = vadd.f32 %v2267_v54, %v2266_v44  ;;  %v3088_v44 = vld [vmem:[#allocation10_spill] sm:$0xff] }
 0x14a   : > { %v1656_v42 = vadd.f32 %v2228_v52, %v1591_v48  ;;  %v2269_v59 = vpop.f32.mrf.mxu1  ;;  %v2253_v47 = vadd.f32 %v3088_v44, %v3087_v41  ;;  %v1716_v46 = vadd.f32 %v2265_v33, %v1651_v36 }
 0x14b   : > { %v2230_v56 = vpop.f32.mrf.mxu0 }
 0x14c   : > { %v2231_v11 = vadd.f32 %v2230_v56, %v2229_v43  ;;  %v2270_v13 = vpop.f32.mrf.mxu1  ;;  %v1721_v15 = vadd.f32 %v2268_v57, %v1656_v42  ;;  %v1700_v28 = vadd.f32 %v2253_v47, %v1635_v20 }
 0x14d   : > { %v2271_v25 = vadd.f32 %v2270_v13, %v2269_v59 }
 0x14e   : > { %v1659_v34 = vadd.f32 %v2231_v11, %v1594_v0  ;;  %v2302_v18 = vpop.f32.mrf.mxu0 }
 0x14f   : > { %v1770_v29 = vadd.f32 %v2302_v18, %v1705_v30  ;;  %v2306_v24 = vpop.f32.mrf.mxu1 }
 0x150   : > { %v1786_v55 = vadd.f32 %v2306_v24, %v1721_v15  ;;  %v1761_v60 = vpop.f32.mrf.mxu0  ;;  %v1724_v9 = vadd.f32 %v2271_v25, %v1659_v34 }
 0x151   : > { %v1794_v45 = vmax.f32 %v1770_v29, 0.0  ;;  %v1762_v58 = vadd.f32 %v1761_v60, %v1697_v38  ;;  %v1777_v12 = vpop.f32.mrf.mxu1 }
 0x152   : > { %v1798_v7 = vmax.f32 %v1786_v55, 0.0  ;;  %v1778_v48 = vadd.f32 %v1777_v12, %v1713_v62  ;;  %v2303_v50 = vpop.f32.mrf.mxu0 }
 0x153   : > { %1802 = vst [vmem:[%s3044_s9 + $0x10] sm:$0xff] %v1794_v45  ;;  %v1792_v52 = vmax.f32 %v1762_v58, 0.0  ;;  %v1773_v54 = vadd.f32 %v2303_v50, %v1708_v31  ;;  %v2307_v26 = vpop.f32.mrf.mxu1 }
 0x154   : > { %1806 = vst [vmem:[%s3044_s9 + $0x30] sm:$0xff] %v1798_v7  ;;  %v1796_v35 = vmax.f32 %v1778_v48, 0.0  ;;  %v1789_v37 = vadd.f32 %v2307_v26, %v1724_v9  ;;  %v1764_v43 = vpop.f32.mrf.mxu0 }
 0x155   : > { %1800 = vst [vmem:[%s3044_s9] sm:$0xff] %v1792_v52  ;;  %v1795_v14 = vmax.f32 %v1773_v54, 0.0  ;;  %v1765_v27 = vadd.f32 %v1764_v43, %v1700_v28  ;;  %v1780_v49 = vpop.f32.mrf.mxu1 }
 0x156   : > { %1804 = vst [vmem:[%s3044_s9 + $0x20] sm:$0xff] %v1796_v35  ;;  %v1799_v51 = vmax.f32 %v1789_v37, 0.0  ;;  %v1781_v61 = vadd.f32 %v1780_v49, %v1716_v46 }
 0x157   : > { %1803 = vst [vmem:[%s3044_s9 + $0x18] sm:$0xff] %v1795_v14  ;;  %v1793_v40 = vmax.f32 %v1765_v27, 0.0 }
 0x158   : > { %1807 = vst [vmem:[%s3044_s9 + $0x38] sm:$0xff] %v1799_v51  ;;  %v1797_v42 = vmax.f32 %v1781_v61, 0.0 }
 0x159   : > { %1801 = vst [vmem:[%s3044_s9 + $0x8] sm:$0xff] %v1793_v40 }
 0x15a   : > { %1805 = vst [vmem:[%s3044_s9 + $0x28] sm:$0xff] %v1797_v42 }
 0x15b PF: > { %s13_s12 = sadd.s32 1, %s2519_s12  }
 0x15c   : > { %p10_p4 = scmp.ge.s32.totalorder %s13_s12, 4  }
 0x15e   :  { %12 = sbr.rel (!%p10_p4) target bundleno = 1 (0x1), region = 62 }

// kernel: forward_pallas.17
= control target key start
LH: loop header
LB: loop body
LE: loop exit
PB: predicated region body
PF: predicated region fallthrough
CT: control target
= control target key end

     0   :  { %s535_s12 = smov 0   ;;  %s610_s0 = inlined_call_operand.vmem [shape: bf16[32,256], index: 0, kind: input, shape index: {}]   ;;  %s611_s1 = inlined_call_operand.vmem [shape: bf16[256,128], index: 1, kind: input, shape index: {}]   ;;  %s612_s2 = inlined_call_operand.vmem [shape: f32[1,128], index: 2, kind: input, shape index: {}]   ;;  %s613_s3 = inlined_call_operand.vmem [shape: f32[32,128], index: 3, kind: output, shape index: {}]  }
   0x1 LB: > { %s426_s13 = sadd.s32 4294967295, %s513_s12   ;;  %p430_p0 = scmp.ge.s32.totalorder %s513_s12, 1  ;;  %s513_s12 = sphi %s535_s12, %s13_s12  }
   0x2   : > { %p139_p1 = scmp.lt.s32.totalorder %s513_s12, 3 }
   0x4   : > { %p140_p2 = pnand %p430_p0, %p139_p1 }
   0x5   : > { %s431_s16 = sshll.u32 (!%p140_p2), %s426_s13, 1 }
   0x6   : > { %143 = sbr.rel (%p140_p2) target bundleno = 250 (0xfa), region = 32  ;;  %p165_p3 = scmp.lt.s32.totalorder (!%p140_p2), %s431_s16, 3 }
   0xb   : > { %v488_v0 = vld [vmem:[%s611_s1 + $0x78] sm:$0xff]   ;;  %v490_v2 = vld [vmem:[%s611_s1 + $0x70] sm:$0xff]   ;;  %v492_v4 = vld [vmem:[%s611_s1 + $0x68] sm:$0xff]   ;;  %s615_s16 = smov (!%p165_p3, %s431_s16), 3 }
   0xc   : > { %v489_v1 = vld [vmem:[%s611_s1 + $0x38] sm:$0xff]   ;;  %458 = vmatprep.subr.bf16.mxu0 %v488_v0  ;;  %v491_v3 = vld [vmem:[%s611_s1 + $0x30] sm:$0xff]   ;;  %v493_v5 = vld [vmem:[%s611_s1 + $0x28] sm:$0xff]   ;;  %s457_s4 = sshll.u32 %s615_s16, 3 }
   0xd   : > { %459 = vmatpush3.bf16.msra.mxu0 %v489_v1  ;;  %v494_v6 = vld [vmem:[%s611_s1 + $0x60] sm:$0xff]   ;;  %v496_v8 = vld [vmem:[%s611_s1 + $0x58] sm:$0xff]   ;;  %s169_s9 = scalar_lea.vmem %s610_s0, %s457_s4  ;;  %v498_v10 = vld [vmem:[%s611_s1 + $0x50] sm:$0xff]   ;;  %s175_s30 = scalar_lea.vmem %s613_s3, %s457_s4 }
   0xe   : > { %460 = vmatprep.subr.bf16.mxu0 %v490_v2  ;;  %v495_v7 = vld [vmem:[%s611_s1 + $0x20] sm:$0xff]   ;;  %v497_v9 = vld [vmem:[%s611_s1 + $0x18] sm:$0xff]   ;;  %v499_v12 = vld [vmem:[%s611_s1 + $0x10] sm:$0xff]  }
   0xf   : > { %v506_v11 = vld [vmem:[%s169_s9 + $0x4] ss:$8 sps:$4 sm:$0xff]   ;;  %v504_v17 = vld [vmem:[%s169_s9] ss:$8 sps:$4 sm:$0xff]  }
  0x10   : > { %357 = vmatprep.mubr.bf16.mxu0 %v506_v11  ;;  %v500_v13 = vld [vmem:[%s611_s1 + $0x48] sm:$0xff]   ;;  %v502_v15 = vld [vmem:[%s611_s1 + $0x40] sm:$0xff]  }
  0x11   : > { %461 = vmatpush3.bf16.msra.mxu0 %v491_v3  ;;  %v501_v14 = vld [vmem:[%s611_s1 + $0x8] sm:$0xff]   ;;  %v503_v16 = vld [vmem:[%s611_s1] sm:$0xff]  }
  0x12   : > { %462 = vmatprep.subr.bf16.mxu0 %v492_v4  ;;  %v436_v19 = vld [vmem:[%s612_s2] ss:$0 sm:$0xff] }
  0x15   : > { %463 = vmatpush3.bf16.msra.mxu0 %v493_v5 }
  0x16   : > { %464 = vmatprep.subr.bf16.mxu0 %v494_v6 }
  0x19   : > { %465 = vmatpush3.bf16.msra.mxu0 %v495_v7 }
  0x1a   : > { %466 = vmatprep.subr.bf16.mxu0 %v496_v8 }
  0x1d   : > { %467 = vmatpush3.bf16.msra.mxu0 %v497_v9 }
  0x1e   : > { %468 = vmatprep.subr.bf16.mxu0 %v498_v10 }
  0x21   : > { %469 = vmatpush3.bf16.msra.mxu0 %v499_v12 }
  0x22   : > { %470 = vmatprep.subr.bf16.mxu0 %v500_v13 }
  0x25   : > { %471 = vmatpush3.bf16.msra.mxu0 %v501_v14 }
  0x26   : > { %472 = vmatprep.subr.bf16.mxu0 %v502_v15 }
  0x29   : > { %473 = vmatpush3.bf16.msra.mxu0 %v503_v16 }
  0x2c   : > { %358 = vmatmul.mubr.bf16.vlgmr.msra.gmra.mxu0 %v504_v17 }
  0xec   : > { %v474_v18 = vpop.f32.mrf.mxu0 }
  0xee   : > { %v475_v20 = vpop.f32.mrf.mxu0 }
  0xef   : > { %v476_v21 = vadd.f32 %v475_v20, %v474_v18 }
  0xf0   : > { %v477_v22 = vpop.f32.mrf.mxu0 }
  0xf1   : > { %v360_v23 = vadd.f32 %v476_v21, %v436_v19 }
  0xf2   : > { %v478_v24 = vpop.f32.mrf.mxu0 }
  0xf3   : > { %v366_v25 = vmax.f32 %v360_v23, 0.0  ;;  %v479_v26 = vadd.f32 %v478_v24, %v477_v22 }
  0xf5   : > { %368 = vst [vmem:[%s175_s30] sm:$0xff] %v366_v25  ;;  %v363_v27 = vadd.f32 %v479_v26, %v436_v19 }
  0xf7   : > { %v367_v28 = vmax.f32 %v363_v27, 0.0 }
  0xf9   : > { %369 = vst [vmem:[%s175_s30 + $0x8] sm:$0xff] %v367_v28 }
  0xfa PF: > { %s13_s12 = sadd.s32 1, %s513_s12  }
  0xfb   : > { %p10_p4 = scmp.ge.s32.totalorder %s13_s12, 4  }
  0xfd   :  { %12 = sbr.rel (!%p10_p4) target bundleno = 1 (0x1), region = 62 }

// kernel: forward_pallas.18
= control target key start
LH: loop header
LB: loop body
LE: loop exit
PB: predicated region body
PF: predicated region fallthrough
CT: control target
= control target key end

     0   :  { %v421_v0 = vmov 0.0   ;;  %vm422_vm0 = vmmov 0   ;;  %s527_s1 = inlined_call_operand.vmem [shape: bf16[384,128], index: 1, kind: input, shape index: {}]   ;;  %s528_s0 = inlined_call_operand.vmem [shape: bf16[8,384], index: 0, kind: input, shape index: {}]   ;;  %s529_s2 = inlined_call_operand.vmem [shape: f32[1,128], index: 2, kind: input, shape index: {}]   ;;  %s530_s3 = inlined_call_operand.vmem [shape: f32[8,128], index: 3, kind: output, shape index: {}]  }
   0x1   :  { %372 = vmatprep.subr.bf16.mxu1 %v421_v0  ;;  %v394_v1 = vld [vmem:[%s527_s1 + $0x78] sm:$0xff]   ;;  %388 = vmatprep.mubr.msk.bf16.mxu1 %vm422_vm0, %v421_v0  ;;  %v397_v4 = vld [vmem:[%s527_s1 + $0x70] sm:$0xff]   ;;  %v400_v7 = vld [vmem:[%s527_s1 + $0x68] sm:$0xff]  }
   0x2   :  { %v395_v2 = vld [vmem:[%s527_s1 + $0xb8] sm:$0xff]   ;;  %341 = vmatprep.subr.bf16.mxu0 %v394_v1  ;;  %v398_v5 = vld [vmem:[%s527_s1 + $0xb0] sm:$0xff]   ;;  %v401_v8 = vld [vmem:[%s527_s1 + $0xa8] sm:$0xff]  }
   0x3   :  { %v396_v3 = vld [vmem:[%s527_s1 + $0x38] sm:$0xff]   ;;  %373 = vmatpush3.bf16.msra.mxu1 %v395_v2  ;;  %v399_v6 = vld [vmem:[%s527_s1 + $0x30] sm:$0xff]   ;;  %v402_v9 = vld [vmem:[%s527_s1 + $0x28] sm:$0xff]  }
   0x4   :  { %342 = vmatpush3.bf16.msra.mxu0 %v396_v3  ;;  %374 = vmatprep.subr.bf16.mxu1 %v421_v0  ;;  %v403_v10 = vld [vmem:[%s527_s1 + $0x60] sm:$0xff]   ;;  %v406_v13 = vld [vmem:[%s527_s1 + $0x58] sm:$0xff]   ;;  %v409_v16 = vld [vmem:[%s527_s1 + $0x50] sm:$0xff]  }
   0x5   :  { %343 = vmatprep.subr.bf16.mxu0 %v397_v4  ;;  %v404_v11 = vld [vmem:[%s527_s1 + $0xa0] sm:$0xff]   ;;  %v407_v14 = vld [vmem:[%s527_s1 + $0x98] sm:$0xff]   ;;  %v410_v17 = vld [vmem:[%s527_s1 + $0x90] sm:$0xff]  }
   0x6   :  { %v405_v12 = vld [vmem:[%s527_s1 + $0x20] sm:$0xff]   ;;  %v408_v15 = vld [vmem:[%s527_s1 + $0x18] sm:$0xff]   ;;  %v411_v18 = vld [vmem:[%s527_s1 + $0x10] sm:$0xff]  }
   0x7   :  { %375 = vmatpush3.bf16.msra.mxu1 %v398_v5  ;;  %v412_v19 = vld [vmem:[%s527_s1 + $0x48] sm:$0xff]   ;;  %v15_v22 = vld [vmem:[%s528_s0] sm:$0xff] }
   0x8   :  { %344 = vmatpush3.bf16.msra.mxu0 %v399_v6  ;;  %376 = vmatprep.subr.bf16.mxu1 %v421_v0  ;;  %v413_v20 = vld [vmem:[%s527_s1 + $0x88] sm:$0xff]   ;;  %v415_v23 = vld [vmem:[%s527_s1 + $0x40] sm:$0xff]   ;;  %v315_v24 = vcombine.high %v15_v22, %v15_v22  ;;  %v314_v28 = vcombine.low %v15_v22, %v15_v22 }
   0x9   :  { %345 = vmatprep.subr.bf16.mxu0 %v400_v7  ;;  %v414_v21 = vld [vmem:[%s527_s1 + $0x8] sm:$0xff]   ;;  %v416_v25 = vld [vmem:[%s527_s1 + $0x80] sm:$0xff]  }
   0xa   :  { %259 = vmatprep.mubr.bf16.mxu0 %v315_v24  ;;  %v417_v26 = vld [vmem:[%s527_s1] sm:$0xff]   ;;  %v420_v27 = vld [vmem:[%s528_s0 + $0x8] ss:$0 sps:$4 sm:$0xff]  }
   0xb   :  { %377 = vmatpush3.bf16.msra.mxu1 %v401_v8  ;;  %v313_v32 = vld [vmem:[%s529_s2] ss:$0 sm:$0xff] }
   0xc   :  { %346 = vmatpush3.bf16.msra.mxu0 %v402_v9  ;;  %378 = vmatprep.subr.bf16.mxu1 %v421_v0 }
   0xd   :  { %347 = vmatprep.subr.bf16.mxu0 %v403_v10 }
   0xf   :  { %379 = vmatpush3.bf16.msra.mxu1 %v404_v11 }
  0x10   :  { %348 = vmatpush3.bf16.msra.mxu0 %v405_v12  ;;  %380 = vmatprep.subr.bf16.mxu1 %v421_v0 }
  0x11   :  { %349 = vmatprep.subr.bf16.mxu0 %v406_v13 }
  0x13   :  { %381 = vmatpush3.bf16.msra.mxu1 %v407_v14 }
  0x14   :  { %350 = vmatpush3.bf16.msra.mxu0 %v408_v15  ;;  %382 = vmatprep.subr.bf16.mxu1 %v421_v0 }
  0x15   :  { %351 = vmatprep.subr.bf16.mxu0 %v409_v16 }
  0x17   :  { %383 = vmatpush3.bf16.msra.mxu1 %v410_v17 }
  0x18   :  { %352 = vmatpush3.bf16.msra.mxu0 %v411_v18  ;;  %384 = vmatprep.subr.bf16.mxu1 %v421_v0 }
  0x19   :  { %353 = vmatprep.subr.bf16.mxu0 %v412_v19 }
  0x1b   :  { %385 = vmatpush3.bf16.msra.mxu1 %v413_v20 }
  0x1c   :  { %354 = vmatpush3.bf16.msra.mxu0 %v414_v21  ;;  %386 = vmatprep.subr.bf16.mxu1 %v421_v0 }
  0x1d   :  { %355 = vmatprep.subr.bf16.mxu0 %v415_v23 }
  0x1f   :  { %387 = vmatpush3.bf16.msra.mxu1 %v416_v25 }
  0x20   :  { %356 = vmatpush3.bf16.msra.mxu0 %v417_v26 }
  0x22   :  { %389 = vmatmul.mubr.bf16.vlgmr.msra.gmra.mxu1 %v420_v27 }
  0x23   :  { %260 = vmatmul.mubr.bf16.vlgmr.msra.gmra.mxu0 %v314_v28 }
  0xe2   :  { %v301_v29 = vpop.f32.mrf.mxu1 }
  0xe3   :  { %v357_v30 = vpop.f32.mrf.mxu0 }
  0xe4   :  { %v390_v31 = vpop.f32.mrf.mxu1 }
  0xe5   :  { %v358_v33 = vpop.f32.mrf.mxu0 }
  0xe6   :  { %v359_v34 = vadd.f32 %v358_v33, %v357_v30  ;;  %v304_v35 = vpop.f32.mrf.mxu1 }
  0xe7   :  { %v360_v36 = vpop.f32.mrf.mxu0 }
  0xe8   :  { %v262_v37 = vadd.f32 %v359_v34, %v313_v32  ;;  %v391_v38 = vpop.f32.mrf.mxu1 }
  0xe9   :  { %v361_v39 = vpop.f32.mrf.mxu0 }
  0xea   :  { %v302_v40 = vadd.f32 %v301_v29, %v262_v37 }
  0xec   :  { %v307_v41 = vmax.f32 %v302_v40, 0.0 }
  0xee   :  { %308 = vst [vmem:[%s530_s3] sm:$0xff] %v307_v41 }

// kernel: forward_pallas.19
= control target key start
LH: loop header
LB: loop body
LE: loop exit
PB: predicated region body
PF: predicated region fallthrough
CT: control target
= control target key end

     0   :  { %v672_v21 = vmov 1966171168   ;;  %v108_v23 = vlaneseq  ;;  %v673_v40 = vmov 0.0   ;;  %vm674_vm0 = vmmov 0   ;;  %s824_s1 = inlined_call_operand.vmem [shape: bf16[640,128], index: 1, kind: input, shape index: {}]   ;;  %s825_s0 = inlined_call_operand.vmem [shape: bf16[2,640], index: 0, kind: input, shape index: {}]   ;;  %s826_s2 = inlined_call_operand.vmem [shape: f32[1,128], index: 2, kind: input, shape index: {}]   ;;  %s827_s3 = inlined_call_operand.vmem [shape: f32[2,128], index: 3, kind: output, shape index: {}]  }
   0x1   :  { %v631_v0 = vld [vmem:[%s824_s1 + $0x78] sm:$0xff]   ;;  %v635_v4 = vld [vmem:[%s824_s1 + $0x70] sm:$0xff]   ;;  %v639_v8 = vld [vmem:[%s824_s1 + $0x68] sm:$0xff]   ;;  %v106_v22 = vunpack.c.l.s4 %v672_v21 }
   0x2   :  { %v632_v1 = vld [vmem:[%s824_s1 + $0x38] sm:$0xff]   ;;  %555 = vmatprep.subr.bf16.mxu0 %v631_v0  ;;  %v636_v5 = vld [vmem:[%s824_s1 + $0x30] sm:$0xff]   ;;  %v640_v9 = vld [vmem:[%s824_s1 + $0x28] sm:$0xff]   ;;  %v109_v29 = vshrl.u32 %v108_v23, 7 }
   0x3   :  { %v633_v2 = vld [vmem:[%s824_s1 + $0xf8] sm:$0xff]   ;;  %556 = vmatpush3.bf16.msra.mxu0 %v632_v1  ;;  %v637_v6 = vld [vmem:[%s824_s1 + $0xf0] sm:$0xff]   ;;  %v641_v10 = vld [vmem:[%s824_s1 + $0xe8] sm:$0xff]   ;;  %v107_v28 = vunpack.c.0.s8 %v106_v22 }
   0x4   :  { %v634_v3 = vld [vmem:[%s824_s1 + $0xb8] sm:$0xff]   ;;  %577 = vmatprep.subr.bf16.mxu1 %v633_v2  ;;  %557 = vmatprep.subr.bf16.mxu0 %v635_v4  ;;  %v638_v7 = vld [vmem:[%s824_s1 + $0xb0] sm:$0xff]   ;;  %v642_v11 = vld [vmem:[%s824_s1 + $0xa8] sm:$0xff]  }
   0x5   :  { %578 = vmatpush3.bf16.msra.mxu1 %v634_v3  ;;  %v643_v12 = vld [vmem:[%s824_s1 + $0x60] sm:$0xff]   ;;  %v647_v16 = vld [vmem:[%s824_s1 + $0x58] sm:$0xff]   ;;  %v651_v20 = vld [vmem:[%s824_s1 + $0x50] sm:$0xff]   ;;  %v110_v34 = vsub.s32 %v107_v28, %v109_v29 }
   0x6   :  { %579 = vmatprep.subr.bf16.mxu1 %v637_v6  ;;  %v644_v13 = vld [vmem:[%s824_s1 + $0x20] sm:$0xff]   ;;  %v648_v17 = vld [vmem:[%s824_s1 + $0x18] sm:$0xff]   ;;  %v652_v24 = vld [vmem:[%s824_s1 + $0x10] sm:$0xff]  }
   0x7   :  { %558 = vmatpush3.bf16.msra.mxu0 %v636_v5  ;;  %v645_v14 = vld [vmem:[%s824_s1 + $0xe0] sm:$0xff]   ;;  %v649_v18 = vld [vmem:[%s824_s1 + $0xd8] sm:$0xff]   ;;  %v653_v25 = vld [vmem:[%s824_s1 + $0xd0] sm:$0xff]  }
   0x8   :  { %559 = vmatprep.subr.bf16.mxu0 %v639_v8  ;;  %v646_v15 = vld [vmem:[%s824_s1 + $0xa0] sm:$0xff]   ;;  %v650_v19 = vld [vmem:[%s824_s1 + $0x98] sm:$0xff]   ;;  %v654_v26 = vld [vmem:[%s824_s1 + $0x90] sm:$0xff]  }
   0x9   :  { %580 = vmatpush3.bf16.msra.mxu1 %v638_v7  ;;  %v655_v27 = vld [vmem:[%s824_s1 + $0x48] sm:$0xff]   ;;  %v659_v33 = vld [vmem:[%s824_s1 + $0x40] sm:$0xff]   ;;  %v664_v44 = vld [vmem:[%s824_s1 + $0x138] sm:$0xff]  }
   0xa   :  { %581 = vmatprep.subr.bf16.mxu1 %v641_v10  ;;  %v656_v30 = vld [vmem:[%s824_s1 + $0x8] sm:$0xff]   ;;  %v660_v35 = vld [vmem:[%s824_s1] sm:$0xff]   ;;  %v665_v47 = vld [vmem:[%s824_s1 + $0x130] sm:$0xff]  }
   0xb   :  { %560 = vmatpush3.bf16.msra.mxu0 %v640_v9  ;;  %v657_v31 = vld [vmem:[%s824_s1 + $0xc8] sm:$0xff]   ;;  %v661_v36 = vld [vmem:[%s824_s1 + $0xc0] sm:$0xff]   ;;  %v668_v50 = vld [vmem:[%s824_s1 + $0x118] sm:$0xff]  }
   0xc   :  { %561 = vmatprep.subr.bf16.mxu0 %v643_v12  ;;  %v658_v32 = vld [vmem:[%s824_s1 + $0x88] sm:$0xff]   ;;  %v15_v37 = vld [vmem:[%s825_s0] sm:$0x1f]  ;;  %v669_v51 = vld [vmem:[%s824_s1 + $0x110] sm:$0xff]  }
   0xd   :  { %582 = vmatpush3.bf16.msra.mxu1 %v642_v11  ;;  %v111_v38 = vrot.slane %v15_v37, %v110_v34  ;;  %v663_v39 = vld [vmem:[%s824_s1 + $0x80] sm:$0xff]   ;;  %v666_v48 = vld [vmem:[%s824_s1 + $0x128] sm:$0xff]   ;;  %v104_v52 = vcombine.high %v15_v37, %v15_v37 }
   0xe   :  { %583 = vmatprep.subr.bf16.mxu1 %v645_v14  ;;  %v667_v49 = vld [vmem:[%s824_s1 + $0x120] sm:$0xff]   ;;  %v670_v53 = vld [vmem:[%s824_s1 + $0x108] sm:$0xff]  }
   0xf   :  { %562 = vmatpush3.bf16.msra.mxu0 %v644_v13  ;;  %v119_v41 = vcombine.high %v111_v38, %v111_v38  ;;  %v126_v42 = vrot.slane %v111_v38, %v110_v34  ;;  %v118_v54 = vrot.slane %v104_v52, %v110_v34  ;;  %v671_v55 = vld [vmem:[%s824_s1 + $0x100] sm:$0xff]  }
  0x10   :  { %563 = vmatprep.subr.bf16.mxu0 %v647_v16  ;;  %v514_v2 = vld [vmem:[%s826_s2] ss:$0 sm:$0xff] }
  0x11   :  { %584 = vmatpush3.bf16.msra.mxu1 %v646_v15  ;;  %v140_v43 = vrot.slane %v119_v41, %v110_v34  ;;  %v141_v45 = vcombine.high %v126_v42, %v126_v42  ;;  %v133_v56 = vrot.slane %v118_v54, %v110_v34 }
  0x12   :  { %585 = vmatprep.subr.bf16.mxu1 %v649_v18 }
  0x13   :  { %564 = vmatpush3.bf16.msra.mxu0 %v648_v17  ;;  %420 = vmatprep.mubr.bf16.mxu0 %v140_v43  ;;  %v142_v46 = vcombine.high %v140_v43, %v140_v43 }
  0x14   :  { %565 = vmatprep.subr.bf16.mxu0 %v651_v20 }
  0x15   :  { %586 = vmatpush3.bf16.msra.mxu1 %v650_v19  ;;  %460 = vmatprep.mubr.bf16.mxu1 %v142_v46 }
  0x16   :  { %587 = vmatprep.subr.bf16.mxu1 %v653_v25 }
  0x17   :  { %566 = vmatpush3.bf16.msra.mxu0 %v652_v24 }
  0x18   :  { %567 = vmatprep.subr.bf16.mxu0 %v655_v27 }
  0x19   :  { %588 = vmatpush3.bf16.msra.mxu1 %v654_v26 }
  0x1a   :  { %589 = vmatprep.subr.bf16.mxu1 %v657_v31 }
  0x1b   :  { %568 = vmatpush3.bf16.msra.mxu0 %v656_v30 }
  0x1c   :  { %569 = vmatprep.subr.bf16.mxu0 %v659_v33 }
  0x1d   :  { %590 = vmatpush3.bf16.msra.mxu1 %v658_v32 }
  0x1e   :  { %591 = vmatprep.subr.bf16.mxu1 %v661_v36 }
  0x1f   :  { %570 = vmatpush3.bf16.msra.mxu0 %v660_v35 }
  0x20   :  { %608 = vmatprep.subr.bf16.mxu0 %v673_v40 }
  0x21   :  { %592 = vmatpush3.bf16.msra.mxu1 %v663_v39 }
  0x22   :  { %421 = vmatmul.mubr.bf16.vlgmr.msra.gmra.mxu0 %v126_v42 }
  0x23   :  { %609 = vmatpush3.bf16.msra.mxu0 %v664_v44  ;;  %624 = vmatprep.mubr.msk.bf16.mxu0 %vm674_vm0, %v673_v40 }
  0x24   :  { %461 = vmatmul.mubr.bf16.vlgmr.msra.gmra.mxu1 %v141_v45  ;;  %610 = vmatprep.subr.bf16.mxu0 %v673_v40 }
  0x27   :  { %611 = vmatpush3.bf16.msra.mxu0 %v665_v47 }
  0x28   :  { %612 = vmatprep.subr.bf16.mxu0 %v673_v40 }
  0x2b   :  { %613 = vmatpush3.bf16.msra.mxu0 %v666_v48 }
  0x2c   :  { %614 = vmatprep.subr.bf16.mxu0 %v673_v40 }
  0x2f   :  { %615 = vmatpush3.bf16.msra.mxu0 %v667_v49 }
  0x30   :  { %616 = vmatprep.subr.bf16.mxu0 %v673_v40 }
  0x33   :  { %617 = vmatpush3.bf16.msra.mxu0 %v668_v50 }
  0x34   :  { %618 = vmatprep.subr.bf16.mxu0 %v673_v40 }
  0x37   :  { %619 = vmatpush3.bf16.msra.mxu0 %v669_v51 }
  0x38   :  { %620 = vmatprep.subr.bf16.mxu0 %v673_v40 }
  0x3b   :  { %621 = vmatpush3.bf16.msra.mxu0 %v670_v53 }
  0x3c   :  { %622 = vmatprep.subr.bf16.mxu0 %v673_v40 }
  0x3f   :  { %623 = vmatpush3.bf16.msra.mxu0 %v671_v55 }
  0x42   :  { %625 = vmatmul.mubr.bf16.vlgmr.msra.gmra.mxu0 %v133_v56 }
  0xe2   :  { %v571_v57 = vpop.f32.mrf.mxu0 }
  0xe4   :  { %v572_v58 = vpop.f32.mrf.mxu0  ;;  %v593_v59 = vpop.f32.mrf.mxu1 }
  0xe5   :  { %v573_v1 = vadd.f32 %v572_v58, %v571_v57 }
  0xe6   :  { %v574_v60 = vpop.f32.mrf.mxu0  ;;  %v594_v61 = vpop.f32.mrf.mxu1 }
  0xe7   :  { %v423_v3 = vadd.f32 %v573_v1, %v514_v2  ;;  %v595_v4 = vadd.f32 %v594_v61, %v593_v59 }
  0xe8   :  { %v575_v62 = vpop.f32.mrf.mxu0  ;;  %v596_v63 = vpop.f32.mrf.mxu1 }
  0xe9   :  { %v463_v5 = vadd.f32 %v595_v4, %v423_v3 }
  0xea   :  { %v597_v0 = vpop.f32.mrf.mxu1 }
 0x102   :  { %v502_v6 = vpop.f32.mrf.mxu0 }
 0x103   :  { %v503_v7 = vadd.f32 %v502_v6, %v463_v5 }
 0x104   :  { %v626_v8 = vpop.f32.mrf.mxu0 }
 0x105   :  { %v508_v9 = vmax.f32 %v503_v7, 0.0 }
 0x106   :  { %v505_v10 = vpop.f32.mrf.mxu0 }
 0x107   :  { %509 = vst [vmem:[%s827_s3] sm:$0x3] %v508_v9 }
 0x108   :  { %v627_v11 = vpop.f32.mrf.mxu0 }

// kernel: forward_pallas.20
= control target key start
LH: loop header
LB: loop body
LE: loop exit
PB: predicated region body
PF: predicated region fallthrough
CT: control target
= control target key end

     0   :  { %s1938_s9 = smov 0   ;;  %s2530_s0 = inlined_call_operand.vmem [shape: f32[2,384], index: 0, kind: input, shape index: {}]   ;;  %s2531_s1 = inlined_call_operand.vmem [shape: f32[15,384,384], index: 1, kind: input, shape index: {}]   ;;  %s2532_s2 = inlined_call_operand.vmem [shape: f32[2,384], index: 2, kind: output, shape index: {}]  }
   0x1 LB: > { %s1944_s10 = sadd.s32 4294967295, %s1912_s9   ;;  %p1614_p0 = scmp.ge.s32.totalorder %s1912_s9, 1  ;;  %s1912_s9 = sphi %s1938_s9, %s12_s9  }
   0x2   : > { %p107_p1 = scmp.lt.s32.totalorder %s1912_s9, 16 }
   0x4   : > { %p108_p2 = pnand %p1614_p0, %p107_p1 }
   0x5   : > { %p124_p3 = scmp.lt.s32.totalorder (!%p108_p2), %s1944_s10, 14  ;;  %p1616_p4 = scmp.ne.s32.totalorder (!%p108_p2), %s1944_s10, 0 }
   0x6   : > { %111 = sbr.rel (%p108_p2) target bundleno = 938 (0x3aa), region = 28 }
   0xb   : > { %s125_s11 = scalar_select %p124_p3, %s1944_s10, 14 }
   0xc   : > { %132 = sbr.rel (%p1616_p4) target bundleno = 19 (0x13), region = 32 }
   0xd   : > { %s1885_s12 = smul.u32 1152, %s125_s11 }
   0xf   : > { %s1955_s15 = scalar_lea.vmem %s2531_s1, %s1885_s12 }
  0x11   : > { %v133_v0 = vld [vmem:[%s2530_s0] sm:$0x3f] }
  0x12   : > { %134 = vst [vmem:[#allocation2] sm:$0x3f] %v133_v0 }
  0x13 PF: > { %p135_p5 = scmp.ge.s32.totalorder %s1944_s10, 2  ;;  %s1617_s18 = sadd.s32 4294967294, %s1944_s10 }
  0x14   : > { %p141_p6 = scmp.lt.s32.totalorder %s1617_s18, 0  ;;  %s142_s19 = ssub.s32 0, %s1617_s18 }
  0x15   : > { %s1618_s20 = smin.u32 %s1617_s18, %s142_s19  ;;  %p137_p7 = pnand %p135_p5, %p124_p3 }
  0x16   : > { %s144_s21 = sand.u32 1, %s1618_s20   ;;  %v208_v1 = vld [vmem:[%s1955_s15 + $0x170] sm:$0xff] (%p137_p7)  ;;  %v207_v2 = vld [vmem:[%s1955_s15 + $0x168] sm:$0xff] (%p137_p7)  ;;  %v205_v3 = vld [vmem:[%s1955_s15 + $0x158] sm:$0xff] (%p137_p7)  ;;  %v1914_v5 = vmov (%p137_p7), 0.0   ;;  %v311_v55 = vlaneseq (%p137_p7)  ;;  %vm1916_vm0 = vmmov (%p137_p7), 0  }
  0x17   : > { %s145_s22 = ssub.s32 0, %s144_s21  ;;  %p138_p9 = pneg %p137_p7  ;;  %326 = vmatprep.subr.mxu0 (%p137_p7), %v208_v1  ;;  %v204_v4 = vld [vmem:[%s1955_s15 + $0x150] sm:$0xff] (%p137_p7)  ;;  %461 = vmatprep.mubr.f32.mxu1 (%p137_p7), %v1914_v5  ;;  %v202_v6 = vld [vmem:[%s1955_s15 + $0x140] sm:$0xff] (%p137_p7)  ;;  %v201_v7 = vld [vmem:[%s1955_s15 + $0x138] sm:$0xff] (%p137_p7)  ;;  %v1915_v53 = vmov (%p137_p7), 1983009808  }
  0x18   : > { %s2536_s22 = smov (!%p141_p6, %s145_s22), %s144_s21  ;;  %327 = vmatpush1.msra.mxu0 (%p137_p7), %v207_v2  ;;  %v199_v8 = vld [vmem:[%s1955_s15 + $0x128] sm:$0xff] (%p137_p7)  ;;  %v198_v9 = vld [vmem:[%s1955_s15 + $0x120] sm:$0xff] (%p137_p7)  ;;  %v196_v10 = vld [vmem:[%s1955_s15 + $0x110] sm:$0xff] (%p137_p7)  ;;  %v309_v54 = vunpack.c.l.s4 (%p137_p7), %v1915_v53  ;;  %v312_v1 = vshrl.u32 (%p137_p7), %v311_v55, 7 }
  0x19   : > { %p1620_p8 = scmp.lt.s32.totalorder %s2536_s22, 0  ;;  %s151_s23 = sadd.s32 2, %s2536_s22  ;;  %328 = vmatprep.subr.mxu0 (%p137_p7), %v205_v3  ;;  %v195_v11 = vld [vmem:[%s1955_s15 + $0x108] sm:$0xff] (%p137_p7)  ;;  %v193_v12 = vld [vmem:[%s1955_s15 + $0xf8] sm:$0xff] (%p137_p7)  ;;  %v192_v13 = vld [vmem:[%s1955_s15 + $0xf0] sm:$0xff] (%p137_p7) }
  0x1a   : > { %160 = sbr.rel (!%p137_p7) target bundleno = 321 (0x141), region = 36  ;;  %329 = vmatpush1.msra.mxu0 (%p137_p7), %v204_v4  ;;  %v304_v14 = vld [vmem:[%s1955_s15 + $0x470] sm:$0xff] (%p137_p7)  ;;  %v303_v15 = vld [vmem:[%s1955_s15 + $0x468] sm:$0xff] (%p137_p7)  ;;  %v190_v16 = vld [vmem:[%s1955_s15 + $0xe0] sm:$0xff] (%p137_p7)  ;;  %v310_v0 = vunpack.c.0.s8 (%p137_p7), %v309_v54 }
  0x1b   : > { %s2538_s23 = smov (!%p1620_p8, %s151_s23), %s2536_s22  ;;  %330 = vmatprep.subr.mxu0 (%p137_p7), %v202_v6  ;;  %397 = vmatprep.subr.mxu1 (%p137_p7), %v304_v14  ;;  %v301_v17 = vld [vmem:[%s1955_s15 + $0x458] sm:$0xff] (%p137_p7)  ;;  %v300_v19 = vld [vmem:[%s1955_s15 + $0x450] sm:$0xff] (%p137_p7)  ;;  %v298_v20 = vld [vmem:[%s1955_s15 + $0x440] sm:$0xff] (%p137_p7) }
  0x1c   : > { %p153_p10 = scmp.eq.s32.totalorder %s2538_s23, 0  ;;  %p156_p11 = scmp.eq.s32.totalorder %s2538_s23, 1  ;;  %331 = vmatpush1.msra.mxu0 (%p137_p7), %v201_v7  ;;  %v189_v18 = vld [vmem:[%s1955_s15 + $0xd8] sm:$0xff] (%p137_p7)  ;;  %398 = vmatpush1.msra.mxu1 (%p137_p7), %v303_v15  ;;  %v187_v21 = vld [vmem:[%s1955_s15 + $0xc8] sm:$0xff] (%p137_p7)  ;;  %v186_v23 = vld [vmem:[%s1955_s15 + $0xc0] sm:$0xff] (%p137_p7) }
  0x1d   : > { %332 = vmatprep.subr.mxu0 (%p137_p7), %v199_v8  ;;  %399 = vmatprep.subr.mxu1 (%p137_p7), %v301_v17  ;;  %v297_v22 = vld [vmem:[%s1955_s15 + $0x438] sm:$0xff] (%p137_p7)  ;;  %v295_v24 = vld [vmem:[%s1955_s15 + $0x428] sm:$0xff] (%p137_p7)  ;;  %v184_v25 = vld [vmem:[%s1955_s15 + $0xb0] sm:$0xff] (%p137_p7) }
  0x1e   : > { %p1965_p12 = pnand %p153_p10, %p138_p9  ;;  %p1969_p13 = pnand %p156_p11, %p138_p9  ;;  %333 = vmatpush1.msra.mxu0 (%p137_p7), %v198_v9  ;;  %400 = vmatpush1.msra.mxu1 (%p137_p7), %v300_v19  ;;  %v294_v26 = vld [vmem:[%s1955_s15 + $0x420] sm:$0xff] (%p137_p7)  ;;  %v183_v27 = vld [vmem:[%s1955_s15 + $0xa8] sm:$0xff] (%p137_p7)  ;;  %v292_v28 = vld [vmem:[%s1955_s15 + $0x410] sm:$0xff] (%p137_p7) }
  0x1f   : > { %334 = vmatprep.subr.mxu0 %v196_v10  ;;  %401 = vmatprep.subr.mxu1 %v298_v20  ;;  %v181_v29 = vld [vmem:[%s1955_s15 + $0x98] sm:$0xff]  ;;  %v291_v30 = vld [vmem:[%s1955_s15 + $0x408] sm:$0xff]  ;;  %v180_v31 = vld [vmem:[%s1955_s15 + $0x90] sm:$0xff] }
  0x20   : > { %335 = vmatpush1.msra.mxu0 %v195_v11  ;;  %402 = vmatpush1.msra.mxu1 %v297_v22  ;;  %v289_v32 = vld [vmem:[%s1955_s15 + $0x3f8] sm:$0xff]  ;;  %v178_v33 = vld [vmem:[%s1955_s15 + $0x80] sm:$0xff]  ;;  %v288_v34 = vld [vmem:[%s1955_s15 + $0x3f0] sm:$0xff] }
  0x21   : > { %336 = vmatprep.subr.mxu0 %v193_v12  ;;  %403 = vmatprep.subr.mxu1 %v295_v24  ;;  %v177_v35 = vld [vmem:[%s1955_s15 + $0x78] sm:$0xff]  ;;  %v286_v36 = vld [vmem:[%s1955_s15 + $0x3e0] sm:$0xff]  ;;  %v175_v37 = vld [vmem:[%s1955_s15 + $0x68] sm:$0xff] }
  0x22   : > { %337 = vmatpush1.msra.mxu0 %v192_v13  ;;  %404 = vmatpush1.msra.mxu1 %v294_v26  ;;  %v285_v38 = vld [vmem:[%s1955_s15 + $0x3d8] sm:$0xff]  ;;  %v174_v39 = vld [vmem:[%s1955_s15 + $0x60] sm:$0xff]  ;;  %v283_v40 = vld [vmem:[%s1955_s15 + $0x3c8] sm:$0xff]  ;;  %v2041_v13 = vsub.s32 %v310_v0, %v312_v1 }
  0x23   : > { %338 = vmatprep.subr.mxu0 %v190_v16  ;;  %405 = vmatprep.subr.mxu1 %v292_v28  ;;  %v172_v41 = vld [vmem:[%s1955_s15 + $0x50] sm:$0xff]  ;;  %v282_v42 = vld [vmem:[%s1955_s15 + $0x3c0] sm:$0xff]  ;;  %v171_v43 = vld [vmem:[%s1955_s15 + $0x48] sm:$0xff] }
  0x24   : > { %339 = vmatpush1.msra.mxu0 %v189_v18  ;;  %406 = vmatpush1.msra.mxu1 %v291_v30  ;;  %v280_v44 = vld [vmem:[%s1955_s15 + $0x3b0] sm:$0xff]  ;;  %v169_v45 = vld [vmem:[%s1955_s15 + $0x38] sm:$0xff]  ;;  %v279_v46 = vld [vmem:[%s1955_s15 + $0x3a8] sm:$0xff] }
  0x25   : > { %340 = vmatprep.subr.mxu0 %v187_v21  ;;  %407 = vmatprep.subr.mxu1 %v289_v32  ;;  %v168_v47 = vld [vmem:[%s1955_s15 + $0x30] sm:$0xff]  ;;  %v277_v48 = vld [vmem:[%s1955_s15 + $0x398] sm:$0xff]  ;;  %v166_v49 = vld [vmem:[%s1955_s15 + $0x20] sm:$0xff] }
  0x26   : > { %341 = vmatpush1.msra.mxu0 %v186_v23  ;;  %408 = vmatpush1.msra.mxu1 %v288_v34  ;;  %v276_v50 = vld [vmem:[%s1955_s15 + $0x390] sm:$0xff]  ;;  %v165_v51 = vld [vmem:[%s1955_s15 + $0x18] sm:$0xff]  ;;  %v274_v52 = vld [vmem:[%s1955_s15 + $0x380] sm:$0xff] }
  0x27   : > { %342 = vmatprep.subr.mxu0 %v184_v25  ;;  %409 = vmatprep.subr.mxu1 %v286_v36  ;;  %v163_v56 = vld [vmem:[%s1955_s15 + $0x8] sm:$0xff]  ;;  %v273_v57 = vld [vmem:[%s1955_s15 + $0x378] sm:$0xff]  ;;  %v162_v58 = vld [vmem:[%s1955_s15] sm:$0xff] }
  0x28   : > { %343 = vmatpush1.msra.mxu0 %v183_v27  ;;  %410 = vmatpush1.msra.mxu1 %v285_v38  ;;  %v271_v59 = vld [vmem:[%s1955_s15 + $0x368] sm:$0xff]  ;;  %v256_v60 = vld [vmem:[%s1955_s15 + $0x2f0] sm:$0xff]  ;;  %v270_v61 = vld [vmem:[%s1955_s15 + $0x360] sm:$0xff] }
  0x29   : > { %344 = vmatprep.subr.mxu0 %v181_v29  ;;  %411 = vmatprep.subr.mxu1 %v283_v40  ;;  %v255_v62 = vld [vmem:[%s1955_s15 + $0x2e8] sm:$0xff]  ;;  %v268_v63 = vld [vmem:[%s1955_s15 + $0x350] sm:$0xff]  ;;  %v253_v2 = vld [vmem:[%s1955_s15 + $0x2d8] sm:$0xff] }
  0x2a   : > { %345 = vmatpush1.msra.mxu0 %v180_v31  ;;  %412 = vmatpush1.msra.mxu1 %v282_v42  ;;  %v267_v3 = vld [vmem:[%s1955_s15 + $0x348] sm:$0xff]  ;;  %v161_v4 = vld [vmem:[#allocation2] sm:$0x3f]  ;;  %v252_v6 = vld [vmem:[%s1955_s15 + $0x2d0] sm:$0xff] }
  0x2b   : > { %346 = vmatprep.subr.mxu0 %v178_v33  ;;  %413 = vmatprep.subr.mxu1 %v280_v44  ;;  %v265_v7 = vld [vmem:[%s1955_s15 + $0x338] sm:$0xff]  ;;  %v250_v8 = vld [vmem:[%s1955_s15 + $0x2c0] sm:$0xff]  ;;  %v264_v9 = vld [vmem:[%s1955_s15 + $0x330] sm:$0xff]  ;;  %v307_v12 = vcombine.high %v161_v4, %v161_v4  ;;  %v2056_v24 = vrot.slane %v161_v4, %v2041_v13 }
  0x2c   : > { %347 = vmatpush1.msra.mxu0 %v177_v35  ;;  %414 = vmatpush1.msra.mxu1 %v279_v46  ;;  %v249_v10 = vld [vmem:[%s1955_s15 + $0x2b8] sm:$0xff]  ;;  %v262_v11 = vld [vmem:[%s1955_s15 + $0x320] sm:$0xff]  ;;  %v247_v14 = vld [vmem:[%s1955_s15 + $0x2a8] sm:$0xff] }
  0x2d   : > { %348 = vmatprep.subr.mxu0 %v175_v37  ;;  %415 = vmatprep.subr.mxu1 %v277_v48  ;;  %v261_v15 = vld [vmem:[%s1955_s15 + $0x318] sm:$0xff]  ;;  %v246_v16 = vld [vmem:[%s1955_s15 + $0x2a0] sm:$0xff]  ;;  %v259_v17 = vld [vmem:[%s1955_s15 + $0x308] sm:$0xff]  ;;  %v2052_v22 = vrot.slane %v307_v12, %v2041_v13  ;;  %v2069_v33 = vcombine.high %v2056_v24, %v2056_v24 }
  0x2e   : > { %349 = vmatpush1.msra.mxu0 %v174_v39  ;;  %416 = vmatpush1.msra.mxu1 %v276_v50  ;;  %v244_v18 = vld [vmem:[%s1955_s15 + $0x290] sm:$0xff]  ;;  %v258_v19 = vld [vmem:[%s1955_s15 + $0x300] sm:$0xff]  ;;  %v243_v20 = vld [vmem:[%s1955_s15 + $0x288] sm:$0xff] }
  0x2f   : > { %350 = vmatprep.subr.mxu0 %v172_v41  ;;  %417 = vmatprep.subr.mxu1 %v274_v52  ;;  %v257_v21 = vld [vmem:[%s1955_s15 + $0x2f8] sm:$0xff]  ;;  %v240_v25 = vld [vmem:[%s1955_s15 + $0x270] sm:$0xff]  ;;  %v238_v27 = vld [vmem:[%s1955_s15 + $0x260] sm:$0xff] }
  0x30   : > { %351 = vmatpush1.msra.mxu0 %v171_v43  ;;  %418 = vmatpush1.msra.mxu1 %v273_v57  ;;  %v241_v23 = vld [vmem:[%s1955_s15 + $0x278] sm:$0xff]  ;;  %v254_v28 = vld [vmem:[%s1955_s15 + $0x2e0] sm:$0xff]  ;;  %v235_v31 = vld [vmem:[%s1955_s15 + $0x248] sm:$0xff] }
  0x31   : > { %352 = vmatprep.subr.mxu0 %v169_v45  ;;  %419 = vmatprep.subr.mxu1 %v271_v59  ;;  %v209_v26 = vld [vmem:[%s1955_s15 + $0x178] sm:$0xff]  ;;  %v206_v30 = vld [vmem:[%s1955_s15 + $0x160] sm:$0xff]  ;;  %v251_v32 = vld [vmem:[%s1955_s15 + $0x2c8] sm:$0xff] }
  0x32   : > { %353 = vmatpush1.msra.mxu0 %v168_v47  ;;  %420 = vmatpush1.msra.mxu1 %v270_v61  ;;  %v237_v29 = vld [vmem:[%s1955_s15 + $0x258] sm:$0xff]  ;;  %v234_v34 = vld [vmem:[%s1955_s15 + $0x240] sm:$0xff]  ;;  %v232_v35 = vld [vmem:[%s1955_s15 + $0x230] sm:$0xff] }
  0x33   : > { %354 = vmatprep.subr.mxu0 %v166_v49  ;;  %421 = vmatprep.subr.mxu1 %v268_v63  ;;  %v203_v36 = vld [vmem:[%s1955_s15 + $0x148] sm:$0xff]  ;;  %v248_v38 = vld [vmem:[%s1955_s15 + $0x2b0] sm:$0xff]  ;;  %v229_v39 = vld [vmem:[%s1955_s15 + $0x218] sm:$0xff] }
  0x34   : > { %355 = vmatpush1.msra.mxu0 %v165_v51  ;;  %422 = vmatpush1.msra.mxu1 %v267_v3  ;;  %v231_v37 = vld [vmem:[%s1955_s15 + $0x228] sm:$0xff]  ;;  %v200_v40 = vld [vmem:[%s1955_s15 + $0x130] sm:$0xff]  ;;  %v245_v42 = vld [vmem:[%s1955_s15 + $0x298] sm:$0xff] }
  0x35   : > { %356 = vmatprep.subr.mxu0 %v163_v56  ;;  %423 = vmatprep.subr.mxu1 %v265_v7  ;;  %v228_v41 = vld [vmem:[%s1955_s15 + $0x210] sm:$0xff]  ;;  %v226_v43 = vld [vmem:[%s1955_s15 + $0x200] sm:$0xff]  ;;  %v197_v44 = vld [vmem:[%s1955_s15 + $0x118] sm:$0xff] }
  0x36   : > { %357 = vmatpush1.msra.mxu0 %v162_v58  ;;  %424 = vmatpush1.msra.mxu1 %v264_v9  ;;  %v225_v45 = vld [vmem:[%s1955_s15 + $0x1f8] sm:$0xff]  ;;  %v242_v46 = vld [vmem:[%s1955_s15 + $0x280] sm:$0xff]  ;;  %v223_v47 = vld [vmem:[%s1955_s15 + $0x1e8] sm:$0xff] }
  0x37   : > { %358 = vmatprep.subr.mxu0 %v256_v60  ;;  %425 = vmatprep.subr.mxu1 %v262_v11  ;;  %v194_v48 = vld [vmem:[%s1955_s15 + $0x100] sm:$0xff]  ;;  %v239_v50 = vld [vmem:[%s1955_s15 + $0x268] sm:$0xff]  ;;  %v220_v51 = vld [vmem:[%s1955_s15 + $0x1d0] sm:$0xff] }
  0x38   : > { %359 = vmatpush2.msra.mxu0 %v255_v62  ;;  %426 = vmatpush1.msra.mxu1 %v261_v15  ;;  %v222_v49 = vld [vmem:[%s1955_s15 + $0x1e0] sm:$0xff]  ;;  %v191_v52 = vld [vmem:[%s1955_s15 + $0xe8] sm:$0xff]  ;;  %v236_v54 = vld [vmem:[%s1955_s15 + $0x250] sm:$0xff] }
  0x39   : > { %360 = vmatprep.subr.mxu0 %v253_v2  ;;  %427 = vmatprep.subr.mxu1 %v259_v17  ;;  %v219_v53 = vld [vmem:[%s1955_s15 + $0x1c8] sm:$0xff]  ;;  %v217_v55 = vld [vmem:[%s1955_s15 + $0x1b8] sm:$0xff]  ;;  %v188_v56 = vld [vmem:[%s1955_s15 + $0xd0] sm:$0xff] }
  0x3a   : > { %361 = vmatpush2.msra.mxu0 %v252_v6  ;;  %428 = vmatpush1.msra.mxu1 %v258_v19  ;;  %v216_v57 = vld [vmem:[%s1955_s15 + $0x1b0] sm:$0xff]  ;;  %v233_v58 = vld [vmem:[%s1955_s15 + $0x238] sm:$0xff]  ;;  %v214_v59 = vld [vmem:[%s1955_s15 + $0x1a0] sm:$0xff] }
  0x3b   : > { %362 = vmatprep.subr.mxu0 %v250_v8  ;;  %1624 = vmatprep.subr.mxu1 %v257_v21  ;;  %v185_v60 = vld [vmem:[%s1955_s15 + $0xb8] sm:$0xff]  ;;  %v230_v62 = vld [vmem:[%s1955_s15 + $0x220] sm:$0xff]  ;;  %v211_v63 = vld [vmem:[%s1955_s15 + $0x188] sm:$0xff] }
  0x3c   : > { %363 = vmatpush2.msra.mxu0 %v249_v10  ;;  %462 = vmatmul.mubr.f32.vlgmr.msra.gmra.mxu1 %v2052_v22  ;;  %v213_v61 = vld [vmem:[%s1955_s15 + $0x198] sm:$0xff]  ;;  %v182_v0 = vld [vmem:[%s1955_s15 + $0xa0] sm:$0xff]  ;;  %v227_v2 = vld [vmem:[%s1955_s15 + $0x208] sm:$0xff] }
  0x3d   : > { %364 = vmatprep.subr.mxu0 %v247_v14  ;;  %1625 = vmatpush3.msra.mxu1 %v209_v26  ;;  %v210_v1 = vld [vmem:[%s1955_s15 + $0x180] sm:$0xff]  ;;  %v305_v3 = vld [vmem:[%s1955_s15 + $0x478] sm:$0xff]  ;;  %v179_v4 = vld [vmem:[%s1955_s15 + $0x88] sm:$0xff] }
  0x3e   : > { %365 = vmatpush2.msra.mxu0 %v246_v16  ;;  %1626 = vmatprep.subr.mxu1 %v254_v28  ;;  %v224_v6 = vld [vmem:[%s1955_s15 + $0x1f0] sm:$0xff]  ;;  %v302_v7 = vld [vmem:[%s1955_s15 + $0x460] sm:$0xff]  ;;  %v221_v9 = vld [vmem:[%s1955_s15 + $0x1d8] sm:$0xff] }
  0x3f   : > { %366 = vmatprep.subr.mxu0 %v244_v18  ;;  %1627 = vmatpush3.msra.mxu1 %v206_v30  ;;  %v176_v8 = vld [vmem:[%s1955_s15 + $0x70] sm:$0xff]  ;;  %v299_v10 = vld [vmem:[%s1955_s15 + $0x448] sm:$0xff]  ;;  %v173_v11 = vld [vmem:[%s1955_s15 + $0x58] sm:$0xff] }
  0x40   : > { %367 = vmatpush2.msra.mxu0 %v243_v20  ;;  %1628 = vmatprep.subr.mxu1 %v251_v32  ;;  %v218_v12 = vld [vmem:[%s1955_s15 + $0x1c0] sm:$0xff]  ;;  %v296_v14 = vld [vmem:[%s1955_s15 + $0x430] sm:$0xff]  ;;  %v215_v16 = vld [vmem:[%s1955_s15 + $0x1a8] sm:$0xff] }
  0x41   : > { %368 = vmatprep.subr.mxu0 %v241_v23  ;;  %390 = vmatprep.mubr.f32.mxu0 %v2069_v33  ;;  %v170_v15 = vld [vmem:[%s1955_s15 + $0x40] sm:$0xff]  ;;  %v293_v17 = vld [vmem:[%s1955_s15 + $0x418] sm:$0xff]  ;;  %v167_v18 = vld [vmem:[%s1955_s15 + $0x28] sm:$0xff] }
  0x42   : > { %369 = vmatpush2.msra.mxu0 %v240_v25  ;;  %1629 = vmatpush3.msra.mxu1 %v203_v36  ;;  %v212_v19 = vld [vmem:[%s1955_s15 + $0x190] sm:$0xff]  ;;  %v290_v20 = vld [vmem:[%s1955_s15 + $0x400] sm:$0xff]  ;;  %v287_v23 = vld [vmem:[%s1955_s15 + $0x3e8] sm:$0xff] }
  0x43   : > { %370 = vmatprep.subr.mxu0 %v238_v27  ;;  %1630 = vmatprep.subr.mxu1 %v248_v38  ;;  %v164_v21 = vld [vmem:[%s1955_s15 + $0x10] sm:$0xff]  ;;  %v281_v26 = vld [vmem:[%s1955_s15 + $0x3b8] sm:$0xff]  ;;  %v278_v27 = vld [vmem:[%s1955_s15 + $0x3a0] sm:$0xff] }
  0x44   : > { %371 = vmatpush2.msra.mxu0 %v237_v29  ;;  %1631 = vmatpush3.msra.mxu1 %v200_v40  ;;  %v284_v25 = vld [vmem:[%s1955_s15 + $0x3d0] sm:$0xff]  ;;  %v275_v28 = vld [vmem:[%s1955_s15 + $0x388] sm:$0xff]  ;;  %v269_v29 = vld [vmem:[%s1955_s15 + $0x358] sm:$0xff] }
  0x45   : > { %372 = vmatprep.subr.mxu0 %v235_v31  ;;  %1632 = vmatprep.subr.mxu1 %v245_v42  ;;  %v266_v30 = vld [vmem:[%s1955_s15 + $0x340] sm:$0xff]  ;;  %v263_v31 = vld [vmem:[%s1955_s15 + $0x328] sm:$0xff]  ;;  %v260_v32 = vld [vmem:[%s1955_s15 + $0x310] sm:$0xff] }
  0x46   : > { %373 = vmatpush2.msra.mxu0 %v234_v34  ;;  %1633 = vmatpush3.msra.mxu1 %v197_v44 }
  0x47   : > { %374 = vmatprep.subr.mxu0 %v232_v35  ;;  %1634 = vmatprep.subr.mxu1 %v242_v46 }
  0x48   : > { %375 = vmatpush2.msra.mxu0 %v231_v37  ;;  %1635 = vmatpush3.msra.mxu1 %v194_v48 }
  0x49   : > { %376 = vmatprep.subr.mxu0 %v229_v39  ;;  %1636 = vmatprep.subr.mxu1 %v239_v50 }
  0x4a   : > { %377 = vmatpush2.msra.mxu0 %v228_v41  ;;  %1637 = vmatpush3.msra.mxu1 %v191_v52 }
  0x4b   : > { %378 = vmatprep.subr.mxu0 %v226_v43  ;;  %1638 = vmatprep.subr.mxu1 %v236_v54 }
  0x4c   : > { %379 = vmatpush2.msra.mxu0 %v225_v45  ;;  %1639 = vmatpush3.msra.mxu1 %v188_v56 }
  0x4d   : > { %380 = vmatprep.subr.mxu0 %v223_v47  ;;  %1640 = vmatprep.subr.mxu1 %v233_v58 }
  0x4e   : > { %381 = vmatpush2.msra.mxu0 %v222_v49  ;;  %1641 = vmatpush3.msra.mxu1 %v185_v60 }
  0x4f   : > { %382 = vmatprep.subr.mxu0 %v220_v51  ;;  %1642 = vmatprep.subr.mxu1 %v230_v62 }
  0x50   : > { %383 = vmatpush2.msra.mxu0 %v219_v53  ;;  %1643 = vmatpush3.msra.mxu1 %v182_v0 }
  0x51   : > { %384 = vmatprep.subr.mxu0 %v217_v55  ;;  %1644 = vmatprep.subr.mxu1 %v227_v2 }
  0x52   : > { %385 = vmatpush2.msra.mxu0 %v216_v57  ;;  %1645 = vmatpush3.msra.mxu1 %v179_v4 }
  0x53   : > { %386 = vmatprep.subr.mxu0 %v214_v59  ;;  %1646 = vmatprep.subr.mxu1 %v224_v6 }
  0x54   : > { %387 = vmatpush2.msra.mxu0 %v213_v61  ;;  %1647 = vmatpush3.msra.mxu1 %v176_v8 }
  0x55   : > { %388 = vmatprep.subr.mxu0 %v211_v63  ;;  %1648 = vmatprep.subr.mxu1 %v221_v9 }
  0x56   : > { %389 = vmatpush2.msra.mxu0 %v210_v1  ;;  %1649 = vmatpush3.msra.mxu1 %v173_v11 }
  0x57   : > { %391 = vmatmul.mubr.f32.vlgmr.msra.gmra.mxu0 %v2056_v24  ;;  %1780 = vmatprep.subr.mxu0 %v1914_v5 }
  0x58   : > { %1781 = vmatpush3.msra.mxu0 %v305_v3  ;;  %1650 = vmatprep.subr.mxu1 %v218_v12 }
  0x59   : > { %1782 = vmatprep.subr.mxu0 %v1914_v5  ;;  %1651 = vmatpush3.msra.mxu1 %v170_v15 }
  0x5a   : > { %1783 = vmatpush3.msra.mxu0 %v302_v7  ;;  %1652 = vmatprep.subr.mxu1 %v215_v16 }
  0x5b   : > { %1784 = vmatprep.subr.mxu0 %v1914_v5  ;;  %1653 = vmatpush3.msra.mxu1 %v167_v18 }
  0x5c   : > { %1785 = vmatpush3.msra.mxu0 %v299_v10  ;;  %1654 = vmatprep.subr.mxu1 %v212_v19 }
  0x5d   : > { %1786 = vmatprep.subr.mxu0 %v1914_v5  ;;  %1655 = vmatpush3.msra.mxu1 %v164_v21 }
  0x5e   : > { %1787 = vmatpush3.msra.mxu0 %v296_v14  ;;  %532 = vmatprep.mubr.f32.mxu1 %v2069_v33 }
  0x5f   : > { %1788 = vmatprep.subr.mxu0 %v1914_v5  ;;  %533 = vmatmul.mubr.f32.vlgmr.msra.gmra.mxu1 %v2056_v24  ;;  %v272_v24 = vld [vmem:[%s1955_s15 + $0x370] sm:$0xff] }
  0x60   : > { %1789 = vmatpush3.msra.mxu0 %v293_v17  ;;  %1812 = vmatprep.mubr.msk.f32.mxu0 %vm1916_vm0, %v1914_v5 }
  0x61   : > { %1790 = vmatprep.subr.mxu0 %v1914_v5 }
  0x62   : > { %1791 = vmatpush3.msra.mxu0 %v290_v20 }
  0x63   : > { %1792 = vmatprep.subr.mxu0 %v1914_v5 }
  0x64   : > { %1793 = vmatpush3.msra.mxu0 %v287_v23 }
  0x65   : > { %1794 = vmatprep.subr.mxu0 %v1914_v5 }
  0x66   : > { %1795 = vmatpush3.msra.mxu0 %v284_v25 }
  0x67   : > { %1796 = vmatprep.subr.mxu0 %v1914_v5 }
  0x68   : > { %1797 = vmatpush3.msra.mxu0 %v281_v26 }
  0x69   : > { %1798 = vmatprep.subr.mxu0 %v1914_v5 }
  0x6a   : > { %1799 = vmatpush3.msra.mxu0 %v278_v27 }
  0x6b   : > { %1800 = vmatprep.subr.mxu0 %v1914_v5 }
  0x6c   : > { %1801 = vmatpush3.msra.mxu0 %v275_v28 }
  0x6d   : > { %1802 = vmatprep.subr.mxu0 %v1914_v5 }
  0x6e   : > { %1803 = vmatpush3.msra.mxu0 %v272_v24 }
  0x6f   : > { %1804 = vmatprep.subr.mxu0 %v1914_v5 }
  0x70   : > { %1805 = vmatpush3.msra.mxu0 %v269_v29 }
  0x71   : > { %1806 = vmatprep.subr.mxu0 %v1914_v5 }
  0x72   : > { %1807 = vmatpush3.msra.mxu0 %v266_v30 }
  0x73   : > { %1808 = vmatprep.subr.mxu0 %v1914_v5 }
  0x74   : > { %1809 = vmatpush3.msra.mxu0 %v263_v31 }
  0x75   : > { %1810 = vmatprep.subr.mxu0 %v1914_v5 }
  0x76   : > { %1811 = vmatpush3.msra.mxu0 %v260_v32 }
  0x77   : > { %1813 = vmatmul.mubr.f32.vlgmr.msra.gmra.mxu0 %v2052_v22 }
  0xfc   : > { %v463_v33 = vpop.f32.mrf.mxu1 }
  0xfe   : > { %v465_v35 = vpop.f32.mrf.mxu1 }
 0x117   : > { %v392_v34 = vpop.f32.mrf.mxu0 }
 0x118   : > { %v464_v39 = vadd.f32 %v463_v33, %v392_v34 }
 0x119   : > { %v394_v36 = vpop.f32.mrf.mxu0 }
 0x11a   : > { %v466_v38 = vadd.f32 %v465_v35, %v394_v36  ;;  %v608_v42 = vmax.f32 %v464_v39, 0.0 }
 0x11c   : > { %v609_v41 = vmax.f32 %v466_v38, 0.0 }
 0x11e   : > { %v614_v45 = vcombine.low %v608_v42, %v609_v41 }
 0x11f   : > { %v1656_v37 = vpop.f32.mrf.mxu1 }
 0x120   : > { %v621_v5 = vrot.slane %v614_v45, %v2041_v13 }
 0x121   : > { %v1657_v40 = vpop.f32.mrf.mxu1 }
 0x122   : > { %v1658_v43 = vadd.f32 %v1657_v40, %v1656_v37 }
 0x137   : > { %v604_v44 = vpop.f32.mrf.mxu0 }
 0x138   : > { %v605_v46 = vadd.f32 %v1658_v43, %v604_v44 }
 0x139   : > { %v1814_v47 = vpop.f32.mrf.mxu0 }
 0x13a   : > { %v610_v48 = vmax.f32 %v605_v46, 0.0 }
 0x13c   : > { %v628_v22 = vrot.slane %v610_v48, %v2041_v13 }
 0x13e   : > { %v629_v49 = vcombine.low %v621_v5, %v628_v22 }
 0x140   : > { %631 = vst [vmem:[#allocation2] sm:$0x3f] %v629_v49 }
 0x141 PF: > { %633 = sbr.rel (%p1965_p12) target bundleno = 625 (0x271), region = 40 }
 0x146   : > { %v681_v50 = vld [vmem:[%s1955_s15 + $0x170] sm:$0xff]  ;;  %v680_v51 = vld [vmem:[%s1955_s15 + $0x168] sm:$0xff]  ;;  %v678_v52 = vld [vmem:[%s1955_s15 + $0x158] sm:$0xff]  ;;  %v1917_v53 = vmov 0.0   ;;  %v1918_v40 = vmov 1983009808   ;;  %v784_v42 = vlaneseq }
 0x147   : > { %799 = vmatprep.subr.mxu0 %v681_v50  ;;  %v677_v13 = vld [vmem:[%s1955_s15 + $0x150] sm:$0xff]  ;;  %934 = vmatprep.mubr.f32.mxu1 %v1917_v53  ;;  %v675_v54 = vld [vmem:[%s1955_s15 + $0x140] sm:$0xff]  ;;  %v674_v55 = vld [vmem:[%s1955_s15 + $0x138] sm:$0xff]  ;;  %v782_v41 = vunpack.c.l.s4 %v1918_v40  ;;  %vm1919_vm1 = vmmov 0  }
 0x148   : > { %800 = vmatpush1.msra.mxu0 %v680_v51  ;;  %v672_v56 = vld [vmem:[%s1955_s15 + $0x128] sm:$0xff]  ;;  %v671_v57 = vld [vmem:[%s1955_s15 + $0x120] sm:$0xff]  ;;  %v669_v58 = vld [vmem:[%s1955_s15 + $0x110] sm:$0xff]  ;;  %v785_v50 = vshrl.u32 %v784_v42, 7 }
 0x149   : > { %801 = vmatprep.subr.mxu0 %v678_v52  ;;  %v668_v59 = vld [vmem:[%s1955_s15 + $0x108] sm:$0xff]  ;;  %v666_v60 = vld [vmem:[%s1955_s15 + $0xf8] sm:$0xff]  ;;  %v665_v61 = vld [vmem:[%s1955_s15 + $0xf0] sm:$0xff]  ;;  %v783_v49 = vunpack.c.0.s8 %v782_v41 }
 0x14a   : > { %802 = vmatpush1.msra.mxu0 %v677_v13  ;;  %v777_v62 = vld [vmem:[%s1955_s15 + $0x470] sm:$0xff]  ;;  %v776_v63 = vld [vmem:[%s1955_s15 + $0x468] sm:$0xff]  ;;  %v663_v0 = vld [vmem:[%s1955_s15 + $0xe0] sm:$0xff] }
 0x14b   : > { %803 = vmatprep.subr.mxu0 %v675_v54  ;;  %870 = vmatprep.subr.mxu1 %v777_v62  ;;  %v774_v1 = vld [vmem:[%s1955_s15 + $0x458] sm:$0xff]  ;;  %v773_v3 = vld [vmem:[%s1955_s15 + $0x450] sm:$0xff]  ;;  %v771_v4 = vld [vmem:[%s1955_s15 + $0x440] sm:$0xff] }
 0x14c   : > { %804 = vmatpush1.msra.mxu0 %v674_v55  ;;  %v662_v2 = vld [vmem:[%s1955_s15 + $0xd8] sm:$0xff]  ;;  %871 = vmatpush1.msra.mxu1 %v776_v63  ;;  %v660_v6 = vld [vmem:[%s1955_s15 + $0xc8] sm:$0xff]  ;;  %v659_v8 = vld [vmem:[%s1955_s15 + $0xc0] sm:$0xff] }
 0x14d   : > { %805 = vmatprep.subr.mxu0 %v672_v56  ;;  %872 = vmatprep.subr.mxu1 %v774_v1  ;;  %v770_v7 = vld [vmem:[%s1955_s15 + $0x438] sm:$0xff]  ;;  %v768_v9 = vld [vmem:[%s1955_s15 + $0x428] sm:$0xff]  ;;  %v657_v10 = vld [vmem:[%s1955_s15 + $0xb0] sm:$0xff] }
 0x14e   : > { %806 = vmatpush1.msra.mxu0 %v671_v57  ;;  %873 = vmatpush1.msra.mxu1 %v773_v3  ;;  %v767_v11 = vld [vmem:[%s1955_s15 + $0x420] sm:$0xff]  ;;  %v656_v12 = vld [vmem:[%s1955_s15 + $0xa8] sm:$0xff]  ;;  %v765_v14 = vld [vmem:[%s1955_s15 + $0x410] sm:$0xff] }
 0x14f   : > { %807 = vmatprep.subr.mxu0 %v669_v58  ;;  %874 = vmatprep.subr.mxu1 %v771_v4  ;;  %v654_v15 = vld [vmem:[%s1955_s15 + $0x98] sm:$0xff]  ;;  %v764_v16 = vld [vmem:[%s1955_s15 + $0x408] sm:$0xff]  ;;  %v653_v17 = vld [vmem:[%s1955_s15 + $0x90] sm:$0xff] }
 0x150   : > { %808 = vmatpush1.msra.mxu0 %v668_v59  ;;  %875 = vmatpush1.msra.mxu1 %v770_v7  ;;  %v762_v18 = vld [vmem:[%s1955_s15 + $0x3f8] sm:$0xff]  ;;  %v651_v19 = vld [vmem:[%s1955_s15 + $0x80] sm:$0xff]  ;;  %v761_v20 = vld [vmem:[%s1955_s15 + $0x3f0] sm:$0xff] }
 0x151   : > { %809 = vmatprep.subr.mxu0 %v666_v60  ;;  %876 = vmatprep.subr.mxu1 %v768_v9  ;;  %v650_v21 = vld [vmem:[%s1955_s15 + $0x78] sm:$0xff]  ;;  %v759_v23 = vld [vmem:[%s1955_s15 + $0x3e0] sm:$0xff]  ;;  %v648_v25 = vld [vmem:[%s1955_s15 + $0x68] sm:$0xff] }
 0x152   : > { %810 = vmatpush1.msra.mxu0 %v665_v61  ;;  %877 = vmatpush1.msra.mxu1 %v767_v11  ;;  %v758_v26 = vld [vmem:[%s1955_s15 + $0x3d8] sm:$0xff]  ;;  %v647_v27 = vld [vmem:[%s1955_s15 + $0x60] sm:$0xff]  ;;  %v756_v28 = vld [vmem:[%s1955_s15 + $0x3c8] sm:$0xff]  ;;  %v2225_v61 = vsub.s32 %v783_v49, %v785_v50 }
 0x153   : > { %811 = vmatprep.subr.mxu0 %v663_v0  ;;  %878 = vmatprep.subr.mxu1 %v765_v14  ;;  %v645_v24 = vld [vmem:[%s1955_s15 + $0x50] sm:$0xff]  ;;  %v755_v29 = vld [vmem:[%s1955_s15 + $0x3c0] sm:$0xff]  ;;  %v644_v30 = vld [vmem:[%s1955_s15 + $0x48] sm:$0xff] }
 0x154   : > { %812 = vmatpush1.msra.mxu0 %v662_v2  ;;  %879 = vmatpush1.msra.mxu1 %v764_v16  ;;  %v753_v31 = vld [vmem:[%s1955_s15 + $0x3b0] sm:$0xff]  ;;  %v642_v32 = vld [vmem:[%s1955_s15 + $0x38] sm:$0xff]  ;;  %v752_v33 = vld [vmem:[%s1955_s15 + $0x3a8] sm:$0xff] }
 0x155   : > { %813 = vmatprep.subr.mxu0 %v660_v6  ;;  %880 = vmatprep.subr.mxu1 %v762_v18  ;;  %v641_v34 = vld [vmem:[%s1955_s15 + $0x30] sm:$0xff]  ;;  %v750_v35 = vld [vmem:[%s1955_s15 + $0x398] sm:$0xff]  ;;  %v639_v36 = vld [vmem:[%s1955_s15 + $0x20] sm:$0xff] }
 0x156   : > { %814 = vmatpush1.msra.mxu0 %v659_v8  ;;  %881 = vmatpush1.msra.mxu1 %v761_v20  ;;  %v749_v37 = vld [vmem:[%s1955_s15 + $0x390] sm:$0xff]  ;;  %v638_v38 = vld [vmem:[%s1955_s15 + $0x18] sm:$0xff]  ;;  %v747_v39 = vld [vmem:[%s1955_s15 + $0x380] sm:$0xff] }
 0x157   : > { %815 = vmatprep.subr.mxu0 %v657_v10  ;;  %882 = vmatprep.subr.mxu1 %v759_v23  ;;  %v636_v43 = vld [vmem:[%s1955_s15 + $0x8] sm:$0xff]  ;;  %v746_v44 = vld [vmem:[%s1955_s15 + $0x378] sm:$0xff]  ;;  %v635_v45 = vld [vmem:[%s1955_s15] sm:$0xff] }
 0x158   : > { %816 = vmatpush1.msra.mxu0 %v656_v12  ;;  %883 = vmatpush1.msra.mxu1 %v758_v26  ;;  %v744_v46 = vld [vmem:[%s1955_s15 + $0x368] sm:$0xff]  ;;  %v729_v47 = vld [vmem:[%s1955_s15 + $0x2f0] sm:$0xff]  ;;  %v743_v48 = vld [vmem:[%s1955_s15 + $0x360] sm:$0xff] }
 0x159   : > { %817 = vmatprep.subr.mxu0 %v654_v15  ;;  %884 = vmatprep.subr.mxu1 %v756_v28  ;;  %v728_v5 = vld [vmem:[%s1955_s15 + $0x2e8] sm:$0xff]  ;;  %v741_v22 = vld [vmem:[%s1955_s15 + $0x350] sm:$0xff]  ;;  %v726_v51 = vld [vmem:[%s1955_s15 + $0x2d8] sm:$0xff] }
 0x15a   : > { %818 = vmatpush1.msra.mxu0 %v653_v17  ;;  %885 = vmatpush1.msra.mxu1 %v755_v29  ;;  %v740_v52 = vld [vmem:[%s1955_s15 + $0x348] sm:$0xff]  ;;  %v634_v13 = vld [vmem:[#allocation2] sm:$0x3f]  ;;  %v725_v54 = vld [vmem:[%s1955_s15 + $0x2d0] sm:$0xff] }
 0x15b   : > { %819 = vmatprep.subr.mxu0 %v651_v19  ;;  %886 = vmatprep.subr.mxu1 %v753_v31  ;;  %v738_v55 = vld [vmem:[%s1955_s15 + $0x338] sm:$0xff]  ;;  %v723_v56 = vld [vmem:[%s1955_s15 + $0x2c0] sm:$0xff]  ;;  %v737_v57 = vld [vmem:[%s1955_s15 + $0x330] sm:$0xff]  ;;  %v780_v60 = vcombine.high %v634_v13, %v634_v13  ;;  %v2240_v9 = vrot.slane %v634_v13, %v2225_v61 }
 0x15c   : > { %820 = vmatpush1.msra.mxu0 %v650_v21  ;;  %887 = vmatpush1.msra.mxu1 %v752_v33  ;;  %v722_v58 = vld [vmem:[%s1955_s15 + $0x2b8] sm:$0xff]  ;;  %v735_v59 = vld [vmem:[%s1955_s15 + $0x320] sm:$0xff]  ;;  %v720_v62 = vld [vmem:[%s1955_s15 + $0x2a8] sm:$0xff] }
 0x15d   : > { %821 = vmatprep.subr.mxu0 %v648_v25  ;;  %888 = vmatprep.subr.mxu1 %v750_v35  ;;  %v734_v63 = vld [vmem:[%s1955_s15 + $0x318] sm:$0xff]  ;;  %v719_v0 = vld [vmem:[%s1955_s15 + $0x2a0] sm:$0xff]  ;;  %v732_v1 = vld [vmem:[%s1955_s15 + $0x308] sm:$0xff]  ;;  %v2236_v7 = vrot.slane %v780_v60, %v2225_v61  ;;  %v2253_v19 = vcombine.high %v2240_v9, %v2240_v9 }
 0x15e   : > { %822 = vmatpush1.msra.mxu0 %v647_v27  ;;  %889 = vmatpush1.msra.mxu1 %v749_v37  ;;  %v717_v2 = vld [vmem:[%s1955_s15 + $0x290] sm:$0xff]  ;;  %v731_v3 = vld [vmem:[%s1955_s15 + $0x300] sm:$0xff]  ;;  %v716_v4 = vld [vmem:[%s1955_s15 + $0x288] sm:$0xff] }
 0x15f   : > { %823 = vmatprep.subr.mxu0 %v645_v24  ;;  %890 = vmatprep.subr.mxu1 %v747_v39  ;;  %v730_v6 = vld [vmem:[%s1955_s15 + $0x2f8] sm:$0xff]  ;;  %v713_v10 = vld [vmem:[%s1955_s15 + $0x270] sm:$0xff]  ;;  %v711_v12 = vld [vmem:[%s1955_s15 + $0x260] sm:$0xff] }
 0x160   : > { %824 = vmatpush1.msra.mxu0 %v644_v30  ;;  %891 = vmatpush1.msra.mxu1 %v746_v44  ;;  %v714_v8 = vld [vmem:[%s1955_s15 + $0x278] sm:$0xff]  ;;  %v727_v14 = vld [vmem:[%s1955_s15 + $0x2e0] sm:$0xff]  ;;  %v708_v17 = vld [vmem:[%s1955_s15 + $0x248] sm:$0xff] }
 0x161   : > { %825 = vmatprep.subr.mxu0 %v642_v32  ;;  %892 = vmatprep.subr.mxu1 %v744_v46  ;;  %v682_v11 = vld [vmem:[%s1955_s15 + $0x178] sm:$0xff]  ;;  %v679_v16 = vld [vmem:[%s1955_s15 + $0x160] sm:$0xff]  ;;  %v724_v18 = vld [vmem:[%s1955_s15 + $0x2c8] sm:$0xff] }
 0x162   : > { %826 = vmatpush1.msra.mxu0 %v641_v34  ;;  %893 = vmatpush1.msra.mxu1 %v743_v48  ;;  %v710_v15 = vld [vmem:[%s1955_s15 + $0x258] sm:$0xff]  ;;  %v707_v20 = vld [vmem:[%s1955_s15 + $0x240] sm:$0xff]  ;;  %v705_v21 = vld [vmem:[%s1955_s15 + $0x230] sm:$0xff] }
 0x163   : > { %827 = vmatprep.subr.mxu0 %v639_v36  ;;  %894 = vmatprep.subr.mxu1 %v741_v22  ;;  %v676_v23 = vld [vmem:[%s1955_s15 + $0x148] sm:$0xff]  ;;  %v721_v26 = vld [vmem:[%s1955_s15 + $0x2b0] sm:$0xff]  ;;  %v702_v27 = vld [vmem:[%s1955_s15 + $0x218] sm:$0xff] }
 0x164   : > { %828 = vmatpush1.msra.mxu0 %v638_v38  ;;  %895 = vmatpush1.msra.mxu1 %v740_v52  ;;  %v704_v25 = vld [vmem:[%s1955_s15 + $0x228] sm:$0xff]  ;;  %v673_v28 = vld [vmem:[%s1955_s15 + $0x130] sm:$0xff]  ;;  %v718_v29 = vld [vmem:[%s1955_s15 + $0x298] sm:$0xff] }
 0x165   : > { %829 = vmatprep.subr.mxu0 %v636_v43  ;;  %896 = vmatprep.subr.mxu1 %v738_v55  ;;  %v701_v24 = vld [vmem:[%s1955_s15 + $0x210] sm:$0xff]  ;;  %v699_v30 = vld [vmem:[%s1955_s15 + $0x200] sm:$0xff]  ;;  %v670_v31 = vld [vmem:[%s1955_s15 + $0x118] sm:$0xff] }
 0x166   : > { %830 = vmatpush1.msra.mxu0 %v635_v45  ;;  %897 = vmatpush1.msra.mxu1 %v737_v57  ;;  %v698_v32 = vld [vmem:[%s1955_s15 + $0x1f8] sm:$0xff]  ;;  %v715_v33 = vld [vmem:[%s1955_s15 + $0x280] sm:$0xff]  ;;  %v696_v34 = vld [vmem:[%s1955_s15 + $0x1e8] sm:$0xff] }
 0x167   : > { %831 = vmatprep.subr.mxu0 %v729_v47  ;;  %898 = vmatprep.subr.mxu1 %v735_v59  ;;  %v667_v35 = vld [vmem:[%s1955_s15 + $0x100] sm:$0xff]  ;;  %v712_v37 = vld [vmem:[%s1955_s15 + $0x268] sm:$0xff]  ;;  %v693_v38 = vld [vmem:[%s1955_s15 + $0x1d0] sm:$0xff] }
 0x168   : > { %832 = vmatpush2.msra.mxu0 %v728_v5  ;;  %899 = vmatpush1.msra.mxu1 %v734_v63  ;;  %v695_v36 = vld [vmem:[%s1955_s15 + $0x1e0] sm:$0xff]  ;;  %v664_v39 = vld [vmem:[%s1955_s15 + $0xe8] sm:$0xff]  ;;  %v709_v41 = vld [vmem:[%s1955_s15 + $0x250] sm:$0xff] }
 0x169   : > { %833 = vmatprep.subr.mxu0 %v726_v51  ;;  %900 = vmatprep.subr.mxu1 %v732_v1  ;;  %v692_v40 = vld [vmem:[%s1955_s15 + $0x1c8] sm:$0xff]  ;;  %v690_v42 = vld [vmem:[%s1955_s15 + $0x1b8] sm:$0xff]  ;;  %v661_v43 = vld [vmem:[%s1955_s15 + $0xd0] sm:$0xff] }
 0x16a   : > { %834 = vmatpush2.msra.mxu0 %v725_v54  ;;  %901 = vmatpush1.msra.mxu1 %v731_v3  ;;  %v689_v44 = vld [vmem:[%s1955_s15 + $0x1b0] sm:$0xff]  ;;  %v706_v45 = vld [vmem:[%s1955_s15 + $0x238] sm:$0xff]  ;;  %v687_v46 = vld [vmem:[%s1955_s15 + $0x1a0] sm:$0xff] }
 0x16b   : > { %835 = vmatprep.subr.mxu0 %v723_v56  ;;  %1676 = vmatprep.subr.mxu1 %v730_v6  ;;  %v658_v47 = vld [vmem:[%s1955_s15 + $0xb8] sm:$0xff]  ;;  %v703_v5 = vld [vmem:[%s1955_s15 + $0x220] sm:$0xff]  ;;  %v684_v22 = vld [vmem:[%s1955_s15 + $0x188] sm:$0xff] }
 0x16c   : > { %836 = vmatpush2.msra.mxu0 %v722_v58  ;;  %935 = vmatmul.mubr.f32.vlgmr.msra.gmra.mxu1 %v2236_v7  ;;  %v686_v48 = vld [vmem:[%s1955_s15 + $0x198] sm:$0xff]  ;;  %v655_v49 = vld [vmem:[%s1955_s15 + $0xa0] sm:$0xff]  ;;  %v700_v51 = vld [vmem:[%s1955_s15 + $0x208] sm:$0xff] }
 0x16d   : > { %837 = vmatprep.subr.mxu0 %v720_v62  ;;  %1677 = vmatpush3.msra.mxu1 %v682_v11  ;;  %v683_v50 = vld [vmem:[%s1955_s15 + $0x180] sm:$0xff]  ;;  %v778_v52 = vld [vmem:[%s1955_s15 + $0x478] sm:$0xff]  ;;  %v652_v13 = vld [vmem:[%s1955_s15 + $0x88] sm:$0xff] }
 0x16e   : > { %838 = vmatpush2.msra.mxu0 %v719_v0  ;;  %1678 = vmatprep.subr.mxu1 %v727_v14  ;;  %v697_v54 = vld [vmem:[%s1955_s15 + $0x1f0] sm:$0xff]  ;;  %v775_v55 = vld [vmem:[%s1955_s15 + $0x460] sm:$0xff]  ;;  %v694_v57 = vld [vmem:[%s1955_s15 + $0x1d8] sm:$0xff] }
 0x16f   : > { %839 = vmatprep.subr.mxu0 %v717_v2  ;;  %1679 = vmatpush3.msra.mxu1 %v679_v16  ;;  %v649_v56 = vld [vmem:[%s1955_s15 + $0x70] sm:$0xff]  ;;  %v772_v58 = vld [vmem:[%s1955_s15 + $0x448] sm:$0xff]  ;;  %v646_v59 = vld [vmem:[%s1955_s15 + $0x58] sm:$0xff] }
 0x170   : > { %840 = vmatpush2.msra.mxu0 %v716_v4  ;;  %1680 = vmatprep.subr.mxu1 %v724_v18  ;;  %v691_v60 = vld [vmem:[%s1955_s15 + $0x1c0] sm:$0xff]  ;;  %v769_v62 = vld [vmem:[%s1955_s15 + $0x430] sm:$0xff]  ;;  %v688_v0 = vld [vmem:[%s1955_s15 + $0x1a8] sm:$0xff] }
 0x171   : > { %841 = vmatprep.subr.mxu0 %v714_v8  ;;  %863 = vmatprep.mubr.f32.mxu0 %v2253_v19  ;;  %v643_v63 = vld [vmem:[%s1955_s15 + $0x40] sm:$0xff]  ;;  %v766_v1 = vld [vmem:[%s1955_s15 + $0x418] sm:$0xff]  ;;  %v640_v2 = vld [vmem:[%s1955_s15 + $0x28] sm:$0xff] }
 0x172   : > { %842 = vmatpush2.msra.mxu0 %v713_v10  ;;  %1681 = vmatpush3.msra.mxu1 %v676_v23  ;;  %v685_v3 = vld [vmem:[%s1955_s15 + $0x190] sm:$0xff]  ;;  %v763_v4 = vld [vmem:[%s1955_s15 + $0x400] sm:$0xff]  ;;  %v760_v8 = vld [vmem:[%s1955_s15 + $0x3e8] sm:$0xff] }
 0x173   : > { %843 = vmatprep.subr.mxu0 %v711_v12  ;;  %1682 = vmatprep.subr.mxu1 %v721_v26  ;;  %v637_v6 = vld [vmem:[%s1955_s15 + $0x10] sm:$0xff]  ;;  %v754_v11 = vld [vmem:[%s1955_s15 + $0x3b8] sm:$0xff]  ;;  %v751_v12 = vld [vmem:[%s1955_s15 + $0x3a0] sm:$0xff] }
 0x174   : > { %844 = vmatpush2.msra.mxu0 %v710_v15  ;;  %1683 = vmatpush3.msra.mxu1 %v673_v28  ;;  %v757_v10 = vld [vmem:[%s1955_s15 + $0x3d0] sm:$0xff]  ;;  %v748_v14 = vld [vmem:[%s1955_s15 + $0x388] sm:$0xff]  ;;  %v742_v15 = vld [vmem:[%s1955_s15 + $0x358] sm:$0xff] }
 0x175   : > { %845 = vmatprep.subr.mxu0 %v708_v17  ;;  %1684 = vmatprep.subr.mxu1 %v718_v29  ;;  %v739_v16 = vld [vmem:[%s1955_s15 + $0x340] sm:$0xff]  ;;  %v736_v17 = vld [vmem:[%s1955_s15 + $0x328] sm:$0xff]  ;;  %v733_v18 = vld [vmem:[%s1955_s15 + $0x310] sm:$0xff] }
 0x176   : > { %846 = vmatpush2.msra.mxu0 %v707_v20  ;;  %1685 = vmatpush3.msra.mxu1 %v670_v31 }
 0x177   : > { %847 = vmatprep.subr.mxu0 %v705_v21  ;;  %1686 = vmatprep.subr.mxu1 %v715_v33 }
 0x178   : > { %848 = vmatpush2.msra.mxu0 %v704_v25  ;;  %1687 = vmatpush3.msra.mxu1 %v667_v35 }
 0x179   : > { %849 = vmatprep.subr.mxu0 %v702_v27  ;;  %1688 = vmatprep.subr.mxu1 %v712_v37 }
 0x17a   : > { %850 = vmatpush2.msra.mxu0 %v701_v24  ;;  %1689 = vmatpush3.msra.mxu1 %v664_v39 }
 0x17b   : > { %851 = vmatprep.subr.mxu0 %v699_v30  ;;  %1690 = vmatprep.subr.mxu1 %v709_v41 }
 0x17c   : > { %852 = vmatpush2.msra.mxu0 %v698_v32  ;;  %1691 = vmatpush3.msra.mxu1 %v661_v43 }
 0x17d   : > { %853 = vmatprep.subr.mxu0 %v696_v34  ;;  %1692 = vmatprep.subr.mxu1 %v706_v45 }
 0x17e   : > { %854 = vmatpush2.msra.mxu0 %v695_v36  ;;  %1693 = vmatpush3.msra.mxu1 %v658_v47 }
 0x17f   : > { %855 = vmatprep.subr.mxu0 %v693_v38  ;;  %1694 = vmatprep.subr.mxu1 %v703_v5 }
 0x180   : > { %856 = vmatpush2.msra.mxu0 %v692_v40  ;;  %1695 = vmatpush3.msra.mxu1 %v655_v49 }
 0x181   : > { %857 = vmatprep.subr.mxu0 %v690_v42  ;;  %1696 = vmatprep.subr.mxu1 %v700_v51 }
 0x182   : > { %858 = vmatpush2.msra.mxu0 %v689_v44  ;;  %1697 = vmatpush3.msra.mxu1 %v652_v13 }
 0x183   : > { %859 = vmatprep.subr.mxu0 %v687_v46  ;;  %1698 = vmatprep.subr.mxu1 %v697_v54 }
 0x184   : > { %860 = vmatpush2.msra.mxu0 %v686_v48  ;;  %1699 = vmatpush3.msra.mxu1 %v649_v56 }
 0x185   : > { %861 = vmatprep.subr.mxu0 %v684_v22  ;;  %1700 = vmatprep.subr.mxu1 %v694_v57 }
 0x186   : > { %862 = vmatpush2.msra.mxu0 %v683_v50  ;;  %1701 = vmatpush3.msra.mxu1 %v646_v59 }
 0x187   : > { %864 = vmatmul.mubr.f32.vlgmr.msra.gmra.mxu0 %v2240_v9  ;;  %1815 = vmatprep.subr.mxu0 %v1917_v53 }
 0x188   : > { %1816 = vmatpush3.msra.mxu0 %v778_v52  ;;  %1702 = vmatprep.subr.mxu1 %v691_v60 }
 0x189   : > { %1817 = vmatprep.subr.mxu0 %v1917_v53  ;;  %1703 = vmatpush3.msra.mxu1 %v643_v63 }
 0x18a   : > { %1818 = vmatpush3.msra.mxu0 %v775_v55  ;;  %1704 = vmatprep.subr.mxu1 %v688_v0 }
 0x18b   : > { %1819 = vmatprep.subr.mxu0 %v1917_v53  ;;  %1705 = vmatpush3.msra.mxu1 %v640_v2 }
 0x18c   : > { %1820 = vmatpush3.msra.mxu0 %v772_v58  ;;  %1706 = vmatprep.subr.mxu1 %v685_v3 }
 0x18d   : > { %1821 = vmatprep.subr.mxu0 %v1917_v53  ;;  %1707 = vmatpush3.msra.mxu1 %v637_v6 }
 0x18e   : > { %1822 = vmatpush3.msra.mxu0 %v769_v62  ;;  %1005 = vmatprep.mubr.f32.mxu1 %v2253_v19 }
 0x18f   : > { %1823 = vmatprep.subr.mxu0 %v1917_v53  ;;  %1006 = vmatmul.mubr.f32.vlgmr.msra.gmra.mxu1 %v2240_v9  ;;  %v745_v9 = vld [vmem:[%s1955_s15 + $0x370] sm:$0xff] }
 0x190   : > { %1824 = vmatpush3.msra.mxu0 %v766_v1  ;;  %1847 = vmatprep.mubr.msk.f32.mxu0 %vm1919_vm1, %v1917_v53 }
 0x191   : > { %1825 = vmatprep.subr.mxu0 %v1917_v53 }
 0x192   : > { %1826 = vmatpush3.msra.mxu0 %v763_v4 }
 0x193   : > { %1827 = vmatprep.subr.mxu0 %v1917_v53 }
 0x194   : > { %1828 = vmatpush3.msra.mxu0 %v760_v8 }
 0x195   : > { %1829 = vmatprep.subr.mxu0 %v1917_v53 }
 0x196   : > { %1830 = vmatpush3.msra.mxu0 %v757_v10 }
 0x197   : > { %1831 = vmatprep.subr.mxu0 %v1917_v53 }
 0x198   : > { %1832 = vmatpush3.msra.mxu0 %v754_v11 }
 0x199   : > { %1833 = vmatprep.subr.mxu0 %v1917_v53 }
 0x19a   : > { %1834 = vmatpush3.msra.mxu0 %v751_v12 }
 0x19b   : > { %1835 = vmatprep.subr.mxu0 %v1917_v53 }
 0x19c   : > { %1836 = vmatpush3.msra.mxu0 %v748_v14 }
 0x19d   : > { %1837 = vmatprep.subr.mxu0 %v1917_v53 }
 0x19e   : > { %1838 = vmatpush3.msra.mxu0 %v745_v9 }
 0x19f   : > { %1839 = vmatprep.subr.mxu0 %v1917_v53 }
 0x1a0   : > { %1840 = vmatpush3.msra.mxu0 %v742_v15 }
 0x1a1   : > { %1841 = vmatprep.subr.mxu0 %v1917_v53 }
 0x1a2   : > { %1842 = vmatpush3.msra.mxu0 %v739_v16 }
 0x1a3   : > { %1843 = vmatprep.subr.mxu0 %v1917_v53 }
 0x1a4   : > { %1844 = vmatpush3.msra.mxu0 %v736_v17 }
 0x1a5   : > { %1845 = vmatprep.subr.mxu0 %v1917_v53 }
 0x1a6   : > { %1846 = vmatpush3.msra.mxu0 %v733_v18 }
 0x1a7   : > { %1848 = vmatmul.mubr.f32.vlgmr.msra.gmra.mxu0 %v2236_v7 }
 0x22c   : > { %v936_v19 = vpop.f32.mrf.mxu1 }
 0x22e   : > { %v938_v21 = vpop.f32.mrf.mxu1 }
 0x247   : > { %v865_v20 = vpop.f32.mrf.mxu0 }
 0x248   : > { %v937_v27 = vadd.f32 %v936_v19, %v865_v20 }
 0x249   : > { %v867_v23 = vpop.f32.mrf.mxu0 }
 0x24a   : > { %v939_v26 = vadd.f32 %v938_v21, %v867_v23  ;;  %v1081_v29 = vmax.f32 %v937_v27, 0.0 }
 0x24c   : > { %v1082_v24 = vmax.f32 %v939_v26, 0.0 }
 0x24e   : > { %v1087_v32 = vcombine.low %v1081_v29, %v1082_v24 }
 0x24f   : > { %v1708_v25 = vpop.f32.mrf.mxu1 }
 0x250   : > { %v1094_v53 = vrot.slane %v1087_v32, %v2225_v61 }
 0x251   : > { %v1709_v28 = vpop.f32.mrf.mxu1 }
 0x252   : > { %v1710_v30 = vadd.f32 %v1709_v28, %v1708_v25 }
 0x267   : > { %v1077_v31 = vpop.f32.mrf.mxu0 }
 0x268   : > { %v1078_v33 = vadd.f32 %v1710_v30, %v1077_v31 }
 0x269   : > { %v1849_v34 = vpop.f32.mrf.mxu0 }
 0x26a   : > { %v1083_v35 = vmax.f32 %v1078_v33, 0.0 }
 0x26c   : > { %v1101_v7 = vrot.slane %v1083_v35, %v2225_v61 }
 0x26e   : > { %v1102_v36 = vcombine.low %v1094_v53, %v1101_v7 }
 0x270   : > { %1104 = vst [vmem:[#allocation3] sm:$0x3f] %v1102_v36 }
 0x271 PF: > { %1106 = sbr.rel (%p1969_p13) target bundleno = 929 (0x3a1), region = 44 }
 0x276   : > { %v1155_v37 = vld [vmem:[%s1955_s15 + $0x170] sm:$0xff]  ;;  %v1154_v38 = vld [vmem:[%s1955_s15 + $0x168] sm:$0xff]  ;;  %v1152_v39 = vld [vmem:[%s1955_s15 + $0x158] sm:$0xff]  ;;  %v1920_v40 = vmov 0.0   ;;  %v1921_v28 = vmov 1983009808   ;;  %v1258_v29 = vlaneseq }
 0x277   : > { %1273 = vmatprep.subr.mxu0 %v1155_v37  ;;  %v1151_v61 = vld [vmem:[%s1955_s15 + $0x150] sm:$0xff]  ;;  %1408 = vmatprep.mubr.f32.mxu1 %v1920_v40  ;;  %v1149_v41 = vld [vmem:[%s1955_s15 + $0x140] sm:$0xff]  ;;  %v1148_v42 = vld [vmem:[%s1955_s15 + $0x138] sm:$0xff]  ;;  %v1256_v24 = vunpack.c.l.s4 %v1921_v28  ;;  %vm1922_vm2 = vmmov 0  }
 0x278   : > { %1274 = vmatpush1.msra.mxu0 %v1154_v38  ;;  %v1146_v43 = vld [vmem:[%s1955_s15 + $0x128] sm:$0xff]  ;;  %v1145_v44 = vld [vmem:[%s1955_s15 + $0x120] sm:$0xff]  ;;  %v1143_v45 = vld [vmem:[%s1955_s15 + $0x110] sm:$0xff]  ;;  %v1259_v37 = vshrl.u32 %v1258_v29, 7 }
 0x279   : > { %1275 = vmatprep.subr.mxu0 %v1152_v39  ;;  %v1142_v46 = vld [vmem:[%s1955_s15 + $0x108] sm:$0xff]  ;;  %v1140_v47 = vld [vmem:[%s1955_s15 + $0xf8] sm:$0xff]  ;;  %v1139_v48 = vld [vmem:[%s1955_s15 + $0xf0] sm:$0xff]  ;;  %v1257_v36 = vunpack.c.0.s8 %v1256_v24 }
 0x27a   : > { %1276 = vmatpush1.msra.mxu0 %v1151_v61  ;;  %v1251_v5 = vld [vmem:[%s1955_s15 + $0x470] sm:$0xff]  ;;  %v1250_v22 = vld [vmem:[%s1955_s15 + $0x468] sm:$0xff]  ;;  %v1137_v49 = vld [vmem:[%s1955_s15 + $0xe0] sm:$0xff] }
 0x27b   : > { %1277 = vmatprep.subr.mxu0 %v1149_v41  ;;  %1344 = vmatprep.subr.mxu1 %v1251_v5  ;;  %v1248_v50 = vld [vmem:[%s1955_s15 + $0x458] sm:$0xff]  ;;  %v1247_v52 = vld [vmem:[%s1955_s15 + $0x450] sm:$0xff]  ;;  %v1245_v13 = vld [vmem:[%s1955_s15 + $0x440] sm:$0xff] }
 0x27c   : > { %1278 = vmatpush1.msra.mxu0 %v1148_v42  ;;  %v1136_v51 = vld [vmem:[%s1955_s15 + $0xd8] sm:$0xff]  ;;  %1345 = vmatpush1.msra.mxu1 %v1250_v22  ;;  %v1134_v54 = vld [vmem:[%s1955_s15 + $0xc8] sm:$0xff]  ;;  %v1133_v56 = vld [vmem:[%s1955_s15 + $0xc0] sm:$0xff] }
 0x27d   : > { %1279 = vmatprep.subr.mxu0 %v1146_v43  ;;  %1346 = vmatprep.subr.mxu1 %v1248_v50  ;;  %v1244_v55 = vld [vmem:[%s1955_s15 + $0x438] sm:$0xff]  ;;  %v1242_v57 = vld [vmem:[%s1955_s15 + $0x428] sm:$0xff]  ;;  %v1131_v58 = vld [vmem:[%s1955_s15 + $0xb0] sm:$0xff] }
 0x27e   : > { %1280 = vmatpush1.msra.mxu0 %v1145_v44  ;;  %1347 = vmatpush1.msra.mxu1 %v1247_v52  ;;  %v1241_v59 = vld [vmem:[%s1955_s15 + $0x420] sm:$0xff]  ;;  %v1130_v60 = vld [vmem:[%s1955_s15 + $0xa8] sm:$0xff]  ;;  %v1239_v62 = vld [vmem:[%s1955_s15 + $0x410] sm:$0xff] }
 0x27f   : > { %1281 = vmatprep.subr.mxu0 %v1143_v45  ;;  %1348 = vmatprep.subr.mxu1 %v1245_v13  ;;  %v1128_v63 = vld [vmem:[%s1955_s15 + $0x98] sm:$0xff]  ;;  %v1238_v0 = vld [vmem:[%s1955_s15 + $0x408] sm:$0xff]  ;;  %v1127_v1 = vld [vmem:[%s1955_s15 + $0x90] sm:$0xff] }
 0x280   : > { %1282 = vmatpush1.msra.mxu0 %v1142_v46  ;;  %1349 = vmatpush1.msra.mxu1 %v1244_v55  ;;  %v1236_v2 = vld [vmem:[%s1955_s15 + $0x3f8] sm:$0xff]  ;;  %v1125_v3 = vld [vmem:[%s1955_s15 + $0x80] sm:$0xff]  ;;  %v1235_v4 = vld [vmem:[%s1955_s15 + $0x3f0] sm:$0xff] }
 0x281   : > { %1283 = vmatprep.subr.mxu0 %v1140_v47  ;;  %1350 = vmatprep.subr.mxu1 %v1242_v57  ;;  %v1124_v6 = vld [vmem:[%s1955_s15 + $0x78] sm:$0xff]  ;;  %v1233_v8 = vld [vmem:[%s1955_s15 + $0x3e0] sm:$0xff]  ;;  %v1122_v10 = vld [vmem:[%s1955_s15 + $0x68] sm:$0xff] }
 0x282   : > { %1284 = vmatpush1.msra.mxu0 %v1139_v48  ;;  %1351 = vmatpush1.msra.mxu1 %v1241_v59  ;;  %v1232_v11 = vld [vmem:[%s1955_s15 + $0x3d8] sm:$0xff]  ;;  %v1121_v12 = vld [vmem:[%s1955_s15 + $0x60] sm:$0xff]  ;;  %v1230_v14 = vld [vmem:[%s1955_s15 + $0x3c8] sm:$0xff]  ;;  %v2409_v48 = vsub.s32 %v1257_v36, %v1259_v37 }
 0x283   : > { %1285 = vmatprep.subr.mxu0 %v1137_v49  ;;  %1352 = vmatprep.subr.mxu1 %v1239_v62  ;;  %v1119_v9 = vld [vmem:[%s1955_s15 + $0x50] sm:$0xff]  ;;  %v1229_v15 = vld [vmem:[%s1955_s15 + $0x3c0] sm:$0xff]  ;;  %v1118_v16 = vld [vmem:[%s1955_s15 + $0x48] sm:$0xff] }
 0x284   : > { %1286 = vmatpush1.msra.mxu0 %v1136_v51  ;;  %1353 = vmatpush1.msra.mxu1 %v1238_v0  ;;  %v1227_v17 = vld [vmem:[%s1955_s15 + $0x3b0] sm:$0xff]  ;;  %v1116_v18 = vld [vmem:[%s1955_s15 + $0x38] sm:$0xff]  ;;  %v1226_v19 = vld [vmem:[%s1955_s15 + $0x3a8] sm:$0xff] }
 0x285   : > { %1287 = vmatprep.subr.mxu0 %v1134_v54  ;;  %1354 = vmatprep.subr.mxu1 %v1236_v2  ;;  %v1115_v20 = vld [vmem:[%s1955_s15 + $0x30] sm:$0xff]  ;;  %v1224_v21 = vld [vmem:[%s1955_s15 + $0x398] sm:$0xff]  ;;  %v1113_v23 = vld [vmem:[%s1955_s15 + $0x20] sm:$0xff] }
 0x286   : > { %1288 = vmatpush1.msra.mxu0 %v1133_v56  ;;  %1355 = vmatpush1.msra.mxu1 %v1235_v4  ;;  %v1223_v25 = vld [vmem:[%s1955_s15 + $0x390] sm:$0xff]  ;;  %v1112_v26 = vld [vmem:[%s1955_s15 + $0x18] sm:$0xff]  ;;  %v1221_v27 = vld [vmem:[%s1955_s15 + $0x380] sm:$0xff] }
 0x287   : > { %1289 = vmatprep.subr.mxu0 %v1131_v58  ;;  %1356 = vmatprep.subr.mxu1 %v1233_v8  ;;  %v1110_v30 = vld [vmem:[%s1955_s15 + $0x8] sm:$0xff]  ;;  %v1220_v31 = vld [vmem:[%s1955_s15 + $0x378] sm:$0xff]  ;;  %v1109_v32 = vld [vmem:[%s1955_s15] sm:$0xff] }
 0x288   : > { %1290 = vmatpush1.msra.mxu0 %v1130_v60  ;;  %1357 = vmatpush1.msra.mxu1 %v1232_v11  ;;  %v1218_v33 = vld [vmem:[%s1955_s15 + $0x368] sm:$0xff]  ;;  %v1203_v34 = vld [vmem:[%s1955_s15 + $0x2f0] sm:$0xff]  ;;  %v1217_v35 = vld [vmem:[%s1955_s15 + $0x360] sm:$0xff] }
 0x289   : > { %1291 = vmatprep.subr.mxu0 %v1128_v63  ;;  %1358 = vmatprep.subr.mxu1 %v1230_v14  ;;  %v1202_v53 = vld [vmem:[%s1955_s15 + $0x2e8] sm:$0xff]  ;;  %v1215_v7 = vld [vmem:[%s1955_s15 + $0x350] sm:$0xff]  ;;  %v1200_v38 = vld [vmem:[%s1955_s15 + $0x2d8] sm:$0xff] }
 0x28a   : > { %1292 = vmatpush1.msra.mxu0 %v1127_v1  ;;  %1359 = vmatpush1.msra.mxu1 %v1229_v15  ;;  %v1214_v39 = vld [vmem:[%s1955_s15 + $0x348] sm:$0xff]  ;;  %v1199_v41 = vld [vmem:[%s1955_s15 + $0x2d0] sm:$0xff]  ;;  %v1212_v42 = vld [vmem:[%s1955_s15 + $0x338] sm:$0xff] }
 0x28b   : > { %1293 = vmatprep.subr.mxu0 %v1125_v3  ;;  %1360 = vmatprep.subr.mxu1 %v1227_v17  ;;  %v1108_v61 = vld [vmem:[#allocation3] sm:$0x3f]  ;;  %v1211_v44 = vld [vmem:[%s1955_s15 + $0x330] sm:$0xff]  ;;  %v1196_v45 = vld [vmem:[%s1955_s15 + $0x2b8] sm:$0xff] }
 0x28c   : > { %1294 = vmatpush1.msra.mxu0 %v1124_v6  ;;  %1361 = vmatpush1.msra.mxu1 %v1226_v19  ;;  %v1197_v43 = vld [vmem:[%s1955_s15 + $0x2c0] sm:$0xff]  ;;  %v1254_v47 = vcombine.high %v1108_v61, %v1108_v61  ;;  %v1194_v5 = vld [vmem:[%s1955_s15 + $0x2a8] sm:$0xff]  ;;  %v1208_v22 = vld [vmem:[%s1955_s15 + $0x318] sm:$0xff]  ;;  %v2424_v57 = vrot.slane %v1108_v61, %v2409_v48 }
 0x28d   : > { %1295 = vmatprep.subr.mxu0 %v1122_v10  ;;  %1362 = vmatprep.subr.mxu1 %v1224_v21  ;;  %v1209_v46 = vld [vmem:[%s1955_s15 + $0x320] sm:$0xff]  ;;  %v1206_v50 = vld [vmem:[%s1955_s15 + $0x308] sm:$0xff]  ;;  %v1191_v51 = vld [vmem:[%s1955_s15 + $0x290] sm:$0xff] }
 0x28e   : > { %1296 = vmatpush1.msra.mxu0 %v1121_v12  ;;  %1363 = vmatpush1.msra.mxu1 %v1223_v25  ;;  %v1193_v49 = vld [vmem:[%s1955_s15 + $0x2a0] sm:$0xff]  ;;  %v1190_v13 = vld [vmem:[%s1955_s15 + $0x288] sm:$0xff]  ;;  %v1204_v54 = vld [vmem:[%s1955_s15 + $0x2f8] sm:$0xff]  ;;  %v2420_v55 = vrot.slane %v1254_v47, %v2409_v48  ;;  %v2437_v3 = vcombine.high %v2424_v57, %v2424_v57 }
 0x28f   : > { %1297 = vmatprep.subr.mxu0 %v1119_v9  ;;  %1364 = vmatprep.subr.mxu1 %v1221_v27  ;;  %v1205_v52 = vld [vmem:[%s1955_s15 + $0x300] sm:$0xff]  ;;  %v1188_v56 = vld [vmem:[%s1955_s15 + $0x278] sm:$0xff]  ;;  %v1187_v58 = vld [vmem:[%s1955_s15 + $0x270] sm:$0xff] }
 0x290   : > { %1298 = vmatpush1.msra.mxu0 %v1118_v16  ;;  %1365 = vmatpush1.msra.mxu1 %v1220_v31  ;;  %v1156_v59 = vld [vmem:[%s1955_s15 + $0x178] sm:$0xff]  ;;  %v1185_v60 = vld [vmem:[%s1955_s15 + $0x260] sm:$0xff]  ;;  %v1182_v1 = vld [vmem:[%s1955_s15 + $0x248] sm:$0xff] }
 0x291   : > { %1299 = vmatprep.subr.mxu0 %v1116_v18  ;;  %1366 = vmatprep.subr.mxu1 %v1218_v33  ;;  %v1201_v62 = vld [vmem:[%s1955_s15 + $0x2e0] sm:$0xff]  ;;  %v1184_v63 = vld [vmem:[%s1955_s15 + $0x258] sm:$0xff]  ;;  %v1198_v2 = vld [vmem:[%s1955_s15 + $0x2c8] sm:$0xff] }
 0x292   : > { %1300 = vmatpush1.msra.mxu0 %v1115_v20  ;;  %1367 = vmatpush1.msra.mxu1 %v1217_v35  ;;  %v1153_v0 = vld [vmem:[%s1955_s15 + $0x160] sm:$0xff]  ;;  %v1179_v6 = vld [vmem:[%s1955_s15 + $0x230] sm:$0xff]  ;;  %v1150_v8 = vld [vmem:[%s1955_s15 + $0x148] sm:$0xff] }
 0x293   : > { %1301 = vmatprep.subr.mxu0 %v1113_v23  ;;  %1368 = vmatprep.subr.mxu1 %v1215_v7  ;;  %v1181_v4 = vld [vmem:[%s1955_s15 + $0x240] sm:$0xff]  ;;  %v1178_v10 = vld [vmem:[%s1955_s15 + $0x228] sm:$0xff]  ;;  %v1195_v11 = vld [vmem:[%s1955_s15 + $0x2b0] sm:$0xff] }
 0x294   : > { %1302 = vmatpush1.msra.mxu0 %v1112_v26  ;;  %1369 = vmatpush1.msra.mxu1 %v1214_v39  ;;  %v1176_v12 = vld [vmem:[%s1955_s15 + $0x218] sm:$0xff]  ;;  %v1147_v14 = vld [vmem:[%s1955_s15 + $0x130] sm:$0xff]  ;;  %v1173_v16 = vld [vmem:[%s1955_s15 + $0x200] sm:$0xff] }
 0x295   : > { %1303 = vmatprep.subr.mxu0 %v1110_v30  ;;  %1370 = vmatprep.subr.mxu1 %v1212_v42  ;;  %v1175_v9 = vld [vmem:[%s1955_s15 + $0x210] sm:$0xff]  ;;  %v1192_v15 = vld [vmem:[%s1955_s15 + $0x298] sm:$0xff]  ;;  %v1189_v19 = vld [vmem:[%s1955_s15 + $0x280] sm:$0xff] }
 0x296   : > { %1304 = vmatpush1.msra.mxu0 %v1109_v32  ;;  %1371 = vmatpush1.msra.mxu1 %v1211_v44  ;;  %v1144_v17 = vld [vmem:[%s1955_s15 + $0x118] sm:$0xff]  ;;  %v1170_v20 = vld [vmem:[%s1955_s15 + $0x1e8] sm:$0xff]  ;;  %v1141_v21 = vld [vmem:[%s1955_s15 + $0x100] sm:$0xff] }
 0x297   : > { %1305 = vmatprep.subr.mxu0 %v1203_v34  ;;  %1372 = vmatprep.subr.mxu1 %v1209_v46  ;;  %v1172_v18 = vld [vmem:[%s1955_s15 + $0x1f8] sm:$0xff]  ;;  %v1169_v23 = vld [vmem:[%s1955_s15 + $0x1e0] sm:$0xff]  ;;  %v1186_v25 = vld [vmem:[%s1955_s15 + $0x268] sm:$0xff] }
 0x298   : > { %1306 = vmatpush2.msra.mxu0 %v1202_v53  ;;  %1373 = vmatpush1.msra.mxu1 %v1208_v22  ;;  %v1167_v26 = vld [vmem:[%s1955_s15 + $0x1d0] sm:$0xff]  ;;  %v1138_v27 = vld [vmem:[%s1955_s15 + $0xe8] sm:$0xff]  ;;  %v1164_v29 = vld [vmem:[%s1955_s15 + $0x1b8] sm:$0xff] }
 0x299   : > { %1307 = vmatprep.subr.mxu0 %v1200_v38  ;;  %1374 = vmatprep.subr.mxu1 %v1206_v50  ;;  %v1166_v28 = vld [vmem:[%s1955_s15 + $0x1c8] sm:$0xff]  ;;  %v1183_v24 = vld [vmem:[%s1955_s15 + $0x250] sm:$0xff]  ;;  %v1180_v32 = vld [vmem:[%s1955_s15 + $0x238] sm:$0xff] }
 0x29a   : > { %1308 = vmatpush2.msra.mxu0 %v1199_v41  ;;  %1375 = vmatpush1.msra.mxu1 %v1205_v52  ;;  %v1135_v30 = vld [vmem:[%s1955_s15 + $0xd0] sm:$0xff]  ;;  %v1161_v33 = vld [vmem:[%s1955_s15 + $0x1a0] sm:$0xff]  ;;  %v1132_v34 = vld [vmem:[%s1955_s15 + $0xb8] sm:$0xff] }
 0x29b   : > { %1309 = vmatprep.subr.mxu0 %v1197_v43  ;;  %1728 = vmatprep.subr.mxu1 %v1204_v54  ;;  %v1163_v31 = vld [vmem:[%s1955_s15 + $0x1b0] sm:$0xff]  ;;  %v1160_v35 = vld [vmem:[%s1955_s15 + $0x198] sm:$0xff]  ;;  %v1177_v53 = vld [vmem:[%s1955_s15 + $0x220] sm:$0xff] }
 0x29c   : > { %1310 = vmatpush2.msra.mxu0 %v1196_v45  ;;  %1409 = vmatmul.mubr.f32.vlgmr.msra.gmra.mxu1 %v2420_v55  ;;  %v1158_v7 = vld [vmem:[%s1955_s15 + $0x188] sm:$0xff]  ;;  %v1129_v36 = vld [vmem:[%s1955_s15 + $0xa0] sm:$0xff]  ;;  %v1252_v39 = vld [vmem:[%s1955_s15 + $0x478] sm:$0xff] }
 0x29d   : > { %1311 = vmatprep.subr.mxu0 %v1194_v5  ;;  %1729 = vmatpush3.msra.mxu1 %v1156_v59  ;;  %v1157_v37 = vld [vmem:[%s1955_s15 + $0x180] sm:$0xff]  ;;  %v1174_v38 = vld [vmem:[%s1955_s15 + $0x208] sm:$0xff]  ;;  %v1171_v41 = vld [vmem:[%s1955_s15 + $0x1f0] sm:$0xff] }
 0x29e   : > { %1312 = vmatpush2.msra.mxu0 %v1193_v49  ;;  %1730 = vmatprep.subr.mxu1 %v1201_v62  ;;  %v1126_v61 = vld [vmem:[%s1955_s15 + $0x88] sm:$0xff]  ;;  %v1249_v42 = vld [vmem:[%s1955_s15 + $0x460] sm:$0xff]  ;;  %v1123_v43 = vld [vmem:[%s1955_s15 + $0x70] sm:$0xff] }
 0x29f   : > { %1313 = vmatprep.subr.mxu0 %v1191_v51  ;;  %1731 = vmatpush3.msra.mxu1 %v1153_v0  ;;  %v1168_v44 = vld [vmem:[%s1955_s15 + $0x1d8] sm:$0xff]  ;;  %v1246_v45 = vld [vmem:[%s1955_s15 + $0x448] sm:$0xff]  ;;  %v1165_v47 = vld [vmem:[%s1955_s15 + $0x1c0] sm:$0xff] }
 0x2a0   : > { %1314 = vmatpush2.msra.mxu0 %v1190_v13  ;;  %1732 = vmatprep.subr.mxu1 %v1198_v2  ;;  %v1120_v46 = vld [vmem:[%s1955_s15 + $0x58] sm:$0xff]  ;;  %v1243_v5 = vld [vmem:[%s1955_s15 + $0x430] sm:$0xff]  ;;  %v1117_v22 = vld [vmem:[%s1955_s15 + $0x40] sm:$0xff] }
 0x2a1   : > { %1315 = vmatprep.subr.mxu0 %v1188_v56  ;;  %1337 = vmatprep.mubr.f32.mxu0 %v2437_v3  ;;  %v1162_v49 = vld [vmem:[%s1955_s15 + $0x1a8] sm:$0xff]  ;;  %v1240_v50 = vld [vmem:[%s1955_s15 + $0x418] sm:$0xff]  ;;  %v1159_v52 = vld [vmem:[%s1955_s15 + $0x190] sm:$0xff] }
 0x2a2   : > { %1316 = vmatpush2.msra.mxu0 %v1187_v58  ;;  %1733 = vmatpush3.msra.mxu1 %v1150_v8  ;;  %v1114_v51 = vld [vmem:[%s1955_s15 + $0x28] sm:$0xff]  ;;  %v1237_v13 = vld [vmem:[%s1955_s15 + $0x400] sm:$0xff]  ;;  %v1111_v54 = vld [vmem:[%s1955_s15 + $0x10] sm:$0xff] }
 0x2a3   : > { %1317 = vmatprep.subr.mxu0 %v1185_v60  ;;  %1734 = vmatprep.subr.mxu1 %v1195_v11  ;;  %v1234_v56 = vld [vmem:[%s1955_s15 + $0x3e8] sm:$0xff]  ;;  %v1231_v58 = vld [vmem:[%s1955_s15 + $0x3d0] sm:$0xff]  ;;  %v1228_v59 = vld [vmem:[%s1955_s15 + $0x3b8] sm:$0xff] }
 0x2a4   : > { %1318 = vmatpush2.msra.mxu0 %v1184_v63  ;;  %1735 = vmatpush3.msra.mxu1 %v1147_v14  ;;  %v1225_v60 = vld [vmem:[%s1955_s15 + $0x3a0] sm:$0xff]  ;;  %v1222_v62 = vld [vmem:[%s1955_s15 + $0x388] sm:$0xff]  ;;  %v1216_v63 = vld [vmem:[%s1955_s15 + $0x358] sm:$0xff] }
 0x2a5   : > { %1319 = vmatprep.subr.mxu0 %v1182_v1  ;;  %1736 = vmatprep.subr.mxu1 %v1192_v15  ;;  %v1213_v0 = vld [vmem:[%s1955_s15 + $0x340] sm:$0xff]  ;;  %v1210_v1 = vld [vmem:[%s1955_s15 + $0x328] sm:$0xff]  ;;  %v1207_v2 = vld [vmem:[%s1955_s15 + $0x310] sm:$0xff] }
 0x2a6   : > { %1320 = vmatpush2.msra.mxu0 %v1181_v4  ;;  %1737 = vmatpush3.msra.mxu1 %v1144_v17 }
 0x2a7   : > { %1321 = vmatprep.subr.mxu0 %v1179_v6  ;;  %1738 = vmatprep.subr.mxu1 %v1189_v19 }
 0x2a8   : > { %1322 = vmatpush2.msra.mxu0 %v1178_v10  ;;  %1739 = vmatpush3.msra.mxu1 %v1141_v21 }
 0x2a9   : > { %1323 = vmatprep.subr.mxu0 %v1176_v12  ;;  %1740 = vmatprep.subr.mxu1 %v1186_v25 }
 0x2aa   : > { %1324 = vmatpush2.msra.mxu0 %v1175_v9  ;;  %1741 = vmatpush3.msra.mxu1 %v1138_v27 }
 0x2ab   : > { %1325 = vmatprep.subr.mxu0 %v1173_v16  ;;  %1742 = vmatprep.subr.mxu1 %v1183_v24 }
 0x2ac   : > { %1326 = vmatpush2.msra.mxu0 %v1172_v18  ;;  %1743 = vmatpush3.msra.mxu1 %v1135_v30 }
 0x2ad   : > { %1327 = vmatprep.subr.mxu0 %v1170_v20  ;;  %1744 = vmatprep.subr.mxu1 %v1180_v32  ;;  %v1107_v20 = vld [vmem:[#allocation2] sm:$0x3f] }
 0x2ae   : > { %1328 = vmatpush2.msra.mxu0 %v1169_v23  ;;  %1745 = vmatpush3.msra.mxu1 %v1132_v34 }
 0x2af   : > { %1329 = vmatprep.subr.mxu0 %v1167_v26  ;;  %1746 = vmatprep.subr.mxu1 %v1177_v53 }
 0x2b0   : > { %1330 = vmatpush2.msra.mxu0 %v1166_v28  ;;  %1747 = vmatpush3.msra.mxu1 %v1129_v36 }
 0x2b1   : > { %1331 = vmatprep.subr.mxu0 %v1164_v29  ;;  %1748 = vmatprep.subr.mxu1 %v1174_v38 }
 0x2b2   : > { %1332 = vmatpush2.msra.mxu0 %v1163_v31  ;;  %1749 = vmatpush3.msra.mxu1 %v1126_v61 }
 0x2b3   : > { %1333 = vmatprep.subr.mxu0 %v1161_v33  ;;  %1750 = vmatprep.subr.mxu1 %v1171_v41 }
 0x2b4   : > { %1334 = vmatpush2.msra.mxu0 %v1160_v35  ;;  %1751 = vmatpush3.msra.mxu1 %v1123_v43 }
 0x2b5   : > { %1335 = vmatprep.subr.mxu0 %v1158_v7  ;;  %1752 = vmatprep.subr.mxu1 %v1168_v44 }
 0x2b6   : > { %1336 = vmatpush2.msra.mxu0 %v1157_v37  ;;  %1753 = vmatpush3.msra.mxu1 %v1120_v46 }
 0x2b7   : > { %1338 = vmatmul.mubr.f32.vlgmr.msra.gmra.mxu0 %v2424_v57  ;;  %1850 = vmatprep.subr.mxu0 %v1920_v40 }
 0x2b8   : > { %1851 = vmatpush3.msra.mxu0 %v1252_v39  ;;  %1754 = vmatprep.subr.mxu1 %v1165_v47 }
 0x2b9   : > { %1852 = vmatprep.subr.mxu0 %v1920_v40  ;;  %1755 = vmatpush3.msra.mxu1 %v1117_v22 }
 0x2ba   : > { %1853 = vmatpush3.msra.mxu0 %v1249_v42  ;;  %1756 = vmatprep.subr.mxu1 %v1162_v49 }
 0x2bb   : > { %1854 = vmatprep.subr.mxu0 %v1920_v40  ;;  %1757 = vmatpush3.msra.mxu1 %v1114_v51 }
 0x2bc   : > { %1855 = vmatpush3.msra.mxu0 %v1246_v45  ;;  %1758 = vmatprep.subr.mxu1 %v1159_v52 }
 0x2bd   : > { %1856 = vmatprep.subr.mxu0 %v1920_v40  ;;  %1759 = vmatpush3.msra.mxu1 %v1111_v54 }
 0x2be   : > { %1857 = vmatpush3.msra.mxu0 %v1243_v5  ;;  %1479 = vmatprep.mubr.f32.mxu1 %v2437_v3 }
 0x2bf   : > { %1858 = vmatprep.subr.mxu0 %v1920_v40  ;;  %1480 = vmatmul.mubr.f32.vlgmr.msra.gmra.mxu1 %v2424_v57  ;;  %v1219_v57 = vld [vmem:[%s1955_s15 + $0x370] sm:$0xff] }
 0x2c0   : > { %1859 = vmatpush3.msra.mxu0 %v1240_v50  ;;  %1882 = vmatprep.mubr.msk.f32.mxu0 %vm1922_vm2, %v1920_v40 }
 0x2c1   : > { %1860 = vmatprep.subr.mxu0 %v1920_v40 }
 0x2c2   : > { %1861 = vmatpush3.msra.mxu0 %v1237_v13 }
 0x2c3   : > { %1862 = vmatprep.subr.mxu0 %v1920_v40 }
 0x2c4   : > { %1863 = vmatpush3.msra.mxu0 %v1234_v56 }
 0x2c5   : > { %1864 = vmatprep.subr.mxu0 %v1920_v40 }
 0x2c6   : > { %1865 = vmatpush3.msra.mxu0 %v1231_v58 }
 0x2c7   : > { %1866 = vmatprep.subr.mxu0 %v1920_v40 }
 0x2c8   : > { %1867 = vmatpush3.msra.mxu0 %v1228_v59 }
 0x2c9   : > { %1868 = vmatprep.subr.mxu0 %v1920_v40 }
 0x2ca   : > { %1869 = vmatpush3.msra.mxu0 %v1225_v60 }
 0x2cb   : > { %1870 = vmatprep.subr.mxu0 %v1920_v40 }
 0x2cc   : > { %1871 = vmatpush3.msra.mxu0 %v1222_v62 }
 0x2cd   : > { %1872 = vmatprep.subr.mxu0 %v1920_v40 }
 0x2ce   : > { %1873 = vmatpush3.msra.mxu0 %v1219_v57 }
 0x2cf   : > { %1874 = vmatprep.subr.mxu0 %v1920_v40 }
 0x2d0   : > { %1875 = vmatpush3.msra.mxu0 %v1216_v63 }
 0x2d1   : > { %1876 = vmatprep.subr.mxu0 %v1920_v40 }
 0x2d2   : > { %1877 = vmatpush3.msra.mxu0 %v1213_v0 }
 0x2d3   : > { %1878 = vmatprep.subr.mxu0 %v1920_v40 }
 0x2d4   : > { %1879 = vmatpush3.msra.mxu0 %v1210_v1 }
 0x2d5   : > { %1880 = vmatprep.subr.mxu0 %v1920_v40 }
 0x2d6   : > { %1881 = vmatpush3.msra.mxu0 %v1207_v2 }
 0x2d7   : > { %1883 = vmatmul.mubr.f32.vlgmr.msra.gmra.mxu0 %v2420_v55 }
 0x35c   : > { %v1410_v3 = vpop.f32.mrf.mxu1 }
 0x35e   : > { %v1412_v6 = vpop.f32.mrf.mxu1 }
 0x377   : > { %v1339_v4 = vpop.f32.mrf.mxu0 }
 0x378   : > { %v1411_v14 = vadd.f32 %v1410_v3, %v1339_v4 }
 0x379   : > { %v1341_v8 = vpop.f32.mrf.mxu0 }
 0x37a   : > { %v1413_v11 = vadd.f32 %v1412_v6, %v1341_v8 }
 0x37c   : > { %v1558_v9 = vcombine.low %v1411_v14, %v1413_v11 }
 0x37e   : > { %v1565_v19 = vrot.slane %v1558_v9, %v2409_v48 }
 0x37f   : > { %v1760_v10 = vpop.f32.mrf.mxu1 }
 0x381   : > { %v1761_v12 = vpop.f32.mrf.mxu1 }
 0x382   : > { %v1762_v15 = vadd.f32 %v1761_v12, %v1760_v10 }
 0x397   : > { %v1551_v16 = vpop.f32.mrf.mxu0 }
 0x398   : > { %v1552_v17 = vadd.f32 %v1762_v15, %v1551_v16 }
 0x399   : > { %v1884_v18 = vpop.f32.mrf.mxu0 }
 0x39a   : > { %v1572_v40 = vrot.slane %v1552_v17, %v2409_v48 }
 0x39c   : > { %v1573_v21 = vcombine.low %v1565_v19, %v1572_v40 }
 0x39e   : > { %v1575_v55 = vadd.f32 %v1573_v21, %v1107_v20 }
 0x3a0   : > { %1576 = vst [vmem:[#allocation2] sm:$0x3f] %v1575_v55 }
 0x3a1 PF: > { %p1621_p0 = scmp.ne.s32.totalorder %s1944_s10, 14 }
 0x3a3   : > { %1580 = sbr.rel (%p1621_p0) target bundleno = 938 (0x3aa), region = 48 }
 0x3a8   : > { %v1581_v23 = vld [vmem:[#allocation2] sm:$0x3f] }
 0x3a9   : > { %1582 = vst [vmem:[%s2532_s2] sm:$0x3f] %v1581_v23 }
 0x3aa PF: > { %s12_s9 = sadd.s32 1, %s1912_s9  }
 0x3ab   : > { %p9_p1 = scmp.ge.s32.totalorder %s12_s9, 17  }
 0x3ad   :  { %11 = sbr.rel (!%p9_p1) target bundleno = 1 (0x1), region = 74 }

// kernel: squeeze.31
= control target key start
LH: loop header
LB: loop body
LE: loop exit
PB: predicated region body
PF: predicated region fallthrough
CT: control target
= control target key end

     0   :  { %vm123_vm0 = vcmask 261120   ;;  %vm290_vm1 = vcmask 1047556   ;;  %s561_s23 = smov 96   ;;  %s740_s0 = inlined_call_operand.vmem [shape: f32[2,3072], index: 0, kind: input, shape index: {}]   ;;  %s741_s1 = inlined_call_operand.hbm [shape: f32[2,3,32,32], index: 1, kind: output, shape index: {}]  }
   0x1   :  { %v528_v0 = vld [vmem:[%s740_s0 + $0xe] sm:$0x3]  ;;  %v529_v1 = vld [vmem:[%s740_s0 + $0xc] sm:$0x3]  ;;  %v530_v2 = vld [vmem:[%s740_s0 + $0xa] sm:$0x3] }
   0x2   :  { %90 = vst [vmem:[#allocation2 + $0x38] sm:$0x3] %v528_v0  ;;  %95 = vst [vmem:[#allocation2 + $0x30] sm:$0x3] %v529_v1  ;;  %v531_v3 = vld [vmem:[%s740_s0 + $0x8] sm:$0x3] }
   0x3   :  { %100 = vst [vmem:[#allocation2 + $0x28] sm:$0x3] %v530_v2  ;;  %v532_v4 = vld [vmem:[%s740_s0 + $0x6] sm:$0x3]  ;;  %v533_v5 = vld [vmem:[%s740_s0 + $0x4] sm:$0x3] }
   0x4   :  { %105 = vst [vmem:[#allocation2 + $0x20] sm:$0x3] %v531_v3  ;;  %110 = vst [vmem:[#allocation2 + $0x18] sm:$0x3] %v532_v4  ;;  %v534_v6 = vld [vmem:[%s740_s0 + $0x2] sm:$0x3] }
   0x5   :  { %115 = vst [vmem:[#allocation2 + $0x10] sm:$0x3] %v533_v5  ;;  %v120_v7 = vld [vmem:[%s740_s0] sm:$0x3]  ;;  %119 = vst [vmem:[#allocation2 + $0x8] sm:$0x3] %v534_v6 }
   0x6   :  { %121 = vst [vmem:[#allocation2] sm:$0x3] %v120_v7  ;;  %v520_v8 = vld [vmem:[%s740_s0 + $0x1e] sm:$0x3]  ;;  %v521_v9 = vld [vmem:[%s740_s0 + $0x1c] sm:$0x3] }
   0x7   :  { %50 = vst [vmem:[#allocation2 + $0x78] sm:$0x3] %v520_v8  ;;  %55 = vst [vmem:[#allocation2 + $0x70] sm:$0x3] %v521_v9  ;;  %v522_v10 = vld [vmem:[%s740_s0 + $0x1a] sm:$0x3] }
   0x8   :  { %v523_v11 = vld [vmem:[%s740_s0 + $0x18] sm:$0x3]  ;;  %v524_v12 = vld [vmem:[%s740_s0 + $0x16] sm:$0x3]  ;;  %60 = vst [vmem:[#allocation2 + $0x68] sm:$0x3] %v522_v10 }
   0x9   :  { %65 = vst [vmem:[#allocation2 + $0x60] sm:$0x3] %v523_v11  ;;  %70 = vst [vmem:[#allocation2 + $0x58] sm:$0x3] %v524_v12  ;;  %v525_v13 = vld [vmem:[%s740_s0 + $0x14] sm:$0x3] }
   0xa   :  { %v526_v14 = vld [vmem:[%s740_s0 + $0x12] sm:$0x3]  ;;  %v527_v15 = vld [vmem:[%s740_s0 + $0x10] sm:$0x3]  ;;  %75 = vst [vmem:[#allocation2 + $0x50] sm:$0x3] %v525_v13 }
   0xb   :  { %80 = vst [vmem:[#allocation2 + $0x48] sm:$0x3] %v526_v14  ;;  %85 = vst [vmem:[#allocation2 + $0x40] sm:$0x3] %v527_v15  ;;  %v512_v16 = vld [vmem:[%s740_s0 + $0x2e] sm:$0x3] }
   0xc   :  { %v513_v17 = vld [vmem:[%s740_s0 + $0x2c] sm:$0x3]  ;;  %v514_v18 = vld [vmem:[%s740_s0 + $0x2a] sm:$0x3]  ;;  %10 = vst [vmem:[#allocation2 + $0xb8] sm:$0x3] %v512_v16 }
   0xd   :  { %15 = vst [vmem:[#allocation2 + $0xb0] sm:$0x3] %v513_v17  ;;  %20 = vst [vmem:[#allocation2 + $0xa8] sm:$0x3] %v514_v18  ;;  %v515_v19 = vld [vmem:[%s740_s0 + $0x28] sm:$0x3] }
   0xe   :  { %v516_v20 = vld [vmem:[%s740_s0 + $0x26] sm:$0x3]  ;;  %v517_v21 = vld [vmem:[%s740_s0 + $0x24] sm:$0x3]  ;;  %v156_v22 = vld [vmem:[#allocation2 + $0x28] sm:$0x3]  }
   0xf   :  { %v163_v23 = vld [vmem:[#allocation2 + $0x30] sm:$0x3]   ;;  %v170_v24 = vld [vmem:[#allocation2 + $0x38] sm:$0x3]   ;;  %25 = vst [vmem:[#allocation2 + $0xa0] sm:$0x3] %v515_v19 }
  0x10   :  { %30 = vst [vmem:[#allocation2 + $0x98] sm:$0x3] %v516_v20  ;;  %35 = vst [vmem:[#allocation2 + $0x90] sm:$0x3] %v517_v21  ;;  %v135_v25 = vld [vmem:[#allocation2 + $0x10] sm:$0x3]  }
  0x11   :  { %v142_v26 = vld [vmem:[#allocation2 + $0x18] sm:$0x3]   ;;  %v149_v27 = vld [vmem:[#allocation2 + $0x20] sm:$0x3]   ;;  %159 = vst.msk [vmem:[#allocation0 + $0x14] sm:$0x1] %vm123_vm0, %v156_v22  }
  0x12   :  { %161 = vst.msk [vmem:[#allocation0 + $0x73] sm:$0x2] %vm123_vm0, %v156_v22   ;;  %166 = vst.msk [vmem:[#allocation0 + $0x18] sm:$0x1] %vm123_vm0, %v163_v23   ;;  %v122_v28 = vld [vmem:[#allocation2] sm:$0x3]  }
  0x13   :  { %168 = vst.msk [vmem:[#allocation0 + $0x77] sm:$0x2] %vm123_vm0, %v163_v23   ;;  %173 = vst.msk [vmem:[#allocation0 + $0x1c] sm:$0x1] %vm123_vm0, %v170_v24   ;;  %v128_v29 = vld [vmem:[#allocation2 + $0x8] sm:$0x3]  }
  0x14   :  { %175 = vst.msk [vmem:[#allocation0 + $0x7b] sm:$0x2] %vm123_vm0, %v170_v24   ;;  %138 = vst.msk [vmem:[#allocation0 + $0x8] sm:$0x1] %vm123_vm0, %v135_v25   ;;  %v518_v30 = vld [vmem:[%s740_s0 + $0x22] sm:$0x3] }
  0x15   :  { %140 = vst.msk [vmem:[#allocation0 + $0x67] sm:$0x2] %vm123_vm0, %v135_v25   ;;  %145 = vst.msk [vmem:[#allocation0 + $0xc] sm:$0x1] %vm123_vm0, %v142_v26   ;;  %v198_v34 = vld [vmem:[#allocation2 + $0x58] sm:$0x3]  }
  0x16   :  { %147 = vst.msk [vmem:[#allocation0 + $0x6b] sm:$0x2] %vm123_vm0, %v142_v26   ;;  %152 = vst.msk [vmem:[#allocation0 + $0x10] sm:$0x1] %vm123_vm0, %v149_v27   ;;  %v205_v35 = vld [vmem:[#allocation2 + $0x60] sm:$0x3]  }
  0x17   :  { %154 = vst.msk [vmem:[#allocation0 + $0x6f] sm:$0x2] %vm123_vm0, %v149_v27   ;;  %124 = vst.msk [vmem:[#allocation0] sm:$0x1] %vm123_vm0, %v122_v28   ;;  %v212_v36 = vld [vmem:[#allocation2 + $0x68] sm:$0x3]  }
  0x18   :  { %126 = vst.msk [vmem:[#allocation0 + $0x5f] sm:$0x2] %vm123_vm0, %v122_v28   ;;  %131 = vst.msk [vmem:[#allocation0 + $0x4] sm:$0x1] %vm123_vm0, %v128_v29   ;;  %v177_v37 = vld [vmem:[#allocation2 + $0x40] sm:$0x3]  }
  0x19   :  { %133 = vst.msk [vmem:[#allocation0 + $0x63] sm:$0x2] %vm123_vm0, %v128_v29   ;;  %v288_v31 = vld [vmem:[#allocation2] ss:$8 sm:$0xf]  }
  0x1a   :  { %v289_v32 = vld [vmem:[#allocation2] ss:$8 sm:$0xf0]   ;;  %40 = vst [vmem:[#allocation2 + $0x88] sm:$0x3] %v518_v30 }
  0x1b   :  { %v291_v33 = vsel %vm290_vm1, %v289_v32, %v288_v31  ;;  %v184_v38 = vld [vmem:[#allocation2 + $0x48] sm:$0x3]   ;;  %v191_v39 = vld [vmem:[#allocation2 + $0x50] sm:$0x3]   ;;  %201 = vst.msk [vmem:[#allocation0 + $0x2c] sm:$0x1] %vm123_vm0, %v198_v34  }
  0x1c   :  { %292 = vrot.lane.b32.xlu0 %v291_v33, %s561_s23  ;;  %203 = vst.msk [vmem:[#allocation0 + $0x8b] sm:$0x2] %vm123_vm0, %v198_v34   ;;  %208 = vst.msk [vmem:[#allocation0 + $0x30] sm:$0x1] %vm123_vm0, %v205_v35   ;;  %v219_v40 = vld [vmem:[#allocation2 + $0x70] sm:$0x3]  }
  0x1d   :  { %210 = vst.msk [vmem:[#allocation0 + $0x8f] sm:$0x2] %vm123_vm0, %v205_v35   ;;  %215 = vst.msk [vmem:[#allocation0 + $0x34] sm:$0x1] %vm123_vm0, %v212_v36   ;;  %v226_v43 = vld [vmem:[#allocation2 + $0x78] sm:$0x3]  }
  0x1e   :  { %217 = vst.msk [vmem:[#allocation0 + $0x93] sm:$0x2] %vm123_vm0, %v212_v36   ;;  %180 = vst.msk [vmem:[#allocation0 + $0x20] sm:$0x1] %vm123_vm0, %v177_v37   ;;  %v519_v51 = vld [vmem:[%s740_s0 + $0x20] sm:$0x3] }
  0x1f   :  { %182 = vst.msk [vmem:[#allocation0 + $0x7f] sm:$0x2] %vm123_vm0, %v177_v37   ;;  %187 = vst.msk [vmem:[#allocation0 + $0x24] sm:$0x1] %vm123_vm0, %v184_v38   ;;  %v247_v53 = vld [vmem:[#allocation2 + $0x90] sm:$0x3]  }
  0x20   :  { %189 = vst.msk [vmem:[#allocation0 + $0x83] sm:$0x2] %vm123_vm0, %v184_v38   ;;  %194 = vst.msk [vmem:[#allocation0 + $0x28] sm:$0x1] %vm123_vm0, %v191_v39   ;;  %v254_v54 = vld [vmem:[#allocation2 + $0x98] sm:$0x3]  }
  0x21   :  { %196 = vst.msk [vmem:[#allocation0 + $0x87] sm:$0x2] %vm123_vm0, %v191_v39   ;;  %v309_v41 = vld [vmem:[#allocation2 + $0x40] ss:$8 sm:$0xf]   ;;  %s562_s0 = smov 64  }
  0x22   :  { %222 = vst.msk [vmem:[#allocation0 + $0x38] sm:$0x1] %vm123_vm0, %v219_v40   ;;  %224 = vst.msk [vmem:[#allocation0 + $0x97] sm:$0x2] %vm123_vm0, %v219_v40   ;;  %v240_v52 = vld [vmem:[#allocation2 + $0x88] sm:$0x3]  }
  0x23   :  { %v311_v42 = vld [vmem:[#allocation2 + $0x40] ss:$8 sm:$0xf0]   ;;  %229 = vst.msk [vmem:[#allocation0 + $0x3c] sm:$0x1] %vm123_vm0, %v226_v43  }
  0x24   :  { %v313_v44 = vsel %vm290_vm1, %v311_v42, %v309_v41  ;;  %231 = vst.msk [vmem:[#allocation0 + $0x9b] sm:$0x2] %vm123_vm0, %v226_v43   ;;  %v298_v45 = vld [vmem:[#allocation2 + $0x1] ss:$8 sm:$0xf]  }
  0x25   :  { %v300_v46 = vld [vmem:[#allocation2 + $0x1] ss:$8 sm:$0xf0]   ;;  %314 = vrot.lane.b32.xlu1 %v313_v44, %s561_s23  ;;  %45 = vst [vmem:[#allocation2 + $0x80] sm:$0x3] %v519_v51 }
  0x26   :  { %v302_v47 = vsel %vm290_vm1, %v300_v46, %v298_v45  ;;  %v320_v48 = vld [vmem:[#allocation2 + $0x41] ss:$8 sm:$0xf]   ;;  %243 = vst.msk [vmem:[#allocation0 + $0x44] sm:$0x1] %vm123_vm0, %v240_v52  }
  0x27   :  { %v322_v49 = vld [vmem:[#allocation2 + $0x41] ss:$8 sm:$0xf0]   ;;  %303 = vrot.lane.b32.xlu0 %v302_v47, %s561_s23  ;;  %245 = vst.msk [vmem:[#allocation0 + $0xa3] sm:$0x2] %vm123_vm0, %v240_v52  }
  0x28   :  { %v324_v50 = vsel %vm290_vm1, %v322_v49, %v320_v48  ;;  %250 = vst.msk [vmem:[#allocation0 + $0x48] sm:$0x1] %vm123_vm0, %v247_v53   ;;  %252 = vst.msk [vmem:[#allocation0 + $0xa7] sm:$0x2] %vm123_vm0, %v247_v53   ;;  %v261_v59 = vld [vmem:[#allocation2 + $0xa0] sm:$0x3]  }
  0x29   :  { %257 = vst.msk [vmem:[#allocation0 + $0x4c] sm:$0x1] %vm123_vm0, %v254_v54   ;;  %259 = vst.msk [vmem:[#allocation0 + $0xab] sm:$0x2] %vm123_vm0, %v254_v54   ;;  %325 = vrot.lane.b32.xlu1 %v324_v50, %s561_s23  ;;  %v268_v61 = vld [vmem:[#allocation2 + $0xa8] sm:$0x3]  }
  0x2a   :  { %v344_v55 = vld [vmem:[#allocation2 + $0x81] ss:$8 sm:$0xf0]   ;;  %v333_v56 = vld [vmem:[#allocation2 + $0x80] ss:$8 sm:$0xf0]  }
  0x2b   :  { %v362_v57 = vld [vmem:[#allocation2 + $0x1] ss:$8 sm:$0xf]   ;;  %v352_v60 = vld [vmem:[#allocation2] ss:$8 sm:$0xf]  }
  0x2c   :  { %v364_v58 = vld [vmem:[#allocation2 + $0x1] ss:$8 sm:$0xf0]   ;;  %264 = vst.msk [vmem:[#allocation0 + $0x50] sm:$0x1] %vm123_vm0, %v261_v59  }
  0x2d   :  { %266 = vst.msk [vmem:[#allocation0 + $0xaf] sm:$0x2] %vm123_vm0, %v261_v59   ;;  %v275_v62 = vld [vmem:[#allocation2 + $0xb0] sm:$0x3]   ;;  %v282_v63 = vld [vmem:[#allocation2 + $0xb8] sm:$0x3]   ;;  %v366_v6 = vsel %vm290_vm1, %v364_v58, %v362_v57 }
  0x2e   :  { %v342_v0 = vld [vmem:[#allocation2 + $0x81] ss:$8 sm:$0xf]   ;;  %271 = vst.msk [vmem:[#allocation0 + $0x54] sm:$0x1] %vm123_vm0, %v268_v61  }
  0x2f   :  { %v233_v1 = vld [vmem:[#allocation2 + $0x80] sm:$0x3]   ;;  %273 = vst.msk [vmem:[#allocation0 + $0xb3] sm:$0x2] %vm123_vm0, %v268_v61   ;;  %278 = vst.msk [vmem:[#allocation0 + $0x58] sm:$0x1] %vm123_vm0, %v275_v62   ;;  %v346_v2 = vsel %vm290_vm1, %v344_v55, %v342_v0 }
  0x30   :  { %280 = vst.msk [vmem:[#allocation0 + $0xb7] sm:$0x2] %vm123_vm0, %v275_v62   ;;  %285 = vst.msk [vmem:[#allocation0 + $0x5c] sm:$0x1] %vm123_vm0, %v282_v63   ;;  %347 = vrot.lane.b32.xlu1 %v346_v2, %s561_s23 }
  0x31   :  { %287 = vst.msk [vmem:[#allocation0 + $0xbb] sm:$0x2] %vm123_vm0, %v282_v63   ;;  %236 = vst.msk [vmem:[#allocation0 + $0x40] sm:$0x1] %vm123_vm0, %v233_v1  }
  0x32   :  { %238 = vst.msk [vmem:[#allocation0 + $0x9f] sm:$0x2] %vm123_vm0, %v233_v1   ;;  %v331_v3 = vld [vmem:[#allocation2 + $0x80] ss:$8 sm:$0xf]  }
  0x33   :  { %v353_v4 = vld [vmem:[#allocation2] ss:$8 sm:$0xf0]   ;;  %v335_v5 = vsel %vm290_vm1, %v333_v56, %v331_v3  ;;  %v384_v8 = vld [vmem:[#allocation2 + $0x41] ss:$8 sm:$0xf]  }
  0x34   :  { %336 = vrot.lane.b32.xlu0 %v335_v5, %s561_s23  ;;  %v355_v7 = vsel %vm290_vm1, %v353_v4, %v352_v60  ;;  %v386_v9 = vld [vmem:[#allocation2 + $0x41] ss:$8 sm:$0xf0]   ;;  %v373_v10 = vld [vmem:[#allocation2 + $0x40] ss:$8 sm:$0xf]   ;;  %367 = vrot.lane.b32.xlu1 %v366_v6, %s562_s0 }
  0x35   :  { %v375_v11 = vld [vmem:[#allocation2 + $0x40] ss:$8 sm:$0xf0]   ;;  %v388_v12 = vsel %vm290_vm1, %v386_v9, %v384_v8  ;;  %v406_v13 = vld [vmem:[#allocation2 + $0x81] ss:$8 sm:$0xf]  }
  0x36   :  { %v377_v14 = vsel %vm290_vm1, %v375_v11, %v373_v10  ;;  %v408_v15 = vld [vmem:[#allocation2 + $0x81] ss:$8 sm:$0xf0]   ;;  %v395_v16 = vld [vmem:[#allocation2 + $0x80] ss:$8 sm:$0xf]  }
  0x37   :  { %v397_v17 = vld [vmem:[#allocation2 + $0x80] ss:$8 sm:$0xf0]  }
  0x38   :  { %356 = vrot.lane.b32.xlu0 %v355_v7, %s562_s0 }
  0x39   :  { %2 = vsyncpa [#allocation1], 0  ;;  %389 = vrot.lane.b32.xlu1 %v388_v12, %s562_s0  ;;  %v410_v18 = vsel %vm290_vm1, %v408_v15, %v406_v13  ;;  %v399_v19 = vsel %vm290_vm1, %v397_v17, %v395_v16  ;;  %v426_v20 = vld [vmem:[#allocation2 + $0x1] ss:$8 sm:$0xf]   ;;  %s563_s26 = smov 32  }
  0x3a   :  { %v428_v21 = vld [vmem:[#allocation2 + $0x1] ss:$8 sm:$0xf0]   ;;  %v416_v22 = vld [vmem:[#allocation2] ss:$8 sm:$0xf]  }
  0x3b   :  { %v417_v23 = vld [vmem:[#allocation2] ss:$8 sm:$0xf0]   ;;  %v430_v24 = vsel %vm290_vm1, %v428_v21, %v426_v20  ;;  %v448_v26 = vld [vmem:[#allocation2 + $0x41] ss:$8 sm:$0xf]  }
  0x3c   :  { %378 = vrot.lane.b32.xlu0 %v377_v14, %s562_s0  ;;  %v419_v25 = vsel %vm290_vm1, %v417_v23, %v416_v22  ;;  %v450_v27 = vld [vmem:[#allocation2 + $0x41] ss:$8 sm:$0xf0]   ;;  %v437_v28 = vld [vmem:[#allocation2 + $0x40] ss:$8 sm:$0xf]  }
  0x3d   :  { %411 = vrot.lane.b32.xlu1 %v410_v18, %s562_s0  ;;  %v439_v29 = vld [vmem:[#allocation2 + $0x40] ss:$8 sm:$0xf0]   ;;  %v452_v30 = vsel %vm290_vm1, %v450_v27, %v448_v26  ;;  %v470_v32 = vld [vmem:[#allocation2 + $0x81] ss:$8 sm:$0xf]  }
  0x3e   :  { %v441_v31 = vsel %vm290_vm1, %v439_v29, %v437_v28  ;;  %v472_v33 = vld [vmem:[#allocation2 + $0x81] ss:$8 sm:$0xf0]   ;;  %v459_v34 = vld [vmem:[#allocation2 + $0x80] ss:$8 sm:$0xf]  }
  0x3f   :  { %v461_v35 = vld [vmem:[#allocation2 + $0x80] ss:$8 sm:$0xf0]   ;;  %v474_v36 = vsel %vm290_vm1, %v472_v33, %v470_v32  ;;  %s564_s27 = smov [#allocation0]  }
  0x40   :  { %400 = vrot.lane.b32.xlu0 %v399_v19, %s562_s0  ;;  %v463_v37 = vsel %vm290_vm1, %v461_v35, %v459_v34  ;;  %s484_s28 = sshll.u32 %s564_s27, 4  ;;  %s485_s28 = int_to_ptr.vmem [resolvable:$true] %s484_s28 }
  0x41   :  { %431 = vrot.lane.b32.xlu1 %v430_v24, %s563_s26  ;;  %s539_s29 = scalar_lea.vmem %s485_s28, 3072  ;;  %p544_p1 = scmp.lt.s32.totalorder %s485_s28, %s485_s28 }
  0x42   :  { %p540_p0 = scmp.ne.s32.totalorder %s485_s28, %s539_s29  ;;  %p545_p2 = scmp.lt.s32.totalorder %s539_s29, %s539_s29 }
  0x44   :  { %420 = vrot.lane.b32.xlu0 %v419_v25, %s563_s26  ;;  %p546_p3 = por %p545_p2, %p544_p1 }
  0x45   :  { %453 = vrot.lane.b32.xlu1 %v452_v30, %s563_s26 }
  0x46   :  { %p547_p4 = pnand %p546_p3, %p540_p0 }
  0x48   :  { %442 = vrot.lane.b32.xlu0 %v441_v31, %s563_s26 }
  0x49   :  { %475 = vrot.lane.b32.xlu1 %v474_v36, %s563_s26 }
  0x4c   :  { %464 = vrot.lane.b32.xlu0 %v463_v37, %s563_s26 }
  0x8e   :  { %v293_v38 = vpop.permute.xlu0 %292  }
  0x8f   :  { %296 = vst.msk [vmem:[#allocation0 + $0x1] ss:$4 sm:$0xff] %vm123_vm0, %v293_v38  }
  0x97   :  { %v315_v39 = vpop.permute.xlu1 %314  }
  0x98   :  { %318 = vst.msk [vmem:[#allocation0 + $0x21] ss:$4 sm:$0xff] %vm123_vm0, %v315_v39  }
  0x99   :  { %v304_v40 = vpop.permute.xlu0 %303  }
  0x9a   :  { %307 = vst.msk [vmem:[#allocation0 + $0x61] ss:$4 sm:$0xff] %vm123_vm0, %v304_v40  }
  0x9b   :  { %v326_v41 = vpop.permute.xlu1 %325  }
  0x9c   :  { %329 = vst.msk [vmem:[#allocation0 + $0x81] ss:$4 sm:$0xff] %vm123_vm0, %v326_v41  }
  0xa2   :  { %v348_v42 = vpop.permute.xlu1 %347  }
  0xa3   :  { %351 = vst.msk [vmem:[#allocation0 + $0xa1] ss:$4 sm:$0xff] %vm123_vm0, %v348_v42  }
  0xa6   :  { %v337_v43 = vpop.permute.xlu0 %336   ;;  %v368_v44 = vpop.permute.xlu1 %367  }
  0xa7   :  { %340 = vst.msk [vmem:[#allocation0 + $0x41] ss:$4 sm:$0xff] %vm123_vm0, %v337_v43   ;;  %371 = vst.msk [vmem:[#allocation0 + $0x62] ss:$4 sm:$0xff] %vm123_vm0, %v368_v44  }
  0xaa   :  { %v357_v45 = vpop.permute.xlu0 %356  }
  0xab   :  { %360 = vst.msk [vmem:[#allocation0 + $0x2] ss:$4 sm:$0xff] %vm123_vm0, %v357_v45   ;;  %v390_v46 = vpop.permute.xlu1 %389  }
  0xac   :  { %393 = vst.msk [vmem:[#allocation0 + $0x82] ss:$4 sm:$0xff] %vm123_vm0, %v390_v46  }
  0xae   :  { %v379_v47 = vpop.permute.xlu0 %378  }
  0xaf   :  { %382 = vst.msk [vmem:[#allocation0 + $0x22] ss:$4 sm:$0xff] %vm123_vm0, %v379_v47   ;;  %v412_v48 = vpop.permute.xlu1 %411  }
  0xb0   :  { %415 = vst.msk [vmem:[#allocation0 + $0xa2] ss:$4 sm:$0xff] %vm123_vm0, %v412_v48  }
  0xb2   :  { %v401_v49 = vpop.permute.xlu0 %400  }
  0xb3   :  { %404 = vst.msk [vmem:[#allocation0 + $0x42] ss:$4 sm:$0xff] %vm123_vm0, %v401_v49   ;;  %v432_v50 = vpop.permute.xlu1 %431  }
  0xb4   :  { %435 = vst.msk [vmem:[#allocation0 + $0x63] ss:$4 sm:$0xff] %vm123_vm0, %v432_v50  }
  0xb6   :  { %v421_v51 = vpop.permute.xlu0 %420  }
  0xb7   :  { %424 = vst.msk [vmem:[#allocation0 + $0x3] ss:$4 sm:$0xff] %vm123_vm0, %v421_v51   ;;  %v454_v52 = vpop.permute.xlu1 %453  }
  0xb8   :  { %457 = vst.msk [vmem:[#allocation0 + $0x83] ss:$4 sm:$0xff] %vm123_vm0, %v454_v52  }
  0xba   :  { %v443_v53 = vpop.permute.xlu0 %442  }
  0xbb   :  { %446 = vst.msk [vmem:[#allocation0 + $0x23] ss:$4 sm:$0xff] %vm123_vm0, %v443_v53   ;;  %v476_v54 = vpop.permute.xlu1 %475  }
  0xbc   :  { %479 = vst.msk [vmem:[#allocation0 + $0xa3] ss:$4 sm:$0xff] %vm123_vm0, %v476_v54  }
  0xbe   :  { %v465_v55 = vpop.permute.xlu0 %464  }
  0xbf   :  { %468 = vst.msk [vmem:[#allocation0 + $0x43] ss:$4 sm:$0xff] %vm123_vm0, %v465_v55  }
  0xc0   :  { %550 = shalt.err (!%p547_p4)
}
  0xc1   :  { %487 = dma.vmem_to_hbm [thread:$0]  %s485_s28, 3072, %s741_s1, [#allocation1]  }
  0xc2   :  { %559 = dma.done.wait [#allocation1], 3072  }
  0xc3   :  { %560 = vsyncadd [#allocation1], 4294964224 }
  0xc4   :  { %489 = vsyncpa [#allocation1], 1 }

// kernel: forward_pallas.21
= control target key start
LH: loop header
LB: loop body
LE: loop exit
PB: predicated region body
PF: predicated region fallthrough
CT: control target
= control target key end

     0   :  { %s5340_s9 = smov 0   ;;  %s6063_s0 = inlined_call_operand.vmem [shape: bf16[2,8,384], index: 0, kind: input, shape index: {}]   ;;  %s6064_s1 = inlined_call_operand.vmem [shape: bf16[2,384,3072], index: 1, kind: input, shape index: {}]   ;;  %s6065_s2 = inlined_call_operand.vmem [shape: f32[2,8,3072], index: 2, kind: output, shape index: {}]  }
   0x1 LB: > { %s4709_s10 = sadd.s32 4294967295, %s5322_s9   ;;  %p4713_p0 = scmp.ge.s32.totalorder %s5322_s9, 1  ;;  %s5322_s9 = sphi %s5340_s9, %s12_s9  }
   0x2   : > { %p122_p1 = scmp.lt.s32.totalorder %s5322_s9, 3 }
   0x4   : > { %p123_p2 = pnand %p4713_p0, %p122_p1 }
   0x5   : > { %p149_p3 = scmp.lt.s32.totalorder (!%p123_p2), %s4709_s10, 1 }
   0x6   : > { %126 = sbr.rel (%p123_p2) target bundleno = 797 (0x31d), region = 28 }
   0xb   : > { %v5324_v0 = vmov 0   ;;  %s6067_s10 = smov (!%p149_p3, %s4709_s10), 1 }
   0xc   : > { %3707 = vmatprep.mubr.bf16.mxu1 %v5324_v0  ;;  %s5299_s11 = smul.u32 4608, %s6067_s10 }
   0xd   : > { %s5298_s15 = smul.u32 12, %s6067_s10 }
   0xe   : > { %s5355_s14 = scalar_lea.vmem %s6064_s1, %s5299_s11  ;;  %s5300_s19 = smul.u32 192, %s6067_s10 }
   0xf   : > { %v335_v1 = vld [vmem:[%s5355_s14 + $0x540] sm:$0xff]  ;;  %s5379_s18 = scalar_lea.vmem %s6063_s0, %s5298_s15 }
  0x10   : > { %v347_v2 = vld [vmem:[%s5355_s14 + $0x5a0] sm:$0xff]  ;;  %s5673_s22 = scalar_lea.vmem %s6065_s2, %s5300_s19 }
  0x11   : > { %v719_v3 = vld [vmem:[%s5355_s14 + $0x1140] sm:$0xff]  ;;  %v4889_v4 = vcombine.high %v335_v1, %v347_v2  ;;  %v4888_v6 = vcombine.low %v335_v1, %v347_v2 }
  0x12   : > { %v731_v5 = vld [vmem:[%s5355_s14 + $0x11a0] sm:$0xff] }
  0x13   : > { %v311_v7 = vld [vmem:[%s5355_s14 + $0x480] sm:$0xff]  ;;  %v5273_v9 = vcombine.high %v719_v3, %v731_v5  ;;  %v5272_v10 = vcombine.low %v719_v3, %v731_v5  ;;  %3634 = vmatprep.subr.bf16.mxu0 %v4889_v4  ;;  %v336_v4 = vld [vmem:[%s5355_s14 + $0x548] sm:$0xff] }
  0x14   : > { %v323_v8 = vld [vmem:[%s5355_s14 + $0x4e0] sm:$0xff]  ;;  %3635 = vmatpush1.bf16.msra.mxu0 %v4888_v6  ;;  %v348_v5 = vld [vmem:[%s5355_s14 + $0x5a8] sm:$0xff] }
  0x15   : > { %v4865_v11 = vcombine.high %v311_v7, %v323_v8  ;;  %v695_v12 = vld [vmem:[%s5355_s14 + $0x1080] sm:$0xff]  ;;  %3675 = vmatprep.subr.bf16.mxu1 %v5273_v9  ;;  %v4864_v19 = vcombine.low %v311_v7, %v323_v8  ;;  %v4891_v9 = vcombine.high %v336_v4, %v348_v5 }
  0x16   : > { %v707_v13 = vld [vmem:[%s5355_s14 + $0x10e0] sm:$0xff]  ;;  %3676 = vmatpush1.bf16.msra.mxu1 %v5272_v10 }
  0x17   : > { %v287_v14 = vld [vmem:[%s5355_s14 + $0x3c0] sm:$0xff]  ;;  %v5249_v15 = vcombine.high %v695_v12, %v707_v13  ;;  %3636 = vmatprep.subr.bf16.mxu0 %v4865_v11  ;;  %v5248_v20 = vcombine.low %v695_v12, %v707_v13  ;;  %v312_v12 = vld [vmem:[%s5355_s14 + $0x488] sm:$0xff] }
  0x18   : > { %v299_v16 = vld [vmem:[%s5355_s14 + $0x420] sm:$0xff]  ;;  %3637 = vmatpush1.bf16.msra.mxu0 %v4864_v19  ;;  %v324_v13 = vld [vmem:[%s5355_s14 + $0x4e8] sm:$0xff] }
  0x19   : > { %v671_v17 = vld [vmem:[%s5355_s14 + $0xfc0] sm:$0xff]  ;;  %v4841_v21 = vcombine.high %v287_v14, %v299_v16  ;;  %3677 = vmatprep.subr.bf16.mxu1 %v5249_v15  ;;  %v4840_v27 = vcombine.low %v287_v14, %v299_v16  ;;  %v5412_v14 = vld [vmem:[%s5379_s18 + $0x8] ss:$0 sps:$4 sm:$0xff]   ;;  %v4890_v16 = vcombine.low %v336_v4, %v348_v5 }
  0x1a   : > { %v683_v18 = vld [vmem:[%s5355_s14 + $0x1020] sm:$0xff]  ;;  %3678 = vmatpush1.bf16.msra.mxu1 %v5248_v20 }
  0x1b   : > { %v5225_v22 = vcombine.high %v671_v17, %v683_v18  ;;  %v263_v23 = vld [vmem:[%s5355_s14 + $0x300] sm:$0xff]  ;;  %3638 = vmatprep.subr.bf16.mxu0 %v4841_v21  ;;  %v5224_v28 = vcombine.low %v671_v17, %v683_v18  ;;  %v4867_v18 = vcombine.high %v312_v12, %v324_v13  ;;  %v288_v21 = vld [vmem:[%s5355_s14 + $0x3c8] sm:$0xff] }
  0x1c   : > { %v275_v24 = vld [vmem:[%s5355_s14 + $0x360] sm:$0xff]  ;;  %3639 = vmatpush1.bf16.msra.mxu0 %v4840_v27 }
  0x1d   : > { %v647_v25 = vld [vmem:[%s5355_s14 + $0xf00] sm:$0xff]  ;;  %v4817_v29 = vcombine.high %v263_v23, %v275_v24  ;;  %3679 = vmatprep.subr.bf16.mxu1 %v5225_v22  ;;  %v4816_v35 = vcombine.low %v263_v23, %v275_v24  ;;  %v300_v22 = vld [vmem:[%s5355_s14 + $0x428] sm:$0xff]  ;;  %v4866_v24 = vcombine.low %v312_v12, %v324_v13 }
  0x1e   : > { %v659_v26 = vld [vmem:[%s5355_s14 + $0xf60] sm:$0xff]  ;;  %3680 = vmatpush1.bf16.msra.mxu1 %v5224_v28 }
  0x1f   : > { %v5201_v30 = vcombine.high %v647_v25, %v659_v26  ;;  %v239_v31 = vld [vmem:[%s5355_s14 + $0x240] sm:$0xff]  ;;  %3640 = vmatprep.subr.bf16.mxu0 %v4817_v29  ;;  %v5200_v36 = vcombine.low %v647_v25, %v659_v26  ;;  %v4843_v26 = vcombine.high %v288_v21, %v300_v22  ;;  %v264_v29 = vld [vmem:[%s5355_s14 + $0x308] sm:$0xff] }
  0x20   : > { %v251_v32 = vld [vmem:[%s5355_s14 + $0x2a0] sm:$0xff]  ;;  %3641 = vmatpush1.bf16.msra.mxu0 %v4816_v35 }
  0x21   : > { %v623_v33 = vld [vmem:[%s5355_s14 + $0xe40] sm:$0xff]  ;;  %v4793_v37 = vcombine.high %v239_v31, %v251_v32  ;;  %3681 = vmatprep.subr.bf16.mxu1 %v5201_v30  ;;  %v4792_v43 = vcombine.low %v239_v31, %v251_v32  ;;  %v276_v30 = vld [vmem:[%s5355_s14 + $0x368] sm:$0xff]  ;;  %v4842_v32 = vcombine.low %v288_v21, %v300_v22 }
  0x22   : > { %v635_v34 = vld [vmem:[%s5355_s14 + $0xea0] sm:$0xff]  ;;  %3682 = vmatpush1.bf16.msra.mxu1 %v5200_v36 }
  0x23   : > { %v5177_v38 = vcombine.high %v623_v33, %v635_v34  ;;  %v215_v39 = vld [vmem:[%s5355_s14 + $0x180] sm:$0xff]  ;;  %3642 = vmatprep.subr.bf16.mxu0 %v4793_v37  ;;  %v5176_v44 = vcombine.low %v623_v33, %v635_v34  ;;  %v4819_v34 = vcombine.high %v264_v29, %v276_v30  ;;  %v240_v37 = vld [vmem:[%s5355_s14 + $0x248] sm:$0xff] }
  0x24   : > { %v227_v40 = vld [vmem:[%s5355_s14 + $0x1e0] sm:$0xff]  ;;  %3643 = vmatpush1.bf16.msra.mxu0 %v4792_v43 }
  0x25   : > { %v599_v41 = vld [vmem:[%s5355_s14 + $0xd80] sm:$0xff]  ;;  %v4769_v45 = vcombine.high %v215_v39, %v227_v40  ;;  %3683 = vmatprep.subr.bf16.mxu1 %v5177_v38  ;;  %v4768_v51 = vcombine.low %v215_v39, %v227_v40  ;;  %v252_v38 = vld [vmem:[%s5355_s14 + $0x2a8] sm:$0xff]  ;;  %v4818_v40 = vcombine.low %v264_v29, %v276_v30 }
  0x26   : > { %v611_v42 = vld [vmem:[%s5355_s14 + $0xde0] sm:$0xff]  ;;  %3684 = vmatpush1.bf16.msra.mxu1 %v5176_v44 }
  0x27   : > { %v5153_v46 = vcombine.high %v599_v41, %v611_v42  ;;  %v191_v47 = vld [vmem:[%s5355_s14 + $0xc0] sm:$0xff]  ;;  %3644 = vmatprep.subr.bf16.mxu0 %v4769_v45  ;;  %v5152_v52 = vcombine.low %v599_v41, %v611_v42  ;;  %v4795_v42 = vcombine.high %v240_v37, %v252_v38  ;;  %v216_v45 = vld [vmem:[%s5355_s14 + $0x188] sm:$0xff] }
  0x28   : > { %v203_v48 = vld [vmem:[%s5355_s14 + $0x120] sm:$0xff]  ;;  %3645 = vmatpush1.bf16.msra.mxu0 %v4768_v51 }
  0x29   : > { %v575_v49 = vld [vmem:[%s5355_s14 + $0xcc0] sm:$0xff]  ;;  %v4745_v53 = vcombine.high %v191_v47, %v203_v48  ;;  %3685 = vmatprep.subr.bf16.mxu1 %v5153_v46  ;;  %v4744_v61 = vcombine.low %v191_v47, %v203_v48  ;;  %v228_v46 = vld [vmem:[%s5355_s14 + $0x1e8] sm:$0xff]  ;;  %v4794_v48 = vcombine.low %v240_v37, %v252_v38 }
  0x2a   : > { %v587_v50 = vld [vmem:[%s5355_s14 + $0xd20] sm:$0xff]  ;;  %3686 = vmatpush1.bf16.msra.mxu1 %v5152_v52 }
  0x2b   : > { %v5129_v54 = vcombine.high %v575_v49, %v587_v50  ;;  %v167_v55 = vld [vmem:[%s5355_s14] sm:$0xff]  ;;  %3646 = vmatprep.subr.bf16.mxu0 %v4745_v53  ;;  %v5128_v62 = vcombine.low %v575_v49, %v587_v50  ;;  %v4771_v50 = vcombine.high %v216_v45, %v228_v46  ;;  %v192_v53 = vld [vmem:[%s5355_s14 + $0xc8] sm:$0xff] }
  0x2c   : > { %v179_v56 = vld [vmem:[%s5355_s14 + $0x60] sm:$0xff]  ;;  %3647 = vmatpush1.bf16.msra.mxu0 %v4744_v61 }
  0x2d   : > { %v5394_v57 = vld [vmem:[%s5379_s18] sm:$0xff]  ;;  %v4721_v63 = vcombine.high %v167_v55, %v179_v56  ;;  %3687 = vmatprep.subr.bf16.mxu1 %v5129_v54  ;;  %v4720_v6 = vcombine.low %v167_v55, %v179_v56  ;;  %v204_v54 = vld [vmem:[%s5355_s14 + $0x128] sm:$0xff]  ;;  %v4770_v56 = vcombine.low %v216_v45, %v228_v46 }
  0x2e   : > { %v551_v58 = vld [vmem:[%s5355_s14 + $0xc00] sm:$0xff]  ;;  %v5400_v60 = vcombine.high %v5394_v57, %v5394_v57  ;;  %3688 = vmatpush1.bf16.msra.mxu1 %v5128_v62 }
  0x2f   : > { %v563_v59 = vld [vmem:[%s5355_s14 + $0xc60] sm:$0xff]  ;;  %3648 = vmatprep.subr.bf16.mxu0 %v4721_v63  ;;  %v168_v63 = vld [vmem:[%s5355_s14 + $0x8] sm:$0xff] }
  0x30   : > { %v5105_v1 = vcombine.high %v551_v58, %v563_v59  ;;  %v527_v2 = vld [vmem:[%s5355_s14 + $0xb40] sm:$0xff]  ;;  %3666 = vmatprep.mubr.bf16.mxu0 %v5400_v60  ;;  %v5104_v7 = vcombine.low %v551_v58, %v563_v59  ;;  %3649 = vmatpush1.bf16.msra.mxu0 %v4720_v6  ;;  %v4747_v59 = vcombine.high %v192_v53, %v204_v54  ;;  %v720_v6 = vld [vmem:[%s5355_s14 + $0x1148] sm:$0xff] }
  0x31   : > { %v539_v3 = vld [vmem:[%s5355_s14 + $0xba0] sm:$0xff] }
  0x32   : > { %v5081_v8 = vcombine.high %v527_v2, %v539_v3  ;;  %3689 = vmatprep.subr.bf16.mxu1 %v5105_v1  ;;  %v503_v10 = vld [vmem:[%s5355_s14 + $0xa80] sm:$0xff]  ;;  %v5080_v15 = vcombine.low %v527_v2, %v539_v3  ;;  %v180_v1 = vld [vmem:[%s5355_s14 + $0x68] sm:$0xff]  ;;  %v4746_v3 = vcombine.low %v192_v53, %v204_v54 }
  0x33   : > { %v515_v11 = vld [vmem:[%s5355_s14 + $0xae0] sm:$0xff]  ;;  %3690 = vmatpush1.bf16.msra.mxu1 %v5104_v7  ;;  %v4723_v5 = vcombine.high %v168_v63, %v180_v1  ;;  %v732_v7 = vld [vmem:[%s5355_s14 + $0x11a8] sm:$0xff] }
  0x34   : > { %3650 = vmatprep.subr.bf16.mxu0 %v5081_v8  ;;  %v5057_v17 = vcombine.high %v503_v10, %v515_v11  ;;  %3716 = vmatprep.subr.bf16.mxu1 %v4891_v9  ;;  %v479_v19 = vld [vmem:[%s5355_s14 + $0x9c0] sm:$0xff]  ;;  %v5056_v23 = vcombine.low %v503_v10, %v515_v11  ;;  %v528_v8 = vld [vmem:[%s5355_s14 + $0xb48] sm:$0xff]  ;;  %v4722_v11 = vcombine.low %v168_v63, %v180_v1 }
  0x35   : > { %v491_v20 = vld [vmem:[%s5355_s14 + $0xa20] sm:$0xff]  ;;  %3651 = vmatpush2.bf16.msra.mxu0 %v5080_v15  ;;  %v540_v9 = vld [vmem:[%s5355_s14 + $0xba8] sm:$0xff]  ;;  %v5275_v12 = vcombine.high %v720_v6, %v732_v7 }
  0x36   : > { %3708 = vmatmul.mubr.bf16.vlgmr.msra.gmra.mxu1 %v5412_v14  ;;  %3652 = vmatprep.subr.bf16.mxu0 %v5057_v17  ;;  %v5033_v25 = vcombine.high %v479_v19, %v491_v20  ;;  %v455_v27 = vld [vmem:[%s5355_s14 + $0x900] sm:$0xff]  ;;  %v5032_v31 = vcombine.low %v479_v19, %v491_v20  ;;  %v5083_v13 = vcombine.high %v528_v8, %v540_v9  ;;  %v696_v15 = vld [vmem:[%s5355_s14 + $0x1088] sm:$0xff] }
  0x37   : > { %3717 = vmatpush1.bf16.msra.mxu1 %v4890_v16  ;;  %v467_v28 = vld [vmem:[%s5355_s14 + $0x960] sm:$0xff]  ;;  %3748 = vmatprep.mubr.bf16.mxu1 %v5400_v60  ;;  %v708_v16 = vld [vmem:[%s5355_s14 + $0x10e8] sm:$0xff]  ;;  %v5448_v17 = vcombine.low %v5394_v57, %v5394_v57  ;;  %v5274_v20 = vcombine.low %v720_v6, %v732_v7  ;;  %v5082_v21 = vcombine.low %v528_v8, %v540_v9 }
  0x38   : > { %3718 = vmatprep.subr.bf16.mxu1 %v4867_v18  ;;  %v5009_v33 = vcombine.high %v455_v27, %v467_v28  ;;  %v431_v35 = vld [vmem:[%s5355_s14 + $0x840] sm:$0xff]  ;;  %v5008_v39 = vcombine.low %v455_v27, %v467_v28  ;;  %v504_v18 = vld [vmem:[%s5355_s14 + $0xa88] sm:$0xff]  ;;  %v5251_v22 = vcombine.high %v696_v15, %v708_v16  ;;  %v5250_v27 = vcombine.low %v696_v15, %v708_v16 }
  0x39   : > { %3653 = vmatpush2.bf16.msra.mxu0 %v5056_v23  ;;  %v443_v36 = vld [vmem:[%s5355_s14 + $0x8a0] sm:$0xff]  ;;  %v516_v19 = vld [vmem:[%s5355_s14 + $0xae8] sm:$0xff] }
  0x3a   : > { %3654 = vmatprep.subr.bf16.mxu0 %v5033_v25  ;;  %v4985_v41 = vcombine.high %v431_v35, %v443_v36  ;;  %v407_v43 = vld [vmem:[%s5355_s14 + $0x780] sm:$0xff]  ;;  %v4984_v47 = vcombine.low %v431_v35, %v443_v36  ;;  %v5059_v23 = vcombine.high %v504_v18, %v516_v19  ;;  %v684_v25 = vld [vmem:[%s5355_s14 + $0x1028] sm:$0xff]  ;;  %v5058_v28 = vcombine.low %v504_v18, %v516_v19 }
  0x3b   : > { %3719 = vmatpush1.bf16.msra.mxu1 %v4866_v24  ;;  %v419_v44 = vld [vmem:[%s5355_s14 + $0x7e0] sm:$0xff]  ;;  %v672_v24 = vld [vmem:[%s5355_s14 + $0xfc8] sm:$0xff] }
  0x3c   : > { %3720 = vmatprep.subr.bf16.mxu1 %v4843_v26  ;;  %v4961_v49 = vcombine.high %v407_v43, %v419_v44  ;;  %v383_v51 = vld [vmem:[%s5355_s14 + $0x6c0] sm:$0xff]  ;;  %v4960_v55 = vcombine.low %v407_v43, %v419_v44  ;;  %v480_v57 = vld [vmem:[%s5355_s14 + $0x9c8] sm:$0xff]  ;;  %v5227_v29 = vcombine.high %v672_v24, %v684_v25  ;;  %v5226_v35 = vcombine.low %v672_v24, %v684_v25 }
  0x3d   : > { %3655 = vmatpush2.bf16.msra.mxu0 %v5032_v31  ;;  %v395_v52 = vld [vmem:[%s5355_s14 + $0x720] sm:$0xff]  ;;  %v492_v26 = vld [vmem:[%s5355_s14 + $0xa28] sm:$0xff] }
  0x3e   : > { %3656 = vmatprep.subr.bf16.mxu0 %v5009_v33  ;;  %v4937_v58 = vcombine.high %v383_v51, %v395_v52  ;;  %v359_v61 = vld [vmem:[%s5355_s14 + $0x600] sm:$0xff]  ;;  %v4936_v2 = vcombine.low %v383_v51, %v395_v52  ;;  %v5035_v30 = vcombine.high %v480_v57, %v492_v26  ;;  %v648_v31 = vld [vmem:[%s5355_s14 + $0xf08] sm:$0xff]  ;;  %v5034_v36 = vcombine.low %v480_v57, %v492_v26 }
  0x3f   : > { %3721 = vmatpush1.bf16.msra.mxu1 %v4842_v32  ;;  %v371_v62 = vld [vmem:[%s5355_s14 + $0x660] sm:$0xff]  ;;  %v660_v32 = vld [vmem:[%s5355_s14 + $0xf68] sm:$0xff] }
  0x40   : > { %3722 = vmatprep.subr.bf16.mxu1 %v4819_v34  ;;  %v4913_v4 = vcombine.high %v359_v61, %v371_v62  ;;  %v4912_v10 = vcombine.low %v359_v61, %v371_v62  ;;  %v456_v33 = vld [vmem:[%s5355_s14 + $0x908] sm:$0xff]  ;;  %v5203_v37 = vcombine.high %v648_v31, %v660_v32  ;;  %v5202_v43 = vcombine.low %v648_v31, %v660_v32 }
  0x41   : > { %3657 = vmatpush2.bf16.msra.mxu0 %v5008_v39  ;;  %v468_v34 = vld [vmem:[%s5355_s14 + $0x968] sm:$0xff] }
  0x42   : > { %3658 = vmatprep.subr.bf16.mxu0 %v4985_v41  ;;  %v5011_v38 = vcombine.high %v456_v33, %v468_v34  ;;  %v624_v39 = vld [vmem:[%s5355_s14 + $0xe48] sm:$0xff]  ;;  %v5010_v44 = vcombine.low %v456_v33, %v468_v34 }
  0x43   : > { %3723 = vmatpush1.bf16.msra.mxu1 %v4818_v40  ;;  %v636_v40 = vld [vmem:[%s5355_s14 + $0xea8] sm:$0xff] }
  0x44   : > { %3724 = vmatprep.subr.bf16.mxu1 %v4795_v42  ;;  %v432_v41 = vld [vmem:[%s5355_s14 + $0x848] sm:$0xff]  ;;  %v5179_v45 = vcombine.high %v624_v39, %v636_v40  ;;  %v5178_v51 = vcombine.low %v624_v39, %v636_v40 }
  0x45   : > { %3659 = vmatpush2.bf16.msra.mxu0 %v4984_v47  ;;  %v444_v42 = vld [vmem:[%s5355_s14 + $0x8a8] sm:$0xff] }
  0x46   : > { %3660 = vmatprep.subr.bf16.mxu0 %v4961_v49  ;;  %v4987_v46 = vcombine.high %v432_v41, %v444_v42  ;;  %v600_v47 = vld [vmem:[%s5355_s14 + $0xd88] sm:$0xff]  ;;  %v4986_v52 = vcombine.low %v432_v41, %v444_v42 }
  0x47   : > { %3725 = vmatpush1.bf16.msra.mxu1 %v4794_v48  ;;  %v612_v48 = vld [vmem:[%s5355_s14 + $0xde8] sm:$0xff] }
  0x48   : > { %3726 = vmatprep.subr.bf16.mxu1 %v4771_v50  ;;  %v408_v49 = vld [vmem:[%s5355_s14 + $0x788] sm:$0xff]  ;;  %v5155_v53 = vcombine.high %v600_v47, %v612_v48  ;;  %v5154_v61 = vcombine.low %v600_v47, %v612_v48 }
  0x49   : > { %3661 = vmatpush2.bf16.msra.mxu0 %v4960_v55  ;;  %v420_v50 = vld [vmem:[%s5355_s14 + $0x7e8] sm:$0xff] }
  0x4a   : > { %3662 = vmatprep.subr.bf16.mxu0 %v4937_v58  ;;  %v4963_v54 = vcombine.high %v408_v49, %v420_v50  ;;  %v576_v55 = vld [vmem:[%s5355_s14 + $0xcc8] sm:$0xff]  ;;  %v4962_v62 = vcombine.low %v408_v49, %v420_v50 }
  0x4b   : > { %3727 = vmatpush1.bf16.msra.mxu1 %v4770_v56  ;;  %v588_v56 = vld [vmem:[%s5355_s14 + $0xd28] sm:$0xff] }
  0x4c   : > { %3728 = vmatprep.subr.bf16.mxu1 %v4747_v59  ;;  %v384_v58 = vld [vmem:[%s5355_s14 + $0x6c8] sm:$0xff]  ;;  %v5131_v63 = vcombine.high %v576_v55, %v588_v56  ;;  %v5130_v6 = vcombine.low %v576_v55, %v588_v56 }
  0x4d   : > { %3663 = vmatpush2.bf16.msra.mxu0 %v4936_v2  ;;  %v396_v59 = vld [vmem:[%s5355_s14 + $0x728] sm:$0xff] }
  0x4e   : > { %3664 = vmatprep.subr.bf16.mxu0 %v4913_v4  ;;  %v4939_v1 = vcombine.high %v384_v58, %v396_v59  ;;  %v552_v2 = vld [vmem:[%s5355_s14 + $0xc08] sm:$0xff]  ;;  %v4938_v7 = vcombine.low %v384_v58, %v396_v59 }
  0x4f   : > { %3729 = vmatpush1.bf16.msra.mxu1 %v4746_v3  ;;  %v564_v3 = vld [vmem:[%s5355_s14 + $0xc68] sm:$0xff] }
  0x50   : > { %3730 = vmatprep.subr.bf16.mxu1 %v4723_v5  ;;  %v360_v4 = vld [vmem:[%s5355_s14 + $0x608] sm:$0xff]  ;;  %v5107_v8 = vcombine.high %v552_v2, %v564_v3  ;;  %v5106_v15 = vcombine.low %v552_v2, %v564_v3 }
  0x51   : > { %3665 = vmatpush2.bf16.msra.mxu0 %v4912_v10  ;;  %v372_v5 = vld [vmem:[%s5355_s14 + $0x668] sm:$0xff]  ;;  %v337_v10 = vld [vmem:[%s5355_s14 + $0x550] sm:$0xff] }
  0x52   : > { %3757 = vmatprep.subr.bf16.mxu0 %v5275_v12  ;;  %v4915_v9 = vcombine.high %v360_v4, %v372_v5  ;;  %v721_v12 = vld [vmem:[%s5355_s14 + $0x1150] sm:$0xff]  ;;  %v4914_v16 = vcombine.low %v360_v4, %v372_v5 }
  0x53   : > { %3731 = vmatpush1.bf16.msra.mxu1 %v4722_v11  ;;  %v349_v11 = vld [vmem:[%s5355_s14 + $0x5b0] sm:$0xff] }
  0x54   : > { %3732 = vmatprep.subr.bf16.mxu1 %v5083_v13  ;;  %3667 = vmatmul.mubr.bf16.vlgmr.msra.gmra.mxu0 %v5448_v17  ;;  %v733_v13 = vld [vmem:[%s5355_s14 + $0x11b0] sm:$0xff]  ;;  %v4893_v18 = vcombine.high %v337_v10, %v349_v11  ;;  %v4892_v24 = vcombine.low %v337_v10, %v349_v11 }
  0x55   : > { %3758 = vmatpush1.bf16.msra.mxu0 %v5274_v20  ;;  %3789 = vmatprep.mubr.bf16.mxu0 %v5324_v0  ;;  %v5277_v19 = vcombine.high %v721_v12, %v733_v13  ;;  %v313_v20 = vld [vmem:[%s5355_s14 + $0x490] sm:$0xff]  ;;  %v5276_v25 = vcombine.low %v721_v12, %v733_v13 }
  0x56   : > { %3759 = vmatprep.subr.bf16.mxu0 %v5251_v22  ;;  %v697_v22 = vld [vmem:[%s5355_s14 + $0x1090] sm:$0xff] }
  0x57   : > { %3733 = vmatpush2.bf16.msra.mxu1 %v5082_v21  ;;  %v325_v21 = vld [vmem:[%s5355_s14 + $0x4f0] sm:$0xff] }
  0x58   : > { %3734 = vmatprep.subr.bf16.mxu1 %v5059_v23  ;;  %v709_v23 = vld [vmem:[%s5355_s14 + $0x10f0] sm:$0xff]  ;;  %v4869_v57 = vcombine.high %v313_v20, %v325_v21  ;;  %v4868_v31 = vcombine.low %v313_v20, %v325_v21 }
  0x59   : > { %3760 = vmatpush1.bf16.msra.mxu0 %v5250_v27  ;;  %v5253_v26 = vcombine.high %v697_v22, %v709_v23  ;;  %v289_v27 = vld [vmem:[%s5355_s14 + $0x3d0] sm:$0xff]  ;;  %v5252_v32 = vcombine.low %v697_v22, %v709_v23 }
  0x5a   : > { %3761 = vmatprep.subr.bf16.mxu0 %v5227_v29  ;;  %v673_v29 = vld [vmem:[%s5355_s14 + $0xfd0] sm:$0xff] }
  0x5b   : > { %3735 = vmatpush2.bf16.msra.mxu1 %v5058_v28  ;;  %v301_v28 = vld [vmem:[%s5355_s14 + $0x430] sm:$0xff] }
  0x5c   : > { %3736 = vmatprep.subr.bf16.mxu1 %v5035_v30  ;;  %v685_v30 = vld [vmem:[%s5355_s14 + $0x1030] sm:$0xff]  ;;  %v4845_v33 = vcombine.high %v289_v27, %v301_v28  ;;  %v4844_v39 = vcombine.low %v289_v27, %v301_v28 }
  0x5d   : > { %3762 = vmatpush1.bf16.msra.mxu0 %v5226_v35  ;;  %v5229_v34 = vcombine.high %v673_v29, %v685_v30  ;;  %v265_v35 = vld [vmem:[%s5355_s14 + $0x310] sm:$0xff]  ;;  %v5228_v40 = vcombine.low %v673_v29, %v685_v30 }
  0x5e   : > { %3763 = vmatprep.subr.bf16.mxu0 %v5203_v37  ;;  %v649_v37 = vld [vmem:[%s5355_s14 + $0xf10] sm:$0xff] }
  0x5f   : > { %3737 = vmatpush2.bf16.msra.mxu1 %v5034_v36  ;;  %v277_v36 = vld [vmem:[%s5355_s14 + $0x370] sm:$0xff] }
  0x60   : > { %3738 = vmatprep.subr.bf16.mxu1 %v5011_v38  ;;  %v661_v38 = vld [vmem:[%s5355_s14 + $0xf70] sm:$0xff]  ;;  %v4821_v41 = vcombine.high %v265_v35, %v277_v36  ;;  %v4820_v47 = vcombine.low %v265_v35, %v277_v36 }
  0x61   : > { %3764 = vmatpush1.bf16.msra.mxu0 %v5202_v43  ;;  %v5205_v42 = vcombine.high %v649_v37, %v661_v38  ;;  %v241_v43 = vld [vmem:[%s5355_s14 + $0x250] sm:$0xff]  ;;  %v5204_v48 = vcombine.low %v649_v37, %v661_v38 }
  0x62   : > { %3765 = vmatprep.subr.bf16.mxu0 %v5179_v45  ;;  %v625_v45 = vld [vmem:[%s5355_s14 + $0xe50] sm:$0xff] }
  0x63   : > { %3739 = vmatpush2.bf16.msra.mxu1 %v5010_v44  ;;  %v253_v44 = vld [vmem:[%s5355_s14 + $0x2b0] sm:$0xff] }
  0x64   : > { %3740 = vmatprep.subr.bf16.mxu1 %v4987_v46  ;;  %v637_v46 = vld [vmem:[%s5355_s14 + $0xeb0] sm:$0xff]  ;;  %v4797_v49 = vcombine.high %v241_v43, %v253_v44  ;;  %v4796_v55 = vcombine.low %v241_v43, %v253_v44 }
  0x65   : > { %3766 = vmatpush1.bf16.msra.mxu0 %v5178_v51  ;;  %v5181_v50 = vcombine.high %v625_v45, %v637_v46  ;;  %v217_v51 = vld [vmem:[%s5355_s14 + $0x190] sm:$0xff]  ;;  %v5180_v56 = vcombine.low %v625_v45, %v637_v46 }
  0x66   : > { %3767 = vmatprep.subr.bf16.mxu0 %v5155_v53  ;;  %v601_v53 = vld [vmem:[%s5355_s14 + $0xd90] sm:$0xff] }
  0x67   : > { %3741 = vmatpush2.bf16.msra.mxu1 %v4986_v52  ;;  %v229_v52 = vld [vmem:[%s5355_s14 + $0x1f0] sm:$0xff] }
  0x68   : > { %3742 = vmatprep.subr.bf16.mxu1 %v4963_v54  ;;  %v613_v54 = vld [vmem:[%s5355_s14 + $0xdf0] sm:$0xff]  ;;  %v4773_v58 = vcombine.high %v217_v51, %v229_v52  ;;  %v4772_v2 = vcombine.low %v217_v51, %v229_v52 }
  0x69   : > { %3768 = vmatpush1.bf16.msra.mxu0 %v5154_v61  ;;  %v5157_v59 = vcombine.high %v601_v53, %v613_v54  ;;  %v193_v61 = vld [vmem:[%s5355_s14 + $0xd0] sm:$0xff]  ;;  %v5156_v3 = vcombine.low %v601_v53, %v613_v54 }
  0x6a   : > { %3769 = vmatprep.subr.bf16.mxu0 %v5131_v63  ;;  %v577_v63 = vld [vmem:[%s5355_s14 + $0xcd0] sm:$0xff] }
  0x6b   : > { %3743 = vmatpush2.bf16.msra.mxu1 %v4962_v62  ;;  %v205_v62 = vld [vmem:[%s5355_s14 + $0x130] sm:$0xff] }
  0x6c   : > { %3744 = vmatprep.subr.bf16.mxu1 %v4939_v1  ;;  %v589_v1 = vld [vmem:[%s5355_s14 + $0xd30] sm:$0xff]  ;;  %v4749_v4 = vcombine.high %v193_v61, %v205_v62  ;;  %v4748_v10 = vcombine.low %v193_v61, %v205_v62 }
  0x6d   : > { %3770 = vmatpush1.bf16.msra.mxu0 %v5130_v6  ;;  %v5133_v5 = vcombine.high %v577_v63, %v589_v1  ;;  %v169_v6 = vld [vmem:[%s5355_s14 + $0x10] sm:$0xff]  ;;  %v5132_v11 = vcombine.low %v577_v63, %v589_v1 }
  0x6e   : > { %3771 = vmatprep.subr.bf16.mxu0 %v5107_v8  ;;  %v553_v8 = vld [vmem:[%s5355_s14 + $0xc10] sm:$0xff] }
  0x6f   : > { %3745 = vmatpush2.bf16.msra.mxu1 %v4938_v7  ;;  %v181_v7 = vld [vmem:[%s5355_s14 + $0x70] sm:$0xff] }
  0x70   : > { %3746 = vmatprep.subr.bf16.mxu1 %v4915_v9  ;;  %v565_v9 = vld [vmem:[%s5355_s14 + $0xc70] sm:$0xff]  ;;  %v4725_v12 = vcombine.high %v169_v6, %v181_v7  ;;  %v4724_v20 = vcombine.low %v169_v6, %v181_v7 }
  0x71   : > { %3772 = vmatpush1.bf16.msra.mxu0 %v5106_v15  ;;  %v5109_v13 = vcombine.high %v553_v8, %v565_v9  ;;  %v529_v15 = vld [vmem:[%s5355_s14 + $0xb50] sm:$0xff]  ;;  %v5108_v21 = vcombine.low %v553_v8, %v565_v9 }
  0x72   : > { %3798 = vmatprep.subr.bf16.mxu0 %v4893_v18  ;;  %v338_v18 = vld [vmem:[%s5355_s14 + $0x558] sm:$0xff] }
  0x73   : > { %3747 = vmatpush2.bf16.msra.mxu1 %v4914_v16  ;;  %v541_v16 = vld [vmem:[%s5355_s14 + $0xbb0] sm:$0xff] }
  0x74   : > { %3839 = vmatprep.subr.bf16.mxu1 %v5277_v19  ;;  %3790 = vmatmul.mubr.bf16.vlgmr.msra.gmra.mxu0 %v5412_v14  ;;  %v350_v19 = vld [vmem:[%s5355_s14 + $0x5b8] sm:$0xff]  ;;  %v5085_v22 = vcombine.high %v529_v15, %v541_v16  ;;  %v5084_v27 = vcombine.low %v529_v15, %v541_v16 }
  0x75   : > { %3799 = vmatpush1.bf16.msra.mxu0 %v4892_v24  ;;  %3830 = vmatprep.mubr.bf16.mxu0 %v5400_v60  ;;  %v4895_v23 = vcombine.high %v338_v18, %v350_v19  ;;  %v505_v24 = vld [vmem:[%s5355_s14 + $0xa90] sm:$0xff]  ;;  %v4894_v28 = vcombine.low %v338_v18, %v350_v19 }
  0x76   : > { %3749 = vmatmul.mubr.bf16.vlgmr.msra.gmra.mxu1 %v5448_v17  ;;  %3800 = vmatprep.subr.bf16.mxu0 %v4869_v57  ;;  %v314_v57 = vld [vmem:[%s5355_s14 + $0x498] sm:$0xff] }
  0x77   : > { %3840 = vmatpush1.bf16.msra.mxu1 %v5276_v25  ;;  %3871 = vmatprep.mubr.bf16.mxu1 %v5324_v0  ;;  %v517_v25 = vld [vmem:[%s5355_s14 + $0xaf0] sm:$0xff] }
  0x78   : > { %3841 = vmatprep.subr.bf16.mxu1 %v5253_v26  ;;  %v326_v26 = vld [vmem:[%s5355_s14 + $0x4f8] sm:$0xff]  ;;  %v5061_v29 = vcombine.high %v505_v24, %v517_v25  ;;  %v5060_v35 = vcombine.low %v505_v24, %v517_v25 }
  0x79   : > { %3801 = vmatpush1.bf16.msra.mxu0 %v4868_v31  ;;  %v4871_v30 = vcombine.high %v314_v57, %v326_v26  ;;  %v481_v31 = vld [vmem:[%s5355_s14 + $0x9d0] sm:$0xff]  ;;  %v4870_v36 = vcombine.low %v314_v57, %v326_v26 }
  0x7a   : > { %3802 = vmatprep.subr.bf16.mxu0 %v4845_v33  ;;  %v290_v33 = vld [vmem:[%s5355_s14 + $0x3d8] sm:$0xff] }
  0x7b   : > { %3842 = vmatpush1.bf16.msra.mxu1 %v5252_v32  ;;  %v493_v32 = vld [vmem:[%s5355_s14 + $0xa30] sm:$0xff] }
  0x7c   : > { %3843 = vmatprep.subr.bf16.mxu1 %v5229_v34  ;;  %v302_v34 = vld [vmem:[%s5355_s14 + $0x438] sm:$0xff]  ;;  %v5037_v37 = vcombine.high %v481_v31, %v493_v32  ;;  %v5036_v43 = vcombine.low %v481_v31, %v493_v32 }
  0x7d   : > { %3803 = vmatpush1.bf16.msra.mxu0 %v4844_v39  ;;  %v4847_v38 = vcombine.high %v290_v33, %v302_v34  ;;  %v457_v39 = vld [vmem:[%s5355_s14 + $0x910] sm:$0xff]  ;;  %v4846_v44 = vcombine.low %v290_v33, %v302_v34 }
  0x7e   : > { %3804 = vmatprep.subr.bf16.mxu0 %v4821_v41  ;;  %v266_v41 = vld [vmem:[%s5355_s14 + $0x318] sm:$0xff] }
  0x7f   : > { %3844 = vmatpush1.bf16.msra.mxu1 %v5228_v40  ;;  %v469_v40 = vld [vmem:[%s5355_s14 + $0x970] sm:$0xff] }
  0x80   : > { %3845 = vmatprep.subr.bf16.mxu1 %v5205_v42  ;;  %v278_v42 = vld [vmem:[%s5355_s14 + $0x378] sm:$0xff]  ;;  %v5013_v45 = vcombine.high %v457_v39, %v469_v40  ;;  %v5012_v51 = vcombine.low %v457_v39, %v469_v40 }
  0x81   : > { %3805 = vmatpush1.bf16.msra.mxu0 %v4820_v47  ;;  %v4823_v46 = vcombine.high %v266_v41, %v278_v42  ;;  %v433_v47 = vld [vmem:[%s5355_s14 + $0x850] sm:$0xff]  ;;  %v4822_v52 = vcombine.low %v266_v41, %v278_v42 }
  0x82   : > { %3806 = vmatprep.subr.bf16.mxu0 %v4797_v49  ;;  %v242_v49 = vld [vmem:[%s5355_s14 + $0x258] sm:$0xff] }
  0x83   : > { %3846 = vmatpush1.bf16.msra.mxu1 %v5204_v48  ;;  %v445_v48 = vld [vmem:[%s5355_s14 + $0x8b0] sm:$0xff] }
  0x84   : > { %3847 = vmatprep.subr.bf16.mxu1 %v5181_v50  ;;  %v254_v50 = vld [vmem:[%s5355_s14 + $0x2b8] sm:$0xff]  ;;  %v4989_v53 = vcombine.high %v433_v47, %v445_v48  ;;  %v4988_v61 = vcombine.low %v433_v47, %v445_v48 }
  0x85   : > { %3807 = vmatpush1.bf16.msra.mxu0 %v4796_v55  ;;  %v4799_v54 = vcombine.high %v242_v49, %v254_v50  ;;  %v409_v55 = vld [vmem:[%s5355_s14 + $0x790] sm:$0xff]  ;;  %v4798_v62 = vcombine.low %v242_v49, %v254_v50 }
  0x86   : > { %3808 = vmatprep.subr.bf16.mxu0 %v4773_v58  ;;  %v218_v58 = vld [vmem:[%s5355_s14 + $0x198] sm:$0xff] }
  0x87   : > { %3848 = vmatpush1.bf16.msra.mxu1 %v5180_v56  ;;  %v421_v56 = vld [vmem:[%s5355_s14 + $0x7f0] sm:$0xff] }
  0x88   : > { %3849 = vmatprep.subr.bf16.mxu1 %v5157_v59  ;;  %v230_v59 = vld [vmem:[%s5355_s14 + $0x1f8] sm:$0xff]  ;;  %v4965_v63 = vcombine.high %v409_v55, %v421_v56  ;;  %v4964_v6 = vcombine.low %v409_v55, %v421_v56 }
  0x89   : > { %3809 = vmatpush1.bf16.msra.mxu0 %v4772_v2  ;;  %v4775_v1 = vcombine.high %v218_v58, %v230_v59  ;;  %v385_v2 = vld [vmem:[%s5355_s14 + $0x6d0] sm:$0xff]  ;;  %v4774_v7 = vcombine.low %v218_v58, %v230_v59 }
  0x8a   : > { %3810 = vmatprep.subr.bf16.mxu0 %v4749_v4  ;;  %v194_v4 = vld [vmem:[%s5355_s14 + $0xd8] sm:$0xff] }
  0x8b   : > { %3850 = vmatpush1.bf16.msra.mxu1 %v5156_v3  ;;  %v397_v3 = vld [vmem:[%s5355_s14 + $0x730] sm:$0xff] }
  0x8c   : > { %3851 = vmatprep.subr.bf16.mxu1 %v5133_v5  ;;  %v206_v5 = vld [vmem:[%s5355_s14 + $0x138] sm:$0xff]  ;;  %v4941_v8 = vcombine.high %v385_v2, %v397_v3  ;;  %v4940_v15 = vcombine.low %v385_v2, %v397_v3 }
  0x8d   : > { %3811 = vmatpush1.bf16.msra.mxu0 %v4748_v10  ;;  %v4751_v9 = vcombine.high %v194_v4, %v206_v5  ;;  %v361_v10 = vld [vmem:[%s5355_s14 + $0x610] sm:$0xff]  ;;  %v4750_v16 = vcombine.low %v194_v4, %v206_v5 }
  0x8e   : > { %3812 = vmatprep.subr.bf16.mxu0 %v4725_v12  ;;  %v170_v12 = vld [vmem:[%s5355_s14 + $0x18] sm:$0xff] }
  0x8f   : > { %3852 = vmatpush1.bf16.msra.mxu1 %v5132_v11  ;;  %v373_v11 = vld [vmem:[%s5355_s14 + $0x670] sm:$0xff] }
  0x90   : > { %3853 = vmatprep.subr.bf16.mxu1 %v5109_v13  ;;  %v182_v13 = vld [vmem:[%s5355_s14 + $0x78] sm:$0xff]  ;;  %v4917_v18 = vcombine.high %v361_v10, %v373_v11  ;;  %v4916_v24 = vcombine.low %v361_v10, %v373_v11 }
  0x91   : > { %3813 = vmatpush1.bf16.msra.mxu0 %v4724_v20  ;;  %v4727_v19 = vcombine.high %v170_v12, %v182_v13  ;;  %v722_v20 = vld [vmem:[%s5355_s14 + $0x1158] sm:$0xff]  ;;  %v4726_v25 = vcombine.low %v170_v12, %v182_v13 }
  0x92   : > { %3814 = vmatprep.subr.bf16.mxu0 %v5085_v22  ;;  %v530_v22 = vld [vmem:[%s5355_s14 + $0xb58] sm:$0xff] }
  0x93   : > { %3854 = vmatpush1.bf16.msra.mxu1 %v5108_v21  ;;  %v734_v21 = vld [vmem:[%s5355_s14 + $0x11b8] sm:$0xff] }
  0x94   : > { %3880 = vmatprep.subr.bf16.mxu1 %v4895_v23  ;;  %v542_v23 = vld [vmem:[%s5355_s14 + $0xbb8] sm:$0xff]  ;;  %v5279_v57 = vcombine.high %v722_v20, %v734_v21  ;;  %v5278_v31 = vcombine.low %v722_v20, %v734_v21 }
  0x95   : > { %3815 = vmatpush2.bf16.msra.mxu0 %v5084_v27  ;;  %v5087_v26 = vcombine.high %v530_v22, %v542_v23  ;;  %v698_v27 = vld [vmem:[%s5355_s14 + $0x1098] sm:$0xff]  ;;  %v5086_v32 = vcombine.low %v530_v22, %v542_v23 }
  0x96   : > { %3872 = vmatmul.mubr.bf16.vlgmr.msra.gmra.mxu1 %v5412_v14  ;;  %3816 = vmatprep.subr.bf16.mxu0 %v5061_v29  ;;  %v506_v29 = vld [vmem:[%s5355_s14 + $0xa98] sm:$0xff] }
  0x97   : > { %3881 = vmatpush1.bf16.msra.mxu1 %v4894_v28  ;;  %3912 = vmatprep.mubr.bf16.mxu1 %v5400_v60  ;;  %v710_v28 = vld [vmem:[%s5355_s14 + $0x10f8] sm:$0xff] }
  0x98   : > { %3882 = vmatprep.subr.bf16.mxu1 %v4871_v30  ;;  %v518_v30 = vld [vmem:[%s5355_s14 + $0xaf8] sm:$0xff]  ;;  %v5255_v33 = vcombine.high %v698_v27, %v710_v28  ;;  %v5254_v39 = vcombine.low %v698_v27, %v710_v28 }
  0x99   : > { %3817 = vmatpush2.bf16.msra.mxu0 %v5060_v35  ;;  %v5063_v34 = vcombine.high %v506_v29, %v518_v30  ;;  %v674_v35 = vld [vmem:[%s5355_s14 + $0xfd8] sm:$0xff]  ;;  %v5062_v40 = vcombine.low %v506_v29, %v518_v30 }
  0x9a   : > { %3818 = vmatprep.subr.bf16.mxu0 %v5037_v37  ;;  %v482_v37 = vld [vmem:[%s5355_s14 + $0x9d8] sm:$0xff] }
  0x9b   : > { %3883 = vmatpush1.bf16.msra.mxu1 %v4870_v36  ;;  %v686_v36 = vld [vmem:[%s5355_s14 + $0x1038] sm:$0xff] }
  0x9c   : > { %3884 = vmatprep.subr.bf16.mxu1 %v4847_v38  ;;  %v494_v38 = vld [vmem:[%s5355_s14 + $0xa38] sm:$0xff]  ;;  %v5231_v41 = vcombine.high %v674_v35, %v686_v36  ;;  %v5230_v47 = vcombine.low %v674_v35, %v686_v36 }
  0x9d   : > { %3819 = vmatpush2.bf16.msra.mxu0 %v5036_v43  ;;  %v5039_v42 = vcombine.high %v482_v37, %v494_v38  ;;  %v650_v43 = vld [vmem:[%s5355_s14 + $0xf18] sm:$0xff]  ;;  %v5038_v48 = vcombine.low %v482_v37, %v494_v38 }
  0x9e   : > { %3820 = vmatprep.subr.bf16.mxu0 %v5013_v45  ;;  %v458_v45 = vld [vmem:[%s5355_s14 + $0x918] sm:$0xff] }
  0x9f   : > { %3885 = vmatpush1.bf16.msra.mxu1 %v4846_v44  ;;  %v662_v44 = vld [vmem:[%s5355_s14 + $0xf78] sm:$0xff] }
  0xa0   : > { %3886 = vmatprep.subr.bf16.mxu1 %v4823_v46  ;;  %v470_v46 = vld [vmem:[%s5355_s14 + $0x978] sm:$0xff]  ;;  %v5207_v49 = vcombine.high %v650_v43, %v662_v44  ;;  %v5206_v55 = vcombine.low %v650_v43, %v662_v44 }
  0xa1   : > { %3821 = vmatpush2.bf16.msra.mxu0 %v5012_v51  ;;  %v5015_v50 = vcombine.high %v458_v45, %v470_v46  ;;  %v626_v51 = vld [vmem:[%s5355_s14 + $0xe58] sm:$0xff]  ;;  %v5014_v56 = vcombine.low %v458_v45, %v470_v46 }
  0xa2   : > { %3822 = vmatprep.subr.bf16.mxu0 %v4989_v53  ;;  %v434_v53 = vld [vmem:[%s5355_s14 + $0x858] sm:$0xff] }
  0xa3   : > { %3887 = vmatpush1.bf16.msra.mxu1 %v4822_v52  ;;  %v638_v52 = vld [vmem:[%s5355_s14 + $0xeb8] sm:$0xff] }
  0xa4   : > { %3888 = vmatprep.subr.bf16.mxu1 %v4799_v54  ;;  %v446_v54 = vld [vmem:[%s5355_s14 + $0x8b8] sm:$0xff]  ;;  %v5183_v58 = vcombine.high %v626_v51, %v638_v52  ;;  %v5182_v2 = vcombine.low %v626_v51, %v638_v52 }
  0xa5   : > { %3823 = vmatpush2.bf16.msra.mxu0 %v4988_v61  ;;  %v4991_v59 = vcombine.high %v434_v53, %v446_v54  ;;  %v602_v61 = vld [vmem:[%s5355_s14 + $0xd98] sm:$0xff]  ;;  %v4990_v3 = vcombine.low %v434_v53, %v446_v54  ;;  %v243_v54 = vld [vmem:[%s5355_s14 + $0x260] sm:$0xff] }
  0xa6   : > { %3824 = vmatprep.subr.bf16.mxu0 %v4965_v63  ;;  %v410_v63 = vld [vmem:[%s5355_s14 + $0x798] sm:$0xff] }
  0xa7   : > { %3889 = vmatpush1.bf16.msra.mxu1 %v4798_v62  ;;  %v614_v62 = vld [vmem:[%s5355_s14 + $0xdf8] sm:$0xff] }
  0xa8   : > { %3890 = vmatprep.subr.bf16.mxu1 %v4775_v1  ;;  %v422_v1 = vld [vmem:[%s5355_s14 + $0x7f8] sm:$0xff]  ;;  %v5159_v4 = vcombine.high %v602_v61, %v614_v62  ;;  %v5158_v10 = vcombine.low %v602_v61, %v614_v62 }
  0xa9   : > { %3825 = vmatpush2.bf16.msra.mxu0 %v4964_v6  ;;  %v4967_v5 = vcombine.high %v410_v63, %v422_v1  ;;  %v578_v6 = vld [vmem:[%s5355_s14 + $0xcd8] sm:$0xff]  ;;  %v4966_v11 = vcombine.low %v410_v63, %v422_v1  ;;  %v219_v1 = vld [vmem:[%s5355_s14 + $0x1a0] sm:$0xff] }
  0xaa   : > { %3826 = vmatprep.subr.bf16.mxu0 %v4941_v8  ;;  %v386_v8 = vld [vmem:[%s5355_s14 + $0x6d8] sm:$0xff] }
  0xab   : > { %3891 = vmatpush1.bf16.msra.mxu1 %v4774_v7  ;;  %v590_v7 = vld [vmem:[%s5355_s14 + $0xd38] sm:$0xff] }
  0xac   : > { %3892 = vmatprep.subr.bf16.mxu1 %v4751_v9  ;;  %v398_v9 = vld [vmem:[%s5355_s14 + $0x738] sm:$0xff]  ;;  %v5135_v12 = vcombine.high %v578_v6, %v590_v7  ;;  %v5134_v20 = vcombine.low %v578_v6, %v590_v7 }
  0xad   : > { %3827 = vmatpush2.bf16.msra.mxu0 %v4940_v15  ;;  %v4943_v13 = vcombine.high %v386_v8, %v398_v9  ;;  %v554_v15 = vld [vmem:[%s5355_s14 + $0xc18] sm:$0xff]  ;;  %v4942_v21 = vcombine.low %v386_v8, %v398_v9  ;;  %v195_v9 = vld [vmem:[%s5355_s14 + $0xe0] sm:$0xff] }
  0xae   : > { %3828 = vmatprep.subr.bf16.mxu0 %v4917_v18  ;;  %v362_v18 = vld [vmem:[%s5355_s14 + $0x618] sm:$0xff] }
  0xaf   : > { %3893 = vmatpush1.bf16.msra.mxu1 %v4750_v16  ;;  %v566_v16 = vld [vmem:[%s5355_s14 + $0xc78] sm:$0xff] }
  0xb0   : > { %3894 = vmatprep.subr.bf16.mxu1 %v4727_v19  ;;  %v374_v19 = vld [vmem:[%s5355_s14 + $0x678] sm:$0xff]  ;;  %v5111_v22 = vcombine.high %v554_v15, %v566_v16  ;;  %v5110_v27 = vcombine.low %v554_v15, %v566_v16 }
  0xb1   : > { %3829 = vmatpush2.bf16.msra.mxu0 %v4916_v24  ;;  %v4919_v23 = vcombine.high %v362_v18, %v374_v19  ;;  %v339_v24 = vld [vmem:[%s5355_s14 + $0x560] sm:$0xff]  ;;  %v4918_v28 = vcombine.low %v362_v18, %v374_v19 }
  0xb2   : > { %3921 = vmatprep.subr.bf16.mxu0 %v5279_v57  ;;  %v723_v57 = vld [vmem:[%s5355_s14 + $0x1160] sm:$0xff] }
  0xb3   : > { %3895 = vmatpush1.bf16.msra.mxu1 %v4726_v25  ;;  %v351_v25 = vld [vmem:[%s5355_s14 + $0x5c0] sm:$0xff] }
  0xb4   : > { %3896 = vmatprep.subr.bf16.mxu1 %v5087_v26  ;;  %3831 = vmatmul.mubr.bf16.vlgmr.msra.gmra.mxu0 %v5448_v17  ;;  %v735_v26 = vld [vmem:[%s5355_s14 + $0x11c0] sm:$0xff]  ;;  %v4897_v29 = vcombine.high %v339_v24, %v351_v25  ;;  %v4896_v35 = vcombine.low %v339_v24, %v351_v25 }
  0xb5   : > { %3922 = vmatpush1.bf16.msra.mxu0 %v5278_v31  ;;  %3953 = vmatprep.mubr.bf16.mxu0 %v5324_v0  ;;  %v5281_v30 = vcombine.high %v723_v57, %v735_v26  ;;  %v315_v31 = vld [vmem:[%s5355_s14 + $0x4a0] sm:$0xff]  ;;  %v5280_v36 = vcombine.low %v723_v57, %v735_v26 }
  0xb6   : > { %3923 = vmatprep.subr.bf16.mxu0 %v5255_v33  ;;  %v699_v33 = vld [vmem:[%s5355_s14 + $0x10a0] sm:$0xff] }
  0xb7   : > { %3897 = vmatpush2.bf16.msra.mxu1 %v5086_v32  ;;  %v327_v32 = vld [vmem:[%s5355_s14 + $0x500] sm:$0xff] }
  0xb8   : > { %3898 = vmatprep.subr.bf16.mxu1 %v5063_v34  ;;  %v711_v34 = vld [vmem:[%s5355_s14 + $0x1100] sm:$0xff]  ;;  %v4873_v37 = vcombine.high %v315_v31, %v327_v32  ;;  %v4872_v43 = vcombine.low %v315_v31, %v327_v32 }
  0xb9   : > { %3924 = vmatpush1.bf16.msra.mxu0 %v5254_v39  ;;  %v5257_v38 = vcombine.high %v699_v33, %v711_v34  ;;  %v291_v39 = vld [vmem:[%s5355_s14 + $0x3e0] sm:$0xff]  ;;  %v5256_v44 = vcombine.low %v699_v33, %v711_v34 }
  0xba   : > { %3925 = vmatprep.subr.bf16.mxu0 %v5231_v41  ;;  %v675_v41 = vld [vmem:[%s5355_s14 + $0xfe0] sm:$0xff] }
  0xbb   : > { %3899 = vmatpush2.bf16.msra.mxu1 %v5062_v40  ;;  %v303_v40 = vld [vmem:[%s5355_s14 + $0x440] sm:$0xff] }
  0xbc   : > { %3900 = vmatprep.subr.bf16.mxu1 %v5039_v42  ;;  %v687_v42 = vld [vmem:[%s5355_s14 + $0x1040] sm:$0xff]  ;;  %v4849_v45 = vcombine.high %v291_v39, %v303_v40 }
  0xbd   : > { %3926 = vmatpush1.bf16.msra.mxu0 %v5230_v47  ;;  %v5233_v46 = vcombine.high %v675_v41, %v687_v42  ;;  %v267_v47 = vld [vmem:[%s5355_s14 + $0x320] sm:$0xff]  ;;  %v5232_v51 = vcombine.low %v675_v41, %v687_v42 }
  0xbe   : > { %3927 = vmatprep.subr.bf16.mxu0 %v5207_v49  ;;  %v663_v49 = vld [vmem:[%s5355_s14 + $0xf80] sm:$0xff] }
  0xbf   : > { %3901 = vmatpush2.bf16.msra.mxu1 %v5038_v48  ;;  %v279_v48 = vld [vmem:[%s5355_s14 + $0x380] sm:$0xff] }
  0xc0   : > { %3902 = vmatprep.subr.bf16.mxu1 %v5015_v50  ;;  %v4848_v50 = vcombine.low %v291_v39, %v303_v40  ;;  %v4825_v52 = vcombine.high %v267_v47, %v279_v48  ;;  %v171_v19 = vld [vmem:[%s5355_s14 + $0x20] sm:$0xff] }
  0xc1   : > { %3928 = vmatpush1.bf16.msra.mxu0 %v5206_v55  ;;  %v255_v55 = vld [vmem:[%s5355_s14 + $0x2c0] sm:$0xff] }
  0xc2   : > { %3929 = vmatprep.subr.bf16.mxu0 %v5183_v58  ;;  %v639_v58 = vld [vmem:[%s5355_s14 + $0xec0] sm:$0xff]  ;;  %v4801_v62 = vcombine.high %v243_v54, %v255_v55 }
  0xc3   : > { %3903 = vmatpush2.bf16.msra.mxu1 %v5014_v56  ;;  %v627_v56 = vld [vmem:[%s5355_s14 + $0xe60] sm:$0xff] }
  0xc4   : > { %3904 = vmatprep.subr.bf16.mxu1 %v4991_v59  ;;  %v4824_v59 = vcombine.low %v267_v47, %v279_v48  ;;  %v5185_v63 = vcombine.high %v627_v56, %v639_v58  ;;  %v5184_v6 = vcombine.low %v627_v56, %v639_v58  ;;  %v531_v26 = vld [vmem:[%s5355_s14 + $0xb60] sm:$0xff]  ;;  %v5633_v47 = vld [vmem:[%s5379_s18 + $0x8] ss:$0 sps:$4 sm:$0xff]  }
  0xc5   : > { %3930 = vmatpush1.bf16.msra.mxu0 %v5182_v2  ;;  %v231_v2 = vld [vmem:[%s5355_s14 + $0x200] sm:$0xff] }
  0xc6   : > { %3931 = vmatprep.subr.bf16.mxu0 %v5159_v4  ;;  %v615_v4 = vld [vmem:[%s5355_s14 + $0xe00] sm:$0xff]  ;;  %v4777_v7 = vcombine.high %v219_v1, %v231_v2 }
  0xc7   : > { %3905 = vmatpush2.bf16.msra.mxu1 %v4990_v3  ;;  %v603_v3 = vld [vmem:[%s5355_s14 + $0xda0] sm:$0xff] }
  0xc8   : > { %3906 = vmatprep.subr.bf16.mxu1 %v4967_v5  ;;  %v4800_v5 = vcombine.low %v243_v54, %v255_v55  ;;  %v5161_v8 = vcombine.high %v603_v3, %v615_v4  ;;  %v5160_v15 = vcombine.low %v603_v3, %v615_v4  ;;  %v507_v34 = vld [vmem:[%s5355_s14 + $0xaa0] sm:$0xff]  ;;  %v268_v54 = vld [vmem:[%s5355_s14 + $0x328] sm:$0xff] }
  0xc9   : > { %3932 = vmatpush1.bf16.msra.mxu0 %v5158_v10  ;;  %v207_v10 = vld [vmem:[%s5355_s14 + $0x140] sm:$0xff]  ;;  %v280_v55 = vld [vmem:[%s5355_s14 + $0x388] sm:$0xff] }
  0xca   : > { %3933 = vmatprep.subr.bf16.mxu0 %v5135_v12  ;;  %v591_v12 = vld [vmem:[%s5355_s14 + $0xd40] sm:$0xff]  ;;  %v4753_v16 = vcombine.high %v195_v9, %v207_v10  ;;  %v244_v3 = vld [vmem:[%s5355_s14 + $0x268] sm:$0xff] }
  0xcb   : > { %3907 = vmatpush2.bf16.msra.mxu1 %v4966_v11  ;;  %v579_v11 = vld [vmem:[%s5355_s14 + $0xce0] sm:$0xff]  ;;  %v256_v4 = vld [vmem:[%s5355_s14 + $0x2c8] sm:$0xff] }
  0xcc   : > { %3908 = vmatprep.subr.bf16.mxu1 %v4943_v13  ;;  %v4776_v13 = vcombine.low %v219_v1, %v231_v2  ;;  %v5137_v18 = vcombine.high %v579_v11, %v591_v12  ;;  %v5136_v24 = vcombine.low %v579_v11, %v591_v12  ;;  %v483_v42 = vld [vmem:[%s5355_s14 + $0x9e0] sm:$0xff]  ;;  %v220_v11 = vld [vmem:[%s5355_s14 + $0x1a8] sm:$0xff] }
  0xcd   : > { %3934 = vmatpush1.bf16.msra.mxu0 %v5134_v20  ;;  %v183_v20 = vld [vmem:[%s5355_s14 + $0x80] sm:$0xff]  ;;  %v232_v12 = vld [vmem:[%s5355_s14 + $0x208] sm:$0xff] }
  0xce   : > { %3935 = vmatprep.subr.bf16.mxu0 %v5111_v22  ;;  %v567_v22 = vld [vmem:[%s5355_s14 + $0xc80] sm:$0xff]  ;;  %v4729_v25 = vcombine.high %v171_v19, %v183_v20 }
  0xcf   : > { %3909 = vmatpush2.bf16.msra.mxu1 %v4942_v21  ;;  %v555_v21 = vld [vmem:[%s5355_s14 + $0xc20] sm:$0xff] }
  0xd0   : > { %3910 = vmatprep.subr.bf16.mxu1 %v4919_v23  ;;  %v4752_v23 = vcombine.low %v195_v9, %v207_v10  ;;  %v5113_v57 = vcombine.high %v555_v21, %v567_v22  ;;  %v5112_v31 = vcombine.low %v555_v21, %v567_v22  ;;  %v435_v1 = vld [vmem:[%s5355_s14 + $0x860] sm:$0xff]  ;;  %v196_v21 = vld [vmem:[%s5355_s14 + $0xe8] sm:$0xff] }
  0xd1   : > { %3936 = vmatpush1.bf16.msra.mxu0 %v5110_v27  ;;  %v543_v27 = vld [vmem:[%s5355_s14 + $0xbc0] sm:$0xff]  ;;  %v208_v22 = vld [vmem:[%s5355_s14 + $0x148] sm:$0xff] }
  0xd2   : > { %3962 = vmatprep.subr.bf16.mxu0 %v4897_v29  ;;  %v352_v29 = vld [vmem:[%s5355_s14 + $0x5c8] sm:$0xff]  ;;  %v5089_v32 = vcombine.high %v531_v26, %v543_v27  ;;  %v447_v2 = vld [vmem:[%s5355_s14 + $0x8c0] sm:$0xff] }
  0xd3   : > { %3911 = vmatpush2.bf16.msra.mxu1 %v4918_v28  ;;  %v340_v28 = vld [vmem:[%s5355_s14 + $0x568] sm:$0xff]  ;;  %v411_v9 = vld [vmem:[%s5355_s14 + $0x7a0] sm:$0xff] }
  0xd4   : > { %4003 = vmatprep.subr.bf16.mxu1 %v5281_v30  ;;  %3954 = vmatmul.mubr.bf16.vlgmr.msra.gmra.mxu0 %v5412_v14  ;;  %v651_v14 = vld [vmem:[%s5355_s14 + $0xf20] sm:$0xff]  ;;  %v4728_v30 = vcombine.low %v171_v19, %v183_v20  ;;  %v4899_v33 = vcombine.high %v340_v28, %v352_v29  ;;  %v4898_v39 = vcombine.low %v340_v28, %v352_v29  ;;  %v172_v28 = vld [vmem:[%s5355_s14 + $0x28] sm:$0xff] }
  0xd5   : > { %3963 = vmatpush1.bf16.msra.mxu0 %v4896_v35  ;;  %3994 = vmatprep.mubr.bf16.mxu0 %v5400_v60  ;;  %v5209_v53 = vcombine.high %v651_v14, %v663_v49  ;;  %v5208_v61 = vcombine.low %v651_v14, %v663_v49  ;;  %v519_v35 = vld [vmem:[%s5355_s14 + $0xb00] sm:$0xff]  ;;  %v184_v29 = vld [vmem:[%s5355_s14 + $0x88] sm:$0xff] }
  0xd6   : > { %3913 = vmatmul.mubr.bf16.vlgmr.msra.gmra.mxu1 %v5448_v17  ;;  %3964 = vmatprep.subr.bf16.mxu0 %v4873_v37  ;;  %v328_v37 = vld [vmem:[%s5355_s14 + $0x508] sm:$0xff]  ;;  %v5065_v40 = vcombine.high %v507_v34, %v519_v35  ;;  %v5064_v48 = vcombine.low %v507_v34, %v519_v35  ;;  %v423_v10 = vld [vmem:[%s5355_s14 + $0x800] sm:$0xff] }
  0xd7   : > { %4004 = vmatpush1.bf16.msra.mxu1 %v5280_v36  ;;  %4035 = vmatprep.mubr.bf16.mxu1 %v5324_v0  ;;  %v316_v36 = vld [vmem:[%s5355_s14 + $0x4a8] sm:$0xff]  ;;  %v387_v19 = vld [vmem:[%s5355_s14 + $0x6e0] sm:$0xff] }
  0xd8   : > { %4005 = vmatprep.subr.bf16.mxu1 %v5257_v38  ;;  %v5088_v38 = vcombine.low %v531_v26, %v543_v27  ;;  %v4875_v41 = vcombine.high %v316_v36, %v328_v37  ;;  %v4874_v14 = vcombine.low %v316_v36, %v328_v37  ;;  %v399_v20 = vld [vmem:[%s5355_s14 + $0x740] sm:$0xff]  ;;  %v724_v34 = vld [vmem:[%s5355_s14 + $0x1168] sm:$0xff] }
  0xd9   : > { %3965 = vmatpush1.bf16.msra.mxu0 %v4872_v43  ;;  %v495_v43 = vld [vmem:[%s5355_s14 + $0xa40] sm:$0xff]  ;;  %v736_v35 = vld [vmem:[%s5355_s14 + $0x11c8] sm:$0xff] }
  0xda   : > { %3966 = vmatprep.subr.bf16.mxu0 %v4849_v45  ;;  %v304_v45 = vld [vmem:[%s5355_s14 + $0x448] sm:$0xff]  ;;  %v5041_v49 = vcombine.high %v483_v42, %v495_v43  ;;  %v5040_v58 = vcombine.low %v483_v42, %v495_v43  ;;  %v363_v26 = vld [vmem:[%s5355_s14 + $0x620] sm:$0xff] }
  0xdb   : > { %4006 = vmatpush1.bf16.msra.mxu1 %v5256_v44  ;;  %v292_v44 = vld [vmem:[%s5355_s14 + $0x3e8] sm:$0xff]  ;;  %v375_v27 = vld [vmem:[%s5355_s14 + $0x680] sm:$0xff] }
  0xdc   : > { %4007 = vmatprep.subr.bf16.mxu1 %v5233_v46  ;;  %v532_v36 = vld [vmem:[%s5355_s14 + $0xb68] sm:$0xff] }
  0xdd   : > { %3967 = vmatpush1.bf16.msra.mxu0 %v4848_v50  ;;  %v544_v37 = vld [vmem:[%s5355_s14 + $0xbc8] sm:$0xff] }
  0xde   : > { %3968 = vmatprep.subr.bf16.mxu0 %v4825_v52  ;;  %v459_v52 = vld [vmem:[%s5355_s14 + $0x920] sm:$0xff]  ;;  %v700_v42 = vld [vmem:[%s5355_s14 + $0x10a8] sm:$0xff] }
  0xdf   : > { %4008 = vmatpush1.bf16.msra.mxu1 %v5232_v51  ;;  %v4851_v51 = vcombine.high %v292_v44, %v304_v45  ;;  %v712_v43 = vld [vmem:[%s5355_s14 + $0x1108] sm:$0xff] }
  0xe0   : > { %4009 = vmatprep.subr.bf16.mxu1 %v5209_v53  ;;  %v471_v53 = vld [vmem:[%s5355_s14 + $0x980] sm:$0xff] }
  0xe1   : > { %3969 = vmatpush1.bf16.msra.mxu0 %v4824_v59  ;;  %v4850_v59 = vcombine.low %v292_v44, %v304_v45  ;;  %v508_v44 = vld [vmem:[%s5355_s14 + $0xaa8] sm:$0xff] }
  0xe2   : > { %3970 = vmatprep.subr.bf16.mxu0 %v4801_v62  ;;  %v520_v45 = vld [vmem:[%s5355_s14 + $0xb08] sm:$0xff] }
  0xe3   : > { %4010 = vmatpush1.bf16.msra.mxu1 %v5208_v61  ;;  %v5017_v61 = vcombine.high %v459_v52, %v471_v53 }
  0xe4   : > { %4011 = vmatprep.subr.bf16.mxu1 %v5185_v63  ;;  %v4827_v63 = vcombine.high %v268_v54, %v280_v55 }
  0xe5   : > { %3971 = vmatpush1.bf16.msra.mxu0 %v4800_v5  ;;  %v5016_v5 = vcombine.low %v459_v52, %v471_v53  ;;  %v676_v52 = vld [vmem:[%s5355_s14 + $0xfe8] sm:$0xff] }
  0xe6   : > { %3972 = vmatprep.subr.bf16.mxu0 %v4777_v7  ;;  %v4993_v7 = vcombine.high %v435_v1, %v447_v2  ;;  %v688_v53 = vld [vmem:[%s5355_s14 + $0x1048] sm:$0xff] }
  0xe7   : > { %4012 = vmatpush1.bf16.msra.mxu1 %v5184_v6  ;;  %v4826_v6 = vcombine.low %v268_v54, %v280_v55  ;;  %v484_v55 = vld [vmem:[%s5355_s14 + $0x9e8] sm:$0xff] }
  0xe8   : > { %4013 = vmatprep.subr.bf16.mxu1 %v5161_v8  ;;  %v4803_v8 = vcombine.high %v244_v3, %v256_v4 }
  0xe9   : > { %3973 = vmatpush1.bf16.msra.mxu0 %v4776_v13  ;;  %v4992_v13 = vcombine.low %v435_v1, %v447_v2 }
  0xea   : > { %3974 = vmatprep.subr.bf16.mxu0 %v4753_v16  ;;  %v4969_v16 = vcombine.high %v411_v9, %v423_v10 }
  0xeb   : > { %4014 = vmatpush1.bf16.msra.mxu1 %v5160_v15  ;;  %v4802_v15 = vcombine.low %v244_v3, %v256_v4  ;;  %v652_v3 = vld [vmem:[%s5355_s14 + $0xf28] sm:$0xff] }
  0xec   : > { %4015 = vmatprep.subr.bf16.mxu1 %v5137_v18  ;;  %v4779_v18 = vcombine.high %v220_v11, %v232_v12 }
  0xed   : > { %3975 = vmatpush1.bf16.msra.mxu0 %v4752_v23  ;;  %v4968_v23 = vcombine.low %v411_v9, %v423_v10 }
  0xee   : > { %3976 = vmatprep.subr.bf16.mxu0 %v4729_v25  ;;  %v4945_v25 = vcombine.high %v387_v19, %v399_v20 }
  0xef   : > { %4016 = vmatpush1.bf16.msra.mxu1 %v5136_v24  ;;  %v4778_v24 = vcombine.low %v220_v11, %v232_v12  ;;  %v628_v11 = vld [vmem:[%s5355_s14 + $0xe68] sm:$0xff] }
  0xf0   : > { %4017 = vmatprep.subr.bf16.mxu1 %v5113_v57  ;;  %v4755_v57 = vcombine.high %v196_v21, %v208_v22  ;;  %v640_v12 = vld [vmem:[%s5355_s14 + $0xec8] sm:$0xff] }
  0xf1   : > { %3977 = vmatpush1.bf16.msra.mxu0 %v4728_v30  ;;  %v4944_v30 = vcombine.low %v387_v19, %v399_v20  ;;  %v5187_v19 = vcombine.high %v628_v11, %v640_v12 }
  0xf2   : > { %3978 = vmatprep.subr.bf16.mxu0 %v5089_v32  ;;  %v4921_v32 = vcombine.high %v363_v26, %v375_v27 }
  0xf3   : > { %4018 = vmatpush1.bf16.msra.mxu1 %v5112_v31  ;;  %v4754_v31 = vcombine.low %v196_v21, %v208_v22  ;;  %v604_v21 = vld [vmem:[%s5355_s14 + $0xda8] sm:$0xff] }
  0xf4   : > { %4044 = vmatprep.subr.bf16.mxu1 %v4899_v33  ;;  %v4731_v33 = vcombine.high %v172_v28, %v184_v29  ;;  %v616_v22 = vld [vmem:[%s5355_s14 + $0xe08] sm:$0xff] }
  0xf5   : > { %3979 = vmatpush2.bf16.msra.mxu0 %v5088_v38  ;;  %v4920_v38 = vcombine.low %v363_v26, %v375_v27  ;;  %v5163_v26 = vcombine.high %v604_v21, %v616_v22 }
  0xf6   : > { %v5630_v46 = vpop.f32.mrf.mxu1  ;;  %4036 = vmatmul.mubr.bf16.vlgmr.msra.gmra.mxu1 %v5633_v47  ;;  %3980 = vmatprep.subr.bf16.mxu0 %v5065_v40  ;;  %v5283_v40 = vcombine.high %v724_v34, %v736_v35 }
  0xf7   : > { %4045 = vmatpush1.bf16.msra.mxu1 %v4898_v39  ;;  %4076 = vmatprep.mubr.bf16.mxu1 %v5400_v60  ;;  %v4730_v39 = vcombine.low %v172_v28, %v184_v29  ;;  %v580_v28 = vld [vmem:[%s5355_s14 + $0xce8] sm:$0xff] }
  0xf8   : > { %v5636_v50 = vpop.f32.mrf.mxu1  ;;  %4046 = vmatprep.subr.bf16.mxu1 %v4875_v41  ;;  %v5091_v41 = vcombine.high %v532_v36, %v544_v37  ;;  %v592_v29 = vld [vmem:[%s5355_s14 + $0xd48] sm:$0xff] }
  0xf9   : > { %3981 = vmatpush2.bf16.msra.mxu0 %v5064_v48  ;;  %v5282_v48 = vcombine.low %v724_v34, %v736_v35  ;;  %v5139_v34 = vcombine.high %v580_v28, %v592_v29 }
  0xfa   : > { %v3713_v56 = vpop.f32.mrf.mxu1  ;;  %3982 = vmatprep.subr.bf16.mxu0 %v5041_v49  ;;  %v5259_v49 = vcombine.high %v700_v42, %v712_v43 }
  0xfb   : > { %4047 = vmatpush1.bf16.msra.mxu1 %v4874_v14  ;;  %v5090_v14 = vcombine.low %v532_v36, %v544_v37  ;;  %v496_v56 = vld [vmem:[%s5355_s14 + $0xa48] sm:$0xff] }
  0xfc   : > { %v3714_v62 = vpop.f32.mrf.mxu1  ;;  %4048 = vmatprep.subr.bf16.mxu1 %v4851_v51  ;;  %v5067_v51 = vcombine.high %v508_v44, %v520_v45  ;;  %v5043_v2 = vcombine.high %v484_v55, %v496_v56  ;;  %v5042_v9 = vcombine.low %v484_v55, %v496_v56  ;;  %v556_v36 = vld [vmem:[%s5355_s14 + $0xc28] sm:$0xff]  ;;  %v329_v55 = vld [vmem:[%s5355_s14 + $0x510] sm:$0xff] }
  0xfd   : > { %3983 = vmatpush2.bf16.msra.mxu0 %v5040_v58  ;;  %v5066_v62 = vcombine.low %v508_v44, %v520_v45  ;;  %v568_v37 = vld [vmem:[%s5355_s14 + $0xc88] sm:$0xff]  ;;  %v341_v44 = vld [vmem:[%s5355_s14 + $0x570] sm:$0xff] }
  0xfe   : > { %3984 = vmatprep.subr.bf16.mxu0 %v5017_v61  ;;  %v353_v45 = vld [vmem:[%s5355_s14 + $0x5d0] sm:$0xff] }
  0xff   : > { %4049 = vmatpush1.bf16.msra.mxu1 %v4850_v59  ;;  %v5258_v59 = vcombine.low %v700_v42, %v712_v43  ;;  %v5115_v42 = vcombine.high %v556_v36, %v568_v37  ;;  %v701_v56 = vld [vmem:[%s5355_s14 + $0x10b0] sm:$0xff] }
 0x100   : > { %4050 = vmatprep.subr.bf16.mxu1 %v4827_v63  ;;  %v5235_v63 = vcombine.high %v676_v52, %v688_v53 }
 0x101   : > { %3985 = vmatpush2.bf16.msra.mxu0 %v5016_v5  ;;  %v460_v5 = vld [vmem:[%s5355_s14 + $0x928] sm:$0xff] }
 0x102   : > { %3986 = vmatprep.subr.bf16.mxu0 %v4993_v7  ;;  %v5234_v7 = vcombine.low %v676_v52, %v688_v53  ;;  %v4901_v52 = vcombine.high %v341_v44, %v353_v45 }
 0x103   : > { %4051 = vmatpush1.bf16.msra.mxu1 %v4826_v6  ;;  %v472_v6 = vld [vmem:[%s5355_s14 + $0x988] sm:$0xff] }
 0x104   : > { %4052 = vmatprep.subr.bf16.mxu1 %v4803_v8  ;;  %v5019_v10 = vcombine.high %v460_v5, %v472_v6 }
 0x105   : > { %3987 = vmatpush2.bf16.msra.mxu0 %v4992_v13  ;;  %v436_v13 = vld [vmem:[%s5355_s14 + $0x868] sm:$0xff] }
 0x106   : > { %3988 = vmatprep.subr.bf16.mxu0 %v4969_v16 }
 0x107   : > { %4053 = vmatpush1.bf16.msra.mxu1 %v4802_v15  ;;  %v448_v15 = vld [vmem:[%s5355_s14 + $0x8c8] sm:$0xff] }
 0x108   : > { %4054 = vmatprep.subr.bf16.mxu1 %v4779_v18  ;;  %v5018_v18 = vcombine.low %v460_v5, %v472_v6  ;;  %v4995_v20 = vcombine.high %v436_v13, %v448_v15 }
 0x109   : > { %3989 = vmatpush2.bf16.msra.mxu0 %v4968_v23  ;;  %v412_v23 = vld [vmem:[%s5355_s14 + $0x7a8] sm:$0xff] }
 0x10a   : > { %3990 = vmatprep.subr.bf16.mxu0 %v4945_v25  ;;  %v5186_v25 = vcombine.low %v628_v11, %v640_v12  ;;  %v269_v12 = vld [vmem:[%s5355_s14 + $0x330] sm:$0xff] }
 0x10b   : > { %4055 = vmatpush1.bf16.msra.mxu1 %v4778_v24  ;;  %v424_v24 = vld [vmem:[%s5355_s14 + $0x808] sm:$0xff] }
 0x10c   : > { %4056 = vmatprep.subr.bf16.mxu1 %v4755_v57  ;;  %v4994_v57 = vcombine.low %v436_v13, %v448_v15  ;;  %v4971_v27 = vcombine.high %v412_v23, %v424_v24  ;;  %v281_v13 = vld [vmem:[%s5355_s14 + $0x390] sm:$0xff] }
 0x10d   : > { %3991 = vmatpush2.bf16.msra.mxu0 %v4944_v30  ;;  %v388_v30 = vld [vmem:[%s5355_s14 + $0x6e8] sm:$0xff] }
 0x10e   : > { %3992 = vmatprep.subr.bf16.mxu0 %v4921_v32  ;;  %v5162_v32 = vcombine.low %v604_v21, %v616_v22 }
 0x10f   : > { %4057 = vmatpush1.bf16.msra.mxu1 %v4754_v31  ;;  %v400_v31 = vld [vmem:[%s5355_s14 + $0x748] sm:$0xff] }
 0x110   : > { %4058 = vmatprep.subr.bf16.mxu1 %v4731_v33  ;;  %v4970_v33 = vcombine.low %v412_v23, %v424_v24  ;;  %v4947_v35 = vcombine.high %v388_v30, %v400_v31  ;;  %v4829_v24 = vcombine.high %v269_v12, %v281_v13 }
 0x111   : > { %3993 = vmatpush2.bf16.msra.mxu0 %v4920_v38  ;;  %v364_v38 = vld [vmem:[%s5355_s14 + $0x628] sm:$0xff] }
 0x112   : > { %4085 = vmatprep.subr.bf16.mxu0 %v5283_v40  ;;  %v5138_v40 = vcombine.low %v580_v28, %v592_v29  ;;  %v629_v28 = vld [vmem:[%s5355_s14 + $0xe70] sm:$0xff] }
 0x113   : > { %4059 = vmatpush1.bf16.msra.mxu1 %v4730_v39  ;;  %v376_v39 = vld [vmem:[%s5355_s14 + $0x688] sm:$0xff]  ;;  %v641_v29 = vld [vmem:[%s5355_s14 + $0xed0] sm:$0xff] }
 0x114   : > { %4060 = vmatprep.subr.bf16.mxu1 %v5091_v41  ;;  %v3668_v54 = vpop.f32.mrf.mxu0  ;;  %3995 = vmatmul.mubr.bf16.vlgmr.msra.gmra.mxu0 %v5448_v17  ;;  %v4946_v41 = vcombine.low %v388_v30, %v400_v31  ;;  %v4923_v43 = vcombine.high %v364_v38, %v376_v39  ;;  %v4828_v30 = vcombine.low %v269_v12, %v281_v13  ;;  %v485_v13 = vld [vmem:[%s5355_s14 + $0x9f0] sm:$0xff] }
 0x115   : > { %v3710_v58 = vadd.f32 %v5630_v46, %v3668_v54  ;;  %4086 = vmatpush1.bf16.msra.mxu0 %v5282_v48  ;;  %4117 = vmatprep.mubr.bf16.mxu0 %v5324_v0  ;;  %v664_v46 = vld [vmem:[%s5355_s14 + $0xf88] sm:$0xff]  ;;  %v725_v48 = vld [vmem:[%s5355_s14 + $0x1170] sm:$0xff] }
 0x116   : > { %v3670_v61 = vpop.f32.mrf.mxu0  ;;  %4087 = vmatprep.subr.bf16.mxu0 %v5259_v49  ;;  %v5210_v16 = vcombine.low %v652_v3, %v664_v46  ;;  %v5114_v49 = vcombine.low %v556_v36, %v568_v37  ;;  %v317_v54 = vld [vmem:[%s5355_s14 + $0x4b0] sm:$0xff] }
 0x117   : > { %4061 = vmatpush2.bf16.msra.mxu1 %v5090_v14  ;;  %4618 = vst [vmem:[%s5673_s22] sm:$0xff] %v3710_v58  ;;  %v3712_v1 = vadd.f32 %v5636_v50, %v3670_v61  ;;  %v5211_v50 = vcombine.high %v652_v3, %v664_v46  ;;  %v737_v14 = vld [vmem:[%s5355_s14 + $0x11d0] sm:$0xff]  ;;  %v4876_v6 = vcombine.low %v317_v54, %v329_v55 }
 0x118   : > { %4062 = vmatprep.subr.bf16.mxu1 %v5067_v51  ;;  %v3672_v4 = vpop.f32.mrf.mxu0  ;;  %v4922_v51 = vcombine.low %v364_v38, %v376_v39  ;;  %v5285_v53 = vcombine.high %v725_v48, %v737_v14  ;;  %v713_v58 = vld [vmem:[%s5355_s14 + $0x1110] sm:$0xff]  ;;  %v5284_v61 = vcombine.low %v725_v48, %v737_v14  ;;  %v5188_v39 = vcombine.low %v629_v28, %v641_v29 }
 0x119   : > { %4619 = vst [vmem:[%s5673_s22 + $0x8] sm:$0xff] %v3712_v1  ;;  %4088 = vmatpush1.bf16.msra.mxu0 %v5258_v59  ;;  %v4900_v59 = vcombine.low %v341_v44, %v353_v45  ;;  %v293_v1 = vld [vmem:[%s5355_s14 + $0x3f0] sm:$0xff] }
 0x11a   : > { %v3673_v8 = vpop.f32.mrf.mxu0  ;;  %4089 = vmatprep.subr.bf16.mxu0 %v5235_v63  ;;  %v5261_v63 = vcombine.high %v701_v56, %v713_v58  ;;  %v677_v46 = vld [vmem:[%s5355_s14 + $0xff0] sm:$0xff] }
 0x11b   : > { %4063 = vmatpush2.bf16.msra.mxu1 %v5066_v62  ;;  %v4877_v62 = vcombine.high %v317_v54, %v329_v55  ;;  %v689_v4 = vld [vmem:[%s5355_s14 + $0x1050] sm:$0xff] }
 0x11c   : > { %4064 = vmatprep.subr.bf16.mxu1 %v5043_v2  ;;  %v305_v2 = vld [vmem:[%s5355_s14 + $0x450] sm:$0xff]  ;;  %v5237_v11 = vcombine.high %v677_v46, %v689_v4  ;;  %v5236_v23 = vcombine.low %v677_v46, %v689_v4 }
 0x11d   : > { %4090 = vmatpush1.bf16.msra.mxu0 %v5234_v7  ;;  %v4852_v21 = vcombine.low %v293_v1, %v305_v2  ;;  %v605_v36 = vld [vmem:[%s5355_s14 + $0xdb0] sm:$0xff] }
 0x11e   : > { %4091 = vmatprep.subr.bf16.mxu0 %v5211_v50  ;;  %v4853_v50 = vcombine.high %v293_v1, %v305_v2  ;;  %v617_v37 = vld [vmem:[%s5355_s14 + $0xe10] sm:$0xff]  ;;  %v342_v1 = vld [vmem:[%s5355_s14 + $0x578] sm:$0xff] }
 0x11f   : > { %4065 = vmatpush2.bf16.msra.mxu1 %v5042_v9  ;;  %v5260_v9 = vcombine.low %v701_v56, %v713_v58  ;;  %v581_v44 = vld [vmem:[%s5355_s14 + $0xcf0] sm:$0xff]  ;;  %v5164_v14 = vcombine.low %v605_v36, %v617_v37  ;;  %v354_v2 = vld [vmem:[%s5355_s14 + $0x5d8] sm:$0xff] }
 0x120   : > { %4066 = vmatprep.subr.bf16.mxu1 %v5019_v10  ;;  %v593_v45 = vld [vmem:[%s5355_s14 + $0xd50] sm:$0xff] }
 0x121   : > { %4092 = vmatpush1.bf16.msra.mxu0 %v5210_v16  ;;  %v557_v54 = vld [vmem:[%s5355_s14 + $0xc30] sm:$0xff]  ;;  %v5140_v58 = vcombine.low %v581_v44, %v593_v45 }
 0x122   : > { %4093 = vmatprep.subr.bf16.mxu0 %v5187_v19  ;;  %v665_v19 = vld [vmem:[%s5355_s14 + $0xf90] sm:$0xff] }
 0x123   : > { %4067 = vmatpush2.bf16.msra.mxu1 %v5018_v18  ;;  %v653_v18 = vld [vmem:[%s5355_s14 + $0xf30] sm:$0xff] }
 0x124   : > { %4068 = vmatprep.subr.bf16.mxu1 %v4995_v20  ;;  %v5212_v31 = vcombine.low %v653_v18, %v665_v19  ;;  %v569_v55 = vld [vmem:[%s5355_s14 + $0xc90] sm:$0xff] }
 0x125   : > { %4094 = vmatpush1.bf16.msra.mxu0 %v5186_v25  ;;  %v5116_v46 = vcombine.low %v557_v54, %v569_v55 }
 0x126   : > { %4095 = vmatprep.subr.bf16.mxu0 %v5163_v26  ;;  %v245_v26 = vld [vmem:[%s5355_s14 + $0x270] sm:$0xff] }
 0x127   : > { %4069 = vmatpush2.bf16.msra.mxu1 %v4994_v57  ;;  %v5213_v57 = vcombine.high %v653_v18, %v665_v19  ;;  %v306_v18 = vld [vmem:[%s5355_s14 + $0x458] sm:$0xff] }
 0x128   : > { %4070 = vmatprep.subr.bf16.mxu1 %v4971_v27  ;;  %v257_v27 = vld [vmem:[%s5355_s14 + $0x2d0] sm:$0xff] }
 0x129   : > { %4096 = vmatpush1.bf16.msra.mxu0 %v5162_v32  ;;  %v4805_v32 = vcombine.high %v245_v26, %v257_v27  ;;  %v4804_v38 = vcombine.low %v245_v26, %v257_v27  ;;  %v270_v26 = vld [vmem:[%s5355_s14 + $0x338] sm:$0xff] }
 0x12a   : > { %4097 = vmatprep.subr.bf16.mxu0 %v5139_v34  ;;  %v221_v34 = vld [vmem:[%s5355_s14 + $0x1b0] sm:$0xff] }
 0x12b   : > { %4071 = vmatpush2.bf16.msra.mxu1 %v4970_v33  ;;  %v5189_v33 = vcombine.high %v629_v28, %v641_v29 }
 0x12c   : > { %4072 = vmatprep.subr.bf16.mxu1 %v4947_v35  ;;  %v233_v35 = vld [vmem:[%s5355_s14 + $0x210] sm:$0xff] }
 0x12d   : > { %4098 = vmatpush1.bf16.msra.mxu0 %v5138_v40  ;;  %v4781_v40 = vcombine.high %v221_v34, %v233_v35  ;;  %v4780_v48 = vcombine.low %v221_v34, %v233_v35  ;;  %v449_v34 = vld [vmem:[%s5355_s14 + $0x8d0] sm:$0xff]  ;;  %v246_v35 = vld [vmem:[%s5355_s14 + $0x278] sm:$0xff] }
 0x12e   : > { %4099 = vmatprep.subr.bf16.mxu0 %v5115_v42  ;;  %v197_v42 = vld [vmem:[%s5355_s14 + $0xf0] sm:$0xff] }
 0x12f   : > { %4073 = vmatpush2.bf16.msra.mxu1 %v4946_v41  ;;  %v5165_v41 = vcombine.high %v605_v36, %v617_v37  ;;  %v258_v36 = vld [vmem:[%s5355_s14 + $0x2d8] sm:$0xff] }
 0x130   : > { %4074 = vmatprep.subr.bf16.mxu1 %v4923_v43  ;;  %v209_v43 = vld [vmem:[%s5355_s14 + $0x150] sm:$0xff] }
 0x131   : > { %4100 = vmatpush1.bf16.msra.mxu0 %v5114_v49  ;;  %v4757_v49 = vcombine.high %v197_v42, %v209_v43  ;;  %v4756_v56 = vcombine.low %v197_v42, %v209_v43  ;;  %v425_v42 = vld [vmem:[%s5355_s14 + $0x810] sm:$0xff]  ;;  %v222_v43 = vld [vmem:[%s5355_s14 + $0x1b8] sm:$0xff] }
 0x132   : > { %4126 = vmatprep.subr.bf16.mxu0 %v4901_v52  ;;  %v173_v52 = vld [vmem:[%s5355_s14 + $0x30] sm:$0xff] }
 0x133   : > { %4075 = vmatpush2.bf16.msra.mxu1 %v4922_v51  ;;  %v5141_v51 = vcombine.high %v581_v44, %v593_v45  ;;  %v234_v44 = vld [vmem:[%s5355_s14 + $0x218] sm:$0xff] }
 0x134   : > { %4167 = vmatprep.subr.bf16.mxu1 %v5285_v53  ;;  %v3791_v3 = vpop.f32.mrf.mxu0  ;;  %4118 = vmatmul.mubr.bf16.vlgmr.msra.gmra.mxu0 %v5633_v47  ;;  %v185_v53 = vld [vmem:[%s5355_s14 + $0x90] sm:$0xff] }
 0x135   : > { %4127 = vmatpush1.bf16.msra.mxu0 %v4900_v59  ;;  %4158 = vmatprep.mubr.bf16.mxu0 %v5400_v60  ;;  %v4733_v59 = vcombine.high %v173_v52, %v185_v53 }
 0x136   : > { %v3750_v5 = vpop.f32.mrf.mxu1  ;;  %4077 = vmatmul.mubr.bf16.vlgmr.msra.gmra.mxu1 %v5448_v17  ;;  %v3793_v8 = vpop.f32.mrf.mxu0  ;;  %4128 = vmatprep.subr.bf16.mxu0 %v4877_v62  ;;  %v533_v62 = vld [vmem:[%s5355_s14 + $0xb70] sm:$0xff] }
 0x137   : > { %v3792_v7 = vadd.f32 %v3791_v3, %v3750_v5  ;;  %4168 = vmatpush1.bf16.msra.mxu1 %v5284_v61  ;;  %4199 = vmatprep.mubr.bf16.mxu1 %v5324_v0  ;;  %v5117_v61 = vcombine.high %v557_v54, %v569_v55  ;;  %v4732_v3 = vcombine.low %v173_v52, %v185_v53  ;;  %v401_v52 = vld [vmem:[%s5355_s14 + $0x750] sm:$0xff]  ;;  %v198_v53 = vld [vmem:[%s5355_s14 + $0xf8] sm:$0xff] }
 0x138   : > { %v3752_v10 = vpop.f32.mrf.mxu1  ;;  %4169 = vmatprep.subr.bf16.mxu1 %v5261_v63  ;;  %v3795_v16 = vpop.f32.mrf.mxu0  ;;  %v545_v63 = vld [vmem:[%s5355_s14 + $0xbd0] sm:$0xff]  ;;  %v4903_v5 = vcombine.high %v342_v1, %v354_v2  ;;  %v210_v54 = vld [vmem:[%s5355_s14 + $0x158] sm:$0xff] }
 0x139   : > { %4620 = vst [vmem:[%s5673_s22 + $0x10] sm:$0xff] %v3792_v7  ;;  %v3794_v15 = vadd.f32 %v3793_v8, %v3752_v10  ;;  %4129 = vmatpush1.bf16.msra.mxu0 %v4876_v6  ;;  %v5093_v4 = vcombine.high %v533_v62, %v545_v63  ;;  %v509_v6 = vld [vmem:[%s5355_s14 + $0xab0] sm:$0xff]  ;;  %v318_v8 = vld [vmem:[%s5355_s14 + $0x4b8] sm:$0xff]  ;;  %v4902_v10 = vcombine.low %v342_v1, %v354_v2 }
 0x13a   : > { %v3754_v20 = vpop.f32.mrf.mxu1  ;;  %v3796_v22 = vpop.f32.mrf.mxu0  ;;  %4130 = vmatprep.subr.bf16.mxu0 %v4853_v50  ;;  %v521_v7 = vld [vmem:[%s5355_s14 + $0xb10] sm:$0xff]  ;;  %v5092_v50 = vcombine.low %v533_v62, %v545_v63  ;;  %v294_v16 = vld [vmem:[%s5355_s14 + $0x3f8] sm:$0xff] }
 0x13b   : > { %4621 = vst [vmem:[%s5673_s22 + $0x18] sm:$0xff] %v3794_v15  ;;  %4170 = vmatpush1.bf16.msra.mxu1 %v5260_v9  ;;  %v330_v9 = vld [vmem:[%s5355_s14 + $0x518] sm:$0xff]  ;;  %v497_v15 = vld [vmem:[%s5355_s14 + $0xa50] sm:$0xff]  ;;  %v5068_v20 = vcombine.low %v509_v6, %v521_v7  ;;  %v4854_v29 = vcombine.low %v294_v16, %v306_v18 }
 0x13c   : > { %v3755_v25 = vpop.f32.mrf.mxu1  ;;  %4171 = vmatprep.subr.bf16.mxu1 %v5237_v11  ;;  %v5069_v11 = vcombine.high %v509_v6, %v521_v7  ;;  %v4879_v12 = vcombine.high %v318_v8, %v330_v9  ;;  %v5045_v22 = vcombine.high %v485_v13, %v497_v15  ;;  %v5044_v28 = vcombine.low %v485_v13, %v497_v15  ;;  %v377_v62 = vld [vmem:[%s5355_s14 + $0x690] sm:$0xff]  ;;  %v174_v63 = vld [vmem:[%s5355_s14 + $0x38] sm:$0xff] }
 0x13d   : > { %4131 = vmatpush1.bf16.msra.mxu0 %v4852_v21  ;;  %v4878_v21 = vcombine.low %v318_v8, %v330_v9  ;;  %v461_v25 = vld [vmem:[%s5355_s14 + $0x930] sm:$0xff]  ;;  %v186_v1 = vld [vmem:[%s5355_s14 + $0x98] sm:$0xff] }
 0x13e   : > { %4132 = vmatprep.subr.bf16.mxu0 %v4829_v24  ;;  %v4855_v24 = vcombine.high %v294_v16, %v306_v18  ;;  %v738_v6 = vld [vmem:[%s5355_s14 + $0x11d8] sm:$0xff] }
 0x13f   : > { %4172 = vmatpush1.bf16.msra.mxu1 %v5236_v23  ;;  %v534_v7 = vld [vmem:[%s5355_s14 + $0xb78] sm:$0xff] }
 0x140   : > { %4173 = vmatprep.subr.bf16.mxu1 %v5213_v57  ;;  %v473_v57 = vld [vmem:[%s5355_s14 + $0x990] sm:$0xff]  ;;  %v546_v8 = vld [vmem:[%s5355_s14 + $0xbd8] sm:$0xff] }
 0x141   : > { %4133 = vmatpush1.bf16.msra.mxu0 %v4828_v30  ;;  %v5021_v30 = vcombine.high %v461_v25, %v473_v57  ;;  %v5020_v37 = vcombine.low %v461_v25, %v473_v57  ;;  %v714_v13 = vld [vmem:[%s5355_s14 + $0x1118] sm:$0xff] }
 0x142   : > { %4134 = vmatprep.subr.bf16.mxu0 %v4805_v32  ;;  %v510_v15 = vld [vmem:[%s5355_s14 + $0xab8] sm:$0xff] }
 0x143   : > { %4174 = vmatpush1.bf16.msra.mxu1 %v5212_v31  ;;  %v522_v16 = vld [vmem:[%s5355_s14 + $0xb18] sm:$0xff] }
 0x144   : > { %4175 = vmatprep.subr.bf16.mxu1 %v5189_v33  ;;  %v437_v33 = vld [vmem:[%s5355_s14 + $0x870] sm:$0xff]  ;;  %v690_v25 = vld [vmem:[%s5355_s14 + $0x1058] sm:$0xff] }
 0x145   : > { %4135 = vmatpush1.bf16.msra.mxu0 %v4804_v38  ;;  %v4996_v45 = vcombine.low %v437_v33, %v449_v34 }
 0x146   : > { %4136 = vmatprep.subr.bf16.mxu0 %v4781_v40  ;;  %v4807_v40 = vcombine.high %v246_v35, %v258_v36 }
 0x147   : > { %4176 = vmatpush1.bf16.msra.mxu1 %v5188_v39  ;;  %v4997_v39 = vcombine.high %v437_v33, %v449_v34  ;;  %v654_v34 = vld [vmem:[%s5355_s14 + $0xf38] sm:$0xff] }
 0x148   : > { %4177 = vmatprep.subr.bf16.mxu1 %v5165_v41  ;;  %v413_v41 = vld [vmem:[%s5355_s14 + $0x7b0] sm:$0xff] }
 0x149   : > { %4137 = vmatpush1.bf16.msra.mxu0 %v4780_v48  ;;  %v4806_v48 = vcombine.low %v246_v35, %v258_v36  ;;  %v4972_v55 = vcombine.low %v413_v41, %v425_v42  ;;  %v462_v36 = vld [vmem:[%s5355_s14 + $0x938] sm:$0xff] }
 0x14a   : > { %4138 = vmatprep.subr.bf16.mxu0 %v4757_v49  ;;  %v4783_v49 = vcombine.high %v222_v43, %v234_v44 }
 0x14b   : > { %4178 = vmatpush1.bf16.msra.mxu1 %v5164_v14  ;;  %v4973_v14 = vcombine.high %v413_v41, %v425_v42  ;;  %v630_v42 = vld [vmem:[%s5355_s14 + $0xe78] sm:$0xff] }
 0x14c   : > { %4179 = vmatprep.subr.bf16.mxu1 %v5141_v51  ;;  %v389_v51 = vld [vmem:[%s5355_s14 + $0x6f0] sm:$0xff] }
 0x14d   : > { %4139 = vmatpush1.bf16.msra.mxu0 %v4756_v56  ;;  %v4782_v56 = vcombine.low %v222_v43, %v234_v44  ;;  %v4948_v2 = vcombine.low %v389_v51, %v401_v52  ;;  %v642_v43 = vld [vmem:[%s5355_s14 + $0xed8] sm:$0xff] }
 0x14e   : > { %4140 = vmatprep.subr.bf16.mxu0 %v4733_v59  ;;  %v4759_v59 = vcombine.high %v198_v53, %v210_v54  ;;  %v438_v44 = vld [vmem:[%s5355_s14 + $0x878] sm:$0xff] }
 0x14f   : > { %4180 = vmatpush1.bf16.msra.mxu1 %v5140_v58  ;;  %v4949_v58 = vcombine.high %v389_v51, %v401_v52  ;;  %v606_v52 = vld [vmem:[%s5355_s14 + $0xdb8] sm:$0xff] }
 0x150   : > { %4181 = vmatprep.subr.bf16.mxu1 %v5117_v61  ;;  %v365_v61 = vld [vmem:[%s5355_s14 + $0x630] sm:$0xff] }
 0x151   : > { %4141 = vmatpush1.bf16.msra.mxu0 %v4732_v3  ;;  %v4758_v3 = vcombine.low %v198_v53, %v210_v54  ;;  %v4924_v9 = vcombine.low %v365_v61, %v377_v62  ;;  %v618_v53 = vld [vmem:[%s5355_s14 + $0xe18] sm:$0xff] }
 0x152   : > { %4142 = vmatprep.subr.bf16.mxu0 %v5093_v4  ;;  %v4735_v4 = vcombine.high %v174_v63, %v186_v1  ;;  %v414_v54 = vld [vmem:[%s5355_s14 + $0x7b8] sm:$0xff] }
 0x153   : > { %4182 = vmatpush1.bf16.msra.mxu1 %v5116_v46  ;;  %v4925_v46 = vcombine.high %v365_v61, %v377_v62  ;;  %v582_v62 = vld [vmem:[%s5355_s14 + $0xcf8] sm:$0xff] }
 0x154   : > { %4208 = vmatprep.subr.bf16.mxu1 %v4903_v5  ;;  %v726_v5 = vld [vmem:[%s5355_s14 + $0x1178] sm:$0xff] }
 0x155   : > { %4143 = vmatpush2.bf16.msra.mxu0 %v5092_v50  ;;  %v4734_v50 = vcombine.low %v174_v63, %v186_v1  ;;  %v5286_v18 = vcombine.low %v726_v5, %v738_v6  ;;  %v594_v63 = vld [vmem:[%s5355_s14 + $0xd58] sm:$0xff] }
 0x156   : > { %v5753_v19 = vpop.f32.mrf.mxu1  ;;  %4200 = vmatmul.mubr.bf16.vlgmr.msra.gmra.mxu1 %v5633_v47  ;;  %4144 = vmatprep.subr.bf16.mxu0 %v5069_v11  ;;  %v282_v47 = vld [vmem:[%s5355_s14 + $0x398] sm:$0xff]  ;;  %v5095_v11 = vcombine.high %v534_v7, %v546_v8 }
 0x157   : > { %4209 = vmatpush1.bf16.msra.mxu1 %v4902_v10  ;;  %4240 = vmatprep.mubr.bf16.mxu1 %v5400_v60  ;;  %v4831_v32 = vcombine.high %v270_v26, %v282_v47  ;;  %v4830_v38 = vcombine.low %v270_v26, %v282_v47  ;;  %v5287_v10 = vcombine.high %v726_v5, %v738_v6  ;;  %v486_v26 = vld [vmem:[%s5355_s14 + $0x9f8] sm:$0xff] }
 0x158   : > { %v5756_v23 = vpop.f32.mrf.mxu1  ;;  %4210 = vmatprep.subr.bf16.mxu1 %v4879_v12  ;;  %v702_v12 = vld [vmem:[%s5355_s14 + $0x10b8] sm:$0xff] }
 0x159   : > { %4145 = vmatpush2.bf16.msra.mxu0 %v5068_v20  ;;  %v5094_v20 = vcombine.low %v534_v7, %v546_v8  ;;  %v498_v47 = vld [vmem:[%s5355_s14 + $0xa58] sm:$0xff] }
 0x15a   : > { %v3877_v27 = vpop.f32.mrf.mxu1  ;;  %4146 = vmatprep.subr.bf16.mxu0 %v5045_v22  ;;  %v5071_v22 = vcombine.high %v510_v15, %v522_v16  ;;  %v5047_v33 = vcombine.high %v486_v26, %v498_v47  ;;  %v390_v1 = vld [vmem:[%s5355_s14 + $0x6f8] sm:$0xff] }
 0x15b   : > { %4211 = vmatpush1.bf16.msra.mxu1 %v4878_v21  ;;  %v5263_v21 = vcombine.high %v702_v12, %v714_v13  ;;  %v558_v6 = vld [vmem:[%s5355_s14 + $0xc38] sm:$0xff] }
 0x15c   : > { %v3878_v31 = vpop.f32.mrf.mxu1  ;;  %4212 = vmatprep.subr.bf16.mxu1 %v4855_v24  ;;  %v678_v24 = vld [vmem:[%s5355_s14 + $0xff8] sm:$0xff] }
 0x15d   : > { %4147 = vmatpush2.bf16.msra.mxu0 %v5044_v28  ;;  %v5262_v28 = vcombine.low %v702_v12, %v714_v13  ;;  %v5239_v31 = vcombine.high %v678_v24, %v690_v25  ;;  %v570_v7 = vld [vmem:[%s5355_s14 + $0xc98] sm:$0xff]  ;;  %v343_v13 = vld [vmem:[%s5355_s14 + $0x580] sm:$0xff] }
 0x15e   : > { %4148 = vmatprep.subr.bf16.mxu0 %v5021_v30  ;;  %v5070_v30 = vcombine.low %v510_v15, %v522_v16  ;;  %v366_v8 = vld [vmem:[%s5355_s14 + $0x638] sm:$0xff]  ;;  %v355_v15 = vld [vmem:[%s5355_s14 + $0x5e0] sm:$0xff] }
 0x15f   : > { %4213 = vmatpush1.bf16.msra.mxu1 %v4854_v29  ;;  %v727_v16 = vld [vmem:[%s5355_s14 + $0x1180] sm:$0xff] }
 0x160   : > { %4214 = vmatprep.subr.bf16.mxu1 %v4831_v32 }
 0x161   : > { %4149 = vmatpush2.bf16.msra.mxu0 %v5020_v37  ;;  %v474_v37 = vld [vmem:[%s5355_s14 + $0x998] sm:$0xff] }
 0x162   : > { %4150 = vmatprep.subr.bf16.mxu0 %v4997_v39  ;;  %v5023_v41 = vcombine.high %v462_v36, %v474_v37 }
 0x163   : > { %4215 = vmatpush1.bf16.msra.mxu1 %v4830_v38  ;;  %v5238_v38 = vcombine.low %v678_v24, %v690_v25  ;;  %v319_v25 = vld [vmem:[%s5355_s14 + $0x4c0] sm:$0xff] }
 0x164   : > { %4216 = vmatprep.subr.bf16.mxu1 %v4807_v40  ;;  %v5046_v40 = vcombine.low %v486_v26, %v498_v47  ;;  %v703_v26 = vld [vmem:[%s5355_s14 + $0x10c0] sm:$0xff] }
 0x165   : > { %4151 = vmatpush2.bf16.msra.mxu0 %v4996_v45  ;;  %v450_v45 = vld [vmem:[%s5355_s14 + $0x8d8] sm:$0xff]  ;;  %v715_v47 = vld [vmem:[%s5355_s14 + $0x1120] sm:$0xff] }
 0x166   : > { %4152 = vmatprep.subr.bf16.mxu0 %v4973_v14  ;;  %v5022_v14 = vcombine.low %v462_v36, %v474_v37  ;;  %v4999_v51 = vcombine.high %v438_v44, %v450_v45 }
 0x167   : > { %4217 = vmatpush1.bf16.msra.mxu1 %v4806_v48 }
 0x168   : > { %4218 = vmatprep.subr.bf16.mxu1 %v4783_v49  ;;  %v5191_v49 = vcombine.high %v630_v42, %v642_v43 }
 0x169   : > { %4153 = vmatpush2.bf16.msra.mxu0 %v4972_v55  ;;  %v426_v55 = vld [vmem:[%s5355_s14 + $0x818] sm:$0xff] }
 0x16a   : > { %4154 = vmatprep.subr.bf16.mxu0 %v4949_v58  ;;  %v4998_v58 = vcombine.low %v438_v44, %v450_v45  ;;  %v4975_v61 = vcombine.high %v414_v54, %v426_v55  ;;  %v283_v44 = vld [vmem:[%s5355_s14 + $0x3a0] sm:$0xff] }
 0x16b   : > { %4219 = vmatpush1.bf16.msra.mxu1 %v4782_v56  ;;  %v5190_v56 = vcombine.low %v630_v42, %v642_v43  ;;  %v271_v43 = vld [vmem:[%s5355_s14 + $0x340] sm:$0xff] }
 0x16c   : > { %4220 = vmatprep.subr.bf16.mxu1 %v4759_v59  ;;  %v5167_v59 = vcombine.high %v606_v52, %v618_v53 }
 0x16d   : > { %4155 = vmatpush2.bf16.msra.mxu0 %v4948_v2  ;;  %v402_v2 = vld [vmem:[%s5355_s14 + $0x758] sm:$0xff] }
 0x16e   : > { %4156 = vmatprep.subr.bf16.mxu0 %v4925_v46  ;;  %v4974_v46 = vcombine.low %v414_v54, %v426_v55  ;;  %v4951_v5 = vcombine.high %v390_v1, %v402_v2  ;;  %v4833_v55 = vcombine.high %v271_v43, %v283_v44 }
 0x16f   : > { %4221 = vmatpush1.bf16.msra.mxu1 %v4758_v3  ;;  %v5166_v3 = vcombine.low %v606_v52, %v618_v53 }
 0x170   : > { %4222 = vmatprep.subr.bf16.mxu1 %v4735_v4  ;;  %v5143_v4 = vcombine.high %v582_v62, %v594_v63 }
 0x171   : > { %4157 = vmatpush2.bf16.msra.mxu0 %v4924_v9  ;;  %v378_v9 = vld [vmem:[%s5355_s14 + $0x698] sm:$0xff] }
 0x172   : > { %4249 = vmatprep.subr.bf16.mxu0 %v5287_v10  ;;  %v4950_v10 = vcombine.low %v390_v1, %v402_v2  ;;  %v4927_v12 = vcombine.high %v366_v8, %v378_v9  ;;  %v4832_v1 = vcombine.low %v271_v43, %v283_v44  ;;  %v487_v44 = vld [vmem:[%s5355_s14 + $0xa00] sm:$0xff] }
 0x173   : > { %4223 = vmatpush1.bf16.msra.mxu1 %v4734_v50  ;;  %v5142_v50 = vcombine.low %v582_v62, %v594_v63  ;;  %v631_v62 = vld [vmem:[%s5355_s14 + $0xe80] sm:$0xff] }
 0x174   : > { %4224 = vmatprep.subr.bf16.mxu1 %v5095_v11  ;;  %v3832_v57 = vpop.f32.mrf.mxu0  ;;  %4159 = vmatmul.mubr.bf16.vlgmr.msra.gmra.mxu0 %v5448_v17  ;;  %v5119_v11 = vcombine.high %v558_v6, %v570_v7  ;;  %v643_v63 = vld [vmem:[%s5355_s14 + $0xee0] sm:$0xff] }
 0x175   : > { %v3874_v27 = vadd.f32 %v5753_v19, %v3832_v57  ;;  %4250 = vmatpush1.bf16.msra.mxu0 %v5286_v18  ;;  %4281 = vmatprep.mubr.bf16.mxu0 %v5324_v0  ;;  %v666_v19 = vld [vmem:[%s5355_s14 + $0xf98] sm:$0xff]  ;;  %v739_v18 = vld [vmem:[%s5355_s14 + $0x11e0] sm:$0xff] }
 0x176   : > { %v3834_v29 = vpop.f32.mrf.mxu0  ;;  %4251 = vmatprep.subr.bf16.mxu0 %v5263_v21  ;;  %v5214_v48 = vcombine.low %v654_v34, %v666_v19  ;;  %v4926_v21 = vcombine.low %v366_v8, %v378_v9  ;;  %v5289_v24 = vcombine.high %v727_v16, %v739_v18  ;;  %v331_v57 = vld [vmem:[%s5355_s14 + $0x520] sm:$0xff]  ;;  %v5192_v9 = vcombine.low %v631_v62, %v643_v63 }
 0x177   : > { %4225 = vmatpush2.bf16.msra.mxu1 %v5094_v20  ;;  %4622 = vst [vmem:[%s5673_s22 + $0x20] sm:$0xff] %v3874_v27  ;;  %v3876_v32 = vadd.f32 %v5756_v23, %v3834_v29  ;;  %v5215_v23 = vcombine.high %v654_v34, %v666_v19  ;;  %v5118_v20 = vcombine.low %v558_v6, %v570_v7  ;;  %v5828_v34 = vld [vmem:[%s5379_s18 + $0x8] ss:$0 sps:$4 sm:$0xff]   ;;  %v679_v19 = vld [vmem:[%s5355_s14 + $0x1000] sm:$0xff] }
 0x178   : > { %4226 = vmatprep.subr.bf16.mxu1 %v5071_v22  ;;  %v3836_v35 = vpop.f32.mrf.mxu0  ;;  %v4905_v22 = vcombine.high %v343_v13, %v355_v15  ;;  %v4904_v27 = vcombine.low %v343_v13, %v355_v15  ;;  %v4881_v29 = vcombine.high %v319_v25, %v331_v57  ;;  %v4880_v37 = vcombine.low %v319_v25, %v331_v57  ;;  %v607_v6 = vld [vmem:[%s5355_s14 + $0xdc0] sm:$0xff] }
 0x179   : > { %4623 = vst [vmem:[%s5673_s22 + $0x28] sm:$0xff] %v3876_v32  ;;  %4252 = vmatpush1.bf16.msra.mxu0 %v5262_v28  ;;  %v5288_v28 = vcombine.low %v727_v16, %v739_v18  ;;  %v307_v32 = vld [vmem:[%s5355_s14 + $0x460] sm:$0xff] }
 0x17a   : > { %v3837_v39 = vpop.f32.mrf.mxu0  ;;  %4253 = vmatprep.subr.bf16.mxu0 %v5239_v31  ;;  %v295_v31 = vld [vmem:[%s5355_s14 + $0x400] sm:$0xff] }
 0x17b   : > { %4227 = vmatpush2.bf16.msra.mxu1 %v5070_v30  ;;  %v5265_v30 = vcombine.high %v703_v26, %v715_v47  ;;  %v691_v35 = vld [vmem:[%s5355_s14 + $0x1060] sm:$0xff]  ;;  %v4856_v52 = vcombine.low %v295_v31, %v307_v32 }
 0x17c   : > { %4228 = vmatprep.subr.bf16.mxu1 %v5047_v33  ;;  %v5241_v42 = vcombine.high %v679_v19, %v691_v35  ;;  %v5240_v54 = vcombine.low %v679_v19, %v691_v35  ;;  %v619_v7 = vld [vmem:[%s5355_s14 + $0xe20] sm:$0xff] }
 0x17d   : > { %4254 = vmatpush1.bf16.msra.mxu0 %v5238_v38  ;;  %v583_v13 = vld [vmem:[%s5355_s14 + $0xd00] sm:$0xff]  ;;  %v5168_v18 = vcombine.low %v607_v6, %v619_v7 }
 0x17e   : > { %4255 = vmatprep.subr.bf16.mxu0 %v5215_v23  ;;  %v4857_v23 = vcombine.high %v295_v31, %v307_v32  ;;  %v595_v15 = vld [vmem:[%s5355_s14 + $0xd60] sm:$0xff]  ;;  %v344_v31 = vld [vmem:[%s5355_s14 + $0x588] sm:$0xff] }
 0x17f   : > { %4229 = vmatpush2.bf16.msra.mxu1 %v5046_v40  ;;  %v5264_v40 = vcombine.low %v703_v26, %v715_v47  ;;  %v559_v25 = vld [vmem:[%s5355_s14 + $0xc40] sm:$0xff]  ;;  %v5144_v47 = vcombine.low %v583_v13, %v595_v15  ;;  %v356_v32 = vld [vmem:[%s5355_s14 + $0x5e8] sm:$0xff] }
 0x180   : > { %4230 = vmatprep.subr.bf16.mxu1 %v5023_v41  ;;  %v571_v57 = vld [vmem:[%s5355_s14 + $0xca0] sm:$0xff] }
 0x181   : > { %4256 = vmatpush1.bf16.msra.mxu0 %v5214_v48  ;;  %v5120_v19 = vcombine.low %v559_v25, %v571_v57 }
 0x182   : > { %4257 = vmatprep.subr.bf16.mxu0 %v5191_v49  ;;  %v667_v49 = vld [vmem:[%s5355_s14 + $0xfa0] sm:$0xff] }
 0x183   : > { %4231 = vmatpush2.bf16.msra.mxu1 %v5022_v14  ;;  %v655_v14 = vld [vmem:[%s5355_s14 + $0xf40] sm:$0xff] }
 0x184   : > { %4232 = vmatprep.subr.bf16.mxu1 %v4999_v51  ;;  %v5216_v2 = vcombine.low %v655_v14, %v667_v49 }
 0x185   : > { %4258 = vmatpush1.bf16.msra.mxu0 %v5190_v56 }
 0x186   : > { %4259 = vmatprep.subr.bf16.mxu0 %v5167_v59  ;;  %v247_v59 = vld [vmem:[%s5355_s14 + $0x280] sm:$0xff] }
 0x187   : > { %4233 = vmatpush2.bf16.msra.mxu1 %v4998_v58  ;;  %v5217_v58 = vcombine.high %v655_v14, %v667_v49  ;;  %v308_v14 = vld [vmem:[%s5355_s14 + $0x468] sm:$0xff] }
 0x188   : > { %4234 = vmatprep.subr.bf16.mxu1 %v4975_v61  ;;  %v259_v61 = vld [vmem:[%s5355_s14 + $0x2e0] sm:$0xff] }
 0x189   : > { %4260 = vmatpush1.bf16.msra.mxu0 %v5166_v3  ;;  %v4809_v3 = vcombine.high %v247_v59, %v259_v61  ;;  %v4808_v8 = vcombine.low %v247_v59, %v259_v61  ;;  %v272_v59 = vld [vmem:[%s5355_s14 + $0x348] sm:$0xff] }
 0x18a   : > { %4261 = vmatprep.subr.bf16.mxu0 %v5143_v4  ;;  %v223_v4 = vld [vmem:[%s5355_s14 + $0x1c0] sm:$0xff]  ;;  %v284_v61 = vld [vmem:[%s5355_s14 + $0x3a8] sm:$0xff] }
 0x18b   : > { %4235 = vmatpush2.bf16.msra.mxu1 %v4974_v46  ;;  %v5193_v46 = vcombine.high %v631_v62, %v643_v63 }
 0x18c   : > { %4236 = vmatprep.subr.bf16.mxu1 %v4951_v5  ;;  %v235_v5 = vld [vmem:[%s5355_s14 + $0x220] sm:$0xff] }
 0x18d   : > { %4262 = vmatpush1.bf16.msra.mxu0 %v5142_v50  ;;  %v4785_v50 = vcombine.high %v223_v4, %v235_v5  ;;  %v4784_v16 = vcombine.low %v223_v4, %v235_v5  ;;  %v439_v4 = vld [vmem:[%s5355_s14 + $0x880] sm:$0xff] }
 0x18e   : > { %4263 = vmatprep.subr.bf16.mxu0 %v5119_v11  ;;  %v199_v11 = vld [vmem:[%s5355_s14 + $0x100] sm:$0xff] }
 0x18f   : > { %4237 = vmatpush2.bf16.msra.mxu1 %v4950_v10  ;;  %v5169_v10 = vcombine.high %v607_v6, %v619_v7  ;;  %v451_v5 = vld [vmem:[%s5355_s14 + $0x8e0] sm:$0xff]  ;;  %v248_v6 = vld [vmem:[%s5355_s14 + $0x288] sm:$0xff] }
 0x190   : > { %4238 = vmatprep.subr.bf16.mxu1 %v4927_v12  ;;  %v211_v12 = vld [vmem:[%s5355_s14 + $0x160] sm:$0xff]  ;;  %v260_v7 = vld [vmem:[%s5355_s14 + $0x2e8] sm:$0xff] }
 0x191   : > { %4264 = vmatpush1.bf16.msra.mxu0 %v5118_v20  ;;  %v4761_v20 = vcombine.high %v199_v11, %v211_v12  ;;  %v4760_v26 = vcombine.low %v199_v11, %v211_v12  ;;  %v415_v11 = vld [vmem:[%s5355_s14 + $0x7c0] sm:$0xff] }
 0x192   : > { %4290 = vmatprep.subr.bf16.mxu0 %v4905_v22  ;;  %v175_v22 = vld [vmem:[%s5355_s14 + $0x40] sm:$0xff] }
 0x193   : > { %4239 = vmatpush2.bf16.msra.mxu1 %v4926_v21  ;;  %v5145_v21 = vcombine.high %v583_v13, %v595_v15  ;;  %v427_v12 = vld [vmem:[%s5355_s14 + $0x820] sm:$0xff]  ;;  %v224_v13 = vld [vmem:[%s5355_s14 + $0x1c8] sm:$0xff] }
 0x194   : > { %4331 = vmatprep.subr.bf16.mxu1 %v5289_v24  ;;  %v3955_v33 = vpop.f32.mrf.mxu0  ;;  %4282 = vmatmul.mubr.bf16.vlgmr.msra.gmra.mxu0 %v5828_v34  ;;  %v187_v24 = vld [vmem:[%s5355_s14 + $0xa0] sm:$0xff]  ;;  %v236_v15 = vld [vmem:[%s5355_s14 + $0x228] sm:$0xff] }
 0x195   : > { %4291 = vmatpush1.bf16.msra.mxu0 %v4904_v27  ;;  %4322 = vmatprep.mubr.bf16.mxu0 %v5400_v60  ;;  %v4737_v27 = vcombine.high %v175_v22, %v187_v24 }
 0x196   : > { %v3914_v36 = vpop.f32.mrf.mxu1  ;;  %4241 = vmatmul.mubr.bf16.vlgmr.msra.gmra.mxu1 %v5448_v17  ;;  %v3957_v39 = vpop.f32.mrf.mxu0  ;;  %4292 = vmatprep.subr.bf16.mxu0 %v4881_v29  ;;  %v535_v29 = vld [vmem:[%s5355_s14 + $0xb80] sm:$0xff] }
 0x197   : > { %v3956_v38 = vadd.f32 %v3955_v33, %v3914_v36  ;;  %4332 = vmatpush1.bf16.msra.mxu1 %v5288_v28  ;;  %4363 = vmatprep.mubr.bf16.mxu1 %v5324_v0  ;;  %v5121_v28 = vcombine.high %v559_v25, %v571_v57  ;;  %v4736_v33 = vcombine.low %v175_v22, %v187_v24  ;;  %v391_v22 = vld [vmem:[%s5355_s14 + $0x700] sm:$0xff]  ;;  %v200_v25 = vld [vmem:[%s5355_s14 + $0x108] sm:$0xff] }
 0x198   : > { %v3916_v41 = vpop.f32.mrf.mxu1  ;;  %4333 = vmatprep.subr.bf16.mxu1 %v5265_v30  ;;  %v3959_v48 = vpop.f32.mrf.mxu0  ;;  %v547_v30 = vld [vmem:[%s5355_s14 + $0xbe0] sm:$0xff]  ;;  %v4907_v36 = vcombine.high %v344_v31, %v356_v32  ;;  %v212_v57 = vld [vmem:[%s5355_s14 + $0x168] sm:$0xff] }
 0x199   : > { %4624 = vst [vmem:[%s5673_s22 + $0x30] sm:$0xff] %v3956_v38  ;;  %v3958_v45 = vadd.f32 %v3957_v39, %v3916_v41  ;;  %4293 = vmatpush1.bf16.msra.mxu0 %v4880_v37  ;;  %v5097_v35 = vcombine.high %v535_v29, %v547_v30  ;;  %v511_v37 = vld [vmem:[%s5355_s14 + $0xac0] sm:$0xff]  ;;  %v320_v39 = vld [vmem:[%s5355_s14 + $0x4c8] sm:$0xff]  ;;  %v4906_v41 = vcombine.low %v344_v31, %v356_v32 }
 0x19a   : > { %v3918_v51 = vpop.f32.mrf.mxu1  ;;  %v3960_v53 = vpop.f32.mrf.mxu0  ;;  %4294 = vmatprep.subr.bf16.mxu0 %v4857_v23  ;;  %v523_v38 = vld [vmem:[%s5355_s14 + $0xb20] sm:$0xff]  ;;  %v5096_v23 = vcombine.low %v535_v29, %v547_v30  ;;  %v296_v48 = vld [vmem:[%s5355_s14 + $0x408] sm:$0xff] }
 0x19b   : > { %4625 = vst [vmem:[%s5673_s22 + $0x38] sm:$0xff] %v3958_v45  ;;  %4334 = vmatpush1.bf16.msra.mxu1 %v5264_v40  ;;  %v332_v40 = vld [vmem:[%s5355_s14 + $0x528] sm:$0xff]  ;;  %v499_v45 = vld [vmem:[%s5355_s14 + $0xa60] sm:$0xff]  ;;  %v5072_v51 = vcombine.low %v511_v37, %v523_v38 }
 0x19c   : > { %v3919_v56 = vpop.f32.mrf.mxu1  ;;  %4335 = vmatprep.subr.bf16.mxu1 %v5241_v42  ;;  %v5073_v42 = vcombine.high %v511_v37, %v523_v38  ;;  %v4883_v43 = vcombine.high %v320_v39, %v332_v40  ;;  %v5049_v53 = vcombine.high %v487_v44, %v499_v45  ;;  %v5048_v63 = vcombine.low %v487_v44, %v499_v45  ;;  %v403_v24 = vld [vmem:[%s5355_s14 + $0x760] sm:$0xff]  ;;  %v176_v31 = vld [vmem:[%s5355_s14 + $0x48] sm:$0xff] }
 0x19d   : > { %4295 = vmatpush1.bf16.msra.mxu0 %v4856_v52  ;;  %v4882_v52 = vcombine.low %v320_v39, %v332_v40  ;;  %v463_v56 = vld [vmem:[%s5355_s14 + $0x940] sm:$0xff]  ;;  %v188_v32 = vld [vmem:[%s5355_s14 + $0xa8] sm:$0xff] }
 0x19e   : > { %4296 = vmatprep.subr.bf16.mxu0 %v4833_v55  ;;  %v4859_v55 = vcombine.high %v296_v48, %v308_v14  ;;  %v367_v29 = vld [vmem:[%s5355_s14 + $0x640] sm:$0xff]  ;;  %v728_v37 = vld [vmem:[%s5355_s14 + $0x1188] sm:$0xff] }
 0x19f   : > { %4336 = vmatpush1.bf16.msra.mxu1 %v5240_v54  ;;  %v379_v30 = vld [vmem:[%s5355_s14 + $0x6a0] sm:$0xff]  ;;  %v740_v38 = vld [vmem:[%s5355_s14 + $0x11e8] sm:$0xff] }
 0x1a0   : > { %4337 = vmatprep.subr.bf16.mxu1 %v5217_v58  ;;  %v475_v58 = vld [vmem:[%s5355_s14 + $0x9a0] sm:$0xff]  ;;  %v536_v39 = vld [vmem:[%s5355_s14 + $0xb88] sm:$0xff] }
 0x1a1   : > { %4297 = vmatpush1.bf16.msra.mxu0 %v4832_v1  ;;  %v4858_v1 = vcombine.low %v296_v48, %v308_v14  ;;  %v548_v40 = vld [vmem:[%s5355_s14 + $0xbe8] sm:$0xff] }
 0x1a2   : > { %4298 = vmatprep.subr.bf16.mxu0 %v4809_v3  ;;  %v704_v44 = vld [vmem:[%s5355_s14 + $0x10c8] sm:$0xff] }
 0x1a3   : > { %4338 = vmatpush1.bf16.msra.mxu1 %v5216_v2  ;;  %v5025_v2 = vcombine.high %v463_v56, %v475_v58  ;;  %v716_v45 = vld [vmem:[%s5355_s14 + $0x1128] sm:$0xff] }
 0x1a4   : > { %4339 = vmatprep.subr.bf16.mxu1 %v5193_v46  ;;  %v4835_v46 = vcombine.high %v272_v59, %v284_v61  ;;  %v512_v48 = vld [vmem:[%s5355_s14 + $0xac8] sm:$0xff] }
 0x1a5   : > { %4299 = vmatpush1.bf16.msra.mxu0 %v4808_v8  ;;  %v5024_v8 = vcombine.low %v463_v56, %v475_v58  ;;  %v524_v14 = vld [vmem:[%s5355_s14 + $0xb28] sm:$0xff] }
 0x1a6   : > { %4300 = vmatprep.subr.bf16.mxu0 %v4785_v50  ;;  %v5001_v50 = vcombine.high %v439_v4, %v451_v5  ;;  %v680_v56 = vld [vmem:[%s5355_s14 + $0x1008] sm:$0xff] }
 0x1a7   : > { %4340 = vmatpush1.bf16.msra.mxu1 %v5192_v9  ;;  %v4834_v9 = vcombine.low %v272_v59, %v284_v61  ;;  %v692_v58 = vld [vmem:[%s5355_s14 + $0x1068] sm:$0xff] }
 0x1a8   : > { %4341 = vmatprep.subr.bf16.mxu1 %v5169_v10  ;;  %v4811_v10 = vcombine.high %v248_v6, %v260_v7  ;;  %v488_v61 = vld [vmem:[%s5355_s14 + $0xa08] sm:$0xff] }
 0x1a9   : > { %4301 = vmatpush1.bf16.msra.mxu0 %v4784_v16  ;;  %v5000_v16 = vcombine.low %v439_v4, %v451_v5 }
 0x1aa   : > { %4302 = vmatprep.subr.bf16.mxu0 %v4761_v20  ;;  %v4977_v20 = vcombine.high %v415_v11, %v427_v12 }
 0x1ab   : > { %4342 = vmatpush1.bf16.msra.mxu1 %v5168_v18  ;;  %v4810_v18 = vcombine.low %v248_v6, %v260_v7  ;;  %v656_v6 = vld [vmem:[%s5355_s14 + $0xf48] sm:$0xff] }
 0x1ac   : > { %4343 = vmatprep.subr.bf16.mxu1 %v5145_v21  ;;  %v4787_v21 = vcombine.high %v224_v13, %v236_v15 }
 0x1ad   : > { %4303 = vmatpush1.bf16.msra.mxu0 %v4760_v26  ;;  %v4976_v26 = vcombine.low %v415_v11, %v427_v12 }
 0x1ae   : > { %4304 = vmatprep.subr.bf16.mxu0 %v4737_v27  ;;  %v4953_v27 = vcombine.high %v391_v22, %v403_v24 }
 0x1af   : > { %4344 = vmatpush1.bf16.msra.mxu1 %v5144_v47  ;;  %v4786_v47 = vcombine.low %v224_v13, %v236_v15  ;;  %v632_v13 = vld [vmem:[%s5355_s14 + $0xe88] sm:$0xff] }
 0x1b0   : > { %4345 = vmatprep.subr.bf16.mxu1 %v5121_v28  ;;  %v4763_v28 = vcombine.high %v200_v25, %v212_v57  ;;  %v644_v15 = vld [vmem:[%s5355_s14 + $0xee8] sm:$0xff] }
 0x1b1   : > { %4305 = vmatpush1.bf16.msra.mxu0 %v4736_v33  ;;  %v4952_v33 = vcombine.low %v391_v22, %v403_v24  ;;  %v5195_v22 = vcombine.high %v632_v13, %v644_v15 }
 0x1b2   : > { %4306 = vmatprep.subr.bf16.mxu0 %v5097_v35  ;;  %v4929_v35 = vcombine.high %v367_v29, %v379_v30 }
 0x1b3   : > { %4346 = vmatpush1.bf16.msra.mxu1 %v5120_v19  ;;  %v4762_v19 = vcombine.low %v200_v25, %v212_v57  ;;  %v608_v25 = vld [vmem:[%s5355_s14 + $0xdc8] sm:$0xff] }
 0x1b4   : > { %4372 = vmatprep.subr.bf16.mxu1 %v4907_v36  ;;  %v4739_v36 = vcombine.high %v176_v31, %v188_v32  ;;  %v620_v57 = vld [vmem:[%s5355_s14 + $0xe28] sm:$0xff] }
 0x1b5   : > { %4307 = vmatpush2.bf16.msra.mxu0 %v5096_v23  ;;  %v4928_v23 = vcombine.low %v367_v29, %v379_v30  ;;  %v5171_v29 = vcombine.high %v608_v25, %v620_v57 }
 0x1b6   : > { %v5870_v49 = vpop.f32.mrf.mxu1  ;;  %4364 = vmatmul.mubr.bf16.vlgmr.msra.gmra.mxu1 %v5828_v34  ;;  %4308 = vmatprep.subr.bf16.mxu0 %v5073_v42  ;;  %v5291_v42 = vcombine.high %v728_v37, %v740_v38 }
 0x1b7   : > { %4373 = vmatpush1.bf16.msra.mxu1 %v4906_v41  ;;  %4404 = vmatprep.mubr.bf16.mxu1 %v5400_v60  ;;  %v4738_v41 = vcombine.low %v176_v31, %v188_v32  ;;  %v584_v31 = vld [vmem:[%s5355_s14 + $0xd08] sm:$0xff] }
 0x1b8   : > { %v5873_v54 = vpop.f32.mrf.mxu1  ;;  %4374 = vmatprep.subr.bf16.mxu1 %v4883_v43  ;;  %v5099_v43 = vcombine.high %v536_v39, %v548_v40  ;;  %v596_v32 = vld [vmem:[%s5355_s14 + $0xd68] sm:$0xff] }
 0x1b9   : > { %4309 = vmatpush2.bf16.msra.mxu0 %v5072_v51  ;;  %v5290_v51 = vcombine.low %v728_v37, %v740_v38  ;;  %v5147_v37 = vcombine.high %v584_v31, %v596_v32 }
 0x1ba   : > { %v4041_v62 = vpop.f32.mrf.mxu1  ;;  %4310 = vmatprep.subr.bf16.mxu0 %v5049_v53  ;;  %v5267_v53 = vcombine.high %v704_v44, %v716_v45 }
 0x1bb   : > { %4375 = vmatpush1.bf16.msra.mxu1 %v4882_v52  ;;  %v5098_v52 = vcombine.low %v536_v39, %v548_v40  ;;  %v500_v62 = vld [vmem:[%s5355_s14 + $0xa68] sm:$0xff] }
 0x1bc   : > { %v4042_v3 = vpop.f32.mrf.mxu1  ;;  %4376 = vmatprep.subr.bf16.mxu1 %v4859_v55  ;;  %v5075_v55 = vcombine.high %v512_v48, %v524_v14  ;;  %v5051_v5 = vcombine.high %v488_v61, %v500_v62  ;;  %v5050_v11 = vcombine.low %v488_v61, %v500_v62  ;;  %v560_v39 = vld [vmem:[%s5355_s14 + $0xc48] sm:$0xff]  ;;  %v333_v61 = vld [vmem:[%s5355_s14 + $0x530] sm:$0xff] }
 0x1bd   : > { %4311 = vmatpush2.bf16.msra.mxu0 %v5048_v63  ;;  %v5074_v3 = vcombine.low %v512_v48, %v524_v14  ;;  %v572_v40 = vld [vmem:[%s5355_s14 + $0xca8] sm:$0xff]  ;;  %v345_v48 = vld [vmem:[%s5355_s14 + $0x590] sm:$0xff] }
 0x1be   : > { %4312 = vmatprep.subr.bf16.mxu0 %v5025_v2  ;;  %v357_v14 = vld [vmem:[%s5355_s14 + $0x5f0] sm:$0xff] }
 0x1bf   : > { %4377 = vmatpush1.bf16.msra.mxu1 %v4858_v1  ;;  %v5266_v1 = vcombine.low %v704_v44, %v716_v45  ;;  %v5123_v44 = vcombine.high %v560_v39, %v572_v40  ;;  %v705_v62 = vld [vmem:[%s5355_s14 + $0x10d0] sm:$0xff] }
 0x1c0   : > { %4378 = vmatprep.subr.bf16.mxu1 %v4835_v46  ;;  %v5243_v46 = vcombine.high %v680_v56, %v692_v58 }
 0x1c1   : > { %4313 = vmatpush2.bf16.msra.mxu0 %v5024_v8  ;;  %v464_v8 = vld [vmem:[%s5355_s14 + $0x948] sm:$0xff] }
 0x1c2   : > { %4314 = vmatprep.subr.bf16.mxu0 %v5001_v50  ;;  %v5242_v50 = vcombine.low %v680_v56, %v692_v58  ;;  %v4909_v56 = vcombine.high %v345_v48, %v357_v14 }
 0x1c3   : > { %4379 = vmatpush1.bf16.msra.mxu1 %v4834_v9  ;;  %v476_v9 = vld [vmem:[%s5355_s14 + $0x9a8] sm:$0xff] }
 0x1c4   : > { %4380 = vmatprep.subr.bf16.mxu1 %v4811_v10  ;;  %v5027_v12 = vcombine.high %v464_v8, %v476_v9 }
 0x1c5   : > { %4315 = vmatpush2.bf16.msra.mxu0 %v5000_v16  ;;  %v440_v16 = vld [vmem:[%s5355_s14 + $0x888] sm:$0xff] }
 0x1c6   : > { %4316 = vmatprep.subr.bf16.mxu0 %v4977_v20 }
 0x1c7   : > { %4381 = vmatpush1.bf16.msra.mxu1 %v4810_v18  ;;  %v452_v18 = vld [vmem:[%s5355_s14 + $0x8e8] sm:$0xff] }
 0x1c8   : > { %4382 = vmatprep.subr.bf16.mxu1 %v4787_v21  ;;  %v5026_v21 = vcombine.low %v464_v8, %v476_v9  ;;  %v5003_v24 = vcombine.high %v440_v16, %v452_v18 }
 0x1c9   : > { %4317 = vmatpush2.bf16.msra.mxu0 %v4976_v26  ;;  %v416_v26 = vld [vmem:[%s5355_s14 + $0x7c8] sm:$0xff] }
 0x1ca   : > { %4318 = vmatprep.subr.bf16.mxu0 %v4953_v27  ;;  %v5194_v27 = vcombine.low %v632_v13, %v644_v15  ;;  %v273_v15 = vld [vmem:[%s5355_s14 + $0x350] sm:$0xff] }
 0x1cb   : > { %4383 = vmatpush1.bf16.msra.mxu1 %v4786_v47  ;;  %v428_v47 = vld [vmem:[%s5355_s14 + $0x828] sm:$0xff] }
 0x1cc   : > { %4384 = vmatprep.subr.bf16.mxu1 %v4763_v28  ;;  %v5002_v28 = vcombine.low %v440_v16, %v452_v18  ;;  %v4979_v30 = vcombine.high %v416_v26, %v428_v47  ;;  %v285_v16 = vld [vmem:[%s5355_s14 + $0x3b0] sm:$0xff] }
 0x1cd   : > { %4319 = vmatpush2.bf16.msra.mxu0 %v4952_v33  ;;  %v392_v33 = vld [vmem:[%s5355_s14 + $0x708] sm:$0xff] }
 0x1ce   : > { %4320 = vmatprep.subr.bf16.mxu0 %v4929_v35  ;;  %v5170_v35 = vcombine.low %v608_v25, %v620_v57 }
 0x1cf   : > { %4385 = vmatpush1.bf16.msra.mxu1 %v4762_v19  ;;  %v404_v19 = vld [vmem:[%s5355_s14 + $0x768] sm:$0xff] }
 0x1d0   : > { %4386 = vmatprep.subr.bf16.mxu1 %v4739_v36  ;;  %v4978_v36 = vcombine.low %v416_v26, %v428_v47  ;;  %v4955_v38 = vcombine.high %v392_v33, %v404_v19  ;;  %v4837_v47 = vcombine.high %v273_v15, %v285_v16 }
 0x1d1   : > { %4321 = vmatpush2.bf16.msra.mxu0 %v4928_v23  ;;  %v368_v23 = vld [vmem:[%s5355_s14 + $0x648] sm:$0xff] }
 0x1d2   : > { %4413 = vmatprep.subr.bf16.mxu0 %v5291_v42  ;;  %v5146_v42 = vcombine.low %v584_v31, %v596_v32  ;;  %v633_v31 = vld [vmem:[%s5355_s14 + $0xe90] sm:$0xff] }
 0x1d3   : > { %4387 = vmatpush1.bf16.msra.mxu1 %v4738_v41  ;;  %v380_v41 = vld [vmem:[%s5355_s14 + $0x6a8] sm:$0xff]  ;;  %v645_v32 = vld [vmem:[%s5355_s14 + $0xef0] sm:$0xff] }
 0x1d4   : > { %4388 = vmatprep.subr.bf16.mxu1 %v5099_v43  ;;  %v3996_v59 = vpop.f32.mrf.mxu0  ;;  %4323 = vmatmul.mubr.bf16.vlgmr.msra.gmra.mxu0 %v5448_v17  ;;  %v4954_v43 = vcombine.low %v392_v33, %v404_v19  ;;  %v4931_v45 = vcombine.high %v368_v23, %v380_v41  ;;  %v4836_v33 = vcombine.low %v273_v15, %v285_v16  ;;  %v489_v16 = vld [vmem:[%s5355_s14 + $0xa10] sm:$0xff] }
 0x1d5   : > { %v4038_v63 = vadd.f32 %v5870_v49, %v3996_v59  ;;  %4414 = vmatpush1.bf16.msra.mxu0 %v5290_v51  ;;  %4445 = vmatprep.mubr.bf16.mxu0 %v5324_v0  ;;  %v668_v49 = vld [vmem:[%s5355_s14 + $0xfa8] sm:$0xff]  ;;  %v729_v51 = vld [vmem:[%s5355_s14 + $0x1190] sm:$0xff] }
 0x1d6   : > { %v3998_v2 = vpop.f32.mrf.mxu0  ;;  %4415 = vmatprep.subr.bf16.mxu0 %v5267_v53  ;;  %v5218_v20 = vcombine.low %v656_v6, %v668_v49  ;;  %v5122_v53 = vcombine.low %v560_v39, %v572_v40  ;;  %v321_v59 = vld [vmem:[%s5355_s14 + $0x4d0] sm:$0xff] }
 0x1d7   : > { %4389 = vmatpush2.bf16.msra.mxu1 %v5098_v52  ;;  %4626 = vst [vmem:[%s5673_s22 + $0x40] sm:$0xff] %v4038_v63  ;;  %v4040_v4 = vadd.f32 %v5873_v54, %v3998_v2  ;;  %v5219_v54 = vcombine.high %v656_v6, %v668_v49  ;;  %v741_v52 = vld [vmem:[%s5355_s14 + $0x11f0] sm:$0xff]  ;;  %v4884_v9 = vcombine.low %v321_v59, %v333_v61 }
 0x1d8   : > { %4390 = vmatprep.subr.bf16.mxu1 %v5075_v55  ;;  %v4000_v7 = vpop.f32.mrf.mxu0  ;;  %v4930_v55 = vcombine.low %v368_v23, %v380_v41  ;;  %v5293_v58 = vcombine.high %v729_v51, %v741_v52  ;;  %v717_v63 = vld [vmem:[%s5355_s14 + $0x1130] sm:$0xff]  ;;  %v5292_v2 = vcombine.low %v729_v51, %v741_v52  ;;  %v5196_v41 = vcombine.low %v633_v31, %v645_v32 }
 0x1d9   : > { %4627 = vst [vmem:[%s5673_s22 + $0x48] sm:$0xff] %v4040_v4  ;;  %4416 = vmatpush1.bf16.msra.mxu0 %v5266_v1  ;;  %v4908_v1 = vcombine.low %v345_v48, %v357_v14  ;;  %v297_v4 = vld [vmem:[%s5355_s14 + $0x410] sm:$0xff] }
 0x1da   : > { %v4001_v10 = vpop.f32.mrf.mxu0  ;;  %4417 = vmatprep.subr.bf16.mxu0 %v5243_v46  ;;  %v5269_v46 = vcombine.high %v705_v62, %v717_v63  ;;  %v681_v49 = vld [vmem:[%s5355_s14 + $0x1010] sm:$0xff] }
 0x1db   : > { %4391 = vmatpush2.bf16.msra.mxu1 %v5074_v3  ;;  %v4885_v3 = vcombine.high %v321_v59, %v333_v61  ;;  %v693_v7 = vld [vmem:[%s5355_s14 + $0x1070] sm:$0xff] }
 0x1dc   : > { %4392 = vmatprep.subr.bf16.mxu1 %v5051_v5  ;;  %v309_v5 = vld [vmem:[%s5355_s14 + $0x470] sm:$0xff]  ;;  %v5245_v13 = vcombine.high %v681_v49, %v693_v7  ;;  %v5244_v26 = vcombine.low %v681_v49, %v693_v7 }
 0x1dd   : > { %4418 = vmatpush1.bf16.msra.mxu0 %v5242_v50  ;;  %v4860_v25 = vcombine.low %v297_v4, %v309_v5  ;;  %v609_v39 = vld [vmem:[%s5355_s14 + $0xdd0] sm:$0xff] }
 0x1de   : > { %4419 = vmatprep.subr.bf16.mxu0 %v5219_v54  ;;  %v4861_v54 = vcombine.high %v297_v4, %v309_v5  ;;  %v621_v40 = vld [vmem:[%s5355_s14 + $0xe30] sm:$0xff]  ;;  %v346_v4 = vld [vmem:[%s5355_s14 + $0x598] sm:$0xff] }
 0x1df   : > { %4393 = vmatpush2.bf16.msra.mxu1 %v5050_v11  ;;  %v5268_v11 = vcombine.low %v705_v62, %v717_v63  ;;  %v585_v48 = vld [vmem:[%s5355_s14 + $0xd10] sm:$0xff]  ;;  %v5172_v52 = vcombine.low %v609_v39, %v621_v40  ;;  %v358_v5 = vld [vmem:[%s5355_s14 + $0x5f8] sm:$0xff] }
 0x1e0   : > { %4394 = vmatprep.subr.bf16.mxu1 %v5027_v12  ;;  %v597_v14 = vld [vmem:[%s5355_s14 + $0xd70] sm:$0xff] }
 0x1e1   : > { %4420 = vmatpush1.bf16.msra.mxu0 %v5218_v20  ;;  %v561_v59 = vld [vmem:[%s5355_s14 + $0xc50] sm:$0xff]  ;;  %v5148_v63 = vcombine.low %v585_v48, %v597_v14 }
 0x1e2   : > { %4421 = vmatprep.subr.bf16.mxu0 %v5195_v22  ;;  %v669_v22 = vld [vmem:[%s5355_s14 + $0xfb0] sm:$0xff] }
 0x1e3   : > { %4395 = vmatpush2.bf16.msra.mxu1 %v5026_v21  ;;  %v657_v21 = vld [vmem:[%s5355_s14 + $0xf50] sm:$0xff] }
 0x1e4   : > { %4396 = vmatprep.subr.bf16.mxu1 %v5003_v24  ;;  %v5220_v19 = vcombine.low %v657_v21, %v669_v22  ;;  %v573_v61 = vld [vmem:[%s5355_s14 + $0xcb0] sm:$0xff] }
 0x1e5   : > { %4422 = vmatpush1.bf16.msra.mxu0 %v5194_v27  ;;  %v5124_v49 = vcombine.low %v561_v59, %v573_v61 }
 0x1e6   : > { %4423 = vmatprep.subr.bf16.mxu0 %v5171_v29  ;;  %v249_v29 = vld [vmem:[%s5355_s14 + $0x290] sm:$0xff] }
 0x1e7   : > { %4397 = vmatpush2.bf16.msra.mxu1 %v5002_v28  ;;  %v5221_v28 = vcombine.high %v657_v21, %v669_v22  ;;  %v310_v21 = vld [vmem:[%s5355_s14 + $0x478] sm:$0xff] }
 0x1e8   : > { %4398 = vmatprep.subr.bf16.mxu1 %v4979_v30  ;;  %v261_v30 = vld [vmem:[%s5355_s14 + $0x2f0] sm:$0xff] }
 0x1e9   : > { %4424 = vmatpush1.bf16.msra.mxu0 %v5170_v35  ;;  %v4813_v35 = vcombine.high %v249_v29, %v261_v30  ;;  %v4812_v23 = vcombine.low %v249_v29, %v261_v30  ;;  %v274_v29 = vld [vmem:[%s5355_s14 + $0x358] sm:$0xff] }
 0x1ea   : > { %4425 = vmatprep.subr.bf16.mxu0 %v5147_v37  ;;  %v225_v37 = vld [vmem:[%s5355_s14 + $0x1d0] sm:$0xff] }
 0x1eb   : > { %4399 = vmatpush2.bf16.msra.mxu1 %v4978_v36  ;;  %v5197_v36 = vcombine.high %v633_v31, %v645_v32 }
 0x1ec   : > { %4400 = vmatprep.subr.bf16.mxu1 %v4955_v38  ;;  %v237_v38 = vld [vmem:[%s5355_s14 + $0x230] sm:$0xff] }
 0x1ed   : > { %4426 = vmatpush1.bf16.msra.mxu0 %v5146_v42  ;;  %v4789_v42 = vcombine.high %v225_v37, %v237_v38  ;;  %v4788_v51 = vcombine.low %v225_v37, %v237_v38  ;;  %v453_v37 = vld [vmem:[%s5355_s14 + $0x8f0] sm:$0xff]  ;;  %v262_v38 = vld [vmem:[%s5355_s14 + $0x2f8] sm:$0xff] }
 0x1ee   : > { %4427 = vmatprep.subr.bf16.mxu0 %v5123_v44  ;;  %v201_v44 = vld [vmem:[%s5355_s14 + $0x110] sm:$0xff] }
 0x1ef   : > { %4401 = vmatpush2.bf16.msra.mxu1 %v4954_v43  ;;  %v5173_v43 = vcombine.high %v609_v39, %v621_v40 }
 0x1f0   : > { %4402 = vmatprep.subr.bf16.mxu1 %v4931_v45  ;;  %v213_v45 = vld [vmem:[%s5355_s14 + $0x170] sm:$0xff] }
 0x1f1   : > { %4428 = vmatpush1.bf16.msra.mxu0 %v5122_v53  ;;  %v4765_v53 = vcombine.high %v201_v44, %v213_v45  ;;  %v4764_v62 = vcombine.low %v201_v44, %v213_v45  ;;  %v226_v44 = vld [vmem:[%s5355_s14 + $0x1d8] sm:$0xff] }
 0x1f2   : > { %4454 = vmatprep.subr.bf16.mxu0 %v4909_v56  ;;  %v177_v56 = vld [vmem:[%s5355_s14 + $0x50] sm:$0xff]  ;;  %v238_v45 = vld [vmem:[%s5355_s14 + $0x238] sm:$0xff] }
 0x1f3   : > { %4403 = vmatpush2.bf16.msra.mxu1 %v4930_v55  ;;  %v5149_v55 = vcombine.high %v585_v48, %v597_v14 }
 0x1f4   : > { %4495 = vmatprep.subr.bf16.mxu1 %v5293_v58  ;;  %v4119_v6 = vpop.f32.mrf.mxu0  ;;  %4446 = vmatmul.mubr.bf16.vlgmr.msra.gmra.mxu0 %v5828_v34  ;;  %v189_v58 = vld [vmem:[%s5355_s14 + $0xb0] sm:$0xff] }
 0x1f5   : > { %4455 = vmatpush1.bf16.msra.mxu0 %v4908_v1  ;;  %4486 = vmatprep.mubr.bf16.mxu0 %v5400_v60  ;;  %v4741_v1 = vcombine.high %v177_v56, %v189_v58 }
 0x1f6   : > { %v4078_v8 = vpop.f32.mrf.mxu1  ;;  %4405 = vmatmul.mubr.bf16.vlgmr.msra.gmra.mxu1 %v5448_v17  ;;  %v4121_v10 = vpop.f32.mrf.mxu0  ;;  %4456 = vmatprep.subr.bf16.mxu0 %v4885_v3  ;;  %v537_v3 = vld [vmem:[%s5355_s14 + $0xb90] sm:$0xff] }
 0x1f7   : > { %v4120_v50 = vadd.f32 %v4119_v6, %v4078_v8  ;;  %4496 = vmatpush1.bf16.msra.mxu1 %v5292_v2  ;;  %4527 = vmatprep.mubr.bf16.mxu1 %v5324_v0  ;;  %v5125_v2 = vcombine.high %v561_v59, %v573_v61  ;;  %v4740_v6 = vcombine.low %v177_v56, %v189_v58  ;;  %v202_v56 = vld [vmem:[%s5355_s14 + $0x118] sm:$0xff] }
 0x1f8   : > { %v4080_v12 = vpop.f32.mrf.mxu1  ;;  %4497 = vmatprep.subr.bf16.mxu1 %v5269_v46  ;;  %v4123_v20 = vpop.f32.mrf.mxu0  ;;  %v549_v46 = vld [vmem:[%s5355_s14 + $0xbf0] sm:$0xff]  ;;  %v4911_v8 = vcombine.high %v346_v4, %v358_v5  ;;  %v214_v58 = vld [vmem:[%s5355_s14 + $0x178] sm:$0xff]  ;;  %v4790_v61 = vcombine.low %v226_v44, %v238_v45 }
 0x1f9   : > { %4628 = vst [vmem:[%s5673_s22 + $0x50] sm:$0xff] %v4120_v50  ;;  %v4122_v18 = vadd.f32 %v4121_v10, %v4080_v12  ;;  %4457 = vmatpush1.bf16.msra.mxu0 %v4884_v9  ;;  %v5101_v7 = vcombine.high %v537_v3, %v549_v46  ;;  %v513_v9 = vld [vmem:[%s5355_s14 + $0xad0] sm:$0xff]  ;;  %v322_v10 = vld [vmem:[%s5355_s14 + $0x4d8] sm:$0xff]  ;;  %v4910_v12 = vcombine.low %v346_v4, %v358_v5 }
 0x1fa   : > { %v4082_v24 = vpop.f32.mrf.mxu1  ;;  %v4124_v57 = vpop.f32.mrf.mxu0  ;;  %4458 = vmatprep.subr.bf16.mxu0 %v4861_v54  ;;  %v525_v50 = vld [vmem:[%s5355_s14 + $0xb30] sm:$0xff]  ;;  %v5100_v54 = vcombine.low %v537_v3, %v549_v46  ;;  %v298_v20 = vld [vmem:[%s5355_s14 + $0x418] sm:$0xff]  ;;  %v4766_v5 = vcombine.low %v202_v56, %v214_v58 }
 0x1fb   : > { %4629 = vst [vmem:[%s5673_s22 + $0x58] sm:$0xff] %v4122_v18  ;;  %4498 = vmatpush1.bf16.msra.mxu1 %v5268_v11  ;;  %v334_v11 = vld [vmem:[%s5355_s14 + $0x538] sm:$0xff]  ;;  %v501_v18 = vld [vmem:[%s5355_s14 + $0xa70] sm:$0xff]  ;;  %v5076_v24 = vcombine.low %v513_v9, %v525_v50  ;;  %v4862_v32 = vcombine.low %v298_v20, %v310_v21 }
 0x1fc   : > { %v4083_v27 = vpop.f32.mrf.mxu1  ;;  %4499 = vmatprep.subr.bf16.mxu1 %v5245_v13  ;;  %v5077_v13 = vcombine.high %v513_v9, %v525_v50  ;;  %v4887_v15 = vcombine.high %v322_v10, %v334_v11  ;;  %v5053_v57 = vcombine.high %v489_v16, %v501_v18  ;;  %v5052_v31 = vcombine.low %v489_v16, %v501_v18  ;;  %v178_v3 = vld [vmem:[%s5355_s14 + $0x58] sm:$0xff] }
 0x1fd   : > { %4459 = vmatpush1.bf16.msra.mxu0 %v4860_v25  ;;  %v4886_v25 = vcombine.low %v322_v10, %v334_v11  ;;  %v465_v27 = vld [vmem:[%s5355_s14 + $0x950] sm:$0xff]  ;;  %v190_v46 = vld [vmem:[%s5355_s14 + $0xb8] sm:$0xff] }
 0x1fe   : > { %4460 = vmatprep.subr.bf16.mxu0 %v4837_v47  ;;  %v4863_v47 = vcombine.high %v298_v20, %v310_v21  ;;  %v538_v9 = vld [vmem:[%s5355_s14 + $0xb98] sm:$0xff]  ;;  %v4742_v11 = vcombine.low %v178_v3, %v190_v46 }
 0x1ff   : > { %4500 = vmatpush1.bf16.msra.mxu1 %v5244_v26  ;;  %v550_v50 = vld [vmem:[%s5355_s14 + $0xbf8] sm:$0xff] }
 0x200   : > { %4501 = vmatprep.subr.bf16.mxu1 %v5221_v28  ;;  %v477_v28 = vld [vmem:[%s5355_s14 + $0x9b0] sm:$0xff]  ;;  %v514_v16 = vld [vmem:[%s5355_s14 + $0xad8] sm:$0xff]  ;;  %v5102_v21 = vcombine.low %v538_v9, %v550_v50 }
 0x201   : > { %4461 = vmatpush1.bf16.msra.mxu0 %v4836_v33  ;;  %v5029_v33 = vcombine.high %v465_v27, %v477_v28  ;;  %v5028_v39 = vcombine.low %v465_v27, %v477_v28  ;;  %v526_v18 = vld [vmem:[%s5355_s14 + $0xb38] sm:$0xff] }
 0x202   : > { %4462 = vmatprep.subr.bf16.mxu0 %v4813_v35  ;;  %v490_v28 = vld [vmem:[%s5355_s14 + $0xa18] sm:$0xff] }
 0x203   : > { %4502 = vmatpush1.bf16.msra.mxu1 %v5220_v19 }
 0x204   : > { %4503 = vmatprep.subr.bf16.mxu1 %v5197_v36  ;;  %v441_v36 = vld [vmem:[%s5355_s14 + $0x890] sm:$0xff] }
 0x205   : > { %4463 = vmatpush1.bf16.msra.mxu0 %v4812_v23  ;;  %v5005_v23 = vcombine.high %v441_v36, %v453_v37  ;;  %v5004_v48 = vcombine.low %v441_v36, %v453_v37  ;;  %v658_v36 = vld [vmem:[%s5355_s14 + $0xf58] sm:$0xff] }
 0x206   : > { %4464 = vmatprep.subr.bf16.mxu0 %v4789_v42  ;;  %v417_v42 = vld [vmem:[%s5355_s14 + $0x7d0] sm:$0xff] }
 0x207   : > { %4504 = vmatpush1.bf16.msra.mxu1 %v5196_v41 }
 0x208   : > { %4505 = vmatprep.subr.bf16.mxu1 %v5173_v43  ;;  %v429_v43 = vld [vmem:[%s5355_s14 + $0x830] sm:$0xff] }
 0x209   : > { %4465 = vmatpush1.bf16.msra.mxu0 %v4788_v51  ;;  %v4981_v51 = vcombine.high %v417_v42, %v429_v43  ;;  %v4980_v59 = vcombine.low %v417_v42, %v429_v43  ;;  %v646_v42 = vld [vmem:[%s5355_s14 + $0xef8] sm:$0xff] }
 0x20a   : > { %4466 = vmatprep.subr.bf16.mxu0 %v4765_v53  ;;  %v393_v53 = vld [vmem:[%s5355_s14 + $0x710] sm:$0xff]  ;;  %v442_v43 = vld [vmem:[%s5355_s14 + $0x898] sm:$0xff] }
 0x20b   : > { %4506 = vmatpush1.bf16.msra.mxu1 %v5172_v52  ;;  %v4791_v52 = vcombine.high %v226_v44, %v238_v45  ;;  %v454_v44 = vld [vmem:[%s5355_s14 + $0x8f8] sm:$0xff] }
 0x20c   : > { %4507 = vmatprep.subr.bf16.mxu1 %v5149_v55  ;;  %v405_v55 = vld [vmem:[%s5355_s14 + $0x770] sm:$0xff] }
 0x20d   : > { %4467 = vmatpush1.bf16.msra.mxu0 %v4764_v62  ;;  %v4957_v62 = vcombine.high %v393_v53, %v405_v55  ;;  %v4956_v4 = vcombine.low %v393_v53, %v405_v55  ;;  %v622_v53 = vld [vmem:[%s5355_s14 + $0xe38] sm:$0xff] }
 0x20e   : > { %4468 = vmatprep.subr.bf16.mxu0 %v4741_v1  ;;  %v369_v1 = vld [vmem:[%s5355_s14 + $0x650] sm:$0xff]  ;;  %v418_v55 = vld [vmem:[%s5355_s14 + $0x7d8] sm:$0xff] }
 0x20f   : > { %4508 = vmatpush1.bf16.msra.mxu1 %v5148_v63  ;;  %v4767_v63 = vcombine.high %v202_v56, %v214_v58  ;;  %v430_v56 = vld [vmem:[%s5355_s14 + $0x838] sm:$0xff] }
 0x210   : > { %4509 = vmatprep.subr.bf16.mxu1 %v5125_v2  ;;  %v381_v2 = vld [vmem:[%s5355_s14 + $0x6b0] sm:$0xff] }
 0x211   : > { %4469 = vmatpush1.bf16.msra.mxu0 %v4740_v6  ;;  %v4933_v6 = vcombine.high %v369_v1, %v381_v2  ;;  %v4932_v10 = vcombine.low %v369_v1, %v381_v2  ;;  %v598_v1 = vld [vmem:[%s5355_s14 + $0xd78] sm:$0xff] }
 0x212   : > { %4470 = vmatprep.subr.bf16.mxu0 %v5101_v7  ;;  %v730_v7 = vld [vmem:[%s5355_s14 + $0x1198] sm:$0xff] }
 0x213   : > { %4510 = vmatpush1.bf16.msra.mxu1 %v5124_v49  ;;  %v4743_v49 = vcombine.high %v178_v3, %v190_v46  ;;  %v394_v2 = vld [vmem:[%s5355_s14 + $0x718] sm:$0xff] }
 0x214   : > { %4536 = vmatprep.subr.bf16.mxu1 %v4911_v8  ;;  %v742_v8 = vld [vmem:[%s5355_s14 + $0x11f8] sm:$0xff] }
 0x215   : > { %4471 = vmatpush2.bf16.msra.mxu0 %v5100_v54  ;;  %v5295_v54 = vcombine.high %v730_v7, %v742_v8  ;;  %v5294_v20 = vcombine.low %v730_v7, %v742_v8  ;;  %v406_v3 = vld [vmem:[%s5355_s14 + $0x778] sm:$0xff] }
 0x216   : > { %v5984_v22 = vpop.f32.mrf.mxu1  ;;  %4528 = vmatmul.mubr.bf16.vlgmr.msra.gmra.mxu1 %v5828_v34  ;;  %4472 = vmatprep.subr.bf16.mxu0 %v5077_v13  ;;  %v286_v34 = vld [vmem:[%s5355_s14 + $0x3b8] sm:$0xff] }
 0x217   : > { %4537 = vmatpush1.bf16.msra.mxu1 %v4910_v12  ;;  %4568 = vmatprep.mubr.bf16.mxu1 %v5400_v60  ;;  %v4839_v35 = vcombine.high %v274_v29, %v286_v34  ;;  %v250_v60 = vld [vmem:[%s5355_s14 + $0x298] sm:$0xff]  ;;  %v4838_v40 = vcombine.low %v274_v29, %v286_v34  ;;  %v5103_v12 = vcombine.high %v538_v9, %v550_v50 }
 0x218   : > { %v5987_v26 = vpop.f32.mrf.mxu1  ;;  %4538 = vmatprep.subr.bf16.mxu1 %v4887_v15  ;;  %v4815_v41 = vcombine.high %v250_v60, %v262_v38  ;;  %v4814_v14 = vcombine.low %v250_v60, %v262_v38  ;;  %v706_v13 = vld [vmem:[%s5355_s14 + $0x10d8] sm:$0xff] }
 0x219   : > { %4473 = vmatpush2.bf16.msra.mxu0 %v5076_v24  ;;  %v718_v15 = vld [vmem:[%s5355_s14 + $0x1138] sm:$0xff] }
 0x21a   : > { %v4205_v30 = vpop.f32.mrf.mxu1  ;;  %4474 = vmatprep.subr.bf16.mxu0 %v5053_v57  ;;  %v5271_v24 = vcombine.high %v706_v13, %v718_v15  ;;  %v682_v57 = vld [vmem:[%s5355_s14 + $0x1018] sm:$0xff] }
 0x21b   : > { %4539 = vmatpush1.bf16.msra.mxu1 %v4886_v25  ;;  %v5079_v25 = vcombine.high %v514_v16, %v526_v18  ;;  %v502_v29 = vld [vmem:[%s5355_s14 + $0xa78] sm:$0xff]  ;;  %v5270_v30 = vcombine.low %v706_v13, %v718_v15 }
 0x21c   : > { %v4206_v19 = vpop.f32.mrf.mxu1  ;;  %4540 = vmatprep.subr.bf16.mxu1 %v4863_v47  ;;  %v694_v47 = vld [vmem:[%s5355_s14 + $0x1078] sm:$0xff] }
 0x21d   : > { %4475 = vmatpush2.bf16.msra.mxu0 %v5052_v31  ;;  %v466_v60 = vld [vmem:[%s5355_s14 + $0x958] sm:$0xff] }
 0x21e   : > { %4476 = vmatprep.subr.bf16.mxu0 %v5029_v33  ;;  %v5247_v33 = vcombine.high %v682_v57, %v694_v47  ;;  %v478_v38 = vld [vmem:[%s5355_s14 + $0x9b8] sm:$0xff] }
 0x21f   : > { %4541 = vmatpush1.bf16.msra.mxu1 %v4862_v32  ;;  %v5078_v32 = vcombine.low %v514_v16, %v526_v18  ;;  %v574_v7 = vld [vmem:[%s5355_s14 + $0xcb8] sm:$0xff]  ;;  %v5315_v16 = vld [vmem:[%s5379_s18 + $0x8] ss:$0 sps:$4 sm:$0xff]  }
 0x220   : > { %4542 = vmatprep.subr.bf16.mxu1 %v4839_v35  ;;  %v5055_v35 = vcombine.high %v490_v28, %v502_v29  ;;  %v370_v8 = vld [vmem:[%s5355_s14 + $0x658] sm:$0xff] }
 0x221   : > { %4477 = vmatpush2.bf16.msra.mxu0 %v5028_v39  ;;  %v382_v9 = vld [vmem:[%s5355_s14 + $0x6b8] sm:$0xff] }
 0x222   : > { %4478 = vmatprep.subr.bf16.mxu0 %v5005_v23  ;;  %v5031_v23 = vcombine.high %v466_v60, %v478_v38  ;;  %v4934_v13 = vcombine.low %v370_v8, %v382_v9 }
 0x223   : > { %4543 = vmatpush1.bf16.msra.mxu1 %v4838_v40  ;;  %v5054_v40 = vcombine.low %v490_v28, %v502_v29 }
 0x224   : > { %4544 = vmatprep.subr.bf16.mxu1 %v4815_v41  ;;  %v634_v41 = vld [vmem:[%s5355_s14 + $0xe98] sm:$0xff] }
 0x225   : > { %4479 = vmatpush2.bf16.msra.mxu0 %v5004_v48  ;;  %v5030_v48 = vcombine.low %v466_v60, %v478_v38  ;;  %v5198_v58 = vcombine.low %v634_v41, %v646_v42 }
 0x226   : > { %4480 = vmatprep.subr.bf16.mxu0 %v4981_v51  ;;  %v5007_v51 = vcombine.high %v442_v43, %v454_v44 }
 0x227   : > { %4545 = vmatpush1.bf16.msra.mxu1 %v4814_v14  ;;  %v5199_v14 = vcombine.high %v634_v41, %v646_v42 }
 0x228   : > { %4546 = vmatprep.subr.bf16.mxu1 %v4791_v52  ;;  %v610_v52 = vld [vmem:[%s5355_s14 + $0xdd8] sm:$0xff] }
 0x229   : > { %4481 = vmatpush2.bf16.msra.mxu0 %v4980_v59  ;;  %v5006_v59 = vcombine.low %v442_v43, %v454_v44  ;;  %v5174_v46 = vcombine.low %v610_v52, %v622_v53 }
 0x22a   : > { %4482 = vmatprep.subr.bf16.mxu0 %v4957_v62  ;;  %v4983_v62 = vcombine.high %v418_v55, %v430_v56 }
 0x22b   : > { %4547 = vmatpush1.bf16.msra.mxu1 %v4790_v61  ;;  %v5175_v61 = vcombine.high %v610_v52, %v622_v53 }
 0x22c   : > { %4548 = vmatprep.subr.bf16.mxu1 %v4767_v63  ;;  %v586_v63 = vld [vmem:[%s5355_s14 + $0xd18] sm:$0xff] }
 0x22d   : > { %4483 = vmatpush2.bf16.msra.mxu0 %v4956_v4  ;;  %v4982_v4 = vcombine.low %v418_v55, %v430_v56  ;;  %v5150_v50 = vcombine.low %v586_v63, %v598_v1 }
 0x22e   : > { %4484 = vmatprep.subr.bf16.mxu0 %v4933_v6  ;;  %v4959_v6 = vcombine.high %v394_v2, %v406_v3 }
 0x22f   : > { %4549 = vmatpush1.bf16.msra.mxu1 %v4766_v5  ;;  %v5151_v5 = vcombine.high %v586_v63, %v598_v1 }
 0x230   : > { %4550 = vmatprep.subr.bf16.mxu1 %v4743_v49  ;;  %v562_v49 = vld [vmem:[%s5355_s14 + $0xc58] sm:$0xff] }
 0x231   : > { %4485 = vmatpush2.bf16.msra.mxu0 %v4932_v10  ;;  %v4958_v10 = vcombine.low %v394_v2, %v406_v3 }
 0x232   : > { %4577 = vmatprep.subr.bf16.mxu0 %v5295_v54  ;;  %v4935_v54 = vcombine.high %v370_v8, %v382_v9 }
 0x233   : > { %4551 = vmatpush1.bf16.msra.mxu1 %v4742_v11  ;;  %v5127_v11 = vcombine.high %v562_v49, %v574_v7 }
 0x234   : > { %4552 = vmatprep.subr.bf16.mxu1 %v5103_v12  ;;  %v4160_v27 = vpop.f32.mrf.mxu0  ;;  %4487 = vmatmul.mubr.bf16.vlgmr.msra.gmra.mxu0 %v5448_v17  ;;  %v5126_v12 = vcombine.low %v562_v49, %v574_v7 }
 0x235   : > { %v4202_v34 = vadd.f32 %v5984_v22, %v4160_v27  ;;  %4578 = vmatpush1.bf16.msra.mxu0 %v5294_v20  ;;  %4609 = vmatprep.mubr.bf16.mxu0 %v5324_v0  ;;  %v670_v22 = vld [vmem:[%s5355_s14 + $0xfb8] sm:$0xff]  ;;  %v5246_v0 = vcombine.low %v682_v57, %v694_v47 }
 0x236   : > { %v4162_v31 = vpop.f32.mrf.mxu0  ;;  %4579 = vmatprep.subr.bf16.mxu0 %v5271_v24  ;;  %v5222_v45 = vcombine.low %v658_v36, %v670_v22 }
 0x237   : > { %4553 = vmatpush2.bf16.msra.mxu1 %v5102_v21  ;;  %4630 = vst [vmem:[%s5673_s22 + $0x60] sm:$0xff] %v4202_v34  ;;  %v4204_v19 = vadd.f32 %v5987_v26, %v4162_v31  ;;  %v5223_v26 = vcombine.high %v658_v36, %v670_v22 }
 0x238   : > { %4554 = vmatprep.subr.bf16.mxu1 %v5079_v25  ;;  %v4164_v37 = vpop.f32.mrf.mxu0 }
 0x239   : > { %4631 = vst [vmem:[%s5673_s22 + $0x68] sm:$0xff] %v4204_v19  ;;  %4580 = vmatpush1.bf16.msra.mxu0 %v5270_v30 }
 0x23a   : > { %v4165_v39 = vpop.f32.mrf.mxu0  ;;  %4581 = vmatprep.subr.bf16.mxu0 %v5247_v33 }
 0x23b   : > { %4555 = vmatpush2.bf16.msra.mxu1 %v5078_v32 }
 0x23c   : > { %4556 = vmatprep.subr.bf16.mxu1 %v5055_v35 }
 0x23d   : > { %4582 = vmatpush1.bf16.msra.mxu0 %v5246_v0 }
 0x23e   : > { %4583 = vmatprep.subr.bf16.mxu0 %v5223_v26 }
 0x23f   : > { %4557 = vmatpush2.bf16.msra.mxu1 %v5054_v40 }
 0x240   : > { %4558 = vmatprep.subr.bf16.mxu1 %v5031_v23 }
 0x241   : > { %4584 = vmatpush1.bf16.msra.mxu0 %v5222_v45 }
 0x242   : > { %4585 = vmatprep.subr.bf16.mxu0 %v5199_v14 }
 0x243   : > { %4559 = vmatpush2.bf16.msra.mxu1 %v5030_v48 }
 0x244   : > { %4560 = vmatprep.subr.bf16.mxu1 %v5007_v51 }
 0x245   : > { %4586 = vmatpush1.bf16.msra.mxu0 %v5198_v58 }
 0x246   : > { %4587 = vmatprep.subr.bf16.mxu0 %v5175_v61 }
 0x247   : > { %4561 = vmatpush2.bf16.msra.mxu1 %v5006_v59 }
 0x248   : > { %4562 = vmatprep.subr.bf16.mxu1 %v4983_v62 }
 0x249   : > { %4588 = vmatpush1.bf16.msra.mxu0 %v5174_v46 }
 0x24a   : > { %4589 = vmatprep.subr.bf16.mxu0 %v5151_v5 }
 0x24b   : > { %4563 = vmatpush2.bf16.msra.mxu1 %v4982_v4 }
 0x24c   : > { %4564 = vmatprep.subr.bf16.mxu1 %v4959_v6 }
 0x24d   : > { %4590 = vmatpush1.bf16.msra.mxu0 %v5150_v50 }
 0x24e   : > { %4591 = vmatprep.subr.bf16.mxu0 %v5127_v11 }
 0x24f   : > { %4565 = vmatpush2.bf16.msra.mxu1 %v4958_v10 }
 0x250   : > { %4566 = vmatprep.subr.bf16.mxu1 %v4935_v54 }
 0x251   : > { %4592 = vmatpush1.bf16.msra.mxu0 %v5126_v12 }
 0x253   : > { %4567 = vmatpush2.bf16.msra.mxu1 %v4934_v13 }
 0x254   : > { %v4283_v15 = vpop.f32.mrf.mxu0  ;;  %4610 = vmatmul.mubr.bf16.vlgmr.msra.gmra.mxu0 %v5315_v16 }
 0x256   : > { %v4242_v18 = vpop.f32.mrf.mxu1  ;;  %4569 = vmatmul.mubr.bf16.vlgmr.msra.gmra.mxu1 %v5448_v17  ;;  %v4285_v21 = vpop.f32.mrf.mxu0 }
 0x257   : > { %v4284_v20 = vadd.f32 %v4283_v15, %v4242_v18 }
 0x258   : > { %v4244_v24 = vpop.f32.mrf.mxu1  ;;  %v4287_v57 = vpop.f32.mrf.mxu0 }
 0x259   : > { %4632 = vst [vmem:[%s5673_s22 + $0x70] sm:$0xff] %v4284_v20  ;;  %v4286_v25 = vadd.f32 %v4285_v21, %v4244_v24 }
 0x25a   : > { %v4246_v47 = vpop.f32.mrf.mxu1  ;;  %v4288_v27 = vpop.f32.mrf.mxu0 }
 0x25b   : > { %4633 = vst [vmem:[%s5673_s22 + $0x78] sm:$0xff] %v4286_v25 }
 0x25c   : > { %v4247_v28 = vpop.f32.mrf.mxu1 }
 0x276   : > { %v4365_v29 = vpop.f32.mrf.mxu1 }
 0x278   : > { %v4367_v34 = vpop.f32.mrf.mxu1 }
 0x27a   : > { %v4369_v30 = vpop.f32.mrf.mxu1 }
 0x27c   : > { %v4370_v31 = vpop.f32.mrf.mxu1 }
 0x294   : > { %v4324_v32 = vpop.f32.mrf.mxu0 }
 0x295   : > { %v4366_v33 = vadd.f32 %v4365_v29, %v4324_v32 }
 0x296   : > { %v4326_v17 = vpop.f32.mrf.mxu0 }
 0x297   : > { %4634 = vst [vmem:[%s5673_s22 + $0x80] sm:$0xff] %v4366_v33  ;;  %v4368_v19 = vadd.f32 %v4367_v34, %v4326_v17 }
 0x298   : > { %v4328_v35 = vpop.f32.mrf.mxu0 }
 0x299   : > { %4635 = vst [vmem:[%s5673_s22 + $0x88] sm:$0xff] %v4368_v19 }
 0x29a   : > { %v4329_v36 = vpop.f32.mrf.mxu0 }
 0x2b4   : > { %v4447_v22 = vpop.f32.mrf.mxu0 }
 0x2b6   : > { %v4406_v37 = vpop.f32.mrf.mxu1  ;;  %v4449_v38 = vpop.f32.mrf.mxu0 }
 0x2b7   : > { %v4448_v60 = vadd.f32 %v4447_v22, %v4406_v37 }
 0x2b8   : > { %v4408_v0 = vpop.f32.mrf.mxu1  ;;  %v4451_v40 = vpop.f32.mrf.mxu0 }
 0x2b9   : > { %4636 = vst [vmem:[%s5673_s22 + $0x90] sm:$0xff] %v4448_v60  ;;  %v4450_v39 = vadd.f32 %v4449_v38, %v4408_v0 }
 0x2ba   : > { %v4410_v26 = vpop.f32.mrf.mxu1  ;;  %v4452_v23 = vpop.f32.mrf.mxu0 }
 0x2bb   : > { %4637 = vst [vmem:[%s5673_s22 + $0x98] sm:$0xff] %v4450_v39 }
 0x2bc   : > { %v4411_v41 = vpop.f32.mrf.mxu1 }
 0x2d6   : > { %v4529_v42 = vpop.f32.mrf.mxu1 }
 0x2d8   : > { %v4531_v43 = vpop.f32.mrf.mxu1 }
 0x2da   : > { %v4533_v44 = vpop.f32.mrf.mxu1 }
 0x2dc   : > { %v4534_v45 = vpop.f32.mrf.mxu1 }
 0x2f4   : > { %v4488_v48 = vpop.f32.mrf.mxu0 }
 0x2f5   : > { %v4530_v14 = vadd.f32 %v4529_v42, %v4488_v48 }
 0x2f6   : > { %v4490_v51 = vpop.f32.mrf.mxu0 }
 0x2f7   : > { %4638 = vst [vmem:[%s5673_s22 + $0xa0] sm:$0xff] %v4530_v14  ;;  %v4532_v52 = vadd.f32 %v4531_v43, %v4490_v51 }
 0x2f8   : > { %v4492_v53 = vpop.f32.mrf.mxu0 }
 0x2f9   : > { %4639 = vst [vmem:[%s5673_s22 + $0xa8] sm:$0xff] %v4532_v52 }
 0x2fa   : > { %v4493_v55 = vpop.f32.mrf.mxu0 }
 0x314   : > { %v4611_v56 = vpop.f32.mrf.mxu0 }
 0x316   : > { %v4570_v58 = vpop.f32.mrf.mxu1  ;;  %v4613_v61 = vpop.f32.mrf.mxu0 }
 0x317   : > { %v4612_v59 = vadd.f32 %v4611_v56, %v4570_v58 }
 0x318   : > { %v4572_v62 = vpop.f32.mrf.mxu1  ;;  %v4615_v1 = vpop.f32.mrf.mxu0 }
 0x319   : > { %4640 = vst [vmem:[%s5673_s22 + $0xb0] sm:$0xff] %v4612_v59  ;;  %v4614_v63 = vadd.f32 %v4613_v61, %v4572_v62 }
 0x31a   : > { %v4574_v2 = vpop.f32.mrf.mxu1  ;;  %v4616_v3 = vpop.f32.mrf.mxu0 }
 0x31b   : > { %4641 = vst [vmem:[%s5673_s22 + $0xb8] sm:$0xff] %v4614_v63 }
 0x31c   : > { %v4575_v46 = vpop.f32.mrf.mxu1 }
 0x31d PF: > { %s12_s9 = sadd.s32 1, %s5322_s9  }
 0x31e   : > { %p9_p4 = scmp.ge.s32.totalorder %s12_s9, 4  }
 0x320   :  { %11 = sbr.rel (!%p9_p4) target bundleno = 1 (0x1), region = 61 }

</bundles_post_ra>
